<compile_context>
chip_gen: v5e
topology: v5e:2x2
jax: 0.10.0
libtpu: 0.0.40
codegen_flags: <defaults>
</compile_context>

<pallas_src>
import math
from functools import partial

import jax
import jax.numpy as jnp
from jax.experimental import pallas as pl
from jax.experimental.pallas import tpu as pltpu


STAGE_STRIDES = (1, 2, 2, 1)          # strides of layer1..layer4 in ModifiedResNet
_VMEM_LIMIT = 48 * 1024 * 1024        # below v7x's 64 MiB physical, above 16/32 MiB defaults


def _round_up(x, m):
    return (x + m - 1) // m * m


# ---------------------------------------------------------------------------
# Kernel 1: tiled matmul (bf16 MXU operands, f32 accumulation) with fused
#           epilogue  y = act(acc * scale + bias [+ residual]).
# Used for every conv (via im2col) and every linear layer in the network.
# ---------------------------------------------------------------------------
def _mm_affine_kernel(apply_relu, has_res, *refs):
    if has_res:
        x_ref, w_ref, s_ref, b_ref, r_ref, o_ref, acc_ref = refs
    else:
        x_ref, w_ref, s_ref, b_ref, o_ref, acc_ref = refs
        r_ref = None

    @pl.when(pl.program_id(2) == 0)
    def _init():
        acc_ref[...] = jnp.zeros_like(acc_ref)

    acc_ref[...] += jnp.dot(x_ref[...], w_ref[...],
                            preferred_element_type=jnp.float32)

    @pl.when(pl.program_id(2) == pl.num_programs(2) - 1)
    def _finalize():
        y = acc_ref[...] * s_ref[...] + b_ref[...]
        if has_res:
            y = y + r_ref[...]
        if apply_relu:
            y = jnp.maximum(y, 0.0)
        o_ref[...] = y.astype(o_ref.dtype)


def _matmul_affine(x, w, scale, bias, *, relu, residual=None):
    """(M,K)@(K,N) * scale + bias (+ residual), optional ReLU.  f32 in/out,
    bf16 matmul operands, K tiled as an 'arbitrary' reduction grid axis."""
    M, K = x.shape
    K2, N = w.shape
    assert K == K2

    TM = 128 if M > 128 else _round_up(M, 16)
    Mp = _round_up(M, TM)
    Kp = _round_up(K, 128)
    TK = Kp if Kp <= 512 else next(t for t in (512, 384, 256, 128) if Kp % t == 0)
    Np = _round_up(N, 128)
    TN = 256 if Np % 256 == 0 else 128

    xp = jnp.pad(x.astype(jnp.bfloat16), ((0, Mp - M), (0, Kp - K)))
    wp = jnp.pad(w.astype(jnp.bfloat16), ((0, Kp - K), (0, Np - N)))
    sp = jnp.pad(scale.reshape(1, N).astype(jnp.float32), ((0, 0), (0, Np - N)))
    bp = jnp.pad(bias.reshape(1, N).astype(jnp.float32), ((0, 0), (0, Np - N)))

    args = [xp, wp, sp, bp]
    in_specs = [
        pl.BlockSpec((TM, TK), lambda i, j, k: (i, k)),
        pl.BlockSpec((TK, TN), lambda i, j, k: (k, j)),
        pl.BlockSpec((1, TN), lambda i, j, k: (0, j)),
        pl.BlockSpec((1, TN), lambda i, j, k: (0, j)),
    ]
    if residual is not None:
        rp = jnp.pad(residual.astype(jnp.float32), ((0, Mp - M), (0, Np - N)))
        args.append(rp)
        in_specs.append(pl.BlockSpec((TM, TN), lambda i, j, k: (i, j)))

    out = pl.pallas_call(
        partial(_mm_affine_kernel, relu, residual is not None),
        out_shape=jax.ShapeDtypeStruct((Mp, Np), jnp.float32),
        grid=(Mp // TM, Np // TN, Kp // TK),
        in_specs=in_specs,
        out_specs=pl.BlockSpec((TM, TN), lambda i, j, k: (i, j)),
        scratch_shapes=[pltpu.VMEM((TM, TN), jnp.float32)],
        compiler_params=pltpu.CompilerParams(
            dimension_semantics=("parallel", "parallel", "arbitrary"),
            vmem_limit_bytes=_VMEM_LIMIT),
    )(*args)
    return out[:M, :N]


# ---------------------------------------------------------------------------
# im2col + conv/BN/ReLU wrapper (pooling folded into the matmul's K reduction)
# ---------------------------------------------------------------------------
def _im2col(x, ksize, stride, pad):
    """x: (B, H, W, C) -> patches (B, Ho, Wo, ksize*ksize*C), channel-minor."""
    B, H, W, C = x.shape
    if pad:
        x = jnp.pad(x, ((0, 0), (pad, pad), (pad, pad), (0, 0)))
    Ho = (H + 2 * pad - ksize) // stride + 1
    Wo = (W + 2 * pad - ksize) // stride + 1
    cols = []
    for dy in range(ksize):
        for dx in range(ksize):
            cols.append(x[:, dy:dy + (Ho - 1) * stride + 1:stride,
                          dx:dx + (Wo - 1) * stride + 1:stride, :])
    return jnp.concatenate(cols, axis=-1), Ho, Wo


def conv_bn_act(x, p, *, ksize, stride, pad, relu, pre_pool=1, residual=None):
    """conv (with an optional preceding AvgPool2d(pre_pool) folded in) + BN affine
    (+ optional residual) + optional ReLU, all in the fused Pallas matmul kernel."""
    B = x.shape[0]
    w = p['w']
    cin, cout = w.shape[2], w.shape[3]
    if pre_pool > 1:
        # AvgPool2d(p) followed by a 1x1 conv == p x p conv, stride p, with the
        # 1x1 weights replicated over the window and scaled by 1/p^2.
        assert ksize == 1 and stride == 1 and pad == 0
        w2d = jnp.tile(w.reshape(cin, cout), (pre_pool * pre_pool, 1)) / float(pre_pool * pre_pool)
        ksize, stride = pre_pool, pre_pool
    else:
        w2d = w.reshape(ksize * ksize * cin, cout)
    patches, Ho, Wo = _im2col(x, ksize, stride, pad)
    M = B * Ho * Wo
    res2d = None if residual is None else residual.reshape(M, cout)
    out = _matmul_affine(patches.reshape(M, -1), w2d, p['scale'], p['bias'],
                         relu=relu, residual=res2d)
    return out.reshape(B, Ho, Wo, cout)


def bottleneck_forward(x, bp, stride, pre_pool):
    # `pre_pool` is a pending AvgPool2d (the stem avgpool) folded into this block's
    # first 1x1 convs; it only occurs together with an existing downsample branch.
    assert not (pre_pool > 1 and bp['downsample'] is None)
    out = conv_bn_act(x, bp['conv1'], ksize=1, stride=1, pad=0, relu=True,
                      pre_pool=pre_pool)
    out = conv_bn_act(out, bp['conv2'], ksize=3, stride=1, pad=1, relu=True)
    if bp['downsample'] is not None:
        identity = conv_bn_act(x, bp['downsample'], ksize=1, stride=1, pad=0,
                               relu=False, pre_pool=pre_pool * stride)
    else:
        identity = x
    # Bottleneck.avgpool(stride) + conv3 + bn3 + residual add + ReLU, all fused.
    return conv_bn_act(out, bp['conv3'], ksize=1, stride=1, pad=0, relu=True,
                       pre_pool=stride, residual=identity)


# ---------------------------------------------------------------------------
# Kernel 2: AttentionPool2d core — one (batch, head) single-query attention.
# ---------------------------------------------------------------------------
def _attn_pool_kernel(scale, q_ref, k_ref, v_ref, o_ref):
    q = q_ref[0] * scale                                        # (1, hd)
    k = k_ref[0]                                                # (L+1, hd)
    v = v_ref[0]
    s = jax.lax.dot_general(q, k, (((1,), (1,)), ((), ())),
                            preferred_element_type=jnp.float32)  # (1, L+1)
    s = s - jnp.max(s, axis=-1, keepdims=True)
    p = jnp.exp(s)
    p = p * pl.reciprocal(jnp.sum(p, axis=-1, keepdims=True), approx=True)
    o = jax.lax.dot_general(p, v, (((1,), (0,)), ((), ())),
                            preferred_element_type=jnp.float32)  # (1, hd)
    o_ref[0] = o.astype(o_ref.dtype)


def attention_pool(x, ap, heads):
    B, H, W, C = x.shape
    L = H * W
    hd = C // heads
    tok = x.reshape(B, L, C)
    # mean token + positional embedding (tiny elementwise work, done in the wrapper)
    tok = jnp.concatenate([jnp.mean(tok, axis=1, keepdims=True), tok], axis=1)
    tok = tok + ap['pos'][None]
    L1 = L + 1
    ones_c = jnp.ones((C,), jnp.float32)
    k = _matmul_affine(tok.reshape(B * L1, C), ap['wk'], ones_c, ap['bk'], relu=False)
    v = _matmul_affine(tok.reshape(B * L1, C), ap['wv'], ones_c, ap['bv'], relu=False)
    q = _matmul_affine(tok[:, 0, :], ap['wq'], ones_c, ap['bq'], relu=False)
    k = k.reshape(B, L1, heads, hd).transpose(0, 2, 1, 3).reshape(B * heads, L1, hd)
    v = v.reshape(B, L1, heads, hd).transpose(0, 2, 1, 3).reshape(B * heads, L1, hd)
    q = q.reshape(B * heads, 1, hd)
    attn = pl.pallas_call(
        partial(_attn_pool_kernel, 1.0 / math.sqrt(hd)),
        out_shape=jax.ShapeDtypeStruct((B * heads, 1, hd), jnp.float32),
        grid=(B * heads,),
        in_specs=[pl.BlockSpec((1, 1, hd), lambda i: (i, 0, 0)),
                  pl.BlockSpec((1, L1, hd), lambda i: (i, 0, 0)),
                  pl.BlockSpec((1, L1, hd), lambda i: (i, 0, 0))],
        out_specs=pl.BlockSpec((1, 1, hd), lambda i: (i, 0, 0)),
        compiler_params=pltpu.CompilerParams(
            dimension_semantics=("parallel",),
            vmem_limit_bytes=_VMEM_LIMIT),
    )(q, k, v)
    attn = attn.reshape(B, C)           # heads concatenated in order (hd contiguous)
    return _matmul_affine(attn, ap['wc'],
                          jnp.ones((ap['wc'].shape[1],), jnp.float32),
                          ap['bc'], relu=False)


# ---------------------------------------------------------------------------
# Full ModifiedResNet forward
# ---------------------------------------------------------------------------
def modified_resnet_forward(x_nchw, params, heads):
    x = jnp.transpose(x_nchw, (0, 2, 3, 1)).astype(jnp.float32)      # NHWC
    # stem: 3 x (conv3x3 + BN + ReLU); the trailing AvgPool2d(2) is folded into
    # the first 1x1 convs of layer1's first Bottleneck (pre_pool=2 below).
    for p, s in zip(params['stem'], (2, 1, 1)):
        x = conv_bn_act(x, p, ksize=3, stride=s, pad=1, relu=True)
    pre_pool = 2
    for si in range(4):
        for bi, bp in enumerate(params['layer%d' % (si + 1)]):
            stride = STAGE_STRIDES[si] if bi == 0 else 1
            x = bottleneck_forward(x, bp, stride, pre_pool)
            pre_pool = 1
    feat = jnp.transpose(x, (0, 3, 1, 2))                            # NCHW, like torch
    pooled = attention_pool(x, params['attnpool'], heads)
    return feat, pooled


# ---------------------------------------------------------------------------
# Synthetic parameters (BN already folded into per-channel scale/bias, eval mode)
# ---------------------------------------------------------------------------
def init_params(key, layers, width, input_resolution, output_dim):
    keys = iter(jax.random.split(key, 256))

    def conv_p(kh, kw, cin, cout):
        w = jax.random.normal(next(keys), (kh, kw, cin, cout), jnp.float32) / math.sqrt(kh * kw * cin)
        scale = 1.0 + 0.1 * jax.random.normal(next(keys), (cout,), jnp.float32)
        bias = 0.1 * jax.random.normal(next(keys), (cout,), jnp.float32)
        return {'w': w, 'scale': scale, 'bias': bias}

    params = {'stem': [conv_p(3, 3, 3, width // 2),
                       conv_p(3, 3, width // 2, width // 2),
                       conv_p(3, 3, width // 2, width)]}
    inplanes = width
    stage_planes = (width, width * 2, width * 4, width * 8)
    for si in range(4):
        blocks = []
        planes = stage_planes[si]
        for bi in range(layers[si]):
            s = STAGE_STRIDES[si] if bi == 0 else 1
            blocks.append({
                'conv1': conv_p(1, 1, inplanes, planes),
                'conv2': conv_p(3, 3, planes, planes),
                'conv3': conv_p(1, 1, planes, planes * 4),
                'downsample': conv_p(1, 1, inplanes, planes * 4)
                              if (s > 1 or inplanes != planes * 4) else None,
            })
            inplanes = planes * 4
        params['layer%d' % (si + 1)] = blocks

    embed_dim = width * 32
    spatial = input_resolution // 16
    # NOTE: the reference module sizes positional_embedding as (spacial_dim+1, D),
    # which only broadcasts when input_resolution == (input_resolution//16)**2;
    # here it is sized to the actual token count H*W + 1 (same forward semantics).
    L1 = spatial * spatial + 1

    def lin_p(cin, cout):
        w = jax.random.normal(next(keys), (cin, cout), jnp.float32) / math.sqrt(cin)
        b = 0.1 * jax.random.normal(next(keys), (cout,), jnp.float32)
        return w, b

    wq, bq = lin_p(embed_dim, embed_dim)
    wk, bk = lin_p(embed_dim, embed_dim)
    wv, bv = lin_p(embed_dim, embed_dim)
    wc, bc = lin_p(embed_dim, output_dim)
    pos = jax.random.normal(next(keys), (L1, embed_dim), jnp.float32) / math.sqrt(embed_dim)
    params['attnpool'] = dict(pos=pos, wq=wq, bq=bq, wk=wk, bk=bk, wv=wv, bv=bv, wc=wc, bc=bc)
    return params


# ---------------------------------------------------------------------------
# Pure-JAX reference (torch op order: real pooling, un-fused BN/ReLU/residual).
# Matmuls use the same bf16-operand / f32-accumulate policy as the kernel.
# ---------------------------------------------------------------------------
def _ref_conv_bn(x, p, stride, pad, relu):
    y = jax.lax.conv_general_dilated(
        x.astype(jnp.bfloat16), p['w'].astype(jnp.bfloat16),
        window_strides=(stride, stride), padding=((pad, pad), (pad, pad)),
        dimension_numbers=('NHWC', 'HWIO', 'NHWC'),
        preferred_element_type=jnp.float32)
    y = y * p['scale'] + p['bias']
    return jnp.maximum(y, 0.0) if relu else y


def _ref_avgpool(x, k):
    if k == 1:
        return x
    B, H, W, C = x.shape
    return x.reshape(B, H // k, k, W // k, k, C).mean(axis=(2, 4))


def _ref_bottleneck(x, bp, stride):
    out = _ref_conv_bn(x, bp['conv1'], 1, 0, True)
    out = _ref_conv_bn(out, bp['conv2'], 1, 1, True)
    out = _ref_avgpool(out, stride)
    out = _ref_conv_bn(out, bp['conv3'], 1, 0, False)
    if bp['downsample'] is not None:
        identity = _ref_conv_bn(_ref_avgpool(x, stride), bp['downsample'], 1, 0, False)
    else:
        identity = x
    return jnp.maximum(out + identity, 0.0)


def _ref_attnpool(x, ap, heads):
    B, H, W, C = x.shape
    tok = x.reshape(B, H * W, C)
    tok = jnp.concatenate([tok.mean(axis=1, keepdims=True), tok], axis=1) + ap['pos'][None]

    def lin(t, w, b):
        return jnp.dot(t.astype(jnp.bfloat16), w.astype(jnp.bfloat16),
                       preferred_element_type=jnp.float32) + b

    L1 = tok.shape[1]
    hd = C // heads
    q = lin(tok[:, :1], ap['wq'], ap['bq']).reshape(B, 1, heads, hd).transpose(0, 2, 1, 3)
    k = lin(tok, ap['wk'], ap['bk']).reshape(B, L1, heads, hd).transpose(0, 2, 1, 3)
    v = lin(tok, ap['wv'], ap['bv']).reshape(B, L1, heads, hd).transpose(0, 2, 1, 3)
    s = jnp.einsum('nhqd,nhkd->nhqk', q, k) / math.sqrt(hd)
    p = jax.nn.softmax(s, axis=-1)
    o = jnp.einsum('nhqk,nhkd->nhqd', p, v).transpose(0, 2, 1, 3).reshape(B, C)
    return lin(o, ap['wc'], ap['bc'])


def reference_forward(x_nchw, params, heads):
    x = jnp.transpose(x_nchw, (0, 2, 3, 1)).astype(jnp.float32)
    for p, s in zip(params['stem'], (2, 1, 1)):
        x = _ref_conv_bn(x, p, s, 1, True)
    x = _ref_avgpool(x, 2)
    for si in range(4):
        for bi, bp in enumerate(params['layer%d' % (si + 1)]):
            x = _ref_bottleneck(x, bp, STAGE_STRIDES[si] if bi == 0 else 1)
    return jnp.transpose(x, (0, 3, 1, 2)), _ref_attnpool(x, params['attnpool'], heads)


if __name__ == "__main__":
    LAYERS = (2, 1, 1, 1)
    WIDTH = 16
    HEADS = 8
    OUTPUT_DIM = 128
    RES = 32
    BATCH = 2

    key = jax.random.PRNGKey(0)
    kx, kp = jax.random.split(key)
    x = jax.random.normal(kx, (BATCH, 3, RES, RES), jnp.float32)
    params = init_params(kp, LAYERS, WIDTH, RES, OUTPUT_DIM)

    fwd = jax.jit(partial(modified_resnet_forward, heads=HEADS))
    feat, pooled = fwd(x, params)
    feat = jax.block_until_ready(feat)
    pooled = jax.block_until_ready(pooled)

    assert feat.shape == (BATCH, WIDTH * 32, RES // 16, RES // 16), feat.shape
    assert pooled.shape == (BATCH, OUTPUT_DIM), pooled.shape

    with jax.default_matmul_precision('float32'):
        ref_feat, ref_pooled = reference_forward(x, params, HEADS)
        ref_feat = jax.block_until_ready(ref_feat)
        ref_pooled = jax.block_until_ready(ref_pooled)

    def rel_err(a, b):
        return float(jnp.max(jnp.abs(a - b)) / (jnp.max(jnp.abs(b)) + 1e-6))

    e_feat = rel_err(feat, ref_feat)
    e_pool = rel_err(pooled, ref_pooled)
    assert e_feat < 5e-2 and e_pool < 5e-2, (e_feat, e_pool)
    print("KERNEL_OK")
</pallas_src>

<mosaic_0001>
module attributes {stable_mosaic.version = 11 : i64} {
  func.func @_mm_affine_kernel(%arg0: i32, %arg1: i32, %arg2: i32, %arg3: memref<128x128xbf16, #tpu.memory_space<vmem>>, %arg4: memref<128x128xbf16, #tpu.memory_space<vmem>>, %arg5: memref<1x128xf32, #tpu.memory_space<vmem>>, %arg6: memref<1x128xf32, #tpu.memory_space<vmem>>, %arg7: memref<128x128xf32, #tpu.memory_space<vmem>>, %arg8: memref<128x128xf32, #tpu.memory_space<vmem>>) attributes {dimension_semantics = [#tpu.dimension_semantics<parallel>, #tpu.dimension_semantics<parallel>, #tpu.dimension_semantics<arbitrary>], iteration_bounds = array<i64: 4, 1, 1>, scalar_prefetch = 0 : i64, scratch_operands = 1 : i64, tpu.core_type = #tpu.core_type<tc>, window_params = [{transform_indices = @transform_0, window_bounds = array<i64: 128, 128>}, {transform_indices = @transform_1, window_bounds = array<i64: 128, 128>}, {transform_indices = @transform_2, window_bounds = array<i64: 1, 128>}, {transform_indices = @transform_3, window_bounds = array<i64: 1, 128>}, {transform_indices = @transform_4, window_bounds = array<i64: 128, 128>}]} {
    %c0_i32 = arith.constant 0 : i32
    %0 = arith.cmpi eq, %arg2, %c0_i32 : i32
    %1 = arith.extui %0 : i1 to i32
    %c0_i32_0 = arith.constant 0 : i32
    %2 = arith.cmpi ne, %1, %c0_i32_0 : i32
    scf.if %2 {
      %cst_10 = arith.constant 0.000000e+00 : f32
      %12 = vector.broadcast %cst_10 : f32 to vector<128x128xf32>
      %c0_11 = arith.constant 0 : index
      %c0_12 = arith.constant 0 : index
      %13 = vector.load %arg8[%c0_11, %c0_12] : memref<128x128xf32, #tpu.memory_space<vmem>>, vector<128x128xf32>
      tpu.vector_store %arg8[%c0_11, %c0_12], %12 {strides = array<i32>} : memref<128x128xf32, #tpu.memory_space<vmem>>, vector<128x128xf32>,
    } else {
    }
    %c0 = arith.constant 0 : index
    %c0_1 = arith.constant 0 : index
    %3 = vector.load %arg8[%c0, %c0_1] : memref<128x128xf32, #tpu.memory_space<vmem>>, vector<128x128xf32>
    %c0_2 = arith.constant 0 : index
    %c0_3 = arith.constant 0 : index
    %4 = vector.load %arg3[%c0_2, %c0_3] : memref<128x128xbf16, #tpu.memory_space<vmem>>, vector<128x128xbf16>
    %c0_4 = arith.constant 0 : index
    %c0_5 = arith.constant 0 : index
    %5 = vector.load %arg4[%c0_4, %c0_5] : memref<128x128xbf16, #tpu.memory_space<vmem>>, vector<128x128xbf16>
    %cst = arith.constant dense<0.000000e+00> : vector<128x128xf32>
    %6 = tpu.matmul %4, %5, %cst {dimension_numbers = #tpu.dot_dimension_numbers<[1], [0], [0], [1], [0, 0, 1, 1], [], []>} : vector<128x128xbf16>, vector<128x128xbf16>, vector<128x128xf32> -> vector<128x128xf32>
    %7 = arith.addf %3, %6 : vector<128x128xf32>
    %c0_6 = arith.constant 0 : index
    %c0_7 = arith.constant 0 : index
    %8 = vector.load %arg8[%c0_6, %c0_7] : memref<128x128xf32, #tpu.memory_space<vmem>>, vector<128x128xf32>
    tpu.vector_store %arg8[%c0_6, %c0_7], %7 {strides = array<i32>} : memref<128x128xf32, #tpu.memory_space<vmem>>, vector<128x128xf32>,
    %c0_i32_8 = arith.constant 0 : i32
    %9 = arith.cmpi eq, %arg2, %c0_i32_8 : i32
    %10 = arith.extui %9 : i1 to i32
    %c0_i32_9 = arith.constant 0 : i32
    %11 = arith.cmpi ne, %10, %c0_i32_9 : i32
    scf.if %11 {
      %c0_10 = arith.constant 0 : index
      %c0_11 = arith.constant 0 : index
      %12 = vector.load %arg8[%c0_10, %c0_11] : memref<128x128xf32, #tpu.memory_space<vmem>>, vector<128x128xf32>
      %c0_12 = arith.constant 0 : index
      %c0_13 = arith.constant 0 : index
      %13 = vector.load %arg5[%c0_12, %c0_13] : memref<1x128xf32, #tpu.memory_space<vmem>>, vector<1x128xf32>
      %14 = vector.broadcast %13 : vector<1x128xf32> to vector<128x128xf32>
      %15 = arith.mulf %12, %14 : vector<128x128xf32>
      %c0_14 = arith.constant 0 : index
      %c0_15 = arith.constant 0 : index
      %16 = vector.load %arg6[%c0_14, %c0_15] : memref<1x128xf32, #tpu.memory_space<vmem>>, vector<1x128xf32>
      %17 = vector.broadcast %16 : vector<1x128xf32> to vector<128x128xf32>
      %18 = arith.addf %15, %17 : vector<128x128xf32>
      %cst_16 = arith.constant 0.000000e+00 : f32
      %19 = vector.broadcast %cst_16 : f32 to vector<128x128xf32>
      %20 = arith.maximumf %18, %19 : vector<128x128xf32>
      %c0_17 = arith.constant 0 : index
      %c0_18 = arith.constant 0 : index
      %21 = vector.load %arg7[%c0_17, %c0_18] : memref<128x128xf32, #tpu.memory_space<vmem>>, vector<128x128xf32>
      tpu.vector_store %arg7[%c0_17, %c0_18], %20 {strides = array<i32>} : memref<128x128xf32, #tpu.memory_space<vmem>>, vector<128x128xf32>,
    } else {
    }
    return
  }
  func.func @transform_0(%arg0: i32, %arg1: i32, %arg2: i32) -> (i32, i32) {
    %c0_i32 = arith.constant 0 : i32
    return %arg0, %arg2 : i32, i32
  }
  func.func @transform_1(%arg0: i32, %arg1: i32, %arg2: i32) -> (i32, i32) {
    %c0_i32 = arith.constant 0 : i32
    return %arg2, %arg1 : i32, i32
  }
  func.func @transform_2(%arg0: i32, %arg1: i32, %arg2: i32) -> (i32, i32) {
    %c0_i32 = arith.constant 0 : i32
    %c0_i32_0 = arith.constant 0 : i32
    return %c0_i32, %arg1 : i32, i32
  }
  func.func @transform_3(%arg0: i32, %arg1: i32, %arg2: i32) -> (i32, i32) {
    %c0_i32 = arith.constant 0 : i32
    %c0_i32_0 = arith.constant 0 : i32
    return %c0_i32, %arg1 : i32, i32
  }
  func.func @transform_4(%arg0: i32, %arg1: i32, %arg2: i32) -> (i32, i32) {
    %c0_i32 = arith.constant 0 : i32
    return %arg0, %arg1 : i32, i32
  }
}

module attributes {stable_mosaic.version = 11 : i64} {
  func.func @_mm_affine_kernel(%arg0: i32, %arg1: i32, %arg2: i32, %arg3: memref<128x128xbf16, #tpu.memory_space<vmem>>, %arg4: memref<128x128xbf16, #tpu.memory_space<vmem>>, %arg5: memref<1x128xf32, #tpu.memory_space<vmem>>, %arg6: memref<1x128xf32, #tpu.memory_space<vmem>>, %arg7: memref<128x128xf32, #tpu.memory_space<vmem>>, %arg8: memref<128x128xf32, #tpu.memory_space<vmem>>) attributes {dimension_semantics = [#tpu.dimension_semantics<parallel>, #tpu.dimension_semantics<parallel>, #tpu.dimension_semantics<arbitrary>], iteration_bounds = array<i64: 1, 1, 1>, scalar_prefetch = 0 : i64, scratch_operands = 1 : i64, tpu.core_type = #tpu.core_type<tc>, window_params = [{transform_indices = @transform_0, window_bounds = array<i64: 128, 128>}, {transform_indices = @transform_1, window_bounds = array<i64: 128, 128>}, {transform_indices = @transform_2, window_bounds = array<i64: 1, 128>}, {transform_indices = @transform_3, window_bounds = array<i64: 1, 128>}, {transform_indices = @transform_4, window_bounds = array<i64: 128, 128>}]} {
    %c0_i32 = arith.constant 0 : i32
    %0 = arith.cmpi eq, %arg2, %c0_i32 : i32
    %1 = arith.extui %0 : i1 to i32
    %c0_i32_0 = arith.constant 0 : i32
    %2 = arith.cmpi ne, %1, %c0_i32_0 : i32
    scf.if %2 {
      %cst_10 = arith.constant 0.000000e+00 : f32
      %12 = vector.broadcast %cst_10 : f32 to vector<128x128xf32>
      %c0_11 = arith.constant 0 : index
      %c0_12 = arith.constant 0 : index
      %13 = vector.load %arg8[%c0_11, %c0_12] : memref<128x128xf32, #tpu.memory_space<vmem>>, vector<128x128xf32>
      tpu.vector_store %arg8[%c0_11, %c0_12], %12 {strides = array<i32>} : memref<128x128xf32, #tpu.memory_space<vmem>>, vector<128x128xf32>,
    } else {
    }
    %c0 = arith.constant 0 : index
    %c0_1 = arith.constant 0 : index
    %3 = vector.load %arg8[%c0, %c0_1] : memref<128x128xf32, #tpu.memory_space<vmem>>, vector<128x128xf32>
    %c0_2 = arith.constant 0 : index
    %c0_3 = arith.constant 0 : index
    %4 = vector.load %arg3[%c0_2, %c0_3] : memref<128x128xbf16, #tpu.memory_space<vmem>>, vector<128x128xbf16>
    %c0_4 = arith.constant 0 : index
    %c0_5 = arith.constant 0 : index
    %5 = vector.load %arg4[%c0_4, %c0_5] : memref<128x128xbf16, #tpu.memory_space<vmem>>, vector<128x128xbf16>
    %cst = arith.constant dense<0.000000e+00> : vector<128x128xf32>
    %6 = tpu.matmul %4, %5, %cst {dimension_numbers = #tpu.dot_dimension_numbers<[1], [0], [0], [1], [0, 0, 1, 1], [], []>} : vector<128x128xbf16>, vector<128x128xbf16>, vector<128x128xf32> -> vector<128x128xf32>
    %7 = arith.addf %3, %6 : vector<128x128xf32>
    %c0_6 = arith.constant 0 : index
    %c0_7 = arith.constant 0 : index
    %8 = vector.load %arg8[%c0_6, %c0_7] : memref<128x128xf32, #tpu.memory_space<vmem>>, vector<128x128xf32>
    tpu.vector_store %arg8[%c0_6, %c0_7], %7 {strides = array<i32>} : memref<128x128xf32, #tpu.memory_space<vmem>>, vector<128x128xf32>,
    %c0_i32_8 = arith.constant 0 : i32
    %9 = arith.cmpi eq, %arg2, %c0_i32_8 : i32
    %10 = arith.extui %9 : i1 to i32
    %c0_i32_9 = arith.constant 0 : i32
    %11 = arith.cmpi ne, %10, %c0_i32_9 : i32
    scf.if %11 {
      %c0_10 = arith.constant 0 : index
      %c0_11 = arith.constant 0 : index
      %12 = vector.load %arg8[%c0_10, %c0_11] : memref<128x128xf32, #tpu.memory_space<vmem>>, vector<128x128xf32>
      %c0_12 = arith.constant 0 : index
      %c0_13 = arith.constant 0 : index
      %13 = vector.load %arg5[%c0_12, %c0_13] : memref<1x128xf32, #tpu.memory_space<vmem>>, vector<1x128xf32>
      %14 = vector.broadcast %13 : vector<1x128xf32> to vector<128x128xf32>
      %15 = arith.mulf %12, %14 : vector<128x128xf32>
      %c0_14 = arith.constant 0 : index
      %c0_15 = arith.constant 0 : index
      %16 = vector.load %arg6[%c0_14, %c0_15] : memref<1x128xf32, #tpu.memory_space<vmem>>, vector<1x128xf32>
      %17 = vector.broadcast %16 : vector<1x128xf32> to vector<128x128xf32>
      %18 = arith.addf %15, %17 : vector<128x128xf32>
      %cst_16 = arith.constant 0.000000e+00 : f32
      %19 = vector.broadcast %cst_16 : f32 to vector<128x128xf32>
      %20 = arith.maximumf %18, %19 : vector<128x128xf32>
      %c0_17 = arith.constant 0 : index
      %c0_18 = arith.constant 0 : index
      %21 = vector.load %arg7[%c0_17, %c0_18] : memref<128x128xf32, #tpu.memory_space<vmem>>, vector<128x128xf32>
      tpu.vector_store %arg7[%c0_17, %c0_18], %20 {strides = array<i32>} : memref<128x128xf32, #tpu.memory_space<vmem>>, vector<128x128xf32>,
    } else {
    }
    return
  }
  func.func @transform_0(%arg0: i32, %arg1: i32, %arg2: i32) -> (i32, i32) {
    %c0_i32 = arith.constant 0 : i32
    return %arg0, %arg2 : i32, i32
  }
  func.func @transform_1(%arg0: i32, %arg1: i32, %arg2: i32) -> (i32, i32) {
    %c0_i32 = arith.constant 0 : i32
    return %arg2, %arg1 : i32, i32
  }
  func.func @transform_2(%arg0: i32, %arg1: i32, %arg2: i32) -> (i32, i32) {
    %c0_i32 = arith.constant 0 : i32
    %c0_i32_0 = arith.constant 0 : i32
    return %c0_i32, %arg1 : i32, i32
  }
  func.func @transform_3(%arg0: i32, %arg1: i32, %arg2: i32) -> (i32, i32) {
    %c0_i32 = arith.constant 0 : i32
    %c0_i32_0 = arith.constant 0 : i32
    return %c0_i32, %arg1 : i32, i32
  }
  func.func @transform_4(%arg0: i32, %arg1: i32, %arg2: i32) -> (i32, i32) {
    %c0_i32 = arith.constant 0 : i32
    return %arg0, %arg1 : i32, i32
  }
}

module attributes {stable_mosaic.version = 11 : i64} {
  func.func @_mm_affine_kernel(%arg0: i32, %arg1: i32, %arg2: i32, %arg3: memref<128x256xbf16, #tpu.memory_space<vmem>>, %arg4: memref<256x128xbf16, #tpu.memory_space<vmem>>, %arg5: memref<1x128xf32, #tpu.memory_space<vmem>>, %arg6: memref<1x128xf32, #tpu.memory_space<vmem>>, %arg7: memref<128x128xf32, #tpu.memory_space<vmem>>, %arg8: memref<128x128xf32, #tpu.memory_space<vmem>>) attributes {dimension_semantics = [#tpu.dimension_semantics<parallel>, #tpu.dimension_semantics<parallel>, #tpu.dimension_semantics<arbitrary>], iteration_bounds = array<i64: 1, 1, 1>, scalar_prefetch = 0 : i64, scratch_operands = 1 : i64, tpu.core_type = #tpu.core_type<tc>, window_params = [{transform_indices = @transform_0, window_bounds = array<i64: 128, 256>}, {transform_indices = @transform_1, window_bounds = array<i64: 256, 128>}, {transform_indices = @transform_2, window_bounds = array<i64: 1, 128>}, {transform_indices = @transform_3, window_bounds = array<i64: 1, 128>}, {transform_indices = @transform_4, window_bounds = array<i64: 128, 128>}]} {
    %c0_i32 = arith.constant 0 : i32
    %0 = arith.cmpi eq, %arg2, %c0_i32 : i32
    %1 = arith.extui %0 : i1 to i32
    %c0_i32_0 = arith.constant 0 : i32
    %2 = arith.cmpi ne, %1, %c0_i32_0 : i32
    scf.if %2 {
      %cst_10 = arith.constant 0.000000e+00 : f32
      %12 = vector.broadcast %cst_10 : f32 to vector<128x128xf32>
      %c0_11 = arith.constant 0 : index
      %c0_12 = arith.constant 0 : index
      %13 = vector.load %arg8[%c0_11, %c0_12] : memref<128x128xf32, #tpu.memory_space<vmem>>, vector<128x128xf32>
      tpu.vector_store %arg8[%c0_11, %c0_12], %12 {strides = array<i32>} : memref<128x128xf32, #tpu.memory_space<vmem>>, vector<128x128xf32>,
    } else {
    }
    %c0 = arith.constant 0 : index
    %c0_1 = arith.constant 0 : index
    %3 = vector.load %arg8[%c0, %c0_1] : memref<128x128xf32, #tpu.memory_space<vmem>>, vector<128x128xf32>
    %c0_2 = arith.constant 0 : index
    %c0_3 = arith.constant 0 : index
    %4 = vector.load %arg3[%c0_2, %c0_3] : memref<128x256xbf16, #tpu.memory_space<vmem>>, vector<128x256xbf16>
    %c0_4 = arith.constant 0 : index
    %c0_5 = arith.constant 0 : index
    %5 = vector.load %arg4[%c0_4, %c0_5] : memref<256x128xbf16, #tpu.memory_space<vmem>>, vector<256x128xbf16>
    %cst = arith.constant dense<0.000000e+00> : vector<128x128xf32>
    %6 = tpu.matmul %4, %5, %cst {dimension_numbers = #tpu.dot_dimension_numbers<[1], [0], [0], [1], [0, 0, 1, 1], [], []>} : vector<128x256xbf16>, vector<256x128xbf16>, vector<128x128xf32> -> vector<128x128xf32>
    %7 = arith.addf %3, %6 : vector<128x128xf32>
    %c0_6 = arith.constant 0 : index
    %c0_7 = arith.constant 0 : index
    %8 = vector.load %arg8[%c0_6, %c0_7] : memref<128x128xf32, #tpu.memory_space<vmem>>, vector<128x128xf32>
    tpu.vector_store %arg8[%c0_6, %c0_7], %7 {strides = array<i32>} : memref<128x128xf32, #tpu.memory_space<vmem>>, vector<128x128xf32>,
    %c0_i32_8 = arith.constant 0 : i32
    %9 = arith.cmpi eq, %arg2, %c0_i32_8 : i32
    %10 = arith.extui %9 : i1 to i32
    %c0_i32_9 = arith.constant 0 : i32
    %11 = arith.cmpi ne, %10, %c0_i32_9 : i32
    scf.if %11 {
      %c0_10 = arith.constant 0 : index
      %c0_11 = arith.constant 0 : index
      %12 = vector.load %arg8[%c0_10, %c0_11] : memref<128x128xf32, #tpu.memory_space<vmem>>, vector<128x128xf32>
      %c0_12 = arith.constant 0 : index
      %c0_13 = arith.constant 0 : index
      %13 = vector.load %arg5[%c0_12, %c0_13] : memref<1x128xf32, #tpu.memory_space<vmem>>, vector<1x128xf32>
      %14 = vector.broadcast %13 : vector<1x128xf32> to vector<128x128xf32>
      %15 = arith.mulf %12, %14 : vector<128x128xf32>
      %c0_14 = arith.constant 0 : index
      %c0_15 = arith.constant 0 : index
      %16 = vector.load %arg6[%c0_14, %c0_15] : memref<1x128xf32, #tpu.memory_space<vmem>>, vector<1x128xf32>
      %17 = vector.broadcast %16 : vector<1x128xf32> to vector<128x128xf32>
      %18 = arith.addf %15, %17 : vector<128x128xf32>
      %cst_16 = arith.constant 0.000000e+00 : f32
      %19 = vector.broadcast %cst_16 : f32 to vector<128x128xf32>
      %20 = arith.maximumf %18, %19 : vector<128x128xf32>
      %c0_17 = arith.constant 0 : index
      %c0_18 = arith.constant 0 : index
      %21 = vector.load %arg7[%c0_17, %c0_18] : memref<128x128xf32, #tpu.memory_space<vmem>>, vector<128x128xf32>
      tpu.vector_store %arg7[%c0_17, %c0_18], %20 {strides = array<i32>} : memref<128x128xf32, #tpu.memory_space<vmem>>, vector<128x128xf32>,
    } else {
    }
    return
  }
  func.func @transform_0(%arg0: i32, %arg1: i32, %arg2: i32) -> (i32, i32) {
    %c0_i32 = arith.constant 0 : i32
    return %arg0, %arg2 : i32, i32
  }
  func.func @transform_1(%arg0: i32, %arg1: i32, %arg2: i32) -> (i32, i32) {
    %c0_i32 = arith.constant 0 : i32
    return %arg2, %arg1 : i32, i32
  }
  func.func @transform_2(%arg0: i32, %arg1: i32, %arg2: i32) -> (i32, i32) {
    %c0_i32 = arith.constant 0 : i32
    %c0_i32_0 = arith.constant 0 : i32
    return %c0_i32, %arg1 : i32, i32
  }
  func.func @transform_3(%arg0: i32, %arg1: i32, %arg2: i32) -> (i32, i32) {
    %c0_i32 = arith.constant 0 : i32
    %c0_i32_0 = arith.constant 0 : i32
    return %c0_i32, %arg1 : i32, i32
  }
  func.func @transform_4(%arg0: i32, %arg1: i32, %arg2: i32) -> (i32, i32) {
    %c0_i32 = arith.constant 0 : i32
    return %arg0, %arg1 : i32, i32
  }
}

module attributes {stable_mosaic.version = 11 : i64} {
  func.func @_mm_affine_kernel(%arg0: i32, %arg1: i32, %arg2: i32, %arg3: memref<128x128xbf16, #tpu.memory_space<vmem>>, %arg4: memref<128x128xbf16, #tpu.memory_space<vmem>>, %arg5: memref<1x128xf32, #tpu.memory_space<vmem>>, %arg6: memref<1x128xf32, #tpu.memory_space<vmem>>, %arg7: memref<128x128xf32, #tpu.memory_space<vmem>>, %arg8: memref<128x128xf32, #tpu.memory_space<vmem>>) attributes {dimension_semantics = [#tpu.dimension_semantics<parallel>, #tpu.dimension_semantics<parallel>, #tpu.dimension_semantics<arbitrary>], iteration_bounds = array<i64: 1, 1, 1>, scalar_prefetch = 0 : i64, scratch_operands = 1 : i64, tpu.core_type = #tpu.core_type<tc>, window_params = [{transform_indices = @transform_0, window_bounds = array<i64: 128, 128>}, {transform_indices = @transform_1, window_bounds = array<i64: 128, 128>}, {transform_indices = @transform_2, window_bounds = array<i64: 1, 128>}, {transform_indices = @transform_3, window_bounds = array<i64: 1, 128>}, {transform_indices = @transform_4, window_bounds = array<i64: 128, 128>}]} {
    %c0_i32 = arith.constant 0 : i32
    %0 = arith.cmpi eq, %arg2, %c0_i32 : i32
    %1 = arith.extui %0 : i1 to i32
    %c0_i32_0 = arith.constant 0 : i32
    %2 = arith.cmpi ne, %1, %c0_i32_0 : i32
    scf.if %2 {
      %cst_10 = arith.constant 0.000000e+00 : f32
      %12 = vector.broadcast %cst_10 : f32 to vector<128x128xf32>
      %c0_11 = arith.constant 0 : index
      %c0_12 = arith.constant 0 : index
      %13 = vector.load %arg8[%c0_11, %c0_12] : memref<128x128xf32, #tpu.memory_space<vmem>>, vector<128x128xf32>
      tpu.vector_store %arg8[%c0_11, %c0_12], %12 {strides = array<i32>} : memref<128x128xf32, #tpu.memory_space<vmem>>, vector<128x128xf32>,
    } else {
    }
    %c0 = arith.constant 0 : index
    %c0_1 = arith.constant 0 : index
    %3 = vector.load %arg8[%c0, %c0_1] : memref<128x128xf32, #tpu.memory_space<vmem>>, vector<128x128xf32>
    %c0_2 = arith.constant 0 : index
    %c0_3 = arith.constant 0 : index
    %4 = vector.load %arg3[%c0_2, %c0_3] : memref<128x128xbf16, #tpu.memory_space<vmem>>, vector<128x128xbf16>
    %c0_4 = arith.constant 0 : index
    %c0_5 = arith.constant 0 : index
    %5 = vector.load %arg4[%c0_4, %c0_5] : memref<128x128xbf16, #tpu.memory_space<vmem>>, vector<128x128xbf16>
    %cst = arith.constant dense<0.000000e+00> : vector<128x128xf32>
    %6 = tpu.matmul %4, %5, %cst {dimension_numbers = #tpu.dot_dimension_numbers<[1], [0], [0], [1], [0, 0, 1, 1], [], []>} : vector<128x128xbf16>, vector<128x128xbf16>, vector<128x128xf32> -> vector<128x128xf32>
    %7 = arith.addf %3, %6 : vector<128x128xf32>
    %c0_6 = arith.constant 0 : index
    %c0_7 = arith.constant 0 : index
    %8 = vector.load %arg8[%c0_6, %c0_7] : memref<128x128xf32, #tpu.memory_space<vmem>>, vector<128x128xf32>
    tpu.vector_store %arg8[%c0_6, %c0_7], %7 {strides = array<i32>} : memref<128x128xf32, #tpu.memory_space<vmem>>, vector<128x128xf32>,
    %c0_i32_8 = arith.constant 0 : i32
    %9 = arith.cmpi eq, %arg2, %c0_i32_8 : i32
    %10 = arith.extui %9 : i1 to i32
    %c0_i32_9 = arith.constant 0 : i32
    %11 = arith.cmpi ne, %10, %c0_i32_9 : i32
    scf.if %11 {
      %c0_10 = arith.constant 0 : index
      %c0_11 = arith.constant 0 : index
      %12 = vector.load %arg8[%c0_10, %c0_11] : memref<128x128xf32, #tpu.memory_space<vmem>>, vector<128x128xf32>
      %c0_12 = arith.constant 0 : index
      %c0_13 = arith.constant 0 : index
      %13 = vector.load %arg5[%c0_12, %c0_13] : memref<1x128xf32, #tpu.memory_space<vmem>>, vector<1x128xf32>
      %14 = vector.broadcast %13 : vector<1x128xf32> to vector<128x128xf32>
      %15 = arith.mulf %12, %14 : vector<128x128xf32>
      %c0_14 = arith.constant 0 : index
      %c0_15 = arith.constant 0 : index
      %16 = vector.load %arg6[%c0_14, %c0_15] : memref<1x128xf32, #tpu.memory_space<vmem>>, vector<1x128xf32>
      %17 = vector.broadcast %16 : vector<1x128xf32> to vector<128x128xf32>
      %18 = arith.addf %15, %17 : vector<128x128xf32>
      %c0_16 = arith.constant 0 : index
      %c0_17 = arith.constant 0 : index
      %19 = vector.load %arg7[%c0_16, %c0_17] : memref<128x128xf32, #tpu.memory_space<vmem>>, vector<128x128xf32>
      tpu.vector_store %arg7[%c0_16, %c0_17], %18 {strides = array<i32>} : memref<128x128xf32, #tpu.memory_space<vmem>>, vector<128x128xf32>,
    } else {
    }
    return
  }
  func.func @transform_0(%arg0: i32, %arg1: i32, %arg2: i32) -> (i32, i32) {
    %c0_i32 = arith.constant 0 : i32
    return %arg0, %arg2 : i32, i32
  }
  func.func @transform_1(%arg0: i32, %arg1: i32, %arg2: i32) -> (i32, i32) {
    %c0_i32 = arith.constant 0 : i32
    return %arg2, %arg1 : i32, i32
  }
  func.func @transform_2(%arg0: i32, %arg1: i32, %arg2: i32) -> (i32, i32) {
    %c0_i32 = arith.constant 0 : i32
    %c0_i32_0 = arith.constant 0 : i32
    return %c0_i32, %arg1 : i32, i32
  }
  func.func @transform_3(%arg0: i32, %arg1: i32, %arg2: i32) -> (i32, i32) {
    %c0_i32 = arith.constant 0 : i32
    %c0_i32_0 = arith.constant 0 : i32
    return %c0_i32, %arg1 : i32, i32
  }
  func.func @transform_4(%arg0: i32, %arg1: i32, %arg2: i32) -> (i32, i32) {
    %c0_i32 = arith.constant 0 : i32
    return %arg0, %arg1 : i32, i32
  }
}

module attributes {stable_mosaic.version = 11 : i64} {
  func.func @_mm_affine_kernel(%arg0: i32, %arg1: i32, %arg2: i32, %arg3: memref<128x128xbf16, #tpu.memory_space<vmem>>, %arg4: memref<128x128xbf16, #tpu.memory_space<vmem>>, %arg5: memref<1x128xf32, #tpu.memory_space<vmem>>, %arg6: memref<1x128xf32, #tpu.memory_space<vmem>>, %arg7: memref<128x128xf32, #tpu.memory_space<vmem>>, %arg8: memref<128x128xf32, #tpu.memory_space<vmem>>, %arg9: memref<128x128xf32, #tpu.memory_space<vmem>>) attributes {dimension_semantics = [#tpu.dimension_semantics<parallel>, #tpu.dimension_semantics<parallel>, #tpu.dimension_semantics<arbitrary>], iteration_bounds = array<i64: 1, 1, 1>, scalar_prefetch = 0 : i64, scratch_operands = 1 : i64, tpu.core_type = #tpu.core_type<tc>, window_params = [{transform_indices = @transform_0, window_bounds = array<i64: 128, 128>}, {transform_indices = @transform_1, window_bounds = array<i64: 128, 128>}, {transform_indices = @transform_2, window_bounds = array<i64: 1, 128>}, {transform_indices = @transform_3, window_bounds = array<i64: 1, 128>}, {transform_indices = @transform_4, window_bounds = array<i64: 128, 128>}, {transform_indices = @transform_5, window_bounds = array<i64: 128, 128>}]} {
    %c0_i32 = arith.constant 0 : i32
    %0 = arith.cmpi eq, %arg2, %c0_i32 : i32
    %1 = arith.extui %0 : i1 to i32
    %c0_i32_0 = arith.constant 0 : i32
    %2 = arith.cmpi ne, %1, %c0_i32_0 : i32
    scf.if %2 {
      %cst_10 = arith.constant 0.000000e+00 : f32
      %12 = vector.broadcast %cst_10 : f32 to vector<128x128xf32>
      %c0_11 = arith.constant 0 : index
      %c0_12 = arith.constant 0 : index
      %13 = vector.load %arg9[%c0_11, %c0_12] : memref<128x128xf32, #tpu.memory_space<vmem>>, vector<128x128xf32>
      tpu.vector_store %arg9[%c0_11, %c0_12], %12 {strides = array<i32>} : memref<128x128xf32, #tpu.memory_space<vmem>>, vector<128x128xf32>,
    } else {
    }
    %c0 = arith.constant 0 : index
    %c0_1 = arith.constant 0 : index
    %3 = vector.load %arg9[%c0, %c0_1] : memref<128x128xf32, #tpu.memory_space<vmem>>, vector<128x128xf32>
    %c0_2 = arith.constant 0 : index
    %c0_3 = arith.constant 0 : index
    %4 = vector.load %arg3[%c0_2, %c0_3] : memref<128x128xbf16, #tpu.memory_space<vmem>>, vector<128x128xbf16>
    %c0_4 = arith.constant 0 : index
    %c0_5 = arith.constant 0 : index
    %5 = vector.load %arg4[%c0_4, %c0_5] : memref<128x128xbf16, #tpu.memory_space<vmem>>, vector<128x128xbf16>
    %cst = arith.constant dense<0.000000e+00> : vector<128x128xf32>
    %6 = tpu.matmul %4, %5, %cst {dimension_numbers = #tpu.dot_dimension_numbers<[1], [0], [0], [1], [0, 0, 1, 1], [], []>} : vector<128x128xbf16>, vector<128x128xbf16>, vector<128x128xf32> -> vector<128x128xf32>
    %7 = arith.addf %3, %6 : vector<128x128xf32>
    %c0_6 = arith.constant 0 : index
    %c0_7 = arith.constant 0 : index
    %8 = vector.load %arg9[%c0_6, %c0_7] : memref<128x128xf32, #tpu.memory_space<vmem>>, vector<128x128xf32>
    tpu.vector_store %arg9[%c0_6, %c0_7], %7 {strides = array<i32>} : memref<128x128xf32, #tpu.memory_space<vmem>>, vector<128x128xf32>,
    %c0_i32_8 = arith.constant 0 : i32
    %9 = arith.cmpi eq, %arg2, %c0_i32_8 : i32
    %10 = arith.extui %9 : i1 to i32
    %c0_i32_9 = arith.constant 0 : i32
    %11 = arith.cmpi ne, %10, %c0_i32_9 : i32
    scf.if %11 {
      %c0_10 = arith.constant 0 : index
      %c0_11 = arith.constant 0 : index
      %12 = vector.load %arg9[%c0_10, %c0_11] : memref<128x128xf32, #tpu.memory_space<vmem>>, vector<128x128xf32>
      %c0_12 = arith.constant 0 : index
      %c0_13 = arith.constant 0 : index
      %13 = vector.load %arg5[%c0_12, %c0_13] : memref<1x128xf32, #tpu.memory_space<vmem>>, vector<1x128xf32>
      %14 = vector.broadcast %13 : vector<1x128xf32> to vector<128x128xf32>
      %15 = arith.mulf %12, %14 : vector<128x128xf32>
      %c0_14 = arith.constant 0 : index
      %c0_15 = arith.constant 0 : index
      %16 = vector.load %arg6[%c0_14, %c0_15] : memref<1x128xf32, #tpu.memory_space<vmem>>, vector<1x128xf32>
      %17 = vector.broadcast %16 : vector<1x128xf32> to vector<128x128xf32>
      %18 = arith.addf %15, %17 : vector<128x128xf32>
      %c0_16 = arith.constant 0 : index
      %c0_17 = arith.constant 0 : index
      %19 = vector.load %arg7[%c0_16, %c0_17] : memref<128x128xf32, #tpu.memory_space<vmem>>, vector<128x128xf32>
      %20 = arith.addf %18, %19 : vector<128x128xf32>
      %cst_18 = arith.constant 0.000000e+00 : f32
      %21 = vector.broadcast %cst_18 : f32 to vector<128x128xf32>
      %22 = arith.maximumf %20, %21 : vector<128x128xf32>
      %c0_19 = arith.constant 0 : index
      %c0_20 = arith.constant 0 : index
      %23 = vector.load %arg8[%c0_19, %c0_20] : memref<128x128xf32, #tpu.memory_space<vmem>>, vector<128x128xf32>
      tpu.vector_store %arg8[%c0_19, %c0_20], %22 {strides = array<i32>} : memref<128x128xf32, #tpu.memory_space<vmem>>, vector<128x128xf32>,
    } else {
    }
    return
  }
  func.func @transform_0(%arg0: i32, %arg1: i32, %arg2: i32) -> (i32, i32) {
    %c0_i32 = arith.constant 0 : i32
    return %arg0, %arg2 : i32, i32
  }
  func.func @transform_1(%arg0: i32, %arg1: i32, %arg2: i32) -> (i32, i32) {
    %c0_i32 = arith.constant 0 : i32
    return %arg2, %arg1 : i32, i32
  }
  func.func @transform_2(%arg0: i32, %arg1: i32, %arg2: i32) -> (i32, i32) {
    %c0_i32 = arith.constant 0 : i32
    %c0_i32_0 = arith.constant 0 : i32
    return %c0_i32, %arg1 : i32, i32
  }
  func.func @transform_3(%arg0: i32, %arg1: i32, %arg2: i32) -> (i32, i32) {
    %c0_i32 = arith.constant 0 : i32
    %c0_i32_0 = arith.constant 0 : i32
    return %c0_i32, %arg1 : i32, i32
  }
  func.func @transform_4(%arg0: i32, %arg1: i32, %arg2: i32) -> (i32, i32) {
    %c0_i32 = arith.constant 0 : i32
    return %arg0, %arg1 : i32, i32
  }
  func.func @transform_5(%arg0: i32, %arg1: i32, %arg2: i32) -> (i32, i32) {
    %c0_i32 = arith.constant 0 : i32
    return %arg0, %arg1 : i32, i32
  }
}

module attributes {stable_mosaic.version = 11 : i64} {
  func.func @_mm_affine_kernel(%arg0: i32, %arg1: i32, %arg2: i32, %arg3: memref<32x256xbf16, #tpu.memory_space<vmem>>, %arg4: memref<256x128xbf16, #tpu.memory_space<vmem>>, %arg5: memref<1x128xf32, #tpu.memory_space<vmem>>, %arg6: memref<1x128xf32, #tpu.memory_space<vmem>>, %arg7: memref<32x128xf32, #tpu.memory_space<vmem>>, %arg8: memref<32x128xf32, #tpu.memory_space<vmem>>) attributes {dimension_semantics = [#tpu.dimension_semantics<parallel>, #tpu.dimension_semantics<parallel>, #tpu.dimension_semantics<arbitrary>], iteration_bounds = array<i64: 1, 1, 1>, scalar_prefetch = 0 : i64, scratch_operands = 1 : i64, tpu.core_type = #tpu.core_type<tc>, window_params = [{transform_indices = @transform_0, window_bounds = array<i64: 32, 256>}, {transform_indices = @transform_1, window_bounds = array<i64: 256, 128>}, {transform_indices = @transform_2, window_bounds = array<i64: 1, 128>}, {transform_indices = @transform_3, window_bounds = array<i64: 1, 128>}, {transform_indices = @transform_4, window_bounds = array<i64: 32, 128>}]} {
    %c0_i32 = arith.constant 0 : i32
    %0 = arith.cmpi eq, %arg2, %c0_i32 : i32
    %1 = arith.extui %0 : i1 to i32
    %c0_i32_0 = arith.constant 0 : i32
    %2 = arith.cmpi ne, %1, %c0_i32_0 : i32
    scf.if %2 {
      %cst_10 = arith.constant 0.000000e+00 : f32
      %12 = vector.broadcast %cst_10 : f32 to vector<32x128xf32>
      %c0_11 = arith.constant 0 : index
      %c0_12 = arith.constant 0 : index
      %13 = vector.load %arg8[%c0_11, %c0_12] : memref<32x128xf32, #tpu.memory_space<vmem>>, vector<32x128xf32>
      tpu.vector_store %arg8[%c0_11, %c0_12], %12 {strides = array<i32>} : memref<32x128xf32, #tpu.memory_space<vmem>>, vector<32x128xf32>,
    } else {
    }
    %c0 = arith.constant 0 : index
    %c0_1 = arith.constant 0 : index
    %3 = vector.load %arg8[%c0, %c0_1] : memref<32x128xf32, #tpu.memory_space<vmem>>, vector<32x128xf32>
    %c0_2 = arith.constant 0 : index
    %c0_3 = arith.constant 0 : index
    %4 = vector.load %arg3[%c0_2, %c0_3] : memref<32x256xbf16, #tpu.memory_space<vmem>>, vector<32x256xbf16>
    %c0_4 = arith.constant 0 : index
    %c0_5 = arith.constant 0 : index
    %5 = vector.load %arg4[%c0_4, %c0_5] : memref<256x128xbf16, #tpu.memory_space<vmem>>, vector<256x128xbf16>
    %cst = arith.constant dense<0.000000e+00> : vector<32x128xf32>
    %6 = tpu.matmul %4, %5, %cst {dimension_numbers = #tpu.dot_dimension_numbers<[1], [0], [0], [1], [0, 0, 1, 1], [], []>} : vector<32x256xbf16>, vector<256x128xbf16>, vector<32x128xf32> -> vector<32x128xf32>
    %7 = arith.addf %3, %6 : vector<32x128xf32>
    %c0_6 = arith.constant 0 : index
    %c0_7 = arith.constant 0 : index
    %8 = vector.load %arg8[%c0_6, %c0_7] : memref<32x128xf32, #tpu.memory_space<vmem>>, vector<32x128xf32>
    tpu.vector_store %arg8[%c0_6, %c0_7], %7 {strides = array<i32>} : memref<32x128xf32, #tpu.memory_space<vmem>>, vector<32x128xf32>,
    %c0_i32_8 = arith.constant 0 : i32
    %9 = arith.cmpi eq, %arg2, %c0_i32_8 : i32
    %10 = arith.extui %9 : i1 to i32
    %c0_i32_9 = arith.constant 0 : i32
    %11 = arith.cmpi ne, %10, %c0_i32_9 : i32
    scf.if %11 {
      %c0_10 = arith.constant 0 : index
      %c0_11 = arith.constant 0 : index
      %12 = vector.load %arg8[%c0_10, %c0_11] : memref<32x128xf32, #tpu.memory_space<vmem>>, vector<32x128xf32>
      %c0_12 = arith.constant 0 : index
      %c0_13 = arith.constant 0 : index
      %13 = vector.load %arg5[%c0_12, %c0_13] : memref<1x128xf32, #tpu.memory_space<vmem>>, vector<1x128xf32>
      %14 = vector.broadcast %13 : vector<1x128xf32> to vector<32x128xf32>
      %15 = arith.mulf %12, %14 : vector<32x128xf32>
      %c0_14 = arith.constant 0 : index
      %c0_15 = arith.constant 0 : index
      %16 = vector.load %arg6[%c0_14, %c0_15] : memref<1x128xf32, #tpu.memory_space<vmem>>, vector<1x128xf32>
      %17 = vector.broadcast %16 : vector<1x128xf32> to vector<32x128xf32>
      %18 = arith.addf %15, %17 : vector<32x128xf32>
      %c0_16 = arith.constant 0 : index
      %c0_17 = arith.constant 0 : index
      %19 = vector.load %arg7[%c0_16, %c0_17] : memref<32x128xf32, #tpu.memory_space<vmem>>, vector<32x128xf32>
      tpu.vector_store %arg7[%c0_16, %c0_17], %18 {strides = array<i32>} : memref<32x128xf32, #tpu.memory_space<vmem>>, vector<32x128xf32>,
    } else {
    }
    return
  }
  func.func @transform_0(%arg0: i32, %arg1: i32, %arg2: i32) -> (i32, i32) {
    %c0_i32 = arith.constant 0 : i32
    return %arg0, %arg2 : i32, i32
  }
  func.func @transform_1(%arg0: i32, %arg1: i32, %arg2: i32) -> (i32, i32) {
    %c0_i32 = arith.constant 0 : i32
    return %arg2, %arg1 : i32, i32
  }
  func.func @transform_2(%arg0: i32, %arg1: i32, %arg2: i32) -> (i32, i32) {
    %c0_i32 = arith.constant 0 : i32
    %c0_i32_0 = arith.constant 0 : i32
    return %c0_i32, %arg1 : i32, i32
  }
  func.func @transform_3(%arg0: i32, %arg1: i32, %arg2: i32) -> (i32, i32) {
    %c0_i32 = arith.constant 0 : i32
    %c0_i32_0 = arith.constant 0 : i32
    return %c0_i32, %arg1 : i32, i32
  }
  func.func @transform_4(%arg0: i32, %arg1: i32, %arg2: i32) -> (i32, i32) {
    %c0_i32 = arith.constant 0 : i32
    return %arg0, %arg1 : i32, i32
  }
}

module attributes {stable_mosaic.version = 11 : i64} {
  func.func @_mm_affine_kernel(%arg0: i32, %arg1: i32, %arg2: i32, %arg3: memref<128x384xbf16, #tpu.memory_space<vmem>>, %arg4: memref<384x128xbf16, #tpu.memory_space<vmem>>, %arg5: memref<1x128xf32, #tpu.memory_space<vmem>>, %arg6: memref<1x128xf32, #tpu.memory_space<vmem>>, %arg7: memref<128x128xf32, #tpu.memory_space<vmem>>, %arg8: memref<128x128xf32, #tpu.memory_space<vmem>>) attributes {dimension_semantics = [#tpu.dimension_semantics<parallel>, #tpu.dimension_semantics<parallel>, #tpu.dimension_semantics<arbitrary>], iteration_bounds = array<i64: 1, 1, 1>, scalar_prefetch = 0 : i64, scratch_operands = 1 : i64, tpu.core_type = #tpu.core_type<tc>, window_params = [{transform_indices = @transform_0, window_bounds = array<i64: 128, 384>}, {transform_indices = @transform_1, window_bounds = array<i64: 384, 128>}, {transform_indices = @transform_2, window_bounds = array<i64: 1, 128>}, {transform_indices = @transform_3, window_bounds = array<i64: 1, 128>}, {transform_indices = @transform_4, window_bounds = array<i64: 128, 128>}]} {
    %c0_i32 = arith.constant 0 : i32
    %0 = arith.cmpi eq, %arg2, %c0_i32 : i32
    %1 = arith.extui %0 : i1 to i32
    %c0_i32_0 = arith.constant 0 : i32
    %2 = arith.cmpi ne, %1, %c0_i32_0 : i32
    scf.if %2 {
      %cst_10 = arith.constant 0.000000e+00 : f32
      %12 = vector.broadcast %cst_10 : f32 to vector<128x128xf32>
      %c0_11 = arith.constant 0 : index
      %c0_12 = arith.constant 0 : index
      %13 = vector.load %arg8[%c0_11, %c0_12] : memref<128x128xf32, #tpu.memory_space<vmem>>, vector<128x128xf32>
      tpu.vector_store %arg8[%c0_11, %c0_12], %12 {strides = array<i32>} : memref<128x128xf32, #tpu.memory_space<vmem>>, vector<128x128xf32>,
    } else {
    }
    %c0 = arith.constant 0 : index
    %c0_1 = arith.constant 0 : index
    %3 = vector.load %arg8[%c0, %c0_1] : memref<128x128xf32, #tpu.memory_space<vmem>>, vector<128x128xf32>
    %c0_2 = arith.constant 0 : index
    %c0_3 = arith.constant 0 : index
    %4 = vector.load %arg3[%c0_2, %c0_3] : memref<128x384xbf16, #tpu.memory_space<vmem>>, vector<128x384xbf16>
    %c0_4 = arith.constant 0 : index
    %c0_5 = arith.constant 0 : index
    %5 = vector.load %arg4[%c0_4, %c0_5] : memref<384x128xbf16, #tpu.memory_space<vmem>>, vector<384x128xbf16>
    %cst = arith.constant dense<0.000000e+00> : vector<128x128xf32>
    %6 = tpu.matmul %4, %5, %cst {dimension_numbers = #tpu.dot_dimension_numbers<[1], [0], [0], [1], [0, 0, 1, 1], [], []>} : vector<128x384xbf16>, vector<384x128xbf16>, vector<128x128xf32> -> vector<128x128xf32>
    %7 = arith.addf %3, %6 : vector<128x128xf32>
    %c0_6 = arith.constant 0 : index
    %c0_7 = arith.constant 0 : index
    %8 = vector.load %arg8[%c0_6, %c0_7] : memref<128x128xf32, #tpu.memory_space<vmem>>, vector<128x128xf32>
    tpu.vector_store %arg8[%c0_6, %c0_7], %7 {strides = array<i32>} : memref<128x128xf32, #tpu.memory_space<vmem>>, vector<128x128xf32>,
    %c0_i32_8 = arith.constant 0 : i32
    %9 = arith.cmpi eq, %arg2, %c0_i32_8 : i32
    %10 = arith.extui %9 : i1 to i32
    %c0_i32_9 = arith.constant 0 : i32
    %11 = arith.cmpi ne, %10, %c0_i32_9 : i32
    scf.if %11 {
      %c0_10 = arith.constant 0 : index
      %c0_11 = arith.constant 0 : index
      %12 = vector.load %arg8[%c0_10, %c0_11] : memref<128x128xf32, #tpu.memory_space<vmem>>, vector<128x128xf32>
      %c0_12 = arith.constant 0 : index
      %c0_13 = arith.constant 0 : index
      %13 = vector.load %arg5[%c0_12, %c0_13] : memref<1x128xf32, #tpu.memory_space<vmem>>, vector<1x128xf32>
      %14 = vector.broadcast %13 : vector<1x128xf32> to vector<128x128xf32>
      %15 = arith.mulf %12, %14 : vector<128x128xf32>
      %c0_14 = arith.constant 0 : index
      %c0_15 = arith.constant 0 : index
      %16 = vector.load %arg6[%c0_14, %c0_15] : memref<1x128xf32, #tpu.memory_space<vmem>>, vector<1x128xf32>
      %17 = vector.broadcast %16 : vector<1x128xf32> to vector<128x128xf32>
      %18 = arith.addf %15, %17 : vector<128x128xf32>
      %cst_16 = arith.constant 0.000000e+00 : f32
      %19 = vector.broadcast %cst_16 : f32 to vector<128x128xf32>
      %20 = arith.maximumf %18, %19 : vector<128x128xf32>
      %c0_17 = arith.constant 0 : index
      %c0_18 = arith.constant 0 : index
      %21 = vector.load %arg7[%c0_17, %c0_18] : memref<128x128xf32, #tpu.memory_space<vmem>>, vector<128x128xf32>
      tpu.vector_store %arg7[%c0_17, %c0_18], %20 {strides = array<i32>} : memref<128x128xf32, #tpu.memory_space<vmem>>, vector<128x128xf32>,
    } else {
    }
    return
  }
  func.func @transform_0(%arg0: i32, %arg1: i32, %arg2: i32) -> (i32, i32) {
    %c0_i32 = arith.constant 0 : i32
    return %arg0, %arg2 : i32, i32
  }
  func.func @transform_1(%arg0: i32, %arg1: i32, %arg2: i32) -> (i32, i32) {
    %c0_i32 = arith.constant 0 : i32
    return %arg2, %arg1 : i32, i32
  }
  func.func @transform_2(%arg0: i32, %arg1: i32, %arg2: i32) -> (i32, i32) {
    %c0_i32 = arith.constant 0 : i32
    %c0_i32_0 = arith.constant 0 : i32
    return %c0_i32, %arg1 : i32, i32
  }
  func.func @transform_3(%arg0: i32, %arg1: i32, %arg2: i32) -> (i32, i32) {
    %c0_i32 = arith.constant 0 : i32
    %c0_i32_0 = arith.constant 0 : i32
    return %c0_i32, %arg1 : i32, i32
  }
  func.func @transform_4(%arg0: i32, %arg1: i32, %arg2: i32) -> (i32, i32) {
    %c0_i32 = arith.constant 0 : i32
    return %arg0, %arg1 : i32, i32
  }
}

module attributes {stable_mosaic.version = 11 : i64} {
  func.func @_mm_affine_kernel(%arg0: i32, %arg1: i32, %arg2: i32, %arg3: memref<32x128xbf16, #tpu.memory_space<vmem>>, %arg4: memref<128x128xbf16, #tpu.memory_space<vmem>>, %arg5: memref<1x128xf32, #tpu.memory_space<vmem>>, %arg6: memref<1x128xf32, #tpu.memory_space<vmem>>, %arg7: memref<32x128xf32, #tpu.memory_space<vmem>>, %arg8: memref<32x128xf32, #tpu.memory_space<vmem>>, %arg9: memref<32x128xf32, #tpu.memory_space<vmem>>) attributes {dimension_semantics = [#tpu.dimension_semantics<parallel>, #tpu.dimension_semantics<parallel>, #tpu.dimension_semantics<arbitrary>], iteration_bounds = array<i64: 1, 1, 1>, scalar_prefetch = 0 : i64, scratch_operands = 1 : i64, tpu.core_type = #tpu.core_type<tc>, window_params = [{transform_indices = @transform_0, window_bounds = array<i64: 32, 128>}, {transform_indices = @transform_1, window_bounds = array<i64: 128, 128>}, {transform_indices = @transform_2, window_bounds = array<i64: 1, 128>}, {transform_indices = @transform_3, window_bounds = array<i64: 1, 128>}, {transform_indices = @transform_4, window_bounds = array<i64: 32, 128>}, {transform_indices = @transform_5, window_bounds = array<i64: 32, 128>}]} {
    %c0_i32 = arith.constant 0 : i32
    %0 = arith.cmpi eq, %arg2, %c0_i32 : i32
    %1 = arith.extui %0 : i1 to i32
    %c0_i32_0 = arith.constant 0 : i32
    %2 = arith.cmpi ne, %1, %c0_i32_0 : i32
    scf.if %2 {
      %cst_10 = arith.constant 0.000000e+00 : f32
      %12 = vector.broadcast %cst_10 : f32 to vector<32x128xf32>
      %c0_11 = arith.constant 0 : index
      %c0_12 = arith.constant 0 : index
      %13 = vector.load %arg9[%c0_11, %c0_12] : memref<32x128xf32, #tpu.memory_space<vmem>>, vector<32x128xf32>
      tpu.vector_store %arg9[%c0_11, %c0_12], %12 {strides = array<i32>} : memref<32x128xf32, #tpu.memory_space<vmem>>, vector<32x128xf32>,
    } else {
    }
    %c0 = arith.constant 0 : index
    %c0_1 = arith.constant 0 : index
    %3 = vector.load %arg9[%c0, %c0_1] : memref<32x128xf32, #tpu.memory_space<vmem>>, vector<32x128xf32>
    %c0_2 = arith.constant 0 : index
    %c0_3 = arith.constant 0 : index
    %4 = vector.load %arg3[%c0_2, %c0_3] : memref<32x128xbf16, #tpu.memory_space<vmem>>, vector<32x128xbf16>
    %c0_4 = arith.constant 0 : index
    %c0_5 = arith.constant 0 : index
    %5 = vector.load %arg4[%c0_4, %c0_5] : memref<128x128xbf16, #tpu.memory_space<vmem>>, vector<128x128xbf16>
    %cst = arith.constant dense<0.000000e+00> : vector<32x128xf32>
    %6 = tpu.matmul %4, %5, %cst {dimension_numbers = #tpu.dot_dimension_numbers<[1], [0], [0], [1], [0, 0, 1, 1], [], []>} : vector<32x128xbf16>, vector<128x128xbf16>, vector<32x128xf32> -> vector<32x128xf32>
    %7 = arith.addf %3, %6 : vector<32x128xf32>
    %c0_6 = arith.constant 0 : index
    %c0_7 = arith.constant 0 : index
    %8 = vector.load %arg9[%c0_6, %c0_7] : memref<32x128xf32, #tpu.memory_space<vmem>>, vector<32x128xf32>
    tpu.vector_store %arg9[%c0_6, %c0_7], %7 {strides = array<i32>} : memref<32x128xf32, #tpu.memory_space<vmem>>, vector<32x128xf32>,
    %c0_i32_8 = arith.constant 0 : i32
    %9 = arith.cmpi eq, %arg2, %c0_i32_8 : i32
    %10 = arith.extui %9 : i1 to i32
    %c0_i32_9 = arith.constant 0 : i32
    %11 = arith.cmpi ne, %10, %c0_i32_9 : i32
    scf.if %11 {
      %c0_10 = arith.constant 0 : index
      %c0_11 = arith.constant 0 : index
      %12 = vector.load %arg9[%c0_10, %c0_11] : memref<32x128xf32, #tpu.memory_space<vmem>>, vector<32x128xf32>
      %c0_12 = arith.constant 0 : index
      %c0_13 = arith.constant 0 : index
      %13 = vector.load %arg5[%c0_12, %c0_13] : memref<1x128xf32, #tpu.memory_space<vmem>>, vector<1x128xf32>
      %14 = vector.broadcast %13 : vector<1x128xf32> to vector<32x128xf32>
      %15 = arith.mulf %12, %14 : vector<32x128xf32>
      %c0_14 = arith.constant 0 : index
      %c0_15 = arith.constant 0 : index
      %16 = vector.load %arg6[%c0_14, %c0_15] : memref<1x128xf32, #tpu.memory_space<vmem>>, vector<1x128xf32>
      %17 = vector.broadcast %16 : vector<1x128xf32> to vector<32x128xf32>
      %18 = arith.addf %15, %17 : vector<32x128xf32>
      %c0_16 = arith.constant 0 : index
      %c0_17 = arith.constant 0 : index
      %19 = vector.load %arg7[%c0_16, %c0_17] : memref<32x128xf32, #tpu.memory_space<vmem>>, vector<32x128xf32>
      %20 = arith.addf %18, %19 : vector<32x128xf32>
      %cst_18 = arith.constant 0.000000e+00 : f32
      %21 = vector.broadcast %cst_18 : f32 to vector<32x128xf32>
      %22 = arith.maximumf %20, %21 : vector<32x128xf32>
      %c0_19 = arith.constant 0 : index
      %c0_20 = arith.constant 0 : index
      %23 = vector.load %arg8[%c0_19, %c0_20] : memref<32x128xf32, #tpu.memory_space<vmem>>, vector<32x128xf32>
      tpu.vector_store %arg8[%c0_19, %c0_20], %22 {strides = array<i32>} : memref<32x128xf32, #tpu.memory_space<vmem>>, vector<32x128xf32>,
    } else {
    }
    return
  }
  func.func @transform_0(%arg0: i32, %arg1: i32, %arg2: i32) -> (i32, i32) {
    %c0_i32 = arith.constant 0 : i32
    return %arg0, %arg2 : i32, i32
  }
  func.func @transform_1(%arg0: i32, %arg1: i32, %arg2: i32) -> (i32, i32) {
    %c0_i32 = arith.constant 0 : i32
    return %arg2, %arg1 : i32, i32
  }
  func.func @transform_2(%arg0: i32, %arg1: i32, %arg2: i32) -> (i32, i32) {
    %c0_i32 = arith.constant 0 : i32
    %c0_i32_0 = arith.constant 0 : i32
    return %c0_i32, %arg1 : i32, i32
  }
  func.func @transform_3(%arg0: i32, %arg1: i32, %arg2: i32) -> (i32, i32) {
    %c0_i32 = arith.constant 0 : i32
    %c0_i32_0 = arith.constant 0 : i32
    return %c0_i32, %arg1 : i32, i32
  }
  func.func @transform_4(%arg0: i32, %arg1: i32, %arg2: i32) -> (i32, i32) {
    %c0_i32 = arith.constant 0 : i32
    return %arg0, %arg1 : i32, i32
  }
  func.func @transform_5(%arg0: i32, %arg1: i32, %arg2: i32) -> (i32, i32) {
    %c0_i32 = arith.constant 0 : i32
    return %arg0, %arg1 : i32, i32
  }
}

module attributes {stable_mosaic.version = 11 : i64} {
  func.func @_mm_affine_kernel(%arg0: i32, %arg1: i32, %arg2: i32, %arg3: memref<16x512xbf16, #tpu.memory_space<vmem>>, %arg4: memref<512x256xbf16, #tpu.memory_space<vmem>>, %arg5: memref<1x256xf32, #tpu.memory_space<vmem>>, %arg6: memref<1x256xf32, #tpu.memory_space<vmem>>, %arg7: memref<16x256xf32, #tpu.memory_space<vmem>>, %arg8: memref<16x256xf32, #tpu.memory_space<vmem>>) attributes {dimension_semantics = [#tpu.dimension_semantics<parallel>, #tpu.dimension_semantics<parallel>, #tpu.dimension_semantics<arbitrary>], iteration_bounds = array<i64: 1, 1, 1>, scalar_prefetch = 0 : i64, scratch_operands = 1 : i64, tpu.core_type = #tpu.core_type<tc>, window_params = [{transform_indices = @transform_0, window_bounds = array<i64: 16, 512>}, {transform_indices = @transform_1, window_bounds = array<i64: 512, 256>}, {transform_indices = @transform_2, window_bounds = array<i64: 1, 256>}, {transform_indices = @transform_3, window_bounds = array<i64: 1, 256>}, {transform_indices = @transform_4, window_bounds = array<i64: 16, 256>}]} {
    %c0_i32 = arith.constant 0 : i32
    %0 = arith.cmpi eq, %arg2, %c0_i32 : i32
    %1 = arith.extui %0 : i1 to i32
    %c0_i32_0 = arith.constant 0 : i32
    %2 = arith.cmpi ne, %1, %c0_i32_0 : i32
    scf.if %2 {
      %cst_10 = arith.constant 0.000000e+00 : f32
      %12 = vector.broadcast %cst_10 : f32 to vector<16x256xf32>
      %c0_11 = arith.constant 0 : index
      %c0_12 = arith.constant 0 : index
      %13 = vector.load %arg8[%c0_11, %c0_12] : memref<16x256xf32, #tpu.memory_space<vmem>>, vector<16x256xf32>
      tpu.vector_store %arg8[%c0_11, %c0_12], %12 {strides = array<i32>} : memref<16x256xf32, #tpu.memory_space<vmem>>, vector<16x256xf32>,
    } else {
    }
    %c0 = arith.constant 0 : index
    %c0_1 = arith.constant 0 : index
    %3 = vector.load %arg8[%c0, %c0_1] : memref<16x256xf32, #tpu.memory_space<vmem>>, vector<16x256xf32>
    %c0_2 = arith.constant 0 : index
    %c0_3 = arith.constant 0 : index
    %4 = vector.load %arg3[%c0_2, %c0_3] : memref<16x512xbf16, #tpu.memory_space<vmem>>, vector<16x512xbf16>
    %c0_4 = arith.constant 0 : index
    %c0_5 = arith.constant 0 : index
    %5 = vector.load %arg4[%c0_4, %c0_5] : memref<512x256xbf16, #tpu.memory_space<vmem>>, vector<512x256xbf16>
    %cst = arith.constant dense<0.000000e+00> : vector<16x256xf32>
    %6 = tpu.matmul %4, %5, %cst {dimension_numbers = #tpu.dot_dimension_numbers<[1], [0], [0], [1], [0, 0, 1, 1], [], []>} : vector<16x512xbf16>, vector<512x256xbf16>, vector<16x256xf32> -> vector<16x256xf32>
    %7 = arith.addf %3, %6 : vector<16x256xf32>
    %c0_6 = arith.constant 0 : index
    %c0_7 = arith.constant 0 : index
    %8 = vector.load %arg8[%c0_6, %c0_7] : memref<16x256xf32, #tpu.memory_space<vmem>>, vector<16x256xf32>
    tpu.vector_store %arg8[%c0_6, %c0_7], %7 {strides = array<i32>} : memref<16x256xf32, #tpu.memory_space<vmem>>, vector<16x256xf32>,
    %c0_i32_8 = arith.constant 0 : i32
    %9 = arith.cmpi eq, %arg2, %c0_i32_8 : i32
    %10 = arith.extui %9 : i1 to i32
    %c0_i32_9 = arith.constant 0 : i32
    %11 = arith.cmpi ne, %10, %c0_i32_9 : i32
    scf.if %11 {
      %c0_10 = arith.constant 0 : index
      %c0_11 = arith.constant 0 : index
      %12 = vector.load %arg8[%c0_10, %c0_11] : memref<16x256xf32, #tpu.memory_space<vmem>>, vector<16x256xf32>
      %c0_12 = arith.constant 0 : index
      %c0_13 = arith.constant 0 : index
      %13 = vector.load %arg5[%c0_12, %c0_13] : memref<1x256xf32, #tpu.memory_space<vmem>>, vector<1x256xf32>
      %14 = vector.broadcast %13 : vector<1x256xf32> to vector<16x256xf32>
      %15 = arith.mulf %12, %14 : vector<16x256xf32>
      %c0_14 = arith.constant 0 : index
      %c0_15 = arith.constant 0 : index
      %16 = vector.load %arg6[%c0_14, %c0_15] : memref<1x256xf32, #tpu.memory_space<vmem>>, vector<1x256xf32>
      %17 = vector.broadcast %16 : vector<1x256xf32> to vector<16x256xf32>
      %18 = arith.addf %15, %17 : vector<16x256xf32>
      %c0_16 = arith.constant 0 : index
      %c0_17 = arith.constant 0 : index
      %19 = vector.load %arg7[%c0_16, %c0_17] : memref<16x256xf32, #tpu.memory_space<vmem>>, vector<16x256xf32>
      tpu.vector_store %arg7[%c0_16, %c0_17], %18 {strides = array<i32>} : memref<16x256xf32, #tpu.memory_space<vmem>>, vector<16x256xf32>,
    } else {
    }
    return
  }
  func.func @transform_0(%arg0: i32, %arg1: i32, %arg2: i32) -> (i32, i32) {
    %c0_i32 = arith.constant 0 : i32
    return %arg0, %arg2 : i32, i32
  }
  func.func @transform_1(%arg0: i32, %arg1: i32, %arg2: i32) -> (i32, i32) {
    %c0_i32 = arith.constant 0 : i32
    return %arg2, %arg1 : i32, i32
  }
  func.func @transform_2(%arg0: i32, %arg1: i32, %arg2: i32) -> (i32, i32) {
    %c0_i32 = arith.constant 0 : i32
    %c0_i32_0 = arith.constant 0 : i32
    return %c0_i32, %arg1 : i32, i32
  }
  func.func @transform_3(%arg0: i32, %arg1: i32, %arg2: i32) -> (i32, i32) {
    %c0_i32 = arith.constant 0 : i32
    %c0_i32_0 = arith.constant 0 : i32
    return %c0_i32, %arg1 : i32, i32
  }
  func.func @transform_4(%arg0: i32, %arg1: i32, %arg2: i32) -> (i32, i32) {
    %c0_i32 = arith.constant 0 : i32
    return %arg0, %arg1 : i32, i32
  }
}

module attributes {stable_mosaic.version = 11 : i64} {
  func.func @_mm_affine_kernel(%arg0: i32, %arg1: i32, %arg2: i32, %arg3: memref<32x128xbf16, #tpu.memory_space<vmem>>, %arg4: memref<128x128xbf16, #tpu.memory_space<vmem>>, %arg5: memref<1x128xf32, #tpu.memory_space<vmem>>, %arg6: memref<1x128xf32, #tpu.memory_space<vmem>>, %arg7: memref<32x128xf32, #tpu.memory_space<vmem>>, %arg8: memref<32x128xf32, #tpu.memory_space<vmem>>) attributes {dimension_semantics = [#tpu.dimension_semantics<parallel>, #tpu.dimension_semantics<parallel>, #tpu.dimension_semantics<arbitrary>], iteration_bounds = array<i64: 1, 1, 1>, scalar_prefetch = 0 : i64, scratch_operands = 1 : i64, tpu.core_type = #tpu.core_type<tc>, window_params = [{transform_indices = @transform_0, window_bounds = array<i64: 32, 128>}, {transform_indices = @transform_1, window_bounds = array<i64: 128, 128>}, {transform_indices = @transform_2, window_bounds = array<i64: 1, 128>}, {transform_indices = @transform_3, window_bounds = array<i64: 1, 128>}, {transform_indices = @transform_4, window_bounds = array<i64: 32, 128>}]} {
    %c0_i32 = arith.constant 0 : i32
    %0 = arith.cmpi eq, %arg2, %c0_i32 : i32
    %1 = arith.extui %0 : i1 to i32
    %c0_i32_0 = arith.constant 0 : i32
    %2 = arith.cmpi ne, %1, %c0_i32_0 : i32
    scf.if %2 {
      %cst_10 = arith.constant 0.000000e+00 : f32
      %12 = vector.broadcast %cst_10 : f32 to vector<32x128xf32>
      %c0_11 = arith.constant 0 : index
      %c0_12 = arith.constant 0 : index
      %13 = vector.load %arg8[%c0_11, %c0_12] : memref<32x128xf32, #tpu.memory_space<vmem>>, vector<32x128xf32>
      tpu.vector_store %arg8[%c0_11, %c0_12], %12 {strides = array<i32>} : memref<32x128xf32, #tpu.memory_space<vmem>>, vector<32x128xf32>,
    } else {
    }
    %c0 = arith.constant 0 : index
    %c0_1 = arith.constant 0 : index
    %3 = vector.load %arg8[%c0, %c0_1] : memref<32x128xf32, #tpu.memory_space<vmem>>, vector<32x128xf32>
    %c0_2 = arith.constant 0 : index
    %c0_3 = arith.constant 0 : index
    %4 = vector.load %arg3[%c0_2, %c0_3] : memref<32x128xbf16, #tpu.memory_space<vmem>>, vector<32x128xbf16>
    %c0_4 = arith.constant 0 : index
    %c0_5 = arith.constant 0 : index
    %5 = vector.load %arg4[%c0_4, %c0_5] : memref<128x128xbf16, #tpu.memory_space<vmem>>, vector<128x128xbf16>
    %cst = arith.constant dense<0.000000e+00> : vector<32x128xf32>
    %6 = tpu.matmul %4, %5, %cst {dimension_numbers = #tpu.dot_dimension_numbers<[1], [0], [0], [1], [0, 0, 1, 1], [], []>} : vector<32x128xbf16>, vector<128x128xbf16>, vector<32x128xf32> -> vector<32x128xf32>
    %7 = arith.addf %3, %6 : vector<32x128xf32>
    %c0_6 = arith.constant 0 : index
    %c0_7 = arith.constant 0 : index
    %8 = vector.load %arg8[%c0_6, %c0_7] : memref<32x128xf32, #tpu.memory_space<vmem>>, vector<32x128xf32>
    tpu.vector_store %arg8[%c0_6, %c0_7], %7 {strides = array<i32>} : memref<32x128xf32, #tpu.memory_space<vmem>>, vector<32x128xf32>,
    %c0_i32_8 = arith.constant 0 : i32
    %9 = arith.cmpi eq, %arg2, %c0_i32_8 : i32
    %10 = arith.extui %9 : i1 to i32
    %c0_i32_9 = arith.constant 0 : i32
    %11 = arith.cmpi ne, %10, %c0_i32_9 : i32
    scf.if %11 {
      %c0_10 = arith.constant 0 : index
      %c0_11 = arith.constant 0 : index
      %12 = vector.load %arg8[%c0_10, %c0_11] : memref<32x128xf32, #tpu.memory_space<vmem>>, vector<32x128xf32>
      %c0_12 = arith.constant 0 : index
      %c0_13 = arith.constant 0 : index
      %13 = vector.load %arg5[%c0_12, %c0_13] : memref<1x128xf32, #tpu.memory_space<vmem>>, vector<1x128xf32>
      %14 = vector.broadcast %13 : vector<1x128xf32> to vector<32x128xf32>
      %15 = arith.mulf %12, %14 : vector<32x128xf32>
      %c0_14 = arith.constant 0 : index
      %c0_15 = arith.constant 0 : index
      %16 = vector.load %arg6[%c0_14, %c0_15] : memref<1x128xf32, #tpu.memory_space<vmem>>, vector<1x128xf32>
      %17 = vector.broadcast %16 : vector<1x128xf32> to vector<32x128xf32>
      %18 = arith.addf %15, %17 : vector<32x128xf32>
      %cst_16 = arith.constant 0.000000e+00 : f32
      %19 = vector.broadcast %cst_16 : f32 to vector<32x128xf32>
      %20 = arith.maximumf %18, %19 : vector<32x128xf32>
      %c0_17 = arith.constant 0 : index
      %c0_18 = arith.constant 0 : index
      %21 = vector.load %arg7[%c0_17, %c0_18] : memref<32x128xf32, #tpu.memory_space<vmem>>, vector<32x128xf32>
      tpu.vector_store %arg7[%c0_17, %c0_18], %20 {strides = array<i32>} : memref<32x128xf32, #tpu.memory_space<vmem>>, vector<32x128xf32>,
    } else {
    }
    return
  }
  func.func @transform_0(%arg0: i32, %arg1: i32, %arg2: i32) -> (i32, i32) {
    %c0_i32 = arith.constant 0 : i32
    return %arg0, %arg2 : i32, i32
  }
  func.func @transform_1(%arg0: i32, %arg1: i32, %arg2: i32) -> (i32, i32) {
    %c0_i32 = arith.constant 0 : i32
    return %arg2, %arg1 : i32, i32
  }
  func.func @transform_2(%arg0: i32, %arg1: i32, %arg2: i32) -> (i32, i32) {
    %c0_i32 = arith.constant 0 : i32
    %c0_i32_0 = arith.constant 0 : i32
    return %c0_i32, %arg1 : i32, i32
  }
  func.func @transform_3(%arg0: i32, %arg1: i32, %arg2: i32) -> (i32, i32) {
    %c0_i32 = arith.constant 0 : i32
    %c0_i32_0 = arith.constant 0 : i32
    return %c0_i32, %arg1 : i32, i32
  }
  func.func @transform_4(%arg0: i32, %arg1: i32, %arg2: i32) -> (i32, i32) {
    %c0_i32 = arith.constant 0 : i32
    return %arg0, %arg1 : i32, i32
  }
}

module attributes {stable_mosaic.version = 11 : i64} {
  func.func @_mm_affine_kernel(%arg0: i32, %arg1: i32, %arg2: i32, %arg3: memref<32x128xbf16, #tpu.memory_space<vmem>>, %arg4: memref<128x128xbf16, #tpu.memory_space<vmem>>, %arg5: memref<1x128xf32, #tpu.memory_space<vmem>>, %arg6: memref<1x128xf32, #tpu.memory_space<vmem>>, %arg7: memref<32x128xf32, #tpu.memory_space<vmem>>, %arg8: memref<32x128xf32, #tpu.memory_space<vmem>>) attributes {dimension_semantics = [#tpu.dimension_semantics<parallel>, #tpu.dimension_semantics<parallel>, #tpu.dimension_semantics<arbitrary>], iteration_bounds = array<i64: 1, 1, 5>, scalar_prefetch = 0 : i64, scratch_operands = 1 : i64, tpu.core_type = #tpu.core_type<tc>, window_params = [{transform_indices = @transform_0, window_bounds = array<i64: 32, 128>}, {transform_indices = @transform_1, window_bounds = array<i64: 128, 128>}, {transform_indices = @transform_2, window_bounds = array<i64: 1, 128>}, {transform_indices = @transform_3, window_bounds = array<i64: 1, 128>}, {transform_indices = @transform_4, window_bounds = array<i64: 32, 128>}]} {
    %c0_i32 = arith.constant 0 : i32
    %0 = arith.cmpi eq, %arg2, %c0_i32 : i32
    %1 = arith.extui %0 : i1 to i32
    %c0_i32_0 = arith.constant 0 : i32
    %2 = arith.cmpi ne, %1, %c0_i32_0 : i32
    scf.if %2 {
      %cst_9 = arith.constant 0.000000e+00 : f32
      %12 = vector.broadcast %cst_9 : f32 to vector<32x128xf32>
      %c0_10 = arith.constant 0 : index
      %c0_11 = arith.constant 0 : index
      %13 = vector.load %arg8[%c0_10, %c0_11] : memref<32x128xf32, #tpu.memory_space<vmem>>, vector<32x128xf32>
      tpu.vector_store %arg8[%c0_10, %c0_11], %12 {strides = array<i32>} : memref<32x128xf32, #tpu.memory_space<vmem>>, vector<32x128xf32>,
    } else {
    }
    %c0 = arith.constant 0 : index
    %c0_1 = arith.constant 0 : index
    %3 = vector.load %arg8[%c0, %c0_1] : memref<32x128xf32, #tpu.memory_space<vmem>>, vector<32x128xf32>
    %c0_2 = arith.constant 0 : index
    %c0_3 = arith.constant 0 : index
    %4 = vector.load %arg3[%c0_2, %c0_3] : memref<32x128xbf16, #tpu.memory_space<vmem>>, vector<32x128xbf16>
    %c0_4 = arith.constant 0 : index
    %c0_5 = arith.constant 0 : index
    %5 = vector.load %arg4[%c0_4, %c0_5] : memref<128x128xbf16, #tpu.memory_space<vmem>>, vector<128x128xbf16>
    %cst = arith.constant dense<0.000000e+00> : vector<32x128xf32>
    %6 = tpu.matmul %4, %5, %cst {dimension_numbers = #tpu.dot_dimension_numbers<[1], [0], [0], [1], [0, 0, 1, 1], [], []>} : vector<32x128xbf16>, vector<128x128xbf16>, vector<32x128xf32> -> vector<32x128xf32>
    %7 = arith.addf %3, %6 : vector<32x128xf32>
    %c0_6 = arith.constant 0 : index
    %c0_7 = arith.constant 0 : index
    %8 = vector.load %arg8[%c0_6, %c0_7] : memref<32x128xf32, #tpu.memory_space<vmem>>, vector<32x128xf32>
    tpu.vector_store %arg8[%c0_6, %c0_7], %7 {strides = array<i32>} : memref<32x128xf32, #tpu.memory_space<vmem>>, vector<32x128xf32>,
    %c4_i32 = arith.constant 4 : i32
    %9 = arith.cmpi eq, %arg2, %c4_i32 : i32
    %10 = arith.extui %9 : i1 to i32
    %c0_i32_8 = arith.constant 0 : i32
    %11 = arith.cmpi ne, %10, %c0_i32_8 : i32
    scf.if %11 {
      %c0_9 = arith.constant 0 : index
      %c0_10 = arith.constant 0 : index
      %12 = vector.load %arg8[%c0_9, %c0_10] : memref<32x128xf32, #tpu.memory_space<vmem>>, vector<32x128xf32>
      %c0_11 = arith.constant 0 : index
      %c0_12 = arith.constant 0 : index
      %13 = vector.load %arg5[%c0_11, %c0_12] : memref<1x128xf32, #tpu.memory_space<vmem>>, vector<1x128xf32>
      %14 = vector.broadcast %13 : vector<1x128xf32> to vector<32x128xf32>
      %15 = arith.mulf %12, %14 : vector<32x128xf32>
      %c0_13 = arith.constant 0 : index
      %c0_14 = arith.constant 0 : index
      %16 = vector.load %arg6[%c0_13, %c0_14] : memref<1x128xf32, #tpu.memory_space<vmem>>, vector<1x128xf32>
      %17 = vector.broadcast %16 : vector<1x128xf32> to vector<32x128xf32>
      %18 = arith.addf %15, %17 : vector<32x128xf32>
      %cst_15 = arith.constant 0.000000e+00 : f32
      %19 = vector.broadcast %cst_15 : f32 to vector<32x128xf32>
      %20 = arith.maximumf %18, %19 : vector<32x128xf32>
      %c0_16 = arith.constant 0 : index
      %c0_17 = arith.constant 0 : index
      %21 = vector.load %arg7[%c0_16, %c0_17] : memref<32x128xf32, #tpu.memory_space<vmem>>, vector<32x128xf32>
      tpu.vector_store %arg7[%c0_16, %c0_17], %20 {strides = array<i32>} : memref<32x128xf32, #tpu.memory_space<vmem>>, vector<32x128xf32>,
    } else {
    }
    return
  }
  func.func @transform_0(%arg0: i32, %arg1: i32, %arg2: i32) -> (i32, i32) {
    %c0_i32 = arith.constant 0 : i32
    return %arg0, %arg2 : i32, i32
  }
  func.func @transform_1(%arg0: i32, %arg1: i32, %arg2: i32) -> (i32, i32) {
    %c0_i32 = arith.constant 0 : i32
    return %arg2, %arg1 : i32, i32
  }
  func.func @transform_2(%arg0: i32, %arg1: i32, %arg2: i32) -> (i32, i32) {
    %c0_i32 = arith.constant 0 : i32
    %c0_i32_0 = arith.constant 0 : i32
    return %c0_i32, %arg1 : i32, i32
  }
  func.func @transform_3(%arg0: i32, %arg1: i32, %arg2: i32) -> (i32, i32) {
    %c0_i32 = arith.constant 0 : i32
    %c0_i32_0 = arith.constant 0 : i32
    return %c0_i32, %arg1 : i32, i32
  }
  func.func @transform_4(%arg0: i32, %arg1: i32, %arg2: i32) -> (i32, i32) {
    %c0_i32 = arith.constant 0 : i32
    return %arg0, %arg1 : i32, i32
  }
}

module attributes {stable_mosaic.version = 11 : i64} {
  func.func @_mm_affine_kernel(%arg0: i32, %arg1: i32, %arg2: i32, %arg3: memref<16x256xbf16, #tpu.memory_space<vmem>>, %arg4: memref<256x256xbf16, #tpu.memory_space<vmem>>, %arg5: memref<1x256xf32, #tpu.memory_space<vmem>>, %arg6: memref<1x256xf32, #tpu.memory_space<vmem>>, %arg7: memref<16x256xf32, #tpu.memory_space<vmem>>, %arg8: memref<16x256xf32, #tpu.memory_space<vmem>>, %arg9: memref<16x256xf32, #tpu.memory_space<vmem>>) attributes {dimension_semantics = [#tpu.dimension_semantics<parallel>, #tpu.dimension_semantics<parallel>, #tpu.dimension_semantics<arbitrary>], iteration_bounds = array<i64: 1, 1, 1>, scalar_prefetch = 0 : i64, scratch_operands = 1 : i64, tpu.core_type = #tpu.core_type<tc>, window_params = [{transform_indices = @transform_0, window_bounds = array<i64: 16, 256>}, {transform_indices = @transform_1, window_bounds = array<i64: 256, 256>}, {transform_indices = @transform_2, window_bounds = array<i64: 1, 256>}, {transform_indices = @transform_3, window_bounds = array<i64: 1, 256>}, {transform_indices = @transform_4, window_bounds = array<i64: 16, 256>}, {transform_indices = @transform_5, window_bounds = array<i64: 16, 256>}]} {
    %c0_i32 = arith.constant 0 : i32
    %0 = arith.cmpi eq, %arg2, %c0_i32 : i32
    %1 = arith.extui %0 : i1 to i32
    %c0_i32_0 = arith.constant 0 : i32
    %2 = arith.cmpi ne, %1, %c0_i32_0 : i32
    scf.if %2 {
      %cst_10 = arith.constant 0.000000e+00 : f32
      %12 = vector.broadcast %cst_10 : f32 to vector<16x256xf32>
      %c0_11 = arith.constant 0 : index
      %c0_12 = arith.constant 0 : index
      %13 = vector.load %arg9[%c0_11, %c0_12] : memref<16x256xf32, #tpu.memory_space<vmem>>, vector<16x256xf32>
      tpu.vector_store %arg9[%c0_11, %c0_12], %12 {strides = array<i32>} : memref<16x256xf32, #tpu.memory_space<vmem>>, vector<16x256xf32>,
    } else {
    }
    %c0 = arith.constant 0 : index
    %c0_1 = arith.constant 0 : index
    %3 = vector.load %arg9[%c0, %c0_1] : memref<16x256xf32, #tpu.memory_space<vmem>>, vector<16x256xf32>
    %c0_2 = arith.constant 0 : index
    %c0_3 = arith.constant 0 : index
    %4 = vector.load %arg3[%c0_2, %c0_3] : memref<16x256xbf16, #tpu.memory_space<vmem>>, vector<16x256xbf16>
    %c0_4 = arith.constant 0 : index
    %c0_5 = arith.constant 0 : index
    %5 = vector.load %arg4[%c0_4, %c0_5] : memref<256x256xbf16, #tpu.memory_space<vmem>>, vector<256x256xbf16>
    %cst = arith.constant dense<0.000000e+00> : vector<16x256xf32>
    %6 = tpu.matmul %4, %5, %cst {dimension_numbers = #tpu.dot_dimension_numbers<[1], [0], [0], [1], [0, 0, 1, 1], [], []>} : vector<16x256xbf16>, vector<256x256xbf16>, vector<16x256xf32> -> vector<16x256xf32>
    %7 = arith.addf %3, %6 : vector<16x256xf32>
    %c0_6 = arith.constant 0 : index
    %c0_7 = arith.constant 0 : index
    %8 = vector.load %arg9[%c0_6, %c0_7] : memref<16x256xf32, #tpu.memory_space<vmem>>, vector<16x256xf32>
    tpu.vector_store %arg9[%c0_6, %c0_7], %7 {strides = array<i32>} : memref<16x256xf32, #tpu.memory_space<vmem>>, vector<16x256xf32>,
    %c0_i32_8 = arith.constant 0 : i32
    %9 = arith.cmpi eq, %arg2, %c0_i32_8 : i32
    %10 = arith.extui %9 : i1 to i32
    %c0_i32_9 = arith.constant 0 : i32
    %11 = arith.cmpi ne, %10, %c0_i32_9 : i32
    scf.if %11 {
      %c0_10 = arith.constant 0 : index
      %c0_11 = arith.constant 0 : index
      %12 = vector.load %arg9[%c0_10, %c0_11] : memref<16x256xf32, #tpu.memory_space<vmem>>, vector<16x256xf32>
      %c0_12 = arith.constant 0 : index
      %c0_13 = arith.constant 0 : index
      %13 = vector.load %arg5[%c0_12, %c0_13] : memref<1x256xf32, #tpu.memory_space<vmem>>, vector<1x256xf32>
      %14 = vector.broadcast %13 : vector<1x256xf32> to vector<16x256xf32>
      %15 = arith.mulf %12, %14 : vector<16x256xf32>
      %c0_14 = arith.constant 0 : index
      %c0_15 = arith.constant 0 : index
      %16 = vector.load %arg6[%c0_14, %c0_15] : memref<1x256xf32, #tpu.memory_space<vmem>>, vector<1x256xf32>
      %17 = vector.broadcast %16 : vector<1x256xf32> to vector<16x256xf32>
      %18 = arith.addf %15, %17 : vector<16x256xf32>
      %c0_16 = arith.constant 0 : index
      %c0_17 = arith.constant 0 : index
      %19 = vector.load %arg7[%c0_16, %c0_17] : memref<16x256xf32, #tpu.memory_space<vmem>>, vector<16x256xf32>
      %20 = arith.addf %18, %19 : vector<16x256xf32>
      %cst_18 = arith.constant 0.000000e+00 : f32
      %21 = vector.broadcast %cst_18 : f32 to vector<16x256xf32>
      %22 = arith.maximumf %20, %21 : vector<16x256xf32>
      %c0_19 = arith.constant 0 : index
      %c0_20 = arith.constant 0 : index
      %23 = vector.load %arg8[%c0_19, %c0_20] : memref<16x256xf32, #tpu.memory_space<vmem>>, vector<16x256xf32>
      tpu.vector_store %arg8[%c0_19, %c0_20], %22 {strides = array<i32>} : memref<16x256xf32, #tpu.memory_space<vmem>>, vector<16x256xf32>,
    } else {
    }
    return
  }
  func.func @transform_0(%arg0: i32, %arg1: i32, %arg2: i32) -> (i32, i32) {
    %c0_i32 = arith.constant 0 : i32
    return %arg0, %arg2 : i32, i32
  }
  func.func @transform_1(%arg0: i32, %arg1: i32, %arg2: i32) -> (i32, i32) {
    %c0_i32 = arith.constant 0 : i32
    return %arg2, %arg1 : i32, i32
  }
  func.func @transform_2(%arg0: i32, %arg1: i32, %arg2: i32) -> (i32, i32) {
    %c0_i32 = arith.constant 0 : i32
    %c0_i32_0 = arith.constant 0 : i32
    return %c0_i32, %arg1 : i32, i32
  }
  func.func @transform_3(%arg0: i32, %arg1: i32, %arg2: i32) -> (i32, i32) {
    %c0_i32 = arith.constant 0 : i32
    %c0_i32_0 = arith.constant 0 : i32
    return %c0_i32, %arg1 : i32, i32
  }
  func.func @transform_4(%arg0: i32, %arg1: i32, %arg2: i32) -> (i32, i32) {
    %c0_i32 = arith.constant 0 : i32
    return %arg0, %arg1 : i32, i32
  }
  func.func @transform_5(%arg0: i32, %arg1: i32, %arg2: i32) -> (i32, i32) {
    %c0_i32 = arith.constant 0 : i32
    return %arg0, %arg1 : i32, i32
  }
}

module attributes {stable_mosaic.version = 11 : i64} {
  func.func @_mm_affine_kernel(%arg0: i32, %arg1: i32, %arg2: i32, %arg3: memref<16x256xbf16, #tpu.memory_space<vmem>>, %arg4: memref<256x128xbf16, #tpu.memory_space<vmem>>, %arg5: memref<1x128xf32, #tpu.memory_space<vmem>>, %arg6: memref<1x128xf32, #tpu.memory_space<vmem>>, %arg7: memref<16x128xf32, #tpu.memory_space<vmem>>, %arg8: memref<16x128xf32, #tpu.memory_space<vmem>>) attributes {dimension_semantics = [#tpu.dimension_semantics<parallel>, #tpu.dimension_semantics<parallel>, #tpu.dimension_semantics<arbitrary>], iteration_bounds = array<i64: 1, 1, 1>, scalar_prefetch = 0 : i64, scratch_operands = 1 : i64, tpu.core_type = #tpu.core_type<tc>, window_params = [{transform_indices = @transform_0, window_bounds = array<i64: 16, 256>}, {transform_indices = @transform_1, window_bounds = array<i64: 256, 128>}, {transform_indices = @transform_2, window_bounds = array<i64: 1, 128>}, {transform_indices = @transform_3, window_bounds = array<i64: 1, 128>}, {transform_indices = @transform_4, window_bounds = array<i64: 16, 128>}]} {
    %c0_i32 = arith.constant 0 : i32
    %0 = arith.cmpi eq, %arg2, %c0_i32 : i32
    %1 = arith.extui %0 : i1 to i32
    %c0_i32_0 = arith.constant 0 : i32
    %2 = arith.cmpi ne, %1, %c0_i32_0 : i32
    scf.if %2 {
      %cst_10 = arith.constant 0.000000e+00 : f32
      %12 = vector.broadcast %cst_10 : f32 to vector<16x128xf32>
      %c0_11 = arith.constant 0 : index
      %c0_12 = arith.constant 0 : index
      %13 = vector.load %arg8[%c0_11, %c0_12] : memref<16x128xf32, #tpu.memory_space<vmem>>, vector<16x128xf32>
      tpu.vector_store %arg8[%c0_11, %c0_12], %12 {strides = array<i32>} : memref<16x128xf32, #tpu.memory_space<vmem>>, vector<16x128xf32>,
    } else {
    }
    %c0 = arith.constant 0 : index
    %c0_1 = arith.constant 0 : index
    %3 = vector.load %arg8[%c0, %c0_1] : memref<16x128xf32, #tpu.memory_space<vmem>>, vector<16x128xf32>
    %c0_2 = arith.constant 0 : index
    %c0_3 = arith.constant 0 : index
    %4 = vector.load %arg3[%c0_2, %c0_3] : memref<16x256xbf16, #tpu.memory_space<vmem>>, vector<16x256xbf16>
    %c0_4 = arith.constant 0 : index
    %c0_5 = arith.constant 0 : index
    %5 = vector.load %arg4[%c0_4, %c0_5] : memref<256x128xbf16, #tpu.memory_space<vmem>>, vector<256x128xbf16>
    %cst = arith.constant dense<0.000000e+00> : vector<16x128xf32>
    %6 = tpu.matmul %4, %5, %cst {dimension_numbers = #tpu.dot_dimension_numbers<[1], [0], [0], [1], [0, 0, 1, 1], [], []>} : vector<16x256xbf16>, vector<256x128xbf16>, vector<16x128xf32> -> vector<16x128xf32>
    %7 = arith.addf %3, %6 : vector<16x128xf32>
    %c0_6 = arith.constant 0 : index
    %c0_7 = arith.constant 0 : index
    %8 = vector.load %arg8[%c0_6, %c0_7] : memref<16x128xf32, #tpu.memory_space<vmem>>, vector<16x128xf32>
    tpu.vector_store %arg8[%c0_6, %c0_7], %7 {strides = array<i32>} : memref<16x128xf32, #tpu.memory_space<vmem>>, vector<16x128xf32>,
    %c0_i32_8 = arith.constant 0 : i32
    %9 = arith.cmpi eq, %arg2, %c0_i32_8 : i32
    %10 = arith.extui %9 : i1 to i32
    %c0_i32_9 = arith.constant 0 : i32
    %11 = arith.cmpi ne, %10, %c0_i32_9 : i32
    scf.if %11 {
      %c0_10 = arith.constant 0 : index
      %c0_11 = arith.constant 0 : index
      %12 = vector.load %arg8[%c0_10, %c0_11] : memref<16x128xf32, #tpu.memory_space<vmem>>, vector<16x128xf32>
      %c0_12 = arith.constant 0 : index
      %c0_13 = arith.constant 0 : index
      %13 = vector.load %arg5[%c0_12, %c0_13] : memref<1x128xf32, #tpu.memory_space<vmem>>, vector<1x128xf32>
      %14 = vector.broadcast %13 : vector<1x128xf32> to vector<16x128xf32>
      %15 = arith.mulf %12, %14 : vector<16x128xf32>
      %c0_14 = arith.constant 0 : index
      %c0_15 = arith.constant 0 : index
      %16 = vector.load %arg6[%c0_14, %c0_15] : memref<1x128xf32, #tpu.memory_space<vmem>>, vector<1x128xf32>
      %17 = vector.broadcast %16 : vector<1x128xf32> to vector<16x128xf32>
      %18 = arith.addf %15, %17 : vector<16x128xf32>
      %cst_16 = arith.constant 0.000000e+00 : f32
      %19 = vector.broadcast %cst_16 : f32 to vector<16x128xf32>
      %20 = arith.maximumf %18, %19 : vector<16x128xf32>
      %c0_17 = arith.constant 0 : index
      %c0_18 = arith.constant 0 : index
      %21 = vector.load %arg7[%c0_17, %c0_18] : memref<16x128xf32, #tpu.memory_space<vmem>>, vector<16x128xf32>
      tpu.vector_store %arg7[%c0_17, %c0_18], %20 {strides = array<i32>} : memref<16x128xf32, #tpu.memory_space<vmem>>, vector<16x128xf32>,
    } else {
    }
    return
  }
  func.func @transform_0(%arg0: i32, %arg1: i32, %arg2: i32) -> (i32, i32) {
    %c0_i32 = arith.constant 0 : i32
    return %arg0, %arg2 : i32, i32
  }
  func.func @transform_1(%arg0: i32, %arg1: i32, %arg2: i32) -> (i32, i32) {
    %c0_i32 = arith.constant 0 : i32
    return %arg2, %arg1 : i32, i32
  }
  func.func @transform_2(%arg0: i32, %arg1: i32, %arg2: i32) -> (i32, i32) {
    %c0_i32 = arith.constant 0 : i32
    %c0_i32_0 = arith.constant 0 : i32
    return %c0_i32, %arg1 : i32, i32
  }
  func.func @transform_3(%arg0: i32, %arg1: i32, %arg2: i32) -> (i32, i32) {
    %c0_i32 = arith.constant 0 : i32
    %c0_i32_0 = arith.constant 0 : i32
    return %c0_i32, %arg1 : i32, i32
  }
  func.func @transform_4(%arg0: i32, %arg1: i32, %arg2: i32) -> (i32, i32) {
    %c0_i32 = arith.constant 0 : i32
    return %arg0, %arg1 : i32, i32
  }
}

module attributes {stable_mosaic.version = 11 : i64} {
  func.func @_mm_affine_kernel(%arg0: i32, %arg1: i32, %arg2: i32, %arg3: memref<16x384xbf16, #tpu.memory_space<vmem>>, %arg4: memref<384x128xbf16, #tpu.memory_space<vmem>>, %arg5: memref<1x128xf32, #tpu.memory_space<vmem>>, %arg6: memref<1x128xf32, #tpu.memory_space<vmem>>, %arg7: memref<16x128xf32, #tpu.memory_space<vmem>>, %arg8: memref<16x128xf32, #tpu.memory_space<vmem>>) attributes {dimension_semantics = [#tpu.dimension_semantics<parallel>, #tpu.dimension_semantics<parallel>, #tpu.dimension_semantics<arbitrary>], iteration_bounds = array<i64: 1, 1, 3>, scalar_prefetch = 0 : i64, scratch_operands = 1 : i64, tpu.core_type = #tpu.core_type<tc>, window_params = [{transform_indices = @transform_0, window_bounds = array<i64: 16, 384>}, {transform_indices = @transform_1, window_bounds = array<i64: 384, 128>}, {transform_indices = @transform_2, window_bounds = array<i64: 1, 128>}, {transform_indices = @transform_3, window_bounds = array<i64: 1, 128>}, {transform_indices = @transform_4, window_bounds = array<i64: 16, 128>}]} {
    %c0_i32 = arith.constant 0 : i32
    %0 = arith.cmpi eq, %arg2, %c0_i32 : i32
    %1 = arith.extui %0 : i1 to i32
    %c0_i32_0 = arith.constant 0 : i32
    %2 = arith.cmpi ne, %1, %c0_i32_0 : i32
    scf.if %2 {
      %cst_9 = arith.constant 0.000000e+00 : f32
      %12 = vector.broadcast %cst_9 : f32 to vector<16x128xf32>
      %c0_10 = arith.constant 0 : index
      %c0_11 = arith.constant 0 : index
      %13 = vector.load %arg8[%c0_10, %c0_11] : memref<16x128xf32, #tpu.memory_space<vmem>>, vector<16x128xf32>
      tpu.vector_store %arg8[%c0_10, %c0_11], %12 {strides = array<i32>} : memref<16x128xf32, #tpu.memory_space<vmem>>, vector<16x128xf32>,
    } else {
    }
    %c0 = arith.constant 0 : index
    %c0_1 = arith.constant 0 : index
    %3 = vector.load %arg8[%c0, %c0_1] : memref<16x128xf32, #tpu.memory_space<vmem>>, vector<16x128xf32>
    %c0_2 = arith.constant 0 : index
    %c0_3 = arith.constant 0 : index
    %4 = vector.load %arg3[%c0_2, %c0_3] : memref<16x384xbf16, #tpu.memory_space<vmem>>, vector<16x384xbf16>
    %c0_4 = arith.constant 0 : index
    %c0_5 = arith.constant 0 : index
    %5 = vector.load %arg4[%c0_4, %c0_5] : memref<384x128xbf16, #tpu.memory_space<vmem>>, vector<384x128xbf16>
    %cst = arith.constant dense<0.000000e+00> : vector<16x128xf32>
    %6 = tpu.matmul %4, %5, %cst {dimension_numbers = #tpu.dot_dimension_numbers<[1], [0], [0], [1], [0, 0, 1, 1], [], []>} : vector<16x384xbf16>, vector<384x128xbf16>, vector<16x128xf32> -> vector<16x128xf32>
    %7 = arith.addf %3, %6 : vector<16x128xf32>
    %c0_6 = arith.constant 0 : index
    %c0_7 = arith.constant 0 : index
    %8 = vector.load %arg8[%c0_6, %c0_7] : memref<16x128xf32, #tpu.memory_space<vmem>>, vector<16x128xf32>
    tpu.vector_store %arg8[%c0_6, %c0_7], %7 {strides = array<i32>} : memref<16x128xf32, #tpu.memory_space<vmem>>, vector<16x128xf32>,
    %c2_i32 = arith.constant 2 : i32
    %9 = arith.cmpi eq, %arg2, %c2_i32 : i32
    %10 = arith.extui %9 : i1 to i32
    %c0_i32_8 = arith.constant 0 : i32
    %11 = arith.cmpi ne, %10, %c0_i32_8 : i32
    scf.if %11 {
      %c0_9 = arith.constant 0 : index
      %c0_10 = arith.constant 0 : index
      %12 = vector.load %arg8[%c0_9, %c0_10] : memref<16x128xf32, #tpu.memory_space<vmem>>, vector<16x128xf32>
      %c0_11 = arith.constant 0 : index
      %c0_12 = arith.constant 0 : index
      %13 = vector.load %arg5[%c0_11, %c0_12] : memref<1x128xf32, #tpu.memory_space<vmem>>, vector<1x128xf32>
      %14 = vector.broadcast %13 : vector<1x128xf32> to vector<16x128xf32>
      %15 = arith.mulf %12, %14 : vector<16x128xf32>
      %c0_13 = arith.constant 0 : index
      %c0_14 = arith.constant 0 : index
      %16 = vector.load %arg6[%c0_13, %c0_14] : memref<1x128xf32, #tpu.memory_space<vmem>>, vector<1x128xf32>
      %17 = vector.broadcast %16 : vector<1x128xf32> to vector<16x128xf32>
      %18 = arith.addf %15, %17 : vector<16x128xf32>
      %cst_15 = arith.constant 0.000000e+00 : f32
      %19 = vector.broadcast %cst_15 : f32 to vector<16x128xf32>
      %20 = arith.maximumf %18, %19 : vector<16x128xf32>
      %c0_16 = arith.constant 0 : index
      %c0_17 = arith.constant 0 : index
      %21 = vector.load %arg7[%c0_16, %c0_17] : memref<16x128xf32, #tpu.memory_space<vmem>>, vector<16x128xf32>
      tpu.vector_store %arg7[%c0_16, %c0_17], %20 {strides = array<i32>} : memref<16x128xf32, #tpu.memory_space<vmem>>, vector<16x128xf32>,
    } else {
    }
    return
  }
  func.func @transform_0(%arg0: i32, %arg1: i32, %arg2: i32) -> (i32, i32) {
    %c0_i32 = arith.constant 0 : i32
    return %arg0, %arg2 : i32, i32
  }
  func.func @transform_1(%arg0: i32, %arg1: i32, %arg2: i32) -> (i32, i32) {
    %c0_i32 = arith.constant 0 : i32
    return %arg2, %arg1 : i32, i32
  }
  func.func @transform_2(%arg0: i32, %arg1: i32, %arg2: i32) -> (i32, i32) {
    %c0_i32 = arith.constant 0 : i32
    %c0_i32_0 = arith.constant 0 : i32
    return %c0_i32, %arg1 : i32, i32
  }
  func.func @transform_3(%arg0: i32, %arg1: i32, %arg2: i32) -> (i32, i32) {
    %c0_i32 = arith.constant 0 : i32
    %c0_i32_0 = arith.constant 0 : i32
    return %c0_i32, %arg1 : i32, i32
  }
  func.func @transform_4(%arg0: i32, %arg1: i32, %arg2: i32) -> (i32, i32) {
    %c0_i32 = arith.constant 0 : i32
    return %arg0, %arg1 : i32, i32
  }
}

module attributes {stable_mosaic.version = 11 : i64} {
  func.func @_mm_affine_kernel(%arg0: i32, %arg1: i32, %arg2: i32, %arg3: memref<16x256xbf16, #tpu.memory_space<vmem>>, %arg4: memref<256x256xbf16, #tpu.memory_space<vmem>>, %arg5: memref<1x256xf32, #tpu.memory_space<vmem>>, %arg6: memref<1x256xf32, #tpu.memory_space<vmem>>, %arg7: memref<16x256xf32, #tpu.memory_space<vmem>>, %arg8: memref<16x256xf32, #tpu.memory_space<vmem>>) attributes {dimension_semantics = [#tpu.dimension_semantics<parallel>, #tpu.dimension_semantics<parallel>, #tpu.dimension_semantics<arbitrary>], iteration_bounds = array<i64: 1, 2, 1>, scalar_prefetch = 0 : i64, scratch_operands = 1 : i64, tpu.core_type = #tpu.core_type<tc>, window_params = [{transform_indices = @transform_0, window_bounds = array<i64: 16, 256>}, {transform_indices = @transform_1, window_bounds = array<i64: 256, 256>}, {transform_indices = @transform_2, window_bounds = array<i64: 1, 256>}, {transform_indices = @transform_3, window_bounds = array<i64: 1, 256>}, {transform_indices = @transform_4, window_bounds = array<i64: 16, 256>}]} {
    %c0_i32 = arith.constant 0 : i32
    %0 = arith.cmpi eq, %arg2, %c0_i32 : i32
    %1 = arith.extui %0 : i1 to i32
    %c0_i32_0 = arith.constant 0 : i32
    %2 = arith.cmpi ne, %1, %c0_i32_0 : i32
    scf.if %2 {
      %cst_10 = arith.constant 0.000000e+00 : f32
      %12 = vector.broadcast %cst_10 : f32 to vector<16x256xf32>
      %c0_11 = arith.constant 0 : index
      %c0_12 = arith.constant 0 : index
      %13 = vector.load %arg8[%c0_11, %c0_12] : memref<16x256xf32, #tpu.memory_space<vmem>>, vector<16x256xf32>
      tpu.vector_store %arg8[%c0_11, %c0_12], %12 {strides = array<i32>} : memref<16x256xf32, #tpu.memory_space<vmem>>, vector<16x256xf32>,
    } else {
    }
    %c0 = arith.constant 0 : index
    %c0_1 = arith.constant 0 : index
    %3 = vector.load %arg8[%c0, %c0_1] : memref<16x256xf32, #tpu.memory_space<vmem>>, vector<16x256xf32>
    %c0_2 = arith.constant 0 : index
    %c0_3 = arith.constant 0 : index
    %4 = vector.load %arg3[%c0_2, %c0_3] : memref<16x256xbf16, #tpu.memory_space<vmem>>, vector<16x256xbf16>
    %c0_4 = arith.constant 0 : index
    %c0_5 = arith.constant 0 : index
    %5 = vector.load %arg4[%c0_4, %c0_5] : memref<256x256xbf16, #tpu.memory_space<vmem>>, vector<256x256xbf16>
    %cst = arith.constant dense<0.000000e+00> : vector<16x256xf32>
    %6 = tpu.matmul %4, %5, %cst {dimension_numbers = #tpu.dot_dimension_numbers<[1], [0], [0], [1], [0, 0, 1, 1], [], []>} : vector<16x256xbf16>, vector<256x256xbf16>, vector<16x256xf32> -> vector<16x256xf32>
    %7 = arith.addf %3, %6 : vector<16x256xf32>
    %c0_6 = arith.constant 0 : index
    %c0_7 = arith.constant 0 : index
    %8 = vector.load %arg8[%c0_6, %c0_7] : memref<16x256xf32, #tpu.memory_space<vmem>>, vector<16x256xf32>
    tpu.vector_store %arg8[%c0_6, %c0_7], %7 {strides = array<i32>} : memref<16x256xf32, #tpu.memory_space<vmem>>, vector<16x256xf32>,
    %c0_i32_8 = arith.constant 0 : i32
    %9 = arith.cmpi eq, %arg2, %c0_i32_8 : i32
    %10 = arith.extui %9 : i1 to i32
    %c0_i32_9 = arith.constant 0 : i32
    %11 = arith.cmpi ne, %10, %c0_i32_9 : i32
    scf.if %11 {
      %c0_10 = arith.constant 0 : index
      %c0_11 = arith.constant 0 : index
      %12 = vector.load %arg8[%c0_10, %c0_11] : memref<16x256xf32, #tpu.memory_space<vmem>>, vector<16x256xf32>
      %c0_12 = arith.constant 0 : index
      %c0_13 = arith.constant 0 : index
      %13 = vector.load %arg5[%c0_12, %c0_13] : memref<1x256xf32, #tpu.memory_space<vmem>>, vector<1x256xf32>
      %14 = vector.broadcast %13 : vector<1x256xf32> to vector<16x256xf32>
      %15 = arith.mulf %12, %14 : vector<16x256xf32>
      %c0_14 = arith.constant 0 : index
      %c0_15 = arith.constant 0 : index
      %16 = vector.load %arg6[%c0_14, %c0_15] : memref<1x256xf32, #tpu.memory_space<vmem>>, vector<1x256xf32>
      %17 = vector.broadcast %16 : vector<1x256xf32> to vector<16x256xf32>
      %18 = arith.addf %15, %17 : vector<16x256xf32>
      %c0_16 = arith.constant 0 : index
      %c0_17 = arith.constant 0 : index
      %19 = vector.load %arg7[%c0_16, %c0_17] : memref<16x256xf32, #tpu.memory_space<vmem>>, vector<16x256xf32>
      tpu.vector_store %arg7[%c0_16, %c0_17], %18 {strides = array<i32>} : memref<16x256xf32, #tpu.memory_space<vmem>>, vector<16x256xf32>,
    } else {
    }
    return
  }
  func.func @transform_0(%arg0: i32, %arg1: i32, %arg2: i32) -> (i32, i32) {
    %c0_i32 = arith.constant 0 : i32
    return %arg0, %arg2 : i32, i32
  }
  func.func @transform_1(%arg0: i32, %arg1: i32, %arg2: i32) -> (i32, i32) {
    %c0_i32 = arith.constant 0 : i32
    return %arg2, %arg1 : i32, i32
  }
  func.func @transform_2(%arg0: i32, %arg1: i32, %arg2: i32) -> (i32, i32) {
    %c0_i32 = arith.constant 0 : i32
    %c0_i32_0 = arith.constant 0 : i32
    return %c0_i32, %arg1 : i32, i32
  }
  func.func @transform_3(%arg0: i32, %arg1: i32, %arg2: i32) -> (i32, i32) {
    %c0_i32 = arith.constant 0 : i32
    %c0_i32_0 = arith.constant 0 : i32
    return %c0_i32, %arg1 : i32, i32
  }
  func.func @transform_4(%arg0: i32, %arg1: i32, %arg2: i32) -> (i32, i32) {
    %c0_i32 = arith.constant 0 : i32
    return %arg0, %arg1 : i32, i32
  }
}

module attributes {stable_mosaic.version = 11 : i64} {
  func.func @_mm_affine_kernel(%arg0: i32, %arg1: i32, %arg2: i32, %arg3: memref<16x128xbf16, #tpu.memory_space<vmem>>, %arg4: memref<128x256xbf16, #tpu.memory_space<vmem>>, %arg5: memref<1x256xf32, #tpu.memory_space<vmem>>, %arg6: memref<1x256xf32, #tpu.memory_space<vmem>>, %arg7: memref<16x256xf32, #tpu.memory_space<vmem>>, %arg8: memref<16x256xf32, #tpu.memory_space<vmem>>, %arg9: memref<16x256xf32, #tpu.memory_space<vmem>>) attributes {dimension_semantics = [#tpu.dimension_semantics<parallel>, #tpu.dimension_semantics<parallel>, #tpu.dimension_semantics<arbitrary>], iteration_bounds = array<i64: 1, 2, 1>, scalar_prefetch = 0 : i64, scratch_operands = 1 : i64, tpu.core_type = #tpu.core_type<tc>, window_params = [{transform_indices = @transform_0, window_bounds = array<i64: 16, 128>}, {transform_indices = @transform_1, window_bounds = array<i64: 128, 256>}, {transform_indices = @transform_2, window_bounds = array<i64: 1, 256>}, {transform_indices = @transform_3, window_bounds = array<i64: 1, 256>}, {transform_indices = @transform_4, window_bounds = array<i64: 16, 256>}, {transform_indices = @transform_5, window_bounds = array<i64: 16, 256>}]} {
    %c0_i32 = arith.constant 0 : i32
    %0 = arith.cmpi eq, %arg2, %c0_i32 : i32
    %1 = arith.extui %0 : i1 to i32
    %c0_i32_0 = arith.constant 0 : i32
    %2 = arith.cmpi ne, %1, %c0_i32_0 : i32
    scf.if %2 {
      %cst_10 = arith.constant 0.000000e+00 : f32
      %12 = vector.broadcast %cst_10 : f32 to vector<16x256xf32>
      %c0_11 = arith.constant 0 : index
      %c0_12 = arith.constant 0 : index
      %13 = vector.load %arg9[%c0_11, %c0_12] : memref<16x256xf32, #tpu.memory_space<vmem>>, vector<16x256xf32>
      tpu.vector_store %arg9[%c0_11, %c0_12], %12 {strides = array<i32>} : memref<16x256xf32, #tpu.memory_space<vmem>>, vector<16x256xf32>,
    } else {
    }
    %c0 = arith.constant 0 : index
    %c0_1 = arith.constant 0 : index
    %3 = vector.load %arg9[%c0, %c0_1] : memref<16x256xf32, #tpu.memory_space<vmem>>, vector<16x256xf32>
    %c0_2 = arith.constant 0 : index
    %c0_3 = arith.constant 0 : index
    %4 = vector.load %arg3[%c0_2, %c0_3] : memref<16x128xbf16, #tpu.memory_space<vmem>>, vector<16x128xbf16>
    %c0_4 = arith.constant 0 : index
    %c0_5 = arith.constant 0 : index
    %5 = vector.load %arg4[%c0_4, %c0_5] : memref<128x256xbf16, #tpu.memory_space<vmem>>, vector<128x256xbf16>
    %cst = arith.constant dense<0.000000e+00> : vector<16x256xf32>
    %6 = tpu.matmul %4, %5, %cst {dimension_numbers = #tpu.dot_dimension_numbers<[1], [0], [0], [1], [0, 0, 1, 1], [], []>} : vector<16x128xbf16>, vector<128x256xbf16>, vector<16x256xf32> -> vector<16x256xf32>
    %7 = arith.addf %3, %6 : vector<16x256xf32>
    %c0_6 = arith.constant 0 : index
    %c0_7 = arith.constant 0 : index
    %8 = vector.load %arg9[%c0_6, %c0_7] : memref<16x256xf32, #tpu.memory_space<vmem>>, vector<16x256xf32>
    tpu.vector_store %arg9[%c0_6, %c0_7], %7 {strides = array<i32>} : memref<16x256xf32, #tpu.memory_space<vmem>>, vector<16x256xf32>,
    %c0_i32_8 = arith.constant 0 : i32
    %9 = arith.cmpi eq, %arg2, %c0_i32_8 : i32
    %10 = arith.extui %9 : i1 to i32
    %c0_i32_9 = arith.constant 0 : i32
    %11 = arith.cmpi ne, %10, %c0_i32_9 : i32
    scf.if %11 {
      %c0_10 = arith.constant 0 : index
      %c0_11 = arith.constant 0 : index
      %12 = vector.load %arg9[%c0_10, %c0_11] : memref<16x256xf32, #tpu.memory_space<vmem>>, vector<16x256xf32>
      %c0_12 = arith.constant 0 : index
      %c0_13 = arith.constant 0 : index
      %13 = vector.load %arg5[%c0_12, %c0_13] : memref<1x256xf32, #tpu.memory_space<vmem>>, vector<1x256xf32>
      %14 = vector.broadcast %13 : vector<1x256xf32> to vector<16x256xf32>
      %15 = arith.mulf %12, %14 : vector<16x256xf32>
      %c0_14 = arith.constant 0 : index
      %c0_15 = arith.constant 0 : index
      %16 = vector.load %arg6[%c0_14, %c0_15] : memref<1x256xf32, #tpu.memory_space<vmem>>, vector<1x256xf32>
      %17 = vector.broadcast %16 : vector<1x256xf32> to vector<16x256xf32>
      %18 = arith.addf %15, %17 : vector<16x256xf32>
      %c0_16 = arith.constant 0 : index
      %c0_17 = arith.constant 0 : index
      %19 = vector.load %arg7[%c0_16, %c0_17] : memref<16x256xf32, #tpu.memory_space<vmem>>, vector<16x256xf32>
      %20 = arith.addf %18, %19 : vector<16x256xf32>
      %cst_18 = arith.constant 0.000000e+00 : f32
      %21 = vector.broadcast %cst_18 : f32 to vector<16x256xf32>
      %22 = arith.maximumf %20, %21 : vector<16x256xf32>
      %c0_19 = arith.constant 0 : index
      %c0_20 = arith.constant 0 : index
      %23 = vector.load %arg8[%c0_19, %c0_20] : memref<16x256xf32, #tpu.memory_space<vmem>>, vector<16x256xf32>
      tpu.vector_store %arg8[%c0_19, %c0_20], %22 {strides = array<i32>} : memref<16x256xf32, #tpu.memory_space<vmem>>, vector<16x256xf32>,
    } else {
    }
    return
  }
  func.func @transform_0(%arg0: i32, %arg1: i32, %arg2: i32) -> (i32, i32) {
    %c0_i32 = arith.constant 0 : i32
    return %arg0, %arg2 : i32, i32
  }
  func.func @transform_1(%arg0: i32, %arg1: i32, %arg2: i32) -> (i32, i32) {
    %c0_i32 = arith.constant 0 : i32
    return %arg2, %arg1 : i32, i32
  }
  func.func @transform_2(%arg0: i32, %arg1: i32, %arg2: i32) -> (i32, i32) {
    %c0_i32 = arith.constant 0 : i32
    %c0_i32_0 = arith.constant 0 : i32
    return %c0_i32, %arg1 : i32, i32
  }
  func.func @transform_3(%arg0: i32, %arg1: i32, %arg2: i32) -> (i32, i32) {
    %c0_i32 = arith.constant 0 : i32
    %c0_i32_0 = arith.constant 0 : i32
    return %c0_i32, %arg1 : i32, i32
  }
  func.func @transform_4(%arg0: i32, %arg1: i32, %arg2: i32) -> (i32, i32) {
    %c0_i32 = arith.constant 0 : i32
    return %arg0, %arg1 : i32, i32
  }
  func.func @transform_5(%arg0: i32, %arg1: i32, %arg2: i32) -> (i32, i32) {
    %c0_i32 = arith.constant 0 : i32
    return %arg0, %arg1 : i32, i32
  }
}

module attributes {stable_mosaic.version = 11 : i64} {
  func.func @_mm_affine_kernel(%arg0: i32, %arg1: i32, %arg2: i32, %arg3: memref<16x512xbf16, #tpu.memory_space<vmem>>, %arg4: memref<512x256xbf16, #tpu.memory_space<vmem>>, %arg5: memref<1x256xf32, #tpu.memory_space<vmem>>, %arg6: memref<1x256xf32, #tpu.memory_space<vmem>>, %arg7: memref<16x256xf32, #tpu.memory_space<vmem>>, %arg8: memref<16x256xf32, #tpu.memory_space<vmem>>) attributes {dimension_semantics = [#tpu.dimension_semantics<parallel>, #tpu.dimension_semantics<parallel>, #tpu.dimension_semantics<arbitrary>], iteration_bounds = array<i64: 1, 2, 1>, scalar_prefetch = 0 : i64, scratch_operands = 1 : i64, tpu.core_type = #tpu.core_type<tc>, window_params = [{transform_indices = @transform_0, window_bounds = array<i64: 16, 512>}, {transform_indices = @transform_1, window_bounds = array<i64: 512, 256>}, {transform_indices = @transform_2, window_bounds = array<i64: 1, 256>}, {transform_indices = @transform_3, window_bounds = array<i64: 1, 256>}, {transform_indices = @transform_4, window_bounds = array<i64: 16, 256>}]} {
    %c0_i32 = arith.constant 0 : i32
    %0 = arith.cmpi eq, %arg2, %c0_i32 : i32
    %1 = arith.extui %0 : i1 to i32
    %c0_i32_0 = arith.constant 0 : i32
    %2 = arith.cmpi ne, %1, %c0_i32_0 : i32
    scf.if %2 {
      %cst_10 = arith.constant 0.000000e+00 : f32
      %12 = vector.broadcast %cst_10 : f32 to vector<16x256xf32>
      %c0_11 = arith.constant 0 : index
      %c0_12 = arith.constant 0 : index
      %13 = vector.load %arg8[%c0_11, %c0_12] : memref<16x256xf32, #tpu.memory_space<vmem>>, vector<16x256xf32>
      tpu.vector_store %arg8[%c0_11, %c0_12], %12 {strides = array<i32>} : memref<16x256xf32, #tpu.memory_space<vmem>>, vector<16x256xf32>,
    } else {
    }
    %c0 = arith.constant 0 : index
    %c0_1 = arith.constant 0 : index
    %3 = vector.load %arg8[%c0, %c0_1] : memref<16x256xf32, #tpu.memory_space<vmem>>, vector<16x256xf32>
    %c0_2 = arith.constant 0 : index
    %c0_3 = arith.constant 0 : index
    %4 = vector.load %arg3[%c0_2, %c0_3] : memref<16x512xbf16, #tpu.memory_space<vmem>>, vector<16x512xbf16>
    %c0_4 = arith.constant 0 : index
    %c0_5 = arith.constant 0 : index
    %5 = vector.load %arg4[%c0_4, %c0_5] : memref<512x256xbf16, #tpu.memory_space<vmem>>, vector<512x256xbf16>
    %cst = arith.constant dense<0.000000e+00> : vector<16x256xf32>
    %6 = tpu.matmul %4, %5, %cst {dimension_numbers = #tpu.dot_dimension_numbers<[1], [0], [0], [1], [0, 0, 1, 1], [], []>} : vector<16x512xbf16>, vector<512x256xbf16>, vector<16x256xf32> -> vector<16x256xf32>
    %7 = arith.addf %3, %6 : vector<16x256xf32>
    %c0_6 = arith.constant 0 : index
    %c0_7 = arith.constant 0 : index
    %8 = vector.load %arg8[%c0_6, %c0_7] : memref<16x256xf32, #tpu.memory_space<vmem>>, vector<16x256xf32>
    tpu.vector_store %arg8[%c0_6, %c0_7], %7 {strides = array<i32>} : memref<16x256xf32, #tpu.memory_space<vmem>>, vector<16x256xf32>,
    %c0_i32_8 = arith.constant 0 : i32
    %9 = arith.cmpi eq, %arg2, %c0_i32_8 : i32
    %10 = arith.extui %9 : i1 to i32
    %c0_i32_9 = arith.constant 0 : i32
    %11 = arith.cmpi ne, %10, %c0_i32_9 : i32
    scf.if %11 {
      %c0_10 = arith.constant 0 : index
      %c0_11 = arith.constant 0 : index
      %12 = vector.load %arg8[%c0_10, %c0_11] : memref<16x256xf32, #tpu.memory_space<vmem>>, vector<16x256xf32>
      %c0_12 = arith.constant 0 : index
      %c0_13 = arith.constant 0 : index
      %13 = vector.load %arg5[%c0_12, %c0_13] : memref<1x256xf32, #tpu.memory_space<vmem>>, vector<1x256xf32>
      %14 = vector.broadcast %13 : vector<1x256xf32> to vector<16x256xf32>
      %15 = arith.mulf %12, %14 : vector<16x256xf32>
      %c0_14 = arith.constant 0 : index
      %c0_15 = arith.constant 0 : index
      %16 = vector.load %arg6[%c0_14, %c0_15] : memref<1x256xf32, #tpu.memory_space<vmem>>, vector<1x256xf32>
      %17 = vector.broadcast %16 : vector<1x256xf32> to vector<16x256xf32>
      %18 = arith.addf %15, %17 : vector<16x256xf32>
      %c0_16 = arith.constant 0 : index
      %c0_17 = arith.constant 0 : index
      %19 = vector.load %arg7[%c0_16, %c0_17] : memref<16x256xf32, #tpu.memory_space<vmem>>, vector<16x256xf32>
      tpu.vector_store %arg7[%c0_16, %c0_17], %18 {strides = array<i32>} : memref<16x256xf32, #tpu.memory_space<vmem>>, vector<16x256xf32>,
    } else {
    }
    return
  }
  func.func @transform_0(%arg0: i32, %arg1: i32, %arg2: i32) -> (i32, i32) {
    %c0_i32 = arith.constant 0 : i32
    return %arg0, %arg2 : i32, i32
  }
  func.func @transform_1(%arg0: i32, %arg1: i32, %arg2: i32) -> (i32, i32) {
    %c0_i32 = arith.constant 0 : i32
    return %arg2, %arg1 : i32, i32
  }
  func.func @transform_2(%arg0: i32, %arg1: i32, %arg2: i32) -> (i32, i32) {
    %c0_i32 = arith.constant 0 : i32
    %c0_i32_0 = arith.constant 0 : i32
    return %c0_i32, %arg1 : i32, i32
  }
  func.func @transform_3(%arg0: i32, %arg1: i32, %arg2: i32) -> (i32, i32) {
    %c0_i32 = arith.constant 0 : i32
    %c0_i32_0 = arith.constant 0 : i32
    return %c0_i32, %arg1 : i32, i32
  }
  func.func @transform_4(%arg0: i32, %arg1: i32, %arg2: i32) -> (i32, i32) {
    %c0_i32 = arith.constant 0 : i32
    return %arg0, %arg1 : i32, i32
  }
}

module attributes {stable_mosaic.version = 11 : i64} {
  func.func @_attn_pool_kernel(%arg0: i32, %arg1: memref<1x1x64xf32, #tpu.memory_space<vmem>>, %arg2: memref<1x5x64xf32, #tpu.memory_space<vmem>>, %arg3: memref<1x5x64xf32, #tpu.memory_space<vmem>>, %arg4: memref<1x1x64xf32, #tpu.memory_space<vmem>>) attributes {dimension_semantics = [#tpu.dimension_semantics<parallel>], iteration_bounds = array<i64: 16>, scalar_prefetch = 0 : i64, scratch_operands = 0 : i64, tpu.core_type = #tpu.core_type<tc>, window_params = [{transform_indices = @transform_0, window_bounds = array<i64: 1, 1, 64>}, {transform_indices = @transform_1, window_bounds = array<i64: 1, 5, 64>}, {transform_indices = @transform_2, window_bounds = array<i64: 1, 5, 64>}, {transform_indices = @transform_3, window_bounds = array<i64: 1, 1, 64>}]} {
    %c0 = arith.constant 0 : index
    %c0_0 = arith.constant 0 : index
    %c0_1 = arith.constant 0 : index
    %0 = vector.load %arg1[%c0, %c0_0, %c0_1] : memref<1x1x64xf32, #tpu.memory_space<vmem>>, vector<1x1x64xf32>
    %1 = vector.shape_cast %0 : vector<1x1x64xf32> to vector<1x64xf32>
    %cst = arith.constant 1.250000e-01 : f32
    %2 = vector.broadcast %cst : f32 to vector<1x64xf32>
    %3 = arith.mulf %1, %2 : vector<1x64xf32>
    %c0_2 = arith.constant 0 : index
    %c0_3 = arith.constant 0 : index
    %c0_4 = arith.constant 0 : index
    %4 = vector.load %arg2[%c0_2, %c0_3, %c0_4] : memref<1x5x64xf32, #tpu.memory_space<vmem>>, vector<1x5x64xf32>
    %5 = vector.shape_cast %4 : vector<1x5x64xf32> to vector<5x64xf32>
    %c0_5 = arith.constant 0 : index
    %c0_6 = arith.constant 0 : index
    %c0_7 = arith.constant 0 : index
    %6 = vector.load %arg3[%c0_5, %c0_6, %c0_7] : memref<1x5x64xf32, #tpu.memory_space<vmem>>, vector<1x5x64xf32>
    %7 = vector.shape_cast %6 : vector<1x5x64xf32> to vector<5x64xf32>
    %cst_8 = arith.constant dense<0.000000e+00> : vector<1x5xf32>
    %8 = tpu.matmul %3, %5, %cst_8 {dimension_numbers = #tpu.dot_dimension_numbers<[1], [1], [0], [0], [0, 0, 1, 0], [], []>} : vector<1x64xf32>, vector<5x64xf32>, vector<1x5xf32> -> vector<1x5xf32>
    %cst_9 = arith.constant dense<0xFF800000> : vector<1xf32>
    %9 = vector.multi_reduction <maximumf>, %8, %cst_9 [1] : vector<1x5xf32> to vector<1xf32>
    %10 = vector.shape_cast %9 : vector<1xf32> to vector<1x1xf32>
    %11 = vector.broadcast %10 : vector<1x1xf32> to vector<1x5xf32>
    %12 = arith.subf %8, %11 : vector<1x5xf32>
    %13 = math.exp %12 : vector<1x5xf32>
    %cst_10 = arith.constant dense<0.000000e+00> : vector<1xf32>
    %14 = vector.multi_reduction <add>, %13, %cst_10 [1] : vector<1x5xf32> to vector<1xf32>
    %15 = vector.shape_cast %14 : vector<1xf32> to vector<1x1xf32>
    %16 = tpu.reciprocal %15 {approx = true} : vector<1x1xf32> -> vector<1x1xf32>
    %17 = vector.broadcast %16 : vector<1x1xf32> to vector<1x5xf32>
    %18 = arith.mulf %13, %17 : vector<1x5xf32>
    %cst_11 = arith.constant dense<0.000000e+00> : vector<1x64xf32>
    %19 = tpu.matmul %18, %7, %cst_11 {dimension_numbers = #tpu.dot_dimension_numbers<[1], [0], [0], [1], [0, 0, 1, 1], [], []>} : vector<1x5xf32>, vector<5x64xf32>, vector<1x64xf32> -> vector<1x64xf32>
    %c0_12 = arith.constant 0 : index
    %c0_13 = arith.constant 0 : index
    %c0_14 = arith.constant 0 : index
    %20 = vector.load %arg4[%c0_12, %c0_13, %c0_14] : memref<1x1x64xf32, #tpu.memory_space<vmem>>, vector<1x1x64xf32>
    %21 = vector.shape_cast %20 : vector<1x1x64xf32> to vector<1x64xf32>
    %22 = vector.shape_cast %19 : vector<1x64xf32> to vector<1x1x64xf32>
    tpu.vector_store %arg4[%c0_12, %c0_13, %c0_14], %22 {strides = array<i32>} : memref<1x1x64xf32, #tpu.memory_space<vmem>>, vector<1x1x64xf32>,
    return
  }
  func.func @transform_0(%arg0: i32) -> (i32, i32, i32) {
    %c0_i32 = arith.constant 0 : i32
    %c0_i32_0 = arith.constant 0 : i32
    %c0_i32_1 = arith.constant 0 : i32
    return %arg0, %c0_i32, %c0_i32_0 : i32, i32, i32
  }
  func.func @transform_1(%arg0: i32) -> (i32, i32, i32) {
    %c0_i32 = arith.constant 0 : i32
    %c0_i32_0 = arith.constant 0 : i32
    %c0_i32_1 = arith.constant 0 : i32
    return %arg0, %c0_i32, %c0_i32_0 : i32, i32, i32
  }
  func.func @transform_2(%arg0: i32) -> (i32, i32, i32) {
    %c0_i32 = arith.constant 0 : i32
    %c0_i32_0 = arith.constant 0 : i32
    %c0_i32_1 = arith.constant 0 : i32
    return %arg0, %c0_i32, %c0_i32_0 : i32, i32, i32
  }
  func.func @transform_3(%arg0: i32) -> (i32, i32, i32) {
    %c0_i32 = arith.constant 0 : i32
    %c0_i32_0 = arith.constant 0 : i32
    %c0_i32_1 = arith.constant 0 : i32
    return %arg0, %c0_i32, %c0_i32_0 : i32, i32, i32
  }
}

module attributes {stable_mosaic.version = 11 : i64} {
  func.func @_mm_affine_kernel(%arg0: i32, %arg1: i32, %arg2: i32, %arg3: memref<16x512xbf16, #tpu.memory_space<vmem>>, %arg4: memref<512x128xbf16, #tpu.memory_space<vmem>>, %arg5: memref<1x128xf32, #tpu.memory_space<vmem>>, %arg6: memref<1x128xf32, #tpu.memory_space<vmem>>, %arg7: memref<16x128xf32, #tpu.memory_space<vmem>>, %arg8: memref<16x128xf32, #tpu.memory_space<vmem>>) attributes {dimension_semantics = [#tpu.dimension_semantics<parallel>, #tpu.dimension_semantics<parallel>, #tpu.dimension_semantics<arbitrary>], iteration_bounds = array<i64: 1, 1, 1>, scalar_prefetch = 0 : i64, scratch_operands = 1 : i64, tpu.core_type = #tpu.core_type<tc>, window_params = [{transform_indices = @transform_0, window_bounds = array<i64: 16, 512>}, {transform_indices = @transform_1, window_bounds = array<i64: 512, 128>}, {transform_indices = @transform_2, window_bounds = array<i64: 1, 128>}, {transform_indices = @transform_3, window_bounds = array<i64: 1, 128>}, {transform_indices = @transform_4, window_bounds = array<i64: 16, 128>}]} {
    %c0_i32 = arith.constant 0 : i32
    %0 = arith.cmpi eq, %arg2, %c0_i32 : i32
    %1 = arith.extui %0 : i1 to i32
    %c0_i32_0 = arith.constant 0 : i32
    %2 = arith.cmpi ne, %1, %c0_i32_0 : i32
    scf.if %2 {
      %cst_10 = arith.constant 0.000000e+00 : f32
      %12 = vector.broadcast %cst_10 : f32 to vector<16x128xf32>
      %c0_11 = arith.constant 0 : index
      %c0_12 = arith.constant 0 : index
      %13 = vector.load %arg8[%c0_11, %c0_12] : memref<16x128xf32, #tpu.memory_space<vmem>>, vector<16x128xf32>
      tpu.vector_store %arg8[%c0_11, %c0_12], %12 {strides = array<i32>} : memref<16x128xf32, #tpu.memory_space<vmem>>, vector<16x128xf32>,
    } else {
    }
    %c0 = arith.constant 0 : index
    %c0_1 = arith.constant 0 : index
    %3 = vector.load %arg8[%c0, %c0_1] : memref<16x128xf32, #tpu.memory_space<vmem>>, vector<16x128xf32>
    %c0_2 = arith.constant 0 : index
    %c0_3 = arith.constant 0 : index
    %4 = vector.load %arg3[%c0_2, %c0_3] : memref<16x512xbf16, #tpu.memory_space<vmem>>, vector<16x512xbf16>
    %c0_4 = arith.constant 0 : index
    %c0_5 = arith.constant 0 : index
    %5 = vector.load %arg4[%c0_4, %c0_5] : memref<512x128xbf16, #tpu.memory_space<vmem>>, vector<512x128xbf16>
    %cst = arith.constant dense<0.000000e+00> : vector<16x128xf32>
    %6 = tpu.matmul %4, %5, %cst {dimension_numbers = #tpu.dot_dimension_numbers<[1], [0], [0], [1], [0, 0, 1, 1], [], []>} : vector<16x512xbf16>, vector<512x128xbf16>, vector<16x128xf32> -> vector<16x128xf32>
    %7 = arith.addf %3, %6 : vector<16x128xf32>
    %c0_6 = arith.constant 0 : index
    %c0_7 = arith.constant 0 : index
    %8 = vector.load %arg8[%c0_6, %c0_7] : memref<16x128xf32, #tpu.memory_space<vmem>>, vector<16x128xf32>
    tpu.vector_store %arg8[%c0_6, %c0_7], %7 {strides = array<i32>} : memref<16x128xf32, #tpu.memory_space<vmem>>, vector<16x128xf32>,
    %c0_i32_8 = arith.constant 0 : i32
    %9 = arith.cmpi eq, %arg2, %c0_i32_8 : i32
    %10 = arith.extui %9 : i1 to i32
    %c0_i32_9 = arith.constant 0 : i32
    %11 = arith.cmpi ne, %10, %c0_i32_9 : i32
    scf.if %11 {
      %c0_10 = arith.constant 0 : index
      %c0_11 = arith.constant 0 : index
      %12 = vector.load %arg8[%c0_10, %c0_11] : memref<16x128xf32, #tpu.memory_space<vmem>>, vector<16x128xf32>
      %c0_12 = arith.constant 0 : index
      %c0_13 = arith.constant 0 : index
      %13 = vector.load %arg5[%c0_12, %c0_13] : memref<1x128xf32, #tpu.memory_space<vmem>>, vector<1x128xf32>
      %14 = vector.broadcast %13 : vector<1x128xf32> to vector<16x128xf32>
      %15 = arith.mulf %12, %14 : vector<16x128xf32>
      %c0_14 = arith.constant 0 : index
      %c0_15 = arith.constant 0 : index
      %16 = vector.load %arg6[%c0_14, %c0_15] : memref<1x128xf32, #tpu.memory_space<vmem>>, vector<1x128xf32>
      %17 = vector.broadcast %16 : vector<1x128xf32> to vector<16x128xf32>
      %18 = arith.addf %15, %17 : vector<16x128xf32>
      %c0_16 = arith.constant 0 : index
      %c0_17 = arith.constant 0 : index
      %19 = vector.load %arg7[%c0_16, %c0_17] : memref<16x128xf32, #tpu.memory_space<vmem>>, vector<16x128xf32>
      tpu.vector_store %arg7[%c0_16, %c0_17], %18 {strides = array<i32>} : memref<16x128xf32, #tpu.memory_space<vmem>>, vector<16x128xf32>,
    } else {
    }
    return
  }
  func.func @transform_0(%arg0: i32, %arg1: i32, %arg2: i32) -> (i32, i32) {
    %c0_i32 = arith.constant 0 : i32
    return %arg0, %arg2 : i32, i32
  }
  func.func @transform_1(%arg0: i32, %arg1: i32, %arg2: i32) -> (i32, i32) {
    %c0_i32 = arith.constant 0 : i32
    return %arg2, %arg1 : i32, i32
  }
  func.func @transform_2(%arg0: i32, %arg1: i32, %arg2: i32) -> (i32, i32) {
    %c0_i32 = arith.constant 0 : i32
    %c0_i32_0 = arith.constant 0 : i32
    return %c0_i32, %arg1 : i32, i32
  }
  func.func @transform_3(%arg0: i32, %arg1: i32, %arg2: i32) -> (i32, i32) {
    %c0_i32 = arith.constant 0 : i32
    %c0_i32_0 = arith.constant 0 : i32
    return %c0_i32, %arg1 : i32, i32
  }
  func.func @transform_4(%arg0: i32, %arg1: i32, %arg2: i32) -> (i32, i32) {
    %c0_i32 = arith.constant 0 : i32
    return %arg0, %arg1 : i32, i32
  }
}

</mosaic_0001>

<bundles_post_ra>
// kernel: modified_resnet_forward.27
= control target key start
LH: loop header
LB: loop body
LE: loop exit
PB: predicated region body
PF: predicated region fallthrough
CT: control target
= control target key end

     0   :  { %s952_s15 = smov 0   ;;  %s954_s16 = smov 0   ;;  %s1076_s0 = inlined_call_operand.vmem [shape: bf16[512,128], index: 0, kind: input, shape index: {}]   ;;  %s1077_s1 = inlined_call_operand.vmem [shape: bf16[128,128], index: 1, kind: input, shape index: {}]   ;;  %s1078_s2 = inlined_call_operand.vmem [shape: f32[1,128], index: 2, kind: input, shape index: {}]   ;;  %s1079_s3 = inlined_call_operand.vmem [shape: f32[1,128], index: 3, kind: input, shape index: {}]   ;;  %s1080_s4 = inlined_call_operand.vmem [shape: f32[512,128], index: 4, kind: output, shape index: {}]  }
   0x1   :  { %s956_s17 = smov 0  }
   0x2 LB: > { %s33_s18 = sadd.s32 1, %s921_s16  ;;  %p766_p0 = scmp.ge.s32.totalorder %s925_s17, 1  ;;  %s925_s17 = sphi %s956_s17, %s14_s17   ;;  %s921_s16 = sphi %s954_s16, %s1082_s16   ;;  %s917_s15 = sphi %s952_s15, %s1081_s15  }
   0x3   : > { %p35_p1 = scmp.ge.s32.totalorder %s33_s18, 4  ;;  %p221_p2 = scmp.lt.s32.totalorder %s925_s17, 5 }
   0x5   : > { %s1084_s18 = smov (%p35_p1, %s33_s18), 0  ;;  %p222_p3 = pnand %p766_p0, %p221_p2 }
   0x6   : > { %s767_s27 = sshll.u32 (!%p222_p3), %s917_s15, 4 }
   0x7   : > { %225 = sbr.rel (%p222_p3) target bundleno = 209 (0xd1), region = 36  ;;  %p268_p4 = scmp.lt.s32.totalorder (!%p222_p3), %s767_s27, 63 }
   0xc   : > { %v852_v0 = vld [vmem:[%s1077_s1 + $0x38] sm:$0xff]  ;;  %v851_v1 = vld [vmem:[%s1077_s1 + $0x30] sm:$0xff]  ;;  %v850_v2 = vld [vmem:[%s1077_s1 + $0x28] sm:$0xff]  ;;  %s1086_s27 = smov (!%p268_p4, %s767_s27), 63 }
   0xd   : > { %464 = vmatpush.bf16.msra.mxu0 %v852_v0  ;;  %853 = vmatpush.bf16.msra.mxu1 %v852_v0  ;;  %v849_v3 = vld [vmem:[%s1077_s1 + $0x20] sm:$0xff]  ;;  %v848_v4 = vld [vmem:[%s1077_s1 + $0x18] sm:$0xff]  ;;  %v847_v5 = vld [vmem:[%s1077_s1 + $0x10] sm:$0xff]  ;;  %s768_s8 = sshll.u32 %s1086_s27, 2  ;;  %s770_s21 = sshll.u32 %s1086_s27, 3 }
   0xe   : > { %854 = vmatpush.bf16.msra.mxu2 %v852_v0  ;;  %855 = vmatpush.bf16.msra.mxu3 %v852_v0  ;;  %v846_v6 = vld [vmem:[%s1077_s1 + $0x8] sm:$0xff]  ;;  %v845_v7 = vld [vmem:[%s1077_s1] sm:$0xff]  ;;  %s274_s13 = scalar_lea.vmem %s1076_s0, %s768_s8  ;;  %s1021_s24 = scalar_lea.vmem %s1080_s4, %s770_s21 }
   0xf   : > { %v837_v8 = vld [vmem:[%s274_s13] sm:$0xff]  ;;  %v839_v9 = vld [vmem:[%s274_s13 + $0x10] sm:$0xff]  ;;  %v838_v12 = vld [vmem:[%s274_s13 + $0x8] sm:$0xff] }
  0x10   : > { %v841_v10 = vld [vmem:[%s274_s13 + $0x20] sm:$0xff]  ;;  %v843_v11 = vld [vmem:[%s274_s13 + $0x30] sm:$0xff]  ;;  %v840_v13 = vld [vmem:[%s274_s13 + $0x18] sm:$0xff] }
  0x11   : > { %465 = vmatpush.bf16.msra.mxu0 %v851_v1  ;;  %856 = vmatpush.bf16.msra.mxu1 %v851_v1  ;;  %v842_v14 = vld [vmem:[%s274_s13 + $0x28] sm:$0xff]  ;;  %v844_v15 = vld [vmem:[%s274_s13 + $0x38] sm:$0xff]  ;;  %v1006_v16 = vld [vmem:[%s1078_s2] ss:$0 sm:$0xff] }
  0x12   : > { %857 = vmatpush.bf16.msra.mxu2 %v851_v1  ;;  %858 = vmatpush.bf16.msra.mxu3 %v851_v1  ;;  %v1011_v17 = vld [vmem:[%s1079_s3] ss:$0 sm:$0xff] }
  0x15   : > { %466 = vmatpush.bf16.msra.mxu0 %v850_v2  ;;  %859 = vmatpush.bf16.msra.mxu1 %v850_v2 }
  0x16   : > { %860 = vmatpush.bf16.msra.mxu2 %v850_v2  ;;  %861 = vmatpush.bf16.msra.mxu3 %v850_v2 }
  0x19   : > { %467 = vmatpush.bf16.msra.mxu0 %v849_v3  ;;  %862 = vmatpush.bf16.msra.mxu1 %v849_v3 }
  0x1a   : > { %863 = vmatpush.bf16.msra.mxu2 %v849_v3  ;;  %864 = vmatpush.bf16.msra.mxu3 %v849_v3 }
  0x1d   : > { %468 = vmatpush.bf16.msra.mxu0 %v848_v4  ;;  %865 = vmatpush.bf16.msra.mxu1 %v848_v4 }
  0x1e   : > { %866 = vmatpush.bf16.msra.mxu2 %v848_v4  ;;  %867 = vmatpush.bf16.msra.mxu3 %v848_v4 }
  0x21   : > { %469 = vmatpush.bf16.msra.mxu0 %v847_v5  ;;  %868 = vmatpush.bf16.msra.mxu1 %v847_v5 }
  0x22   : > { %869 = vmatpush.bf16.msra.mxu2 %v847_v5  ;;  %870 = vmatpush.bf16.msra.mxu3 %v847_v5 }
  0x25   : > { %470 = vmatpush.bf16.msra.mxu0 %v846_v6  ;;  %871 = vmatpush.bf16.msra.mxu1 %v846_v6 }
  0x26   : > { %872 = vmatpush.bf16.msra.mxu2 %v846_v6  ;;  %873 = vmatpush.bf16.msra.mxu3 %v846_v6 }
  0x29   : > { %471 = vmatpush.bf16.msra.mxu0 %v845_v7  ;;  %874 = vmatpush.bf16.msra.mxu1 %v845_v7 }
  0x2a   : > { %875 = vmatpush.bf16.msra.mxu2 %v845_v7  ;;  %876 = vmatpush.bf16.msra.mxu3 %v845_v7 }
  0x2c   : > { %472 = vmatmul.bf16.vlgmr.msra.gmra.mxu0 %v837_v8  ;;  %482 = vmatmul.bf16.vlgmr.msra.gmra.mxu1 %v839_v9 }
  0x2d   : > { %492 = vmatmul.bf16.vlgmr.msra.gmra.mxu2 %v841_v10  ;;  %502 = vmatmul.bf16.vlgmr.msra.gmra.mxu3 %v843_v11 }
  0x3c   : > { %477 = vmatmul.bf16.gmra.mxu0 %v838_v12  ;;  %487 = vmatmul.bf16.gmra.mxu1 %v840_v13 }
  0x3d   : > { %497 = vmatmul.bf16.gmra.mxu2 %v842_v14  ;;  %507 = vmatmul.bf16.gmra.mxu3 %v844_v15 }
  0xa9   : > { %v473_v18 = vpop.f32.mrf.mxu0  ;;  %v483_v19 = vpop.f32.mrf.mxu1 }
  0xaa   : > { %v568_v20 = vmul.f32 %v1006_v16, %v473_v18  ;;  %v572_v21 = vmul.f32 %v1006_v16, %v483_v19 }
  0xac   : > { %v588_v22 = vadd.f32 %v1011_v17, %v568_v20  ;;  %v592_v23 = vadd.f32 %v1011_v17, %v572_v21 }
  0xae   : > { %v604_v24 = vmax.f32 %v588_v22, 0.0  ;;  %v608_v25 = vmax.f32 %v592_v23, 0.0 }
  0xb0   : > { %620 = vst [vmem:[%s1021_s24] sm:$0xff] %v604_v24  ;;  %v493_v26 = vpop.f32.mrf.mxu2  ;;  %v503_v27 = vpop.f32.mrf.mxu3 }
  0xb1   : > { %624 = vst [vmem:[%s1021_s24 + $0x20] sm:$0xff] %v608_v25  ;;  %v576_v28 = vmul.f32 %v1006_v16, %v493_v26  ;;  %v580_v29 = vmul.f32 %v1006_v16, %v503_v27  ;;  %v475_v30 = vpop.f32.mrf.mxu0  ;;  %v485_v31 = vpop.f32.mrf.mxu1 }
  0xb2   : > { %v569_v32 = vmul.f32 %v1006_v16, %v475_v30  ;;  %v573_v33 = vmul.f32 %v1006_v16, %v485_v31 }
  0xb3   : > { %v596_v34 = vadd.f32 %v1011_v17, %v576_v28  ;;  %v600_v35 = vadd.f32 %v1011_v17, %v580_v29 }
  0xb4   : > { %v589_v36 = vadd.f32 %v1011_v17, %v569_v32  ;;  %v593_v37 = vadd.f32 %v1011_v17, %v573_v33 }
  0xb5   : > { %v612_v38 = vmax.f32 %v596_v34, 0.0  ;;  %v616_v39 = vmax.f32 %v600_v35, 0.0 }
  0xb6   : > { %v605_v40 = vmax.f32 %v589_v36, 0.0  ;;  %v609_v41 = vmax.f32 %v593_v37, 0.0 }
  0xb7   : > { %628 = vst [vmem:[%s1021_s24 + $0x40] sm:$0xff] %v612_v38 }
  0xb8   : > { %632 = vst [vmem:[%s1021_s24 + $0x60] sm:$0xff] %v616_v39  ;;  %v495_v42 = vpop.f32.mrf.mxu2  ;;  %v505_v43 = vpop.f32.mrf.mxu3 }
  0xb9   : > { %621 = vst [vmem:[%s1021_s24 + $0x8] sm:$0xff] %v605_v40  ;;  %v577_v44 = vmul.f32 %v1006_v16, %v495_v42  ;;  %v581_v45 = vmul.f32 %v1006_v16, %v505_v43  ;;  %v478_v46 = vpop.f32.mrf.mxu0  ;;  %v488_v47 = vpop.f32.mrf.mxu1 }
  0xba   : > { %625 = vst [vmem:[%s1021_s24 + $0x28] sm:$0xff] %v609_v41  ;;  %v570_v48 = vmul.f32 %v1006_v16, %v478_v46  ;;  %v574_v49 = vmul.f32 %v1006_v16, %v488_v47 }
  0xbb   : > { %v597_v50 = vadd.f32 %v1011_v17, %v577_v44  ;;  %v601_v51 = vadd.f32 %v1011_v17, %v581_v45 }
  0xbc   : > { %v590_v52 = vadd.f32 %v1011_v17, %v570_v48  ;;  %v594_v53 = vadd.f32 %v1011_v17, %v574_v49 }
  0xbd   : > { %v613_v54 = vmax.f32 %v597_v50, 0.0  ;;  %v617_v55 = vmax.f32 %v601_v51, 0.0 }
  0xbe   : > { %v606_v56 = vmax.f32 %v590_v52, 0.0  ;;  %v610_v57 = vmax.f32 %v594_v53, 0.0 }
  0xbf   : > { %629 = vst [vmem:[%s1021_s24 + $0x48] sm:$0xff] %v613_v54 }
  0xc0   : > { %633 = vst [vmem:[%s1021_s24 + $0x68] sm:$0xff] %v617_v55  ;;  %v498_v58 = vpop.f32.mrf.mxu2  ;;  %v508_v59 = vpop.f32.mrf.mxu3 }
  0xc1   : > { %622 = vst [vmem:[%s1021_s24 + $0x10] sm:$0xff] %v606_v56  ;;  %v578_v60 = vmul.f32 %v1006_v16, %v498_v58  ;;  %v582_v61 = vmul.f32 %v1006_v16, %v508_v59  ;;  %v480_v62 = vpop.f32.mrf.mxu0  ;;  %v490_v63 = vpop.f32.mrf.mxu1 }
  0xc2   : > { %626 = vst [vmem:[%s1021_s24 + $0x30] sm:$0xff] %v610_v57  ;;  %v571_v0 = vmul.f32 %v1006_v16, %v480_v62  ;;  %v575_v1 = vmul.f32 %v1006_v16, %v490_v63 }
  0xc3   : > { %v598_v2 = vadd.f32 %v1011_v17, %v578_v60  ;;  %v602_v3 = vadd.f32 %v1011_v17, %v582_v61 }
  0xc4   : > { %v591_v4 = vadd.f32 %v1011_v17, %v571_v0  ;;  %v595_v5 = vadd.f32 %v1011_v17, %v575_v1 }
  0xc5   : > { %v614_v6 = vmax.f32 %v598_v2, 0.0  ;;  %v618_v7 = vmax.f32 %v602_v3, 0.0 }
  0xc6   : > { %v607_v8 = vmax.f32 %v591_v4, 0.0  ;;  %v611_v9 = vmax.f32 %v595_v5, 0.0 }
  0xc7   : > { %630 = vst [vmem:[%s1021_s24 + $0x50] sm:$0xff] %v614_v6 }
  0xc8   : > { %634 = vst [vmem:[%s1021_s24 + $0x70] sm:$0xff] %v618_v7  ;;  %v500_v10 = vpop.f32.mrf.mxu2  ;;  %v510_v11 = vpop.f32.mrf.mxu3 }
  0xc9   : > { %623 = vst [vmem:[%s1021_s24 + $0x18] sm:$0xff] %v607_v8  ;;  %v579_v12 = vmul.f32 %v1006_v16, %v500_v10  ;;  %v583_v13 = vmul.f32 %v1006_v16, %v510_v11 }
  0xca   : > { %627 = vst [vmem:[%s1021_s24 + $0x38] sm:$0xff] %v611_v9 }
  0xcb   : > { %v599_v14 = vadd.f32 %v1011_v17, %v579_v12  ;;  %v603_v15 = vadd.f32 %v1011_v17, %v583_v13 }
  0xcd   : > { %v615_v18 = vmax.f32 %v599_v14, 0.0  ;;  %v619_v19 = vmax.f32 %v603_v15, 0.0 }
  0xcf   : > { %631 = vst [vmem:[%s1021_s24 + $0x58] sm:$0xff] %v615_v18 }
  0xd0   : > { %635 = vst [vmem:[%s1021_s24 + $0x78] sm:$0xff] %v619_v19 }
  0xd1 PF: > { %s14_s17 = sadd.s32 1, %s925_s17   ;;  %s1081_s15 = smov %s921_s16 }
  0xd2   : > { %p11_p5 = scmp.ge.s32.totalorder %s14_s17, 6   ;;  %s1082_s16 = smov %s1084_s18 }
  0xd4   :  { %13 = sbr.rel (!%p11_p5) target bundleno = 2 (0x2), region = 83 }

// kernel: modified_resnet_forward.30
= control target key start
LH: loop header
LB: loop body
LE: loop exit
PB: predicated region body
PF: predicated region fallthrough
CT: control target
= control target key end

     0   :  { %s626_s1 = inlined_call_operand.vmem [shape: bf16[128,128], index: 1, kind: input, shape index: {}]   ;;  %s627_s2 = inlined_call_operand.vmem [shape: f32[1,128], index: 2, kind: input, shape index: {}]   ;;  %s628_s3 = inlined_call_operand.vmem [shape: f32[1,128], index: 3, kind: input, shape index: {}]   ;;  %s629_s0 = inlined_call_operand.vmem [shape: bf16[128,128], index: 0, kind: input, shape index: {}]   ;;  %s630_s4 = inlined_call_operand.vmem [shape: f32[128,128], index: 4, kind: output, shape index: {}]  }
   0x1   :  { %v436_v0 = vld [vmem:[%s626_s1 + $0x38] sm:$0xff]  ;;  %v435_v1 = vld [vmem:[%s626_s1 + $0x30] sm:$0xff]  ;;  %v434_v2 = vld [vmem:[%s626_s1 + $0x28] sm:$0xff] }
   0x2   :  { %181 = vmatpush.bf16.msra.mxu0 %v436_v0  ;;  %437 = vmatpush.bf16.msra.mxu1 %v436_v0  ;;  %v433_v3 = vld [vmem:[%s626_s1 + $0x20] sm:$0xff]  ;;  %v432_v4 = vld [vmem:[%s626_s1 + $0x18] sm:$0xff]  ;;  %v431_v5 = vld [vmem:[%s626_s1 + $0x10] sm:$0xff] }
   0x3   :  { %438 = vmatpush.bf16.msra.mxu2 %v436_v0  ;;  %439 = vmatpush.bf16.msra.mxu3 %v436_v0  ;;  %v430_v6 = vld [vmem:[%s626_s1 + $0x8] sm:$0xff]  ;;  %v429_v7 = vld [vmem:[%s626_s1] sm:$0xff]  ;;  %v423_v9 = vld [vmem:[%s629_s0 + $0x10] sm:$0xff] }
   0x4   :  { %v421_v8 = vld [vmem:[%s629_s0] sm:$0xff]  ;;  %v427_v11 = vld [vmem:[%s629_s0 + $0x30] sm:$0xff]  ;;  %v422_v12 = vld [vmem:[%s629_s0 + $0x8] sm:$0xff] }
   0x5   :  { %v425_v10 = vld [vmem:[%s629_s0 + $0x20] sm:$0xff]  ;;  %v424_v13 = vld [vmem:[%s629_s0 + $0x18] sm:$0xff]  ;;  %v426_v14 = vld [vmem:[%s629_s0 + $0x28] sm:$0xff] }
   0x6   :  { %182 = vmatpush.bf16.msra.mxu0 %v435_v1  ;;  %440 = vmatpush.bf16.msra.mxu1 %v435_v1  ;;  %v428_v15 = vld [vmem:[%s629_s0 + $0x38] sm:$0xff]  ;;  %v539_v16 = vld [vmem:[%s627_s2] ss:$0 sm:$0xff] }
   0x7   :  { %441 = vmatpush.bf16.msra.mxu2 %v435_v1  ;;  %442 = vmatpush.bf16.msra.mxu3 %v435_v1  ;;  %v544_v17 = vld [vmem:[%s628_s3] ss:$0 sm:$0xff] }
   0xa   :  { %183 = vmatpush.bf16.msra.mxu0 %v434_v2  ;;  %443 = vmatpush.bf16.msra.mxu1 %v434_v2 }
   0xb   :  { %444 = vmatpush.bf16.msra.mxu2 %v434_v2  ;;  %445 = vmatpush.bf16.msra.mxu3 %v434_v2 }
   0xe   :  { %184 = vmatpush.bf16.msra.mxu0 %v433_v3  ;;  %446 = vmatpush.bf16.msra.mxu1 %v433_v3 }
   0xf   :  { %447 = vmatpush.bf16.msra.mxu2 %v433_v3  ;;  %448 = vmatpush.bf16.msra.mxu3 %v433_v3 }
  0x12   :  { %185 = vmatpush.bf16.msra.mxu0 %v432_v4  ;;  %449 = vmatpush.bf16.msra.mxu1 %v432_v4 }
  0x13   :  { %450 = vmatpush.bf16.msra.mxu2 %v432_v4  ;;  %451 = vmatpush.bf16.msra.mxu3 %v432_v4 }
  0x16   :  { %186 = vmatpush.bf16.msra.mxu0 %v431_v5  ;;  %452 = vmatpush.bf16.msra.mxu1 %v431_v5 }
  0x17   :  { %453 = vmatpush.bf16.msra.mxu2 %v431_v5  ;;  %454 = vmatpush.bf16.msra.mxu3 %v431_v5 }
  0x1a   :  { %187 = vmatpush.bf16.msra.mxu0 %v430_v6  ;;  %455 = vmatpush.bf16.msra.mxu1 %v430_v6 }
  0x1b   :  { %456 = vmatpush.bf16.msra.mxu2 %v430_v6  ;;  %457 = vmatpush.bf16.msra.mxu3 %v430_v6 }
  0x1e   :  { %188 = vmatpush.bf16.msra.mxu0 %v429_v7  ;;  %458 = vmatpush.bf16.msra.mxu1 %v429_v7 }
  0x1f   :  { %459 = vmatpush.bf16.msra.mxu2 %v429_v7  ;;  %460 = vmatpush.bf16.msra.mxu3 %v429_v7 }
  0x21   :  { %189 = vmatmul.bf16.vlgmr.msra.gmra.mxu0 %v421_v8  ;;  %199 = vmatmul.bf16.vlgmr.msra.gmra.mxu1 %v423_v9 }
  0x22   :  { %209 = vmatmul.bf16.vlgmr.msra.gmra.mxu2 %v425_v10  ;;  %219 = vmatmul.bf16.vlgmr.msra.gmra.mxu3 %v427_v11 }
  0x31   :  { %194 = vmatmul.bf16.gmra.mxu0 %v422_v12  ;;  %204 = vmatmul.bf16.gmra.mxu1 %v424_v13 }
  0x32   :  { %214 = vmatmul.bf16.gmra.mxu2 %v426_v14  ;;  %224 = vmatmul.bf16.gmra.mxu3 %v428_v15 }
  0x9e   :  { %v190_v18 = vpop.f32.mrf.mxu0  ;;  %v200_v19 = vpop.f32.mrf.mxu1 }
  0x9f   :  { %v285_v20 = vmul.f32 %v539_v16, %v190_v18  ;;  %v289_v21 = vmul.f32 %v539_v16, %v200_v19 }
  0xa1   :  { %v305_v22 = vadd.f32 %v544_v17, %v285_v20  ;;  %v309_v23 = vadd.f32 %v544_v17, %v289_v21 }
  0xa3   :  { %v321_v24 = vmax.f32 %v305_v22, 0.0  ;;  %v325_v25 = vmax.f32 %v309_v23, 0.0 }
  0xa5   :  { %337 = vst [vmem:[%s630_s4] sm:$0xff] %v321_v24  ;;  %v210_v26 = vpop.f32.mrf.mxu2  ;;  %v220_v27 = vpop.f32.mrf.mxu3 }
  0xa6   :  { %341 = vst [vmem:[%s630_s4 + $0x20] sm:$0xff] %v325_v25  ;;  %v293_v28 = vmul.f32 %v539_v16, %v210_v26  ;;  %v297_v29 = vmul.f32 %v539_v16, %v220_v27  ;;  %v192_v30 = vpop.f32.mrf.mxu0  ;;  %v202_v31 = vpop.f32.mrf.mxu1 }
  0xa7   :  { %v286_v32 = vmul.f32 %v539_v16, %v192_v30  ;;  %v290_v33 = vmul.f32 %v539_v16, %v202_v31 }
  0xa8   :  { %v313_v34 = vadd.f32 %v544_v17, %v293_v28  ;;  %v317_v35 = vadd.f32 %v544_v17, %v297_v29 }
  0xa9   :  { %v306_v36 = vadd.f32 %v544_v17, %v286_v32  ;;  %v310_v37 = vadd.f32 %v544_v17, %v290_v33 }
  0xaa   :  { %v329_v38 = vmax.f32 %v313_v34, 0.0  ;;  %v333_v39 = vmax.f32 %v317_v35, 0.0 }
  0xab   :  { %v322_v40 = vmax.f32 %v306_v36, 0.0  ;;  %v326_v41 = vmax.f32 %v310_v37, 0.0 }
  0xac   :  { %345 = vst [vmem:[%s630_s4 + $0x40] sm:$0xff] %v329_v38 }
  0xad   :  { %349 = vst [vmem:[%s630_s4 + $0x60] sm:$0xff] %v333_v39  ;;  %v212_v42 = vpop.f32.mrf.mxu2  ;;  %v222_v43 = vpop.f32.mrf.mxu3 }
  0xae   :  { %338 = vst [vmem:[%s630_s4 + $0x8] sm:$0xff] %v322_v40  ;;  %v294_v44 = vmul.f32 %v539_v16, %v212_v42  ;;  %v298_v45 = vmul.f32 %v539_v16, %v222_v43  ;;  %v195_v46 = vpop.f32.mrf.mxu0  ;;  %v205_v47 = vpop.f32.mrf.mxu1 }
  0xaf   :  { %342 = vst [vmem:[%s630_s4 + $0x28] sm:$0xff] %v326_v41  ;;  %v287_v48 = vmul.f32 %v539_v16, %v195_v46  ;;  %v291_v49 = vmul.f32 %v539_v16, %v205_v47 }
  0xb0   :  { %v314_v50 = vadd.f32 %v544_v17, %v294_v44  ;;  %v318_v51 = vadd.f32 %v544_v17, %v298_v45 }
  0xb1   :  { %v307_v52 = vadd.f32 %v544_v17, %v287_v48  ;;  %v311_v53 = vadd.f32 %v544_v17, %v291_v49 }
  0xb2   :  { %v330_v54 = vmax.f32 %v314_v50, 0.0  ;;  %v334_v55 = vmax.f32 %v318_v51, 0.0 }
  0xb3   :  { %v323_v56 = vmax.f32 %v307_v52, 0.0  ;;  %v327_v57 = vmax.f32 %v311_v53, 0.0 }
  0xb4   :  { %346 = vst [vmem:[%s630_s4 + $0x48] sm:$0xff] %v330_v54 }
  0xb5   :  { %350 = vst [vmem:[%s630_s4 + $0x68] sm:$0xff] %v334_v55  ;;  %v215_v58 = vpop.f32.mrf.mxu2  ;;  %v225_v59 = vpop.f32.mrf.mxu3 }
  0xb6   :  { %339 = vst [vmem:[%s630_s4 + $0x10] sm:$0xff] %v323_v56  ;;  %v295_v60 = vmul.f32 %v539_v16, %v215_v58  ;;  %v299_v61 = vmul.f32 %v539_v16, %v225_v59  ;;  %v197_v62 = vpop.f32.mrf.mxu0  ;;  %v207_v63 = vpop.f32.mrf.mxu1 }
  0xb7   :  { %343 = vst [vmem:[%s630_s4 + $0x30] sm:$0xff] %v327_v57  ;;  %v288_v0 = vmul.f32 %v539_v16, %v197_v62  ;;  %v292_v1 = vmul.f32 %v539_v16, %v207_v63 }
  0xb8   :  { %v315_v2 = vadd.f32 %v544_v17, %v295_v60  ;;  %v319_v3 = vadd.f32 %v544_v17, %v299_v61 }
  0xb9   :  { %v308_v4 = vadd.f32 %v544_v17, %v288_v0  ;;  %v312_v5 = vadd.f32 %v544_v17, %v292_v1 }
  0xba   :  { %v331_v6 = vmax.f32 %v315_v2, 0.0  ;;  %v335_v7 = vmax.f32 %v319_v3, 0.0 }
  0xbb   :  { %v324_v8 = vmax.f32 %v308_v4, 0.0  ;;  %v328_v9 = vmax.f32 %v312_v5, 0.0 }
  0xbc   :  { %347 = vst [vmem:[%s630_s4 + $0x50] sm:$0xff] %v331_v6 }
  0xbd   :  { %351 = vst [vmem:[%s630_s4 + $0x70] sm:$0xff] %v335_v7  ;;  %v217_v10 = vpop.f32.mrf.mxu2  ;;  %v227_v11 = vpop.f32.mrf.mxu3 }
  0xbe   :  { %340 = vst [vmem:[%s630_s4 + $0x18] sm:$0xff] %v324_v8  ;;  %v296_v12 = vmul.f32 %v539_v16, %v217_v10  ;;  %v300_v13 = vmul.f32 %v539_v16, %v227_v11 }
  0xbf   :  { %344 = vst [vmem:[%s630_s4 + $0x38] sm:$0xff] %v328_v9 }
  0xc0   :  { %v316_v14 = vadd.f32 %v544_v17, %v296_v12  ;;  %v320_v15 = vadd.f32 %v544_v17, %v300_v13 }
  0xc2   :  { %v332_v18 = vmax.f32 %v316_v14, 0.0  ;;  %v336_v19 = vmax.f32 %v320_v15, 0.0 }
  0xc4   :  { %348 = vst [vmem:[%s630_s4 + $0x58] sm:$0xff] %v332_v18 }
  0xc5   :  { %352 = vst [vmem:[%s630_s4 + $0x78] sm:$0xff] %v336_v19 }

// kernel: modified_resnet_forward.31
= control target key start
LH: loop header
LB: loop body
LE: loop exit
PB: predicated region body
PF: predicated region fallthrough
CT: control target
= control target key end

     0   :  { %s939_s1 = inlined_call_operand.vmem [shape: bf16[256,128], index: 1, kind: input, shape index: {}]   ;;  %s940_s0 = inlined_call_operand.vmem [shape: bf16[128,256], index: 0, kind: input, shape index: {}]   ;;  %s941_s2 = inlined_call_operand.vmem [shape: f32[1,128], index: 2, kind: input, shape index: {}]   ;;  %s942_s3 = inlined_call_operand.vmem [shape: f32[1,128], index: 3, kind: input, shape index: {}]   ;;  %s943_s4 = inlined_call_operand.vmem [shape: f32[128,128], index: 4, kind: output, shape index: {}]  }
   0x1   :  { %v653_v0 = vld [vmem:[%s939_s1 + $0x38] sm:$0xff]  ;;  %v652_v2 = vld [vmem:[%s939_s1 + $0x30] sm:$0xff]  ;;  %v651_v4 = vld [vmem:[%s939_s1 + $0x28] sm:$0xff] }
   0x2   :  { %v661_v1 = vld [vmem:[%s939_s1 + $0x78] sm:$0xff]  ;;  %277 = vmatpush.bf16.msra.mxu0 %v653_v0  ;;  %662 = vmatpush.bf16.msra.mxu2 %v653_v0  ;;  %v660_v3 = vld [vmem:[%s939_s1 + $0x70] sm:$0xff]  ;;  %v659_v5 = vld [vmem:[%s939_s1 + $0x68] sm:$0xff] }
   0x3   :  { %326 = vmatpush.bf16.msra.mxu1 %v661_v1  ;;  %670 = vmatpush.bf16.msra.mxu3 %v661_v1  ;;  %v650_v6 = vld [vmem:[%s939_s1 + $0x20] sm:$0xff]  ;;  %v649_v8 = vld [vmem:[%s939_s1 + $0x18] sm:$0xff]  ;;  %v648_v10 = vld [vmem:[%s939_s1 + $0x10] sm:$0xff] }
   0x4   :  { %v658_v7 = vld [vmem:[%s939_s1 + $0x60] sm:$0xff]  ;;  %v657_v9 = vld [vmem:[%s939_s1 + $0x58] sm:$0xff]  ;;  %v656_v11 = vld [vmem:[%s939_s1 + $0x50] sm:$0xff] }
   0x5   :  { %v647_v12 = vld [vmem:[%s939_s1 + $0x8] sm:$0xff]  ;;  %v646_v14 = vld [vmem:[%s939_s1] sm:$0xff]  ;;  %v512_v28 = vld [vmem:[%s940_s0 + $0x10] sm:$0xf] }
   0x6   :  { %278 = vmatpush.bf16.msra.mxu0 %v652_v2  ;;  %663 = vmatpush.bf16.msra.mxu2 %v652_v2  ;;  %v655_v13 = vld [vmem:[%s939_s1 + $0x48] sm:$0xff]  ;;  %v654_v15 = vld [vmem:[%s939_s1 + $0x40] sm:$0xff]  ;;  %v633_v29 = vld [vmem:[%s940_s0 + $0x14] sm:$0xf0] }
   0x7   :  { %327 = vmatpush.bf16.msra.mxu1 %v660_v3  ;;  %671 = vmatpush.bf16.msra.mxu3 %v660_v3  ;;  %v504_v16 = vld [vmem:[%s940_s0] sm:$0xf]  ;;  %v631_v17 = vld [vmem:[%s940_s0 + $0x4] sm:$0xf0]  ;;  %v630_v20 = vld [vmem:[%s940_s0 + $0x4] sm:$0xf]  ;;  %v513_v36 = vor.u32 %v633_v29, %v512_v28 }
   0x8   :  { %v536_v18 = vld [vmem:[%s940_s0 + $0x40] sm:$0xf]  ;;  %v639_v19 = vld [vmem:[%s940_s0 + $0x44] sm:$0xf0]  ;;  %v506_v21 = vld [vmem:[%s940_s0 + $0x8] sm:$0xf0]  ;;  %v505_v24 = vor.u32 %v631_v17, %v504_v16 }
   0x9   :  { %v638_v22 = vld [vmem:[%s940_s0 + $0x44] sm:$0xf]  ;;  %v538_v23 = vld [vmem:[%s940_s0 + $0x48] sm:$0xf0]  ;;  %v537_v25 = vor.u32 %v639_v19, %v536_v18  ;;  %v509_v26 = vor.u32 %v630_v20, %v506_v21  ;;  %v544_v30 = vld [vmem:[%s940_s0 + $0x50] sm:$0xf] }
   0xa   :  { %279 = vmatpush.bf16.msra.mxu0 %v651_v4  ;;  %664 = vmatpush.bf16.msra.mxu2 %v651_v4  ;;  %v541_v27 = vor.u32 %v638_v22, %v538_v23  ;;  %v641_v31 = vld [vmem:[%s940_s0 + $0x54] sm:$0xf0]  ;;  %v632_v32 = vld [vmem:[%s940_s0 + $0x14] sm:$0xf]  ;;  %v514_v33 = vld [vmem:[%s940_s0 + $0x18] sm:$0xf0] }
   0xb   :  { %328 = vmatpush.bf16.msra.mxu1 %v659_v5  ;;  %672 = vmatpush.bf16.msra.mxu3 %v659_v5  ;;  %v640_v34 = vld [vmem:[%s940_s0 + $0x54] sm:$0xf]  ;;  %v546_v35 = vld [vmem:[%s940_s0 + $0x58] sm:$0xf0]  ;;  %v545_v37 = vor.u32 %v641_v31, %v544_v30  ;;  %v517_v38 = vor.u32 %v632_v32, %v514_v33  ;;  %v520_v40 = vld [vmem:[%s940_s0 + $0x20] sm:$0xf] }
   0xc   :  { %v549_v39 = vor.u32 %v640_v34, %v546_v35  ;;  %v635_v41 = vld [vmem:[%s940_s0 + $0x24] sm:$0xf0]  ;;  %v552_v42 = vld [vmem:[%s940_s0 + $0x60] sm:$0xf]  ;;  %v634_v44 = vld [vmem:[%s940_s0 + $0x24] sm:$0xf] }
   0xd   :  { %v643_v43 = vld [vmem:[%s940_s0 + $0x64] sm:$0xf0]  ;;  %v522_v45 = vld [vmem:[%s940_s0 + $0x28] sm:$0xf0]  ;;  %v642_v46 = vld [vmem:[%s940_s0 + $0x64] sm:$0xf]  ;;  %v521_v48 = vor.u32 %v635_v41, %v520_v40 }
   0xe   :  { %280 = vmatpush.bf16.msra.mxu0 %v650_v6  ;;  %665 = vmatpush.bf16.msra.mxu2 %v650_v6  ;;  %v554_v47 = vld [vmem:[%s940_s0 + $0x68] sm:$0xf0]  ;;  %v553_v49 = vor.u32 %v643_v43, %v552_v42  ;;  %v525_v50 = vor.u32 %v634_v44, %v522_v45  ;;  %v528_v52 = vld [vmem:[%s940_s0 + $0x30] sm:$0xf]  ;;  %v637_v53 = vld [vmem:[%s940_s0 + $0x34] sm:$0xf0] }
   0xf   :  { %329 = vmatpush.bf16.msra.mxu1 %v658_v7  ;;  %673 = vmatpush.bf16.msra.mxu3 %v658_v7  ;;  %v557_v51 = vor.u32 %v642_v46, %v554_v47  ;;  %v560_v54 = vld [vmem:[%s940_s0 + $0x70] sm:$0xf]  ;;  %v645_v55 = vld [vmem:[%s940_s0 + $0x74] sm:$0xf0]  ;;  %v636_v56 = vld [vmem:[%s940_s0 + $0x34] sm:$0xf]  ;;  %v529_v60 = vor.u32 %v637_v53, %v528_v52 }
  0x10   :  { %v530_v57 = vld [vmem:[%s940_s0 + $0x38] sm:$0xf0]  ;;  %v644_v58 = vld [vmem:[%s940_s0 + $0x74] sm:$0xf]  ;;  %v561_v61 = vor.u32 %v645_v55, %v560_v54  ;;  %v852_v1 = vld [vmem:[%s941_s2] ss:$0 sm:$0xff] }
  0x11   :  { %v562_v59 = vld [vmem:[%s940_s0 + $0x78] sm:$0xf0]  ;;  %v533_v62 = vor.u32 %v636_v56, %v530_v57  ;;  %v857_v4 = vld [vmem:[%s942_s3] ss:$0 sm:$0xff] }
  0x12   :  { %281 = vmatpush.bf16.msra.mxu0 %v649_v8  ;;  %666 = vmatpush.bf16.msra.mxu2 %v649_v8  ;;  %v565_v63 = vor.u32 %v644_v58, %v562_v59 }
  0x13   :  { %330 = vmatpush.bf16.msra.mxu1 %v657_v9  ;;  %674 = vmatpush.bf16.msra.mxu3 %v657_v9 }
  0x16   :  { %282 = vmatpush.bf16.msra.mxu0 %v648_v10  ;;  %667 = vmatpush.bf16.msra.mxu2 %v648_v10 }
  0x17   :  { %331 = vmatpush.bf16.msra.mxu1 %v656_v11  ;;  %675 = vmatpush.bf16.msra.mxu3 %v656_v11 }
  0x1a   :  { %283 = vmatpush.bf16.msra.mxu0 %v647_v12  ;;  %668 = vmatpush.bf16.msra.mxu2 %v647_v12 }
  0x1b   :  { %332 = vmatpush.bf16.msra.mxu1 %v655_v13  ;;  %676 = vmatpush.bf16.msra.mxu3 %v655_v13 }
  0x1e   :  { %284 = vmatpush.bf16.msra.mxu0 %v646_v14  ;;  %669 = vmatpush.bf16.msra.mxu2 %v646_v14 }
  0x1f   :  { %333 = vmatpush.bf16.msra.mxu1 %v654_v15  ;;  %677 = vmatpush.bf16.msra.mxu3 %v654_v15 }
  0x21   :  { %285 = vmatmul.bf16.vlgmr.msra.gmra.mxu0 %v505_v24  ;;  %305 = vmatmul.bf16.vlgmr.msra.gmra.mxu2 %v537_v25 }
  0x22   :  { %334 = vmatmul.bf16.vlgmr.msra.gmra.mxu1 %v509_v26  ;;  %354 = vmatmul.bf16.vlgmr.msra.gmra.mxu3 %v541_v27 }
  0x31   :  { %290 = vmatmul.bf16.gmra.mxu0 %v513_v36  ;;  %310 = vmatmul.bf16.gmra.mxu2 %v545_v37 }
  0x32   :  { %339 = vmatmul.bf16.gmra.mxu1 %v517_v38  ;;  %359 = vmatmul.bf16.gmra.mxu3 %v549_v39 }
  0x41   :  { %295 = vmatmul.bf16.gmra.mxu0 %v521_v48  ;;  %315 = vmatmul.bf16.gmra.mxu2 %v553_v49 }
  0x42   :  { %344 = vmatmul.bf16.gmra.mxu1 %v525_v50  ;;  %364 = vmatmul.bf16.gmra.mxu3 %v557_v51 }
  0x51   :  { %300 = vmatmul.bf16.gmra.mxu0 %v529_v60  ;;  %320 = vmatmul.bf16.gmra.mxu2 %v561_v61 }
  0x52   :  { %349 = vmatmul.bf16.gmra.mxu1 %v533_v62  ;;  %369 = vmatmul.bf16.gmra.mxu3 %v565_v63 }
  0x9e   :  { %v286_v0 = vpop.f32.mrf.mxu0 }
  0x9f   :  { %v335_v2 = vpop.f32.mrf.mxu1 }
  0xa0   :  { %v336_v3 = vadd.f32 %v335_v2, %v286_v0 }
  0xa2   :  { %v430_v5 = vmul.f32 %v852_v1, %v336_v3 }
  0xa4   :  { %v450_v6 = vadd.f32 %v857_v4, %v430_v5  ;;  %v306_v7 = vpop.f32.mrf.mxu2 }
  0xa5   :  { %v355_v8 = vpop.f32.mrf.mxu3 }
  0xa6   :  { %v466_v9 = vmax.f32 %v450_v6, 0.0  ;;  %v356_v10 = vadd.f32 %v355_v8, %v306_v7  ;;  %v288_v11 = vpop.f32.mrf.mxu0 }
  0xa7   :  { %v337_v12 = vpop.f32.mrf.mxu1 }
  0xa8   :  { %482 = vst [vmem:[%s943_s4] sm:$0xff] %v466_v9  ;;  %v438_v13 = vmul.f32 %v852_v1, %v356_v10  ;;  %v338_v14 = vadd.f32 %v337_v12, %v288_v11 }
  0xaa   :  { %v458_v15 = vadd.f32 %v857_v4, %v438_v13  ;;  %v431_v16 = vmul.f32 %v852_v1, %v338_v14 }
  0xac   :  { %v474_v17 = vmax.f32 %v458_v15, 0.0  ;;  %v451_v18 = vadd.f32 %v857_v4, %v431_v16  ;;  %v308_v19 = vpop.f32.mrf.mxu2 }
  0xad   :  { %v357_v20 = vpop.f32.mrf.mxu3 }
  0xae   :  { %490 = vst [vmem:[%s943_s4 + $0x40] sm:$0xff] %v474_v17  ;;  %v467_v21 = vmax.f32 %v451_v18, 0.0  ;;  %v358_v22 = vadd.f32 %v357_v20, %v308_v19  ;;  %v291_v23 = vpop.f32.mrf.mxu0 }
  0xaf   :  { %v340_v24 = vpop.f32.mrf.mxu1 }
  0xb0   :  { %483 = vst [vmem:[%s943_s4 + $0x8] sm:$0xff] %v467_v21  ;;  %v439_v25 = vmul.f32 %v852_v1, %v358_v22  ;;  %v341_v26 = vadd.f32 %v340_v24, %v291_v23 }
  0xb2   :  { %v459_v27 = vadd.f32 %v857_v4, %v439_v25  ;;  %v432_v28 = vmul.f32 %v852_v1, %v341_v26 }
  0xb4   :  { %v475_v29 = vmax.f32 %v459_v27, 0.0  ;;  %v452_v30 = vadd.f32 %v857_v4, %v432_v28  ;;  %v311_v31 = vpop.f32.mrf.mxu2 }
  0xb5   :  { %v360_v32 = vpop.f32.mrf.mxu3 }
  0xb6   :  { %491 = vst [vmem:[%s943_s4 + $0x48] sm:$0xff] %v475_v29  ;;  %v468_v33 = vmax.f32 %v452_v30, 0.0  ;;  %v361_v34 = vadd.f32 %v360_v32, %v311_v31  ;;  %v293_v35 = vpop.f32.mrf.mxu0 }
  0xb7   :  { %v342_v36 = vpop.f32.mrf.mxu1 }
  0xb8   :  { %484 = vst [vmem:[%s943_s4 + $0x10] sm:$0xff] %v468_v33  ;;  %v440_v37 = vmul.f32 %v852_v1, %v361_v34  ;;  %v343_v38 = vadd.f32 %v342_v36, %v293_v35 }
  0xba   :  { %v460_v39 = vadd.f32 %v857_v4, %v440_v37  ;;  %v433_v40 = vmul.f32 %v852_v1, %v343_v38 }
  0xbc   :  { %v476_v41 = vmax.f32 %v460_v39, 0.0  ;;  %v453_v42 = vadd.f32 %v857_v4, %v433_v40  ;;  %v313_v43 = vpop.f32.mrf.mxu2 }
  0xbd   :  { %v362_v44 = vpop.f32.mrf.mxu3 }
  0xbe   :  { %492 = vst [vmem:[%s943_s4 + $0x50] sm:$0xff] %v476_v41  ;;  %v469_v45 = vmax.f32 %v453_v42, 0.0  ;;  %v363_v46 = vadd.f32 %v362_v44, %v313_v43  ;;  %v296_v47 = vpop.f32.mrf.mxu0 }
  0xbf   :  { %v345_v48 = vpop.f32.mrf.mxu1 }
  0xc0   :  { %485 = vst [vmem:[%s943_s4 + $0x18] sm:$0xff] %v469_v45  ;;  %v441_v49 = vmul.f32 %v852_v1, %v363_v46  ;;  %v346_v50 = vadd.f32 %v345_v48, %v296_v47 }
  0xc2   :  { %v461_v51 = vadd.f32 %v857_v4, %v441_v49  ;;  %v434_v52 = vmul.f32 %v852_v1, %v346_v50 }
  0xc4   :  { %v477_v53 = vmax.f32 %v461_v51, 0.0  ;;  %v454_v54 = vadd.f32 %v857_v4, %v434_v52  ;;  %v316_v55 = vpop.f32.mrf.mxu2 }
  0xc5   :  { %v365_v56 = vpop.f32.mrf.mxu3 }
  0xc6   :  { %493 = vst [vmem:[%s943_s4 + $0x58] sm:$0xff] %v477_v53  ;;  %v470_v57 = vmax.f32 %v454_v54, 0.0  ;;  %v366_v58 = vadd.f32 %v365_v56, %v316_v55  ;;  %v298_v59 = vpop.f32.mrf.mxu0 }
  0xc7   :  { %v347_v60 = vpop.f32.mrf.mxu1 }
  0xc8   :  { %486 = vst [vmem:[%s943_s4 + $0x20] sm:$0xff] %v470_v57  ;;  %v442_v61 = vmul.f32 %v852_v1, %v366_v58  ;;  %v348_v62 = vadd.f32 %v347_v60, %v298_v59 }
  0xca   :  { %v462_v63 = vadd.f32 %v857_v4, %v442_v61  ;;  %v435_v0 = vmul.f32 %v852_v1, %v348_v62 }
  0xcc   :  { %v478_v2 = vmax.f32 %v462_v63, 0.0  ;;  %v455_v3 = vadd.f32 %v857_v4, %v435_v0  ;;  %v318_v5 = vpop.f32.mrf.mxu2 }
  0xcd   :  { %v367_v6 = vpop.f32.mrf.mxu3 }
  0xce   :  { %494 = vst [vmem:[%s943_s4 + $0x60] sm:$0xff] %v478_v2  ;;  %v471_v7 = vmax.f32 %v455_v3, 0.0  ;;  %v368_v8 = vadd.f32 %v367_v6, %v318_v5  ;;  %v301_v9 = vpop.f32.mrf.mxu0 }
  0xcf   :  { %v350_v10 = vpop.f32.mrf.mxu1 }
  0xd0   :  { %487 = vst [vmem:[%s943_s4 + $0x28] sm:$0xff] %v471_v7  ;;  %v443_v11 = vmul.f32 %v852_v1, %v368_v8  ;;  %v351_v12 = vadd.f32 %v350_v10, %v301_v9 }
  0xd2   :  { %v463_v13 = vadd.f32 %v857_v4, %v443_v11  ;;  %v436_v14 = vmul.f32 %v852_v1, %v351_v12 }
  0xd4   :  { %v479_v15 = vmax.f32 %v463_v13, 0.0  ;;  %v456_v16 = vadd.f32 %v857_v4, %v436_v14  ;;  %v321_v17 = vpop.f32.mrf.mxu2 }
  0xd5   :  { %v370_v18 = vpop.f32.mrf.mxu3 }
  0xd6   :  { %495 = vst [vmem:[%s943_s4 + $0x68] sm:$0xff] %v479_v15  ;;  %v472_v19 = vmax.f32 %v456_v16, 0.0  ;;  %v371_v20 = vadd.f32 %v370_v18, %v321_v17  ;;  %v303_v21 = vpop.f32.mrf.mxu0 }
  0xd7   :  { %v352_v22 = vpop.f32.mrf.mxu1 }
  0xd8   :  { %488 = vst [vmem:[%s943_s4 + $0x30] sm:$0xff] %v472_v19  ;;  %v444_v23 = vmul.f32 %v852_v1, %v371_v20  ;;  %v353_v24 = vadd.f32 %v352_v22, %v303_v21 }
  0xda   :  { %v464_v25 = vadd.f32 %v857_v4, %v444_v23  ;;  %v437_v26 = vmul.f32 %v852_v1, %v353_v24 }
  0xdc   :  { %v480_v27 = vmax.f32 %v464_v25, 0.0  ;;  %v457_v28 = vadd.f32 %v857_v4, %v437_v26  ;;  %v323_v29 = vpop.f32.mrf.mxu2 }
  0xdd   :  { %v372_v30 = vpop.f32.mrf.mxu3 }
  0xde   :  { %496 = vst [vmem:[%s943_s4 + $0x70] sm:$0xff] %v480_v27  ;;  %v473_v31 = vmax.f32 %v457_v28, 0.0  ;;  %v373_v32 = vadd.f32 %v372_v30, %v323_v29 }
  0xe0   :  { %489 = vst [vmem:[%s943_s4 + $0x38] sm:$0xff] %v473_v31  ;;  %v445_v33 = vmul.f32 %v852_v1, %v373_v32 }
  0xe2   :  { %v465_v34 = vadd.f32 %v857_v4, %v445_v33 }
  0xe4   :  { %v481_v35 = vmax.f32 %v465_v34, 0.0 }
  0xe6   :  { %497 = vst [vmem:[%s943_s4 + $0x78] sm:$0xff] %v481_v35 }

// kernel: modified_resnet_forward.32
= control target key start
LH: loop header
LB: loop body
LE: loop exit
PB: predicated region body
PF: predicated region fallthrough
CT: control target
= control target key end

     0   :  { %s592_s1 = inlined_call_operand.vmem [shape: bf16[128,128], index: 1, kind: input, shape index: {}]   ;;  %s593_s2 = inlined_call_operand.vmem [shape: f32[1,128], index: 2, kind: input, shape index: {}]   ;;  %s594_s3 = inlined_call_operand.vmem [shape: f32[1,128], index: 3, kind: input, shape index: {}]   ;;  %s595_s0 = inlined_call_operand.vmem [shape: bf16[128,128], index: 0, kind: input, shape index: {}]   ;;  %s596_s4 = inlined_call_operand.vmem [shape: f32[128,128], index: 4, kind: output, shape index: {}]  }
   0x1   :  { %v420_v0 = vld [vmem:[%s592_s1 + $0x38] sm:$0xff]  ;;  %v419_v1 = vld [vmem:[%s592_s1 + $0x30] sm:$0xff]  ;;  %v418_v2 = vld [vmem:[%s592_s1 + $0x28] sm:$0xff] }
   0x2   :  { %181 = vmatpush.bf16.msra.mxu0 %v420_v0  ;;  %421 = vmatpush.bf16.msra.mxu1 %v420_v0  ;;  %v417_v3 = vld [vmem:[%s592_s1 + $0x20] sm:$0xff]  ;;  %v416_v4 = vld [vmem:[%s592_s1 + $0x18] sm:$0xff]  ;;  %v415_v5 = vld [vmem:[%s592_s1 + $0x10] sm:$0xff] }
   0x3   :  { %422 = vmatpush.bf16.msra.mxu2 %v420_v0  ;;  %423 = vmatpush.bf16.msra.mxu3 %v420_v0  ;;  %v414_v6 = vld [vmem:[%s592_s1 + $0x8] sm:$0xff]  ;;  %v413_v7 = vld [vmem:[%s592_s1] sm:$0xff]  ;;  %v407_v9 = vld [vmem:[%s595_s0 + $0x10] sm:$0xff] }
   0x4   :  { %v405_v8 = vld [vmem:[%s595_s0] sm:$0xff]  ;;  %v411_v11 = vld [vmem:[%s595_s0 + $0x30] sm:$0xff]  ;;  %v406_v12 = vld [vmem:[%s595_s0 + $0x8] sm:$0xff] }
   0x5   :  { %v409_v10 = vld [vmem:[%s595_s0 + $0x20] sm:$0xff]  ;;  %v408_v13 = vld [vmem:[%s595_s0 + $0x18] sm:$0xff]  ;;  %v410_v14 = vld [vmem:[%s595_s0 + $0x28] sm:$0xff] }
   0x6   :  { %182 = vmatpush.bf16.msra.mxu0 %v419_v1  ;;  %424 = vmatpush.bf16.msra.mxu1 %v419_v1  ;;  %v412_v15 = vld [vmem:[%s595_s0 + $0x38] sm:$0xff]  ;;  %v445_v16 = vld [vmem:[%s593_s2] ss:$0 sm:$0xff] }
   0x7   :  { %425 = vmatpush.bf16.msra.mxu2 %v419_v1  ;;  %426 = vmatpush.bf16.msra.mxu3 %v419_v1  ;;  %v526_v17 = vld [vmem:[%s594_s3] ss:$0 sm:$0xff] }
   0xa   :  { %183 = vmatpush.bf16.msra.mxu0 %v418_v2  ;;  %427 = vmatpush.bf16.msra.mxu1 %v418_v2 }
   0xb   :  { %428 = vmatpush.bf16.msra.mxu2 %v418_v2  ;;  %429 = vmatpush.bf16.msra.mxu3 %v418_v2 }
   0xe   :  { %184 = vmatpush.bf16.msra.mxu0 %v417_v3  ;;  %430 = vmatpush.bf16.msra.mxu1 %v417_v3 }
   0xf   :  { %431 = vmatpush.bf16.msra.mxu2 %v417_v3  ;;  %432 = vmatpush.bf16.msra.mxu3 %v417_v3 }
  0x12   :  { %185 = vmatpush.bf16.msra.mxu0 %v416_v4  ;;  %433 = vmatpush.bf16.msra.mxu1 %v416_v4 }
  0x13   :  { %434 = vmatpush.bf16.msra.mxu2 %v416_v4  ;;  %435 = vmatpush.bf16.msra.mxu3 %v416_v4 }
  0x16   :  { %186 = vmatpush.bf16.msra.mxu0 %v415_v5  ;;  %436 = vmatpush.bf16.msra.mxu1 %v415_v5 }
  0x17   :  { %437 = vmatpush.bf16.msra.mxu2 %v415_v5  ;;  %438 = vmatpush.bf16.msra.mxu3 %v415_v5 }
  0x1a   :  { %187 = vmatpush.bf16.msra.mxu0 %v414_v6  ;;  %439 = vmatpush.bf16.msra.mxu1 %v414_v6 }
  0x1b   :  { %440 = vmatpush.bf16.msra.mxu2 %v414_v6  ;;  %441 = vmatpush.bf16.msra.mxu3 %v414_v6 }
  0x1e   :  { %188 = vmatpush.bf16.msra.mxu0 %v413_v7  ;;  %442 = vmatpush.bf16.msra.mxu1 %v413_v7 }
  0x1f   :  { %443 = vmatpush.bf16.msra.mxu2 %v413_v7  ;;  %444 = vmatpush.bf16.msra.mxu3 %v413_v7 }
  0x21   :  { %189 = vmatmul.bf16.vlgmr.msra.gmra.mxu0 %v405_v8  ;;  %199 = vmatmul.bf16.vlgmr.msra.gmra.mxu1 %v407_v9 }
  0x22   :  { %209 = vmatmul.bf16.vlgmr.msra.gmra.mxu2 %v409_v10  ;;  %219 = vmatmul.bf16.vlgmr.msra.gmra.mxu3 %v411_v11 }
  0x31   :  { %194 = vmatmul.bf16.gmra.mxu0 %v406_v12  ;;  %204 = vmatmul.bf16.gmra.mxu1 %v408_v13 }
  0x32   :  { %214 = vmatmul.bf16.gmra.mxu2 %v410_v14  ;;  %224 = vmatmul.bf16.gmra.mxu3 %v412_v15 }
  0x9e   :  { %v190_v18 = vpop.f32.mrf.mxu0  ;;  %v200_v19 = vpop.f32.mrf.mxu1 }
  0x9f   :  { %v285_v20 = vmul.f32 %v445_v16, %v190_v18  ;;  %v289_v21 = vmul.f32 %v445_v16, %v200_v19 }
  0xa1   :  { %v305_v22 = vadd.f32 %v526_v17, %v285_v20  ;;  %v309_v23 = vadd.f32 %v526_v17, %v289_v21 }
  0xa3   :  { %321 = vst [vmem:[%s596_s4] sm:$0xff] %v305_v22 }
  0xa4   :  { %325 = vst [vmem:[%s596_s4 + $0x20] sm:$0xff] %v309_v23 }
  0xa5   :  { %v210_v24 = vpop.f32.mrf.mxu2  ;;  %v220_v25 = vpop.f32.mrf.mxu3 }
  0xa6   :  { %v293_v26 = vmul.f32 %v445_v16, %v210_v24  ;;  %v297_v27 = vmul.f32 %v445_v16, %v220_v25  ;;  %v192_v28 = vpop.f32.mrf.mxu0  ;;  %v202_v29 = vpop.f32.mrf.mxu1 }
  0xa7   :  { %v286_v30 = vmul.f32 %v445_v16, %v192_v28  ;;  %v290_v31 = vmul.f32 %v445_v16, %v202_v29 }
  0xa8   :  { %v313_v32 = vadd.f32 %v526_v17, %v293_v26  ;;  %v317_v33 = vadd.f32 %v526_v17, %v297_v27 }
  0xa9   :  { %v306_v34 = vadd.f32 %v526_v17, %v286_v30  ;;  %v310_v35 = vadd.f32 %v526_v17, %v290_v31 }
  0xaa   :  { %329 = vst [vmem:[%s596_s4 + $0x40] sm:$0xff] %v313_v32 }
  0xab   :  { %333 = vst [vmem:[%s596_s4 + $0x60] sm:$0xff] %v317_v33 }
  0xac   :  { %322 = vst [vmem:[%s596_s4 + $0x8] sm:$0xff] %v306_v34 }
  0xad   :  { %326 = vst [vmem:[%s596_s4 + $0x28] sm:$0xff] %v310_v35  ;;  %v212_v36 = vpop.f32.mrf.mxu2  ;;  %v222_v37 = vpop.f32.mrf.mxu3 }
  0xae   :  { %v294_v38 = vmul.f32 %v445_v16, %v212_v36  ;;  %v298_v39 = vmul.f32 %v445_v16, %v222_v37  ;;  %v195_v40 = vpop.f32.mrf.mxu0  ;;  %v205_v41 = vpop.f32.mrf.mxu1 }
  0xaf   :  { %v287_v42 = vmul.f32 %v445_v16, %v195_v40  ;;  %v291_v43 = vmul.f32 %v445_v16, %v205_v41 }
  0xb0   :  { %v314_v44 = vadd.f32 %v526_v17, %v294_v38  ;;  %v318_v45 = vadd.f32 %v526_v17, %v298_v39 }
  0xb1   :  { %v307_v46 = vadd.f32 %v526_v17, %v287_v42  ;;  %v311_v47 = vadd.f32 %v526_v17, %v291_v43 }
  0xb2   :  { %330 = vst [vmem:[%s596_s4 + $0x48] sm:$0xff] %v314_v44 }
  0xb3   :  { %334 = vst [vmem:[%s596_s4 + $0x68] sm:$0xff] %v318_v45 }
  0xb4   :  { %323 = vst [vmem:[%s596_s4 + $0x10] sm:$0xff] %v307_v46 }
  0xb5   :  { %327 = vst [vmem:[%s596_s4 + $0x30] sm:$0xff] %v311_v47  ;;  %v215_v48 = vpop.f32.mrf.mxu2  ;;  %v225_v49 = vpop.f32.mrf.mxu3 }
  0xb6   :  { %v295_v50 = vmul.f32 %v445_v16, %v215_v48  ;;  %v299_v51 = vmul.f32 %v445_v16, %v225_v49  ;;  %v197_v52 = vpop.f32.mrf.mxu0  ;;  %v207_v53 = vpop.f32.mrf.mxu1 }
  0xb7   :  { %v288_v54 = vmul.f32 %v445_v16, %v197_v52  ;;  %v292_v55 = vmul.f32 %v445_v16, %v207_v53 }
  0xb8   :  { %v315_v56 = vadd.f32 %v526_v17, %v295_v50  ;;  %v319_v57 = vadd.f32 %v526_v17, %v299_v51 }
  0xb9   :  { %v308_v58 = vadd.f32 %v526_v17, %v288_v54  ;;  %v312_v59 = vadd.f32 %v526_v17, %v292_v55 }
  0xba   :  { %331 = vst [vmem:[%s596_s4 + $0x50] sm:$0xff] %v315_v56 }
  0xbb   :  { %335 = vst [vmem:[%s596_s4 + $0x70] sm:$0xff] %v319_v57 }
  0xbc   :  { %324 = vst [vmem:[%s596_s4 + $0x18] sm:$0xff] %v308_v58 }
  0xbd   :  { %328 = vst [vmem:[%s596_s4 + $0x38] sm:$0xff] %v312_v59  ;;  %v217_v60 = vpop.f32.mrf.mxu2  ;;  %v227_v61 = vpop.f32.mrf.mxu3 }
  0xbe   :  { %v296_v62 = vmul.f32 %v445_v16, %v217_v60  ;;  %v300_v63 = vmul.f32 %v445_v16, %v227_v61 }
  0xc0   :  { %v316_v0 = vadd.f32 %v526_v17, %v296_v62  ;;  %v320_v1 = vadd.f32 %v526_v17, %v300_v63 }
  0xc2   :  { %332 = vst [vmem:[%s596_s4 + $0x58] sm:$0xff] %v316_v0 }
  0xc3   :  { %336 = vst [vmem:[%s596_s4 + $0x78] sm:$0xff] %v320_v1 }

// kernel: modified_resnet_forward.33
= control target key start
LH: loop header
LB: loop body
LE: loop exit
PB: predicated region body
PF: predicated region fallthrough
CT: control target
= control target key end

     0   :  { %s714_s1 = inlined_call_operand.vmem [shape: bf16[128,128], index: 1, kind: input, shape index: {}]   ;;  %s715_s2 = inlined_call_operand.vmem [shape: f32[1,128], index: 2, kind: input, shape index: {}]   ;;  %s716_s3 = inlined_call_operand.vmem [shape: f32[1,128], index: 3, kind: input, shape index: {}]   ;;  %s717_s0 = inlined_call_operand.vmem [shape: bf16[128,128], index: 0, kind: input, shape index: {}]   ;;  %s718_s4 = inlined_call_operand.vmem [shape: f32[128,128], index: 4, kind: input, shape index: {}]   ;;  %s719_s5 = inlined_call_operand.vmem [shape: f32[128,128], index: 5, kind: output, shape index: {}]  }
   0x1   :  { %v471_v0 = vld [vmem:[%s714_s1 + $0x38] sm:$0xff]  ;;  %v470_v1 = vld [vmem:[%s714_s1 + $0x30] sm:$0xff]  ;;  %v469_v2 = vld [vmem:[%s714_s1 + $0x28] sm:$0xff] }
   0x2   :  { %184 = vmatpush.bf16.msra.mxu0 %v471_v0  ;;  %472 = vmatpush.bf16.msra.mxu1 %v471_v0  ;;  %v468_v3 = vld [vmem:[%s714_s1 + $0x20] sm:$0xff]  ;;  %v467_v4 = vld [vmem:[%s714_s1 + $0x18] sm:$0xff]  ;;  %v466_v5 = vld [vmem:[%s714_s1 + $0x10] sm:$0xff] }
   0x3   :  { %473 = vmatpush.bf16.msra.mxu2 %v471_v0  ;;  %474 = vmatpush.bf16.msra.mxu3 %v471_v0  ;;  %v465_v6 = vld [vmem:[%s714_s1 + $0x8] sm:$0xff]  ;;  %v464_v7 = vld [vmem:[%s714_s1] sm:$0xff]  ;;  %v458_v9 = vld [vmem:[%s717_s0 + $0x10] sm:$0xff] }
   0x4   :  { %v456_v8 = vld [vmem:[%s717_s0] sm:$0xff]  ;;  %v462_v11 = vld [vmem:[%s717_s0 + $0x30] sm:$0xff]  ;;  %v457_v12 = vld [vmem:[%s717_s0 + $0x8] sm:$0xff] }
   0x5   :  { %v460_v10 = vld [vmem:[%s717_s0 + $0x20] sm:$0xff]  ;;  %v459_v13 = vld [vmem:[%s717_s0 + $0x18] sm:$0xff]  ;;  %v461_v14 = vld [vmem:[%s717_s0 + $0x28] sm:$0xff] }
   0x6   :  { %185 = vmatpush.bf16.msra.mxu0 %v470_v1  ;;  %475 = vmatpush.bf16.msra.mxu1 %v470_v1  ;;  %v463_v15 = vld [vmem:[%s717_s0 + $0x38] sm:$0xff]  ;;  %v579_v16 = vld [vmem:[%s715_s2] ss:$0 sm:$0xff]  ;;  %v325_v42 = vld [vmem:[%s718_s4 + $0x8] sm:$0xff] }
   0x7   :  { %476 = vmatpush.bf16.msra.mxu2 %v470_v1  ;;  %477 = vmatpush.bf16.msra.mxu3 %v470_v1  ;;  %v584_v17 = vld [vmem:[%s716_s3] ss:$0 sm:$0xff]  ;;  %v329_v43 = vld [vmem:[%s718_s4 + $0x28] sm:$0xff] }
   0x8   :  { %v324_v22 = vld [vmem:[%s718_s4] sm:$0xff]  ;;  %v333_v60 = vld [vmem:[%s718_s4 + $0x48] sm:$0xff] }
   0x9   :  { %v328_v23 = vld [vmem:[%s718_s4 + $0x20] sm:$0xff]  ;;  %v337_v61 = vld [vmem:[%s718_s4 + $0x68] sm:$0xff] }
   0xa   :  { %186 = vmatpush.bf16.msra.mxu0 %v469_v2  ;;  %478 = vmatpush.bf16.msra.mxu1 %v469_v2  ;;  %v332_v36 = vld [vmem:[%s718_s4 + $0x40] sm:$0xff] }
   0xb   :  { %479 = vmatpush.bf16.msra.mxu2 %v469_v2  ;;  %480 = vmatpush.bf16.msra.mxu3 %v469_v2  ;;  %v336_v37 = vld [vmem:[%s718_s4 + $0x60] sm:$0xff]  ;;  %v326_v2 = vld [vmem:[%s718_s4 + $0x10] sm:$0xff] }
   0xe   :  { %187 = vmatpush.bf16.msra.mxu0 %v468_v3  ;;  %481 = vmatpush.bf16.msra.mxu1 %v468_v3 }
   0xf   :  { %482 = vmatpush.bf16.msra.mxu2 %v468_v3  ;;  %483 = vmatpush.bf16.msra.mxu3 %v468_v3  ;;  %v330_v3 = vld [vmem:[%s718_s4 + $0x30] sm:$0xff] }
  0x12   :  { %188 = vmatpush.bf16.msra.mxu0 %v467_v4  ;;  %484 = vmatpush.bf16.msra.mxu1 %v467_v4 }
  0x13   :  { %485 = vmatpush.bf16.msra.mxu2 %v467_v4  ;;  %486 = vmatpush.bf16.msra.mxu3 %v467_v4 }
  0x16   :  { %189 = vmatpush.bf16.msra.mxu0 %v466_v5  ;;  %487 = vmatpush.bf16.msra.mxu1 %v466_v5 }
  0x17   :  { %488 = vmatpush.bf16.msra.mxu2 %v466_v5  ;;  %489 = vmatpush.bf16.msra.mxu3 %v466_v5 }
  0x1a   :  { %190 = vmatpush.bf16.msra.mxu0 %v465_v6  ;;  %490 = vmatpush.bf16.msra.mxu1 %v465_v6 }
  0x1b   :  { %491 = vmatpush.bf16.msra.mxu2 %v465_v6  ;;  %492 = vmatpush.bf16.msra.mxu3 %v465_v6 }
  0x1e   :  { %191 = vmatpush.bf16.msra.mxu0 %v464_v7  ;;  %493 = vmatpush.bf16.msra.mxu1 %v464_v7 }
  0x1f   :  { %494 = vmatpush.bf16.msra.mxu2 %v464_v7  ;;  %495 = vmatpush.bf16.msra.mxu3 %v464_v7 }
  0x21   :  { %192 = vmatmul.bf16.vlgmr.msra.gmra.mxu0 %v456_v8  ;;  %202 = vmatmul.bf16.vlgmr.msra.gmra.mxu1 %v458_v9 }
  0x22   :  { %212 = vmatmul.bf16.vlgmr.msra.gmra.mxu2 %v460_v10  ;;  %222 = vmatmul.bf16.vlgmr.msra.gmra.mxu3 %v462_v11 }
  0x31   :  { %197 = vmatmul.bf16.gmra.mxu0 %v457_v12  ;;  %207 = vmatmul.bf16.gmra.mxu1 %v459_v13 }
  0x32   :  { %217 = vmatmul.bf16.gmra.mxu2 %v461_v14  ;;  %227 = vmatmul.bf16.gmra.mxu3 %v463_v15 }
  0x9e   :  { %v193_v18 = vpop.f32.mrf.mxu0  ;;  %v203_v19 = vpop.f32.mrf.mxu1 }
  0x9f   :  { %v288_v20 = vmul.f32 %v579_v16, %v193_v18  ;;  %v292_v21 = vmul.f32 %v579_v16, %v203_v19 }
  0xa1   :  { %v308_v24 = vadd.f32 %v584_v17, %v288_v20  ;;  %v312_v25 = vadd.f32 %v584_v17, %v292_v21 }
  0xa3   :  { %v340_v26 = vadd.f32 %v324_v22, %v308_v24  ;;  %v344_v27 = vadd.f32 %v328_v23, %v312_v25  ;;  %v334_v22 = vld [vmem:[%s718_s4 + $0x50] sm:$0xff] }
  0xa4   :  { %v338_v23 = vld [vmem:[%s718_s4 + $0x70] sm:$0xff] }
  0xa5   :  { %v356_v28 = vmax.f32 %v340_v26, 0.0  ;;  %v360_v29 = vmax.f32 %v344_v27, 0.0  ;;  %v213_v30 = vpop.f32.mrf.mxu2  ;;  %v223_v31 = vpop.f32.mrf.mxu3 }
  0xa6   :  { %v296_v32 = vmul.f32 %v579_v16, %v213_v30  ;;  %v300_v33 = vmul.f32 %v579_v16, %v223_v31  ;;  %v195_v34 = vpop.f32.mrf.mxu0  ;;  %v205_v35 = vpop.f32.mrf.mxu1 }
  0xa7   :  { %372 = vst [vmem:[%s719_s5] sm:$0xff] %v356_v28  ;;  %v289_v38 = vmul.f32 %v579_v16, %v195_v34  ;;  %v293_v39 = vmul.f32 %v579_v16, %v205_v35  ;;  %v327_v28 = vld [vmem:[%s718_s4 + $0x18] sm:$0xff] }
  0xa8   :  { %376 = vst [vmem:[%s719_s5 + $0x20] sm:$0xff] %v360_v29  ;;  %v316_v40 = vadd.f32 %v584_v17, %v296_v32  ;;  %v320_v41 = vadd.f32 %v584_v17, %v300_v33  ;;  %v331_v29 = vld [vmem:[%s718_s4 + $0x38] sm:$0xff] }
  0xa9   :  { %v309_v44 = vadd.f32 %v584_v17, %v289_v38  ;;  %v313_v45 = vadd.f32 %v584_v17, %v293_v39 }
  0xaa   :  { %v348_v46 = vadd.f32 %v332_v36, %v316_v40  ;;  %v352_v47 = vadd.f32 %v336_v37, %v320_v41 }
  0xab   :  { %v341_v48 = vadd.f32 %v325_v42, %v309_v44  ;;  %v345_v49 = vadd.f32 %v329_v43, %v313_v45  ;;  %v335_v44 = vld [vmem:[%s718_s4 + $0x58] sm:$0xff] }
  0xac   :  { %v364_v50 = vmax.f32 %v348_v46, 0.0  ;;  %v368_v51 = vmax.f32 %v352_v47, 0.0  ;;  %v339_v45 = vld [vmem:[%s718_s4 + $0x78] sm:$0xff] }
  0xad   :  { %v357_v52 = vmax.f32 %v341_v48, 0.0  ;;  %v361_v53 = vmax.f32 %v345_v49, 0.0  ;;  %v215_v54 = vpop.f32.mrf.mxu2  ;;  %v225_v55 = vpop.f32.mrf.mxu3 }
  0xae   :  { %380 = vst [vmem:[%s719_s5 + $0x40] sm:$0xff] %v364_v50  ;;  %v297_v56 = vmul.f32 %v579_v16, %v215_v54  ;;  %v301_v57 = vmul.f32 %v579_v16, %v225_v55  ;;  %v198_v58 = vpop.f32.mrf.mxu0  ;;  %v208_v59 = vpop.f32.mrf.mxu1 }
  0xaf   :  { %384 = vst [vmem:[%s719_s5 + $0x60] sm:$0xff] %v368_v51  ;;  %v290_v62 = vmul.f32 %v579_v16, %v198_v58  ;;  %v294_v63 = vmul.f32 %v579_v16, %v208_v59 }
  0xb0   :  { %373 = vst [vmem:[%s719_s5 + $0x8] sm:$0xff] %v357_v52  ;;  %v317_v0 = vadd.f32 %v584_v17, %v297_v56  ;;  %v321_v1 = vadd.f32 %v584_v17, %v301_v57 }
  0xb1   :  { %377 = vst [vmem:[%s719_s5 + $0x28] sm:$0xff] %v361_v53  ;;  %v310_v4 = vadd.f32 %v584_v17, %v290_v62  ;;  %v314_v5 = vadd.f32 %v584_v17, %v294_v63 }
  0xb2   :  { %v349_v6 = vadd.f32 %v333_v60, %v317_v0  ;;  %v353_v7 = vadd.f32 %v337_v61, %v321_v1 }
  0xb3   :  { %v342_v8 = vadd.f32 %v326_v2, %v310_v4  ;;  %v346_v9 = vadd.f32 %v330_v3, %v314_v5 }
  0xb4   :  { %v365_v10 = vmax.f32 %v349_v6, 0.0  ;;  %v369_v11 = vmax.f32 %v353_v7, 0.0 }
  0xb5   :  { %v358_v12 = vmax.f32 %v342_v8, 0.0  ;;  %v362_v13 = vmax.f32 %v346_v9, 0.0  ;;  %v218_v14 = vpop.f32.mrf.mxu2  ;;  %v228_v15 = vpop.f32.mrf.mxu3 }
  0xb6   :  { %381 = vst [vmem:[%s719_s5 + $0x48] sm:$0xff] %v365_v10  ;;  %v298_v18 = vmul.f32 %v579_v16, %v218_v14  ;;  %v302_v19 = vmul.f32 %v579_v16, %v228_v15  ;;  %v200_v20 = vpop.f32.mrf.mxu0  ;;  %v210_v21 = vpop.f32.mrf.mxu1 }
  0xb7   :  { %385 = vst [vmem:[%s719_s5 + $0x68] sm:$0xff] %v369_v11  ;;  %v291_v24 = vmul.f32 %v579_v16, %v200_v20  ;;  %v295_v25 = vmul.f32 %v579_v16, %v210_v21 }
  0xb8   :  { %374 = vst [vmem:[%s719_s5 + $0x10] sm:$0xff] %v358_v12  ;;  %v318_v26 = vadd.f32 %v584_v17, %v298_v18  ;;  %v322_v27 = vadd.f32 %v584_v17, %v302_v19 }
  0xb9   :  { %378 = vst [vmem:[%s719_s5 + $0x30] sm:$0xff] %v362_v13  ;;  %v311_v30 = vadd.f32 %v584_v17, %v291_v24  ;;  %v315_v31 = vadd.f32 %v584_v17, %v295_v25 }
  0xba   :  { %v350_v32 = vadd.f32 %v334_v22, %v318_v26  ;;  %v354_v33 = vadd.f32 %v338_v23, %v322_v27 }
  0xbb   :  { %v343_v34 = vadd.f32 %v327_v28, %v311_v30  ;;  %v347_v35 = vadd.f32 %v331_v29, %v315_v31 }
  0xbc   :  { %v366_v36 = vmax.f32 %v350_v32, 0.0  ;;  %v370_v37 = vmax.f32 %v354_v33, 0.0 }
  0xbd   :  { %v359_v38 = vmax.f32 %v343_v34, 0.0  ;;  %v363_v39 = vmax.f32 %v347_v35, 0.0  ;;  %v220_v40 = vpop.f32.mrf.mxu2  ;;  %v230_v41 = vpop.f32.mrf.mxu3 }
  0xbe   :  { %382 = vst [vmem:[%s719_s5 + $0x50] sm:$0xff] %v366_v36  ;;  %v299_v42 = vmul.f32 %v579_v16, %v220_v40  ;;  %v303_v43 = vmul.f32 %v579_v16, %v230_v41 }
  0xbf   :  { %386 = vst [vmem:[%s719_s5 + $0x70] sm:$0xff] %v370_v37 }
  0xc0   :  { %375 = vst [vmem:[%s719_s5 + $0x18] sm:$0xff] %v359_v38  ;;  %v319_v46 = vadd.f32 %v584_v17, %v299_v42  ;;  %v323_v16 = vadd.f32 %v584_v17, %v303_v43 }
  0xc1   :  { %379 = vst [vmem:[%s719_s5 + $0x38] sm:$0xff] %v363_v39 }
  0xc2   :  { %v351_v47 = vadd.f32 %v335_v44, %v319_v46  ;;  %v355_v48 = vadd.f32 %v339_v45, %v323_v16 }
  0xc4   :  { %v367_v49 = vmax.f32 %v351_v47, 0.0  ;;  %v371_v50 = vmax.f32 %v355_v48, 0.0 }
  0xc6   :  { %383 = vst [vmem:[%s719_s5 + $0x58] sm:$0xff] %v367_v49 }
  0xc7   :  { %387 = vst [vmem:[%s719_s5 + $0x78] sm:$0xff] %v371_v50 }

// kernel: modified_resnet_forward.39
= control target key start
LH: loop header
LB: loop body
LE: loop exit
PB: predicated region body
PF: predicated region fallthrough
CT: control target
= control target key end

     0   :  { %s491_s1 = inlined_call_operand.vmem [shape: bf16[256,128], index: 1, kind: input, shape index: {}]   ;;  %s492_s0 = inlined_call_operand.vmem [shape: bf16[32,256], index: 0, kind: input, shape index: {}]   ;;  %s493_s2 = inlined_call_operand.vmem [shape: f32[1,128], index: 2, kind: input, shape index: {}]   ;;  %s494_s3 = inlined_call_operand.vmem [shape: f32[1,128], index: 3, kind: input, shape index: {}]   ;;  %s495_s4 = inlined_call_operand.vmem [shape: f32[32,128], index: 4, kind: output, shape index: {}]  }
   0x1   :  { %v349_v0 = vld [vmem:[%s491_s1 + $0x38] sm:$0xff]  ;;  %v348_v2 = vld [vmem:[%s491_s1 + $0x30] sm:$0xff]  ;;  %v347_v4 = vld [vmem:[%s491_s1 + $0x28] sm:$0xff] }
   0x2   :  { %v357_v1 = vld [vmem:[%s491_s1 + $0x78] sm:$0xff]  ;;  %181 = vmatpush.bf16.msra.mxu0 %v349_v0  ;;  %358 = vmatpush.bf16.msra.mxu2 %v349_v0  ;;  %v356_v3 = vld [vmem:[%s491_s1 + $0x70] sm:$0xff]  ;;  %v355_v5 = vld [vmem:[%s491_s1 + $0x68] sm:$0xff] }
   0x3   :  { %200 = vmatpush.bf16.msra.mxu1 %v357_v1  ;;  %366 = vmatpush.bf16.msra.mxu3 %v357_v1  ;;  %v346_v6 = vld [vmem:[%s491_s1 + $0x20] sm:$0xff]  ;;  %v345_v8 = vld [vmem:[%s491_s1 + $0x18] sm:$0xff]  ;;  %v344_v10 = vld [vmem:[%s491_s1 + $0x10] sm:$0xff] }
   0x4   :  { %v354_v7 = vld [vmem:[%s491_s1 + $0x60] sm:$0xff]  ;;  %v353_v9 = vld [vmem:[%s491_s1 + $0x58] sm:$0xff]  ;;  %v352_v11 = vld [vmem:[%s491_s1 + $0x50] sm:$0xff] }
   0x5   :  { %v343_v12 = vld [vmem:[%s491_s1 + $0x8] sm:$0xff]  ;;  %v342_v14 = vld [vmem:[%s491_s1] sm:$0xff]  ;;  %v268_v18 = vld [vmem:[%s492_s0 + $0x10] sm:$0xf] }
   0x6   :  { %182 = vmatpush.bf16.msra.mxu0 %v348_v2  ;;  %359 = vmatpush.bf16.msra.mxu2 %v348_v2  ;;  %v351_v13 = vld [vmem:[%s491_s1 + $0x48] sm:$0xff]  ;;  %v350_v15 = vld [vmem:[%s491_s1 + $0x40] sm:$0xff]  ;;  %v341_v19 = vld [vmem:[%s492_s0 + $0x14] sm:$0xf0] }
   0x7   :  { %201 = vmatpush.bf16.msra.mxu1 %v356_v3  ;;  %367 = vmatpush.bf16.msra.mxu3 %v356_v3  ;;  %v260_v16 = vld [vmem:[%s492_s0] sm:$0xf]  ;;  %v339_v17 = vld [vmem:[%s492_s0 + $0x4] sm:$0xf0]  ;;  %v338_v20 = vld [vmem:[%s492_s0 + $0x4] sm:$0xf]  ;;  %v269_v25 = vor.u32 %v341_v19, %v268_v18 }
   0x8   :  { %v262_v21 = vld [vmem:[%s492_s0 + $0x8] sm:$0xf0]  ;;  %v340_v22 = vld [vmem:[%s492_s0 + $0x14] sm:$0xf]  ;;  %v270_v23 = vld [vmem:[%s492_s0 + $0x18] sm:$0xf0]  ;;  %v261_v24 = vor.u32 %v339_v17, %v260_v16 }
   0x9   :  { %v265_v26 = vor.u32 %v338_v20, %v262_v21  ;;  %v273_v27 = vor.u32 %v340_v22, %v270_v23  ;;  %v374_v29 = vld [vmem:[%s493_s2] ss:$0 sm:$0xff] }
   0xa   :  { %183 = vmatpush.bf16.msra.mxu0 %v347_v4  ;;  %360 = vmatpush.bf16.msra.mxu2 %v347_v4  ;;  %v375_v32 = vld [vmem:[%s494_s3] ss:$0 sm:$0xff] }
   0xb   :  { %202 = vmatpush.bf16.msra.mxu1 %v355_v5  ;;  %368 = vmatpush.bf16.msra.mxu3 %v355_v5 }
   0xe   :  { %184 = vmatpush.bf16.msra.mxu0 %v346_v6  ;;  %361 = vmatpush.bf16.msra.mxu2 %v346_v6 }
   0xf   :  { %203 = vmatpush.bf16.msra.mxu1 %v354_v7  ;;  %369 = vmatpush.bf16.msra.mxu3 %v354_v7 }
  0x12   :  { %185 = vmatpush.bf16.msra.mxu0 %v345_v8  ;;  %362 = vmatpush.bf16.msra.mxu2 %v345_v8 }
  0x13   :  { %204 = vmatpush.bf16.msra.mxu1 %v353_v9  ;;  %370 = vmatpush.bf16.msra.mxu3 %v353_v9 }
  0x16   :  { %186 = vmatpush.bf16.msra.mxu0 %v344_v10  ;;  %363 = vmatpush.bf16.msra.mxu2 %v344_v10 }
  0x17   :  { %205 = vmatpush.bf16.msra.mxu1 %v352_v11  ;;  %371 = vmatpush.bf16.msra.mxu3 %v352_v11 }
  0x1a   :  { %187 = vmatpush.bf16.msra.mxu0 %v343_v12  ;;  %364 = vmatpush.bf16.msra.mxu2 %v343_v12 }
  0x1b   :  { %206 = vmatpush.bf16.msra.mxu1 %v351_v13  ;;  %372 = vmatpush.bf16.msra.mxu3 %v351_v13 }
  0x1e   :  { %188 = vmatpush.bf16.msra.mxu0 %v342_v14  ;;  %365 = vmatpush.bf16.msra.mxu2 %v342_v14 }
  0x1f   :  { %207 = vmatpush.bf16.msra.mxu1 %v350_v15  ;;  %373 = vmatpush.bf16.msra.mxu3 %v350_v15 }
  0x21   :  { %189 = vmatmul.bf16.vlgmr.msra.gmra.mxu0 %v261_v24  ;;  %194 = vmatmul.bf16.vlgmr.msra.gmra.mxu2 %v269_v25 }
  0x22   :  { %208 = vmatmul.bf16.vlgmr.msra.gmra.mxu1 %v265_v26  ;;  %213 = vmatmul.bf16.vlgmr.msra.gmra.mxu3 %v273_v27 }
  0x9e   :  { %v190_v28 = vpop.f32.mrf.mxu0 }
  0x9f   :  { %v209_v30 = vpop.f32.mrf.mxu1 }
  0xa0   :  { %v210_v31 = vadd.f32 %v209_v30, %v190_v28 }
  0xa2   :  { %v238_v33 = vmul.f32 %v374_v29, %v210_v31 }
  0xa4   :  { %v246_v34 = vadd.f32 %v375_v32, %v238_v33  ;;  %v195_v35 = vpop.f32.mrf.mxu2 }
  0xa5   :  { %v214_v36 = vpop.f32.mrf.mxu3 }
  0xa6   :  { %250 = vst [vmem:[%s495_s4] sm:$0xff] %v246_v34  ;;  %v215_v37 = vadd.f32 %v214_v36, %v195_v35  ;;  %v192_v38 = vpop.f32.mrf.mxu0 }
  0xa7   :  { %v211_v39 = vpop.f32.mrf.mxu1 }
  0xa8   :  { %v240_v40 = vmul.f32 %v374_v29, %v215_v37  ;;  %v212_v41 = vadd.f32 %v211_v39, %v192_v38 }
  0xaa   :  { %v248_v42 = vadd.f32 %v375_v32, %v240_v40  ;;  %v239_v43 = vmul.f32 %v374_v29, %v212_v41 }
  0xac   :  { %252 = vst [vmem:[%s495_s4 + $0x10] sm:$0xff] %v248_v42  ;;  %v247_v44 = vadd.f32 %v375_v32, %v239_v43  ;;  %v197_v45 = vpop.f32.mrf.mxu2 }
  0xad   :  { %v216_v46 = vpop.f32.mrf.mxu3 }
  0xae   :  { %251 = vst [vmem:[%s495_s4 + $0x8] sm:$0xff] %v247_v44  ;;  %v217_v47 = vadd.f32 %v216_v46, %v197_v45 }
  0xb0   :  { %v241_v48 = vmul.f32 %v374_v29, %v217_v47 }
  0xb2   :  { %v249_v49 = vadd.f32 %v375_v32, %v241_v48 }
  0xb4   :  { %253 = vst [vmem:[%s495_s4 + $0x18] sm:$0xff] %v249_v49 }

// kernel: modified_resnet_forward.38
= control target key start
LH: loop header
LB: loop body
LE: loop exit
PB: predicated region body
PF: predicated region fallthrough
CT: control target
= control target key end

     0   :  { %s1332_s1 = inlined_call_operand.vmem [shape: bf16[384,128], index: 1, kind: input, shape index: {}]   ;;  %s1333_s0 = inlined_call_operand.vmem [shape: bf16[128,384], index: 0, kind: input, shape index: {}]   ;;  %s1334_s2 = inlined_call_operand.vmem [shape: f32[1,128], index: 2, kind: input, shape index: {}]   ;;  %s1335_s3 = inlined_call_operand.vmem [shape: f32[1,128], index: 3, kind: input, shape index: {}]   ;;  %s1336_s4 = inlined_call_operand.vmem [shape: f32[128,128], index: 4, kind: output, shape index: {}]  }
   0x1   :  { %v902_v0 = vld [vmem:[%s1332_s1 + $0x38] sm:$0xff]  ;;  %v901_v3 = vld [vmem:[%s1332_s1 + $0x30] sm:$0xff]  ;;  %v900_v6 = vld [vmem:[%s1332_s1 + $0x28] sm:$0xff] }
   0x2   :  { %v976_v1 = vld [vmem:[%s1332_s1 + $0x78] sm:$0xff]  ;;  %405 = vmatpush.bf16.msra.mxu0 %v902_v0  ;;  %919 = vmatpush.bf16.msra.mxu3 %v902_v0  ;;  %v991_v4 = vld [vmem:[%s1332_s1 + $0x70] sm:$0xff]  ;;  %v908_v7 = vld [vmem:[%s1332_s1 + $0x68] sm:$0xff] }
   0x3   :  { %v981_v2 = vld [vmem:[%s1332_s1 + $0xb8] sm:$0xff]  ;;  %454 = vmatpush.bf16.msra.mxu1 %v976_v1  ;;  %v996_v5 = vld [vmem:[%s1332_s1 + $0xb0] sm:$0xff]  ;;  %v1009_v8 = vld [vmem:[%s1332_s1 + $0xa8] sm:$0xff] }
   0x4   :  { %503 = vmatpush.bf16.msra.mxu2 %v981_v2  ;;  %v899_v9 = vld [vmem:[%s1332_s1 + $0x20] sm:$0xff]  ;;  %v898_v12 = vld [vmem:[%s1332_s1 + $0x18] sm:$0xff]  ;;  %v897_v15 = vld [vmem:[%s1332_s1 + $0x10] sm:$0xff] }
   0x5   :  { %v1018_v10 = vld [vmem:[%s1332_s1 + $0x60] sm:$0xff]  ;;  %v906_v13 = vld [vmem:[%s1332_s1 + $0x58] sm:$0xff]  ;;  %v905_v16 = vld [vmem:[%s1332_s1 + $0x50] sm:$0xff] }
   0x6   :  { %406 = vmatpush.bf16.msra.mxu0 %v901_v3  ;;  %920 = vmatpush.bf16.msra.mxu3 %v901_v3  ;;  %v1023_v11 = vld [vmem:[%s1332_s1 + $0xa0] sm:$0xff]  ;;  %v1036_v14 = vld [vmem:[%s1332_s1 + $0x98] sm:$0xff]  ;;  %v1048_v17 = vld [vmem:[%s1332_s1 + $0x90] sm:$0xff] }
   0x7   :  { %455 = vmatpush.bf16.msra.mxu1 %v991_v4  ;;  %v896_v18 = vld [vmem:[%s1332_s1 + $0x8] sm:$0xff]  ;;  %v895_v21 = vld [vmem:[%s1332_s1] sm:$0xff]  ;;  %v753_v26 = vld [vmem:[%s1333_s0 + $0x90] sm:$0xf] }
   0x8   :  { %504 = vmatpush.bf16.msra.mxu2 %v996_v5  ;;  %v904_v19 = vld [vmem:[%s1332_s1 + $0x48] sm:$0xff]  ;;  %v903_v22 = vld [vmem:[%s1332_s1 + $0x40] sm:$0xff]  ;;  %v890_v27 = vld [vmem:[%s1333_s0 + $0x98] sm:$0xf0] }
   0x9   :  { %v1060_v20 = vld [vmem:[%s1332_s1 + $0x88] sm:$0xff]  ;;  %v1071_v23 = vld [vmem:[%s1332_s1 + $0x80] sm:$0xff]  ;;  %v683_v29 = vld [vmem:[%s1333_s0 + $0xc] sm:$0xf0]  ;;  %v754_v33 = vor.u32 %v890_v27, %v753_v26 }
   0xa   :  { %407 = vmatpush.bf16.msra.mxu0 %v900_v6  ;;  %921 = vmatpush.bf16.msra.mxu3 %v900_v6  ;;  %v681_v24 = vld [vmem:[%s1333_s0] sm:$0xf]  ;;  %v872_v25 = vld [vmem:[%s1333_s0 + $0x8] sm:$0xf0]  ;;  %v871_v28 = vld [vmem:[%s1333_s0 + $0x4] sm:$0xf] }
   0xb   :  { %456 = vmatpush.bf16.msra.mxu1 %v908_v7  ;;  %v689_v30 = vld [vmem:[%s1333_s0 + $0x8] sm:$0xf]  ;;  %v873_v31 = vld [vmem:[%s1333_s0 + $0x10] sm:$0xf0]  ;;  %v682_v32 = vor.u32 %v872_v25, %v681_v24  ;;  %v686_v34 = vor.u32 %v871_v28, %v683_v29  ;;  %v693_v36 = vld [vmem:[%s1333_s0 + $0x18] sm:$0xf] }
   0xc   :  { %505 = vmatpush.bf16.msra.mxu2 %v1009_v8  ;;  %v690_v35 = vor.u32 %v873_v31, %v689_v30  ;;  %v875_v37 = vld [vmem:[%s1333_s0 + $0x20] sm:$0xf0]  ;;  %v765_v38 = vld [vmem:[%s1333_s0 + $0xa8] sm:$0xf]  ;;  %v893_v39 = vld [vmem:[%s1333_s0 + $0xb0] sm:$0xf0] }
   0xd   :  { %v874_v40 = vld [vmem:[%s1333_s0 + $0x1c] sm:$0xf]  ;;  %v695_v41 = vld [vmem:[%s1333_s0 + $0x24] sm:$0xf0]  ;;  %v701_v42 = vld [vmem:[%s1333_s0 + $0x20] sm:$0xf]  ;;  %v694_v44 = vor.u32 %v875_v37, %v693_v36  ;;  %v766_v45 = vor.u32 %v893_v39, %v765_v38 }
   0xe   :  { %408 = vmatpush.bf16.msra.mxu0 %v899_v9  ;;  %922 = vmatpush.bf16.msra.mxu3 %v899_v9  ;;  %v876_v43 = vld [vmem:[%s1333_s0 + $0x28] sm:$0xf0]  ;;  %v698_v46 = vor.u32 %v874_v40, %v695_v41  ;;  %v705_v48 = vld [vmem:[%s1333_s0 + $0x30] sm:$0xf]  ;;  %v878_v49 = vld [vmem:[%s1333_s0 + $0x38] sm:$0xf0] }
   0xf   :  { %457 = vmatpush.bf16.msra.mxu1 %v1018_v10  ;;  %v702_v47 = vor.u32 %v876_v43, %v701_v42  ;;  %v877_v50 = vld [vmem:[%s1333_s0 + $0x34] sm:$0xf]  ;;  %v755_v52 = vld [vmem:[%s1333_s0 + $0x9c] sm:$0xf0]  ;;  %v713_v54 = vld [vmem:[%s1333_s0 + $0x38] sm:$0xf]  ;;  %v706_v56 = vor.u32 %v878_v49, %v705_v48 }
  0x10   :  { %506 = vmatpush.bf16.msra.mxu2 %v1023_v11  ;;  %v889_v51 = vld [vmem:[%s1333_s0 + $0x94] sm:$0xf]  ;;  %v707_v53 = vld [vmem:[%s1333_s0 + $0x3c] sm:$0xf0]  ;;  %v879_v55 = vld [vmem:[%s1333_s0 + $0x40] sm:$0xf0] }
  0x11   :  { %v758_v57 = vor.u32 %v889_v51, %v755_v52  ;;  %v710_v58 = vor.u32 %v877_v50, %v707_v53  ;;  %v714_v59 = vor.u32 %v879_v55, %v713_v54  ;;  %v717_v60 = vld [vmem:[%s1333_s0 + $0x48] sm:$0xf]  ;;  %v881_v61 = vld [vmem:[%s1333_s0 + $0x50] sm:$0xf0]  ;;  %v880_v62 = vld [vmem:[%s1333_s0 + $0x4c] sm:$0xf] }
  0x12   :  { %409 = vmatpush.bf16.msra.mxu0 %v898_v12  ;;  %923 = vmatpush.bf16.msra.mxu3 %v898_v12  ;;  %v892_v63 = vld [vmem:[%s1333_s0 + $0xac] sm:$0xf]  ;;  %v767_v0 = vld [vmem:[%s1333_s0 + $0xb4] sm:$0xf0]  ;;  %v882_v3 = vld [vmem:[%s1333_s0 + $0x58] sm:$0xf0] }
  0x13   :  { %458 = vmatpush.bf16.msra.mxu1 %v906_v13  ;;  %v884_v9 = vld [vmem:[%s1333_s0 + $0x68] sm:$0xf0]  ;;  %v891_v12 = vld [vmem:[%s1333_s0 + $0xa0] sm:$0xf0]  ;;  %v894_v24 = vld [vmem:[%s1333_s0 + $0xb8] sm:$0xf0] }
  0x14   :  { %507 = vmatpush.bf16.msra.mxu2 %v1036_v14  ;;  %v743_v25 = vld [vmem:[%s1333_s0 + $0x84] sm:$0xf0]  ;;  %v749_v26 = vld [vmem:[%s1333_s0 + $0x80] sm:$0xf]  ;;  %v888_v27 = vld [vmem:[%s1333_s0 + $0x88] sm:$0xf0] }
  0x15   :  { %v750_v31 = vor.u32 %v888_v27, %v749_v26  ;;  %v1235_v36 = vld [vmem:[%s1334_s2] ss:$0 sm:$0xff] }
  0x16   :  { %410 = vmatpush.bf16.msra.mxu0 %v897_v15  ;;  %924 = vmatpush.bf16.msra.mxu3 %v897_v15  ;;  %v885_v15 = vld [vmem:[%s1333_s0 + $0x70] sm:$0xf0]  ;;  %v1240_v39 = vld [vmem:[%s1335_s3] ss:$0 sm:$0xff] }
  0x17   :  { %459 = vmatpush.bf16.msra.mxu1 %v905_v16 }
  0x18   :  { %508 = vmatpush.bf16.msra.mxu2 %v1048_v17 }
  0x1a   :  { %411 = vmatpush.bf16.msra.mxu0 %v896_v18  ;;  %925 = vmatpush.bf16.msra.mxu3 %v896_v18 }
  0x1b   :  { %460 = vmatpush.bf16.msra.mxu1 %v904_v19 }
  0x1c   :  { %509 = vmatpush.bf16.msra.mxu2 %v1060_v20 }
  0x1e   :  { %412 = vmatpush.bf16.msra.mxu0 %v895_v21  ;;  %926 = vmatpush.bf16.msra.mxu3 %v895_v21  ;;  %v887_v21 = vld [vmem:[%s1333_s0 + $0x80] sm:$0xf0] }
  0x1f   :  { %461 = vmatpush.bf16.msra.mxu1 %v903_v22 }
  0x20   :  { %510 = vmatpush.bf16.msra.mxu2 %v1071_v23 }
  0x21   :  { %413 = vmatmul.bf16.vlgmr.msra.gmra.mxu0 %v682_v32  ;;  %443 = vmatmul.bf16.vlgmr.msra.gmra.mxu3 %v754_v33 }
  0x22   :  { %927 = vmatpush.bf16.msrb.mxu3 %v976_v1  ;;  %462 = vmatmul.bf16.vlgmr.msra.gmra.mxu1 %v686_v34  ;;  %v719_v1 = vld [vmem:[%s1333_s0 + $0x54] sm:$0xf0] }
  0x23   :  { %511 = vmatmul.bf16.vlgmr.msra.gmra.mxu2 %v690_v35  ;;  %v722_v6 = vor.u32 %v880_v62, %v719_v1 }
  0x26   :  { %928 = vmatpush.bf16.msrb.mxu3 %v991_v4  ;;  %v718_v4 = vor.u32 %v881_v61, %v717_v60 }
  0x2a   :  { %929 = vmatpush.bf16.msrb.mxu3 %v908_v7 }
  0x2e   :  { %930 = vmatpush.bf16.msrb.mxu3 %v1018_v10  ;;  %v883_v10 = vld [vmem:[%s1333_s0 + $0x64] sm:$0xf] }
  0x31   :  { %418 = vmatmul.bf16.gmra.mxu0 %v694_v44  ;;  %448 = vmatmul.bf16.gmra.mxu3 %v766_v45 }
  0x32   :  { %931 = vmatpush.bf16.msrb.mxu3 %v906_v13  ;;  %467 = vmatmul.bf16.gmra.mxu1 %v698_v46  ;;  %v731_v13 = vld [vmem:[%s1333_s0 + $0x6c] sm:$0xf0] }
  0x33   :  { %516 = vmatmul.bf16.gmra.mxu2 %v702_v47  ;;  %v734_v18 = vor.u32 %v883_v10, %v731_v13 }
  0x36   :  { %932 = vmatpush.bf16.msrb.mxu3 %v905_v16 }
  0x3a   :  { %933 = vmatpush.bf16.msrb.mxu3 %v904_v19 }
  0x3e   :  { %934 = vmatpush.bf16.msrb.mxu3 %v903_v22  ;;  %v886_v22 = vld [vmem:[%s1333_s0 + $0x7c] sm:$0xf] }
  0x3f   :  { %v746_v30 = vor.u32 %v886_v22, %v743_v25 }
  0x41   :  { %423 = vmatmul.bf16.gmra.mxu0 %v706_v56  ;;  %492 = vmatmul.bf16.vlgmr.msrb.gmra.mxu3 %v758_v57 }
  0x42   :  { %935 = vmatpush.bf16.msra.mxu3 %v981_v2  ;;  %472 = vmatmul.bf16.gmra.mxu1 %v710_v58  ;;  %v725_v2 = vld [vmem:[%s1333_s0 + $0x50] sm:$0xf] }
  0x43   :  { %521 = vmatmul.bf16.gmra.mxu2 %v714_v59  ;;  %v726_v7 = vor.u32 %v882_v3, %v725_v2 }
  0x46   :  { %936 = vmatpush.bf16.msra.mxu3 %v996_v5  ;;  %v770_v5 = vor.u32 %v892_v63, %v767_v0 }
  0x4a   :  { %937 = vmatpush.bf16.msra.mxu3 %v1009_v8  ;;  %v729_v8 = vld [vmem:[%s1333_s0 + $0x60] sm:$0xf] }
  0x4b   :  { %v730_v16 = vor.u32 %v884_v9, %v729_v8 }
  0x4e   :  { %938 = vmatpush.bf16.msra.mxu3 %v1023_v11  ;;  %v761_v11 = vld [vmem:[%s1333_s0 + $0x98] sm:$0xf] }
  0x51   :  { %428 = vmatmul.bf16.gmra.mxu0 %v718_v4  ;;  %497 = vmatmul.bf16.gmra.mxu3 %v770_v5 }
  0x52   :  { %939 = vmatpush.bf16.msra.mxu3 %v1036_v14  ;;  %477 = vmatmul.bf16.gmra.mxu1 %v722_v6  ;;  %v737_v14 = vld [vmem:[%s1333_s0 + $0x68] sm:$0xf] }
  0x53   :  { %526 = vmatmul.bf16.gmra.mxu2 %v726_v7  ;;  %v738_v19 = vor.u32 %v885_v15, %v737_v14 }
  0x56   :  { %940 = vmatpush.bf16.msra.mxu3 %v1048_v17  ;;  %v762_v17 = vor.u32 %v891_v12, %v761_v11 }
  0x5a   :  { %941 = vmatpush.bf16.msra.mxu3 %v1060_v20  ;;  %v741_v20 = vld [vmem:[%s1333_s0 + $0x78] sm:$0xf] }
  0x5b   :  { %v742_v28 = vor.u32 %v887_v21, %v741_v20 }
  0x5e   :  { %942 = vmatpush.bf16.msra.mxu3 %v1071_v23  ;;  %v773_v23 = vld [vmem:[%s1333_s0 + $0xb0] sm:$0xf] }
  0x5f   :  { %v774_v29 = vor.u32 %v894_v24, %v773_v23 }
  0x61   :  { %433 = vmatmul.bf16.gmra.mxu0 %v730_v16  ;;  %541 = vmatmul.bf16.vlgmr.msra.gmra.mxu3 %v762_v17 }
  0x62   :  { %482 = vmatmul.bf16.gmra.mxu1 %v734_v18 }
  0x63   :  { %531 = vmatmul.bf16.gmra.mxu2 %v738_v19 }
  0x71   :  { %438 = vmatmul.bf16.gmra.mxu0 %v742_v28  ;;  %546 = vmatmul.bf16.gmra.mxu3 %v774_v29 }
  0x72   :  { %487 = vmatmul.bf16.gmra.mxu1 %v746_v30 }
  0x73   :  { %536 = vmatmul.bf16.gmra.mxu2 %v750_v31 }
  0x9e   :  { %v414_v32 = vpop.f32.mrf.mxu0 }
  0x9f   :  { %v463_v33 = vpop.f32.mrf.mxu1 }
  0xa0   :  { %v464_v34 = vadd.f32 %v463_v33, %v414_v32 }
  0xa4   :  { %v1230_v35 = vpop.f32.mrf.mxu3 }
  0xa6   :  { %v512_v37 = vpop.f32.mrf.mxu2  ;;  %v416_v40 = vpop.f32.mrf.mxu0 }
  0xa7   :  { %v513_v38 = vadd.f32 %v512_v37, %v464_v34  ;;  %v465_v41 = vpop.f32.mrf.mxu1 }
  0xa8   :  { %v466_v45 = vadd.f32 %v465_v41, %v416_v40 }
  0xa9   :  { %v607_v42 = vmul.f32 %v1235_v36, %v513_v38 }
  0xab   :  { %v627_v43 = vadd.f32 %v1240_v39, %v607_v42 }
  0xac   :  { %v1244_v46 = vpop.f32.mrf.mxu3 }
  0xad   :  { %v643_v44 = vmax.f32 %v627_v43, 0.0 }
  0xae   :  { %v514_v47 = vpop.f32.mrf.mxu2  ;;  %v419_v49 = vpop.f32.mrf.mxu0 }
  0xaf   :  { %659 = vst [vmem:[%s1336_s4] sm:$0xff] %v643_v44  ;;  %v515_v48 = vadd.f32 %v514_v47, %v466_v45  ;;  %v468_v50 = vpop.f32.mrf.mxu1 }
  0xb0   :  { %v469_v53 = vadd.f32 %v468_v50, %v419_v49 }
  0xb1   :  { %v608_v51 = vmul.f32 %v1235_v36, %v515_v48 }
  0xb3   :  { %v628_v52 = vadd.f32 %v1240_v39, %v608_v51 }
  0xb4   :  { %v1251_v55 = vpop.f32.mrf.mxu3 }
  0xb5   :  { %v644_v54 = vmax.f32 %v628_v52, 0.0 }
  0xb6   :  { %v517_v56 = vpop.f32.mrf.mxu2  ;;  %v421_v58 = vpop.f32.mrf.mxu0 }
  0xb7   :  { %660 = vst [vmem:[%s1336_s4 + $0x8] sm:$0xff] %v644_v54  ;;  %v518_v57 = vadd.f32 %v517_v56, %v469_v53  ;;  %v470_v59 = vpop.f32.mrf.mxu1 }
  0xb8   :  { %v471_v63 = vadd.f32 %v470_v59, %v421_v58 }
  0xb9   :  { %v609_v60 = vmul.f32 %v1235_v36, %v518_v57 }
  0xbb   :  { %v629_v61 = vadd.f32 %v1240_v39, %v609_v60 }
  0xbc   :  { %v1258_v0 = vpop.f32.mrf.mxu3 }
  0xbd   :  { %v645_v62 = vmax.f32 %v629_v61, 0.0 }
  0xbe   :  { %v519_v1 = vpop.f32.mrf.mxu2  ;;  %v424_v3 = vpop.f32.mrf.mxu0 }
  0xbf   :  { %661 = vst [vmem:[%s1336_s4 + $0x10] sm:$0xff] %v645_v62  ;;  %v520_v2 = vadd.f32 %v519_v1, %v471_v63  ;;  %v473_v4 = vpop.f32.mrf.mxu1 }
  0xc0   :  { %v474_v7 = vadd.f32 %v473_v4, %v424_v3 }
  0xc1   :  { %v610_v5 = vmul.f32 %v1235_v36, %v520_v2 }
  0xc3   :  { %v630_v6 = vadd.f32 %v1240_v39, %v610_v5 }
  0xc4   :  { %v493_v9 = vpop.f32.mrf.mxu3 }
  0xc5   :  { %v646_v8 = vmax.f32 %v630_v6, 0.0  ;;  %v494_v48 = vadd.f32 %v493_v9, %v1230_v35 }
  0xc6   :  { %v522_v10 = vpop.f32.mrf.mxu2  ;;  %v426_v12 = vpop.f32.mrf.mxu0 }
  0xc7   :  { %662 = vst [vmem:[%s1336_s4 + $0x18] sm:$0xff] %v646_v8  ;;  %v523_v11 = vadd.f32 %v522_v10, %v474_v7  ;;  %v475_v13 = vpop.f32.mrf.mxu1 }
  0xc8   :  { %v476_v17 = vadd.f32 %v475_v13, %v426_v12 }
  0xc9   :  { %v611_v14 = vmul.f32 %v1235_v36, %v523_v11 }
  0xcb   :  { %v631_v15 = vadd.f32 %v1240_v39, %v611_v14 }
  0xcc   :  { %v495_v18 = vpop.f32.mrf.mxu3 }
  0xcd   :  { %v647_v16 = vmax.f32 %v631_v15, 0.0  ;;  %v496_v35 = vadd.f32 %v495_v18, %v1244_v46 }
  0xce   :  { %v524_v19 = vpop.f32.mrf.mxu2  ;;  %v429_v21 = vpop.f32.mrf.mxu0 }
  0xcf   :  { %663 = vst [vmem:[%s1336_s4 + $0x20] sm:$0xff] %v647_v16  ;;  %v525_v20 = vadd.f32 %v524_v19, %v476_v17  ;;  %v478_v22 = vpop.f32.mrf.mxu1 }
  0xd0   :  { %v479_v25 = vadd.f32 %v478_v22, %v429_v21 }
  0xd1   :  { %v612_v23 = vmul.f32 %v1235_v36, %v525_v20 }
  0xd3   :  { %v632_v24 = vadd.f32 %v1240_v39, %v612_v23 }
  0xd4   :  { %v498_v27 = vpop.f32.mrf.mxu3 }
  0xd5   :  { %v648_v26 = vmax.f32 %v632_v24, 0.0  ;;  %v499_v11 = vadd.f32 %v498_v27, %v1251_v55 }
  0xd6   :  { %v527_v28 = vpop.f32.mrf.mxu2  ;;  %v431_v30 = vpop.f32.mrf.mxu0 }
  0xd7   :  { %664 = vst [vmem:[%s1336_s4 + $0x28] sm:$0xff] %v648_v26  ;;  %v528_v29 = vadd.f32 %v527_v28, %v479_v25  ;;  %v480_v31 = vpop.f32.mrf.mxu1 }
  0xd8   :  { %v481_v37 = vadd.f32 %v480_v31, %v431_v30 }
  0xd9   :  { %v613_v32 = vmul.f32 %v1235_v36, %v528_v29 }
  0xdb   :  { %v633_v33 = vadd.f32 %v1240_v39, %v613_v32 }
  0xdc   :  { %v500_v38 = vpop.f32.mrf.mxu3 }
  0xdd   :  { %v649_v34 = vmax.f32 %v633_v33, 0.0  ;;  %v501_v23 = vadd.f32 %v500_v38, %v1258_v0 }
  0xde   :  { %v529_v40 = vpop.f32.mrf.mxu2  ;;  %v434_v42 = vpop.f32.mrf.mxu0 }
  0xdf   :  { %665 = vst [vmem:[%s1336_s4 + $0x30] sm:$0xff] %v649_v34  ;;  %v530_v41 = vadd.f32 %v529_v40, %v481_v37  ;;  %v483_v43 = vpop.f32.mrf.mxu1 }
  0xe0   :  { %v484_v47 = vadd.f32 %v483_v43, %v434_v42 }
  0xe1   :  { %v614_v44 = vmul.f32 %v1235_v36, %v530_v41 }
  0xe3   :  { %v634_v45 = vadd.f32 %v1240_v39, %v614_v44 }
  0xe4   :  { %v542_v50 = vpop.f32.mrf.mxu3 }
  0xe5   :  { %v650_v49 = vmax.f32 %v634_v45, 0.0  ;;  %v543_v52 = vadd.f32 %v542_v50, %v494_v48 }
  0xe6   :  { %v532_v51 = vpop.f32.mrf.mxu2  ;;  %v436_v54 = vpop.f32.mrf.mxu0 }
  0xe7   :  { %666 = vst [vmem:[%s1336_s4 + $0x38] sm:$0xff] %v650_v49  ;;  %v533_v53 = vadd.f32 %v532_v51, %v484_v47  ;;  %v619_v56 = vmul.f32 %v1235_v36, %v543_v52  ;;  %v485_v57 = vpop.f32.mrf.mxu1 }
  0xe8   :  { %v486_v63 = vadd.f32 %v485_v57, %v436_v54 }
  0xe9   :  { %v615_v58 = vmul.f32 %v1235_v36, %v533_v53  ;;  %v639_v59 = vadd.f32 %v1240_v39, %v619_v56 }
  0xeb   :  { %v635_v60 = vadd.f32 %v1240_v39, %v615_v58  ;;  %v655_v61 = vmax.f32 %v639_v59, 0.0 }
  0xec   :  { %v544_v1 = vpop.f32.mrf.mxu3 }
  0xed   :  { %v651_v62 = vmax.f32 %v635_v60, 0.0  ;;  %671 = vst [vmem:[%s1336_s4 + $0x60] sm:$0xff] %v655_v61  ;;  %v545_v3 = vadd.f32 %v544_v1, %v496_v35 }
  0xee   :  { %v534_v2 = vpop.f32.mrf.mxu2  ;;  %v439_v6 = vpop.f32.mrf.mxu0 }
  0xef   :  { %667 = vst [vmem:[%s1336_s4 + $0x40] sm:$0xff] %v651_v62  ;;  %v535_v4 = vadd.f32 %v534_v2, %v486_v63  ;;  %v620_v5 = vmul.f32 %v1235_v36, %v545_v3  ;;  %v488_v7 = vpop.f32.mrf.mxu1 }
  0xf0   :  { %v489_v10 = vadd.f32 %v488_v7, %v439_v6 }
  0xf1   :  { %v616_v46 = vmul.f32 %v1235_v36, %v535_v4  ;;  %v640_v8 = vadd.f32 %v1240_v39, %v620_v5 }
  0xf3   :  { %v636_v9 = vadd.f32 %v1240_v39, %v616_v46  ;;  %v656_v12 = vmax.f32 %v640_v8, 0.0 }
  0xf4   :  { %v547_v14 = vpop.f32.mrf.mxu3 }
  0xf5   :  { %v652_v13 = vmax.f32 %v636_v9, 0.0  ;;  %672 = vst [vmem:[%s1336_s4 + $0x68] sm:$0xff] %v656_v12  ;;  %v548_v16 = vadd.f32 %v547_v14, %v499_v11 }
  0xf6   :  { %v537_v15 = vpop.f32.mrf.mxu2  ;;  %v441_v20 = vpop.f32.mrf.mxu0 }
  0xf7   :  { %668 = vst [vmem:[%s1336_s4 + $0x48] sm:$0xff] %v652_v13  ;;  %v538_v17 = vadd.f32 %v537_v15, %v489_v10  ;;  %v621_v18 = vmul.f32 %v1235_v36, %v548_v16  ;;  %v490_v21 = vpop.f32.mrf.mxu1 }
  0xf8   :  { %v491_v26 = vadd.f32 %v490_v21, %v441_v20 }
  0xf9   :  { %v617_v19 = vmul.f32 %v1235_v36, %v538_v17  ;;  %v641_v55 = vadd.f32 %v1240_v39, %v621_v18 }
  0xfb   :  { %v637_v22 = vadd.f32 %v1240_v39, %v617_v19  ;;  %v657_v24 = vmax.f32 %v641_v55, 0.0 }
  0xfc   :  { %v549_v27 = vpop.f32.mrf.mxu3 }
  0xfd   :  { %v653_v25 = vmax.f32 %v637_v22, 0.0  ;;  %673 = vst [vmem:[%s1336_s4 + $0x70] sm:$0xff] %v657_v24  ;;  %v550_v29 = vadd.f32 %v549_v27, %v501_v23 }
  0xfe   :  { %v539_v28 = vpop.f32.mrf.mxu2 }
  0xff   :  { %669 = vst [vmem:[%s1336_s4 + $0x50] sm:$0xff] %v653_v25  ;;  %v540_v30 = vadd.f32 %v539_v28, %v491_v26  ;;  %v622_v31 = vmul.f32 %v1235_v36, %v550_v29 }
 0x101   :  { %v618_v32 = vmul.f32 %v1235_v36, %v540_v30  ;;  %v642_v0 = vadd.f32 %v1240_v39, %v622_v31 }
 0x103   :  { %v638_v33 = vadd.f32 %v1240_v39, %v618_v32  ;;  %v658_v34 = vmax.f32 %v642_v0, 0.0 }
 0x105   :  { %v654_v37 = vmax.f32 %v638_v33, 0.0  ;;  %674 = vst [vmem:[%s1336_s4 + $0x78] sm:$0xff] %v658_v34 }
 0x107   :  { %670 = vst [vmem:[%s1336_s4 + $0x58] sm:$0xff] %v654_v37 }

// kernel: modified_resnet_forward.40
= control target key start
LH: loop header
LB: loop body
LE: loop exit
PB: predicated region body
PF: predicated region fallthrough
CT: control target
= control target key end

     0   :  { %s332_s1 = inlined_call_operand.vmem [shape: bf16[128,128], index: 1, kind: input, shape index: {}]   ;;  %s333_s2 = inlined_call_operand.vmem [shape: f32[1,128], index: 2, kind: input, shape index: {}]   ;;  %s334_s3 = inlined_call_operand.vmem [shape: f32[1,128], index: 3, kind: input, shape index: {}]   ;;  %s335_s0 = inlined_call_operand.vmem [shape: bf16[32,128], index: 0, kind: input, shape index: {}]   ;;  %s336_s4 = inlined_call_operand.vmem [shape: f32[32,128], index: 4, kind: input, shape index: {}]   ;;  %s337_s5 = inlined_call_operand.vmem [shape: f32[32,128], index: 5, kind: output, shape index: {}]  }
   0x1   :  { %v231_v0 = vld [vmem:[%s332_s1 + $0x38] sm:$0xff]  ;;  %v230_v1 = vld [vmem:[%s332_s1 + $0x30] sm:$0xff]  ;;  %v229_v2 = vld [vmem:[%s332_s1 + $0x28] sm:$0xff] }
   0x2   :  { %112 = vmatpush.bf16.msra.mxu0 %v231_v0  ;;  %232 = vmatpush.bf16.msra.mxu1 %v231_v0  ;;  %v228_v3 = vld [vmem:[%s332_s1 + $0x20] sm:$0xff]  ;;  %v227_v4 = vld [vmem:[%s332_s1 + $0x18] sm:$0xff]  ;;  %v226_v5 = vld [vmem:[%s332_s1 + $0x10] sm:$0xff] }
   0x3   :  { %v225_v6 = vld [vmem:[%s332_s1 + $0x8] sm:$0xff]  ;;  %v224_v7 = vld [vmem:[%s332_s1] sm:$0xff]  ;;  %v164_v17 = vld [vmem:[%s336_s4 + $0x10] sm:$0xff] }
   0x4   :  { %v222_v8 = vld [vmem:[%s335_s0] sm:$0xff]  ;;  %v223_v9 = vld [vmem:[%s335_s0 + $0x8] sm:$0xff]  ;;  %v165_v29 = vld [vmem:[%s336_s4 + $0x18] sm:$0xff] }
   0x5   :  { %v240_v10 = vld [vmem:[%s333_s2] ss:$0 sm:$0xff]  ;;  %v163_v28 = vld [vmem:[%s336_s4 + $0x8] sm:$0xff] }
   0x6   :  { %113 = vmatpush.bf16.msra.mxu0 %v230_v1  ;;  %233 = vmatpush.bf16.msra.mxu1 %v230_v1  ;;  %v241_v11 = vld [vmem:[%s334_s3] ss:$0 sm:$0xff] }
   0x7   :  { %v162_v16 = vld [vmem:[%s336_s4] sm:$0xff] }
   0xa   :  { %114 = vmatpush.bf16.msra.mxu0 %v229_v2  ;;  %234 = vmatpush.bf16.msra.mxu1 %v229_v2 }
   0xe   :  { %115 = vmatpush.bf16.msra.mxu0 %v228_v3  ;;  %235 = vmatpush.bf16.msra.mxu1 %v228_v3 }
  0x12   :  { %116 = vmatpush.bf16.msra.mxu0 %v227_v4  ;;  %236 = vmatpush.bf16.msra.mxu1 %v227_v4 }
  0x16   :  { %117 = vmatpush.bf16.msra.mxu0 %v226_v5  ;;  %237 = vmatpush.bf16.msra.mxu1 %v226_v5 }
  0x1a   :  { %118 = vmatpush.bf16.msra.mxu0 %v225_v6  ;;  %238 = vmatpush.bf16.msra.mxu1 %v225_v6 }
  0x1e   :  { %119 = vmatpush.bf16.msra.mxu0 %v224_v7  ;;  %239 = vmatpush.bf16.msra.mxu1 %v224_v7 }
  0x21   :  { %120 = vmatmul.bf16.vlgmr.msra.gmra.mxu0 %v222_v8  ;;  %125 = vmatmul.bf16.vlgmr.msra.gmra.mxu1 %v223_v9 }
  0x9e   :  { %v121_v12 = vpop.f32.mrf.mxu0  ;;  %v126_v13 = vpop.f32.mrf.mxu1 }
  0x9f   :  { %v150_v14 = vmul.f32 %v240_v10, %v121_v12  ;;  %v152_v15 = vmul.f32 %v240_v10, %v126_v13 }
  0xa1   :  { %v158_v18 = vadd.f32 %v241_v11, %v150_v14  ;;  %v160_v19 = vadd.f32 %v241_v11, %v152_v15 }
  0xa3   :  { %v166_v20 = vadd.f32 %v162_v16, %v158_v18  ;;  %v168_v21 = vadd.f32 %v164_v17, %v160_v19 }
  0xa5   :  { %v170_v22 = vmax.f32 %v166_v20, 0.0  ;;  %v172_v23 = vmax.f32 %v168_v21, 0.0 }
  0xa6   :  { %v123_v24 = vpop.f32.mrf.mxu0  ;;  %v128_v25 = vpop.f32.mrf.mxu1 }
  0xa7   :  { %174 = vst [vmem:[%s337_s5] sm:$0xff] %v170_v22  ;;  %v151_v26 = vmul.f32 %v240_v10, %v123_v24  ;;  %v153_v27 = vmul.f32 %v240_v10, %v128_v25 }
  0xa8   :  { %176 = vst [vmem:[%s337_s5 + $0x10] sm:$0xff] %v172_v23 }
  0xa9   :  { %v159_v30 = vadd.f32 %v241_v11, %v151_v26  ;;  %v161_v31 = vadd.f32 %v241_v11, %v153_v27 }
  0xab   :  { %v167_v32 = vadd.f32 %v163_v28, %v159_v30  ;;  %v169_v33 = vadd.f32 %v165_v29, %v161_v31 }
  0xad   :  { %v171_v34 = vmax.f32 %v167_v32, 0.0  ;;  %v173_v35 = vmax.f32 %v169_v33, 0.0 }
  0xaf   :  { %175 = vst [vmem:[%s337_s5 + $0x8] sm:$0xff] %v171_v34 }
  0xb0   :  { %177 = vst [vmem:[%s337_s5 + $0x18] sm:$0xff] %v173_v35 }

// kernel: modified_resnet_forward.41
= control target key start
LH: loop header
LB: loop body
LE: loop exit
PB: predicated region body
PF: predicated region fallthrough
CT: control target
= control target key end

     0   :  { %s304_s1 = inlined_call_operand.vmem [shape: bf16[128,128], index: 1, kind: input, shape index: {}]   ;;  %s305_s2 = inlined_call_operand.vmem [shape: f32[1,128], index: 2, kind: input, shape index: {}]   ;;  %s306_s3 = inlined_call_operand.vmem [shape: f32[1,128], index: 3, kind: input, shape index: {}]   ;;  %s307_s0 = inlined_call_operand.vmem [shape: bf16[32,128], index: 0, kind: input, shape index: {}]   ;;  %s308_s4 = inlined_call_operand.vmem [shape: f32[32,128], index: 4, kind: output, shape index: {}]  }
   0x1   :  { %v220_v0 = vld [vmem:[%s304_s1 + $0x38] sm:$0xff]  ;;  %v219_v1 = vld [vmem:[%s304_s1 + $0x30] sm:$0xff]  ;;  %v218_v2 = vld [vmem:[%s304_s1 + $0x28] sm:$0xff] }
   0x2   :  { %109 = vmatpush.bf16.msra.mxu0 %v220_v0  ;;  %221 = vmatpush.bf16.msra.mxu1 %v220_v0  ;;  %v217_v3 = vld [vmem:[%s304_s1 + $0x20] sm:$0xff]  ;;  %v216_v4 = vld [vmem:[%s304_s1 + $0x18] sm:$0xff]  ;;  %v215_v5 = vld [vmem:[%s304_s1 + $0x10] sm:$0xff] }
   0x3   :  { %v214_v6 = vld [vmem:[%s304_s1 + $0x8] sm:$0xff]  ;;  %v213_v7 = vld [vmem:[%s304_s1] sm:$0xff] }
   0x4   :  { %v211_v8 = vld [vmem:[%s307_s0] sm:$0xff]  ;;  %v212_v9 = vld [vmem:[%s307_s0 + $0x8] sm:$0xff] }
   0x5   :  { %v229_v10 = vld [vmem:[%s305_s2] ss:$0 sm:$0xff] }
   0x6   :  { %110 = vmatpush.bf16.msra.mxu0 %v219_v1  ;;  %222 = vmatpush.bf16.msra.mxu1 %v219_v1  ;;  %v230_v11 = vld [vmem:[%s306_s3] ss:$0 sm:$0xff] }
   0xa   :  { %111 = vmatpush.bf16.msra.mxu0 %v218_v2  ;;  %223 = vmatpush.bf16.msra.mxu1 %v218_v2 }
   0xe   :  { %112 = vmatpush.bf16.msra.mxu0 %v217_v3  ;;  %224 = vmatpush.bf16.msra.mxu1 %v217_v3 }
  0x12   :  { %113 = vmatpush.bf16.msra.mxu0 %v216_v4  ;;  %225 = vmatpush.bf16.msra.mxu1 %v216_v4 }
  0x16   :  { %114 = vmatpush.bf16.msra.mxu0 %v215_v5  ;;  %226 = vmatpush.bf16.msra.mxu1 %v215_v5 }
  0x1a   :  { %115 = vmatpush.bf16.msra.mxu0 %v214_v6  ;;  %227 = vmatpush.bf16.msra.mxu1 %v214_v6 }
  0x1e   :  { %116 = vmatpush.bf16.msra.mxu0 %v213_v7  ;;  %228 = vmatpush.bf16.msra.mxu1 %v213_v7 }
  0x21   :  { %117 = vmatmul.bf16.vlgmr.msra.gmra.mxu0 %v211_v8  ;;  %122 = vmatmul.bf16.vlgmr.msra.gmra.mxu1 %v212_v9 }
  0x9e   :  { %v118_v12 = vpop.f32.mrf.mxu0  ;;  %v123_v13 = vpop.f32.mrf.mxu1 }
  0x9f   :  { %v147_v14 = vmul.f32 %v229_v10, %v118_v12  ;;  %v149_v15 = vmul.f32 %v229_v10, %v123_v13 }
  0xa1   :  { %v155_v16 = vadd.f32 %v230_v11, %v147_v14  ;;  %v157_v17 = vadd.f32 %v230_v11, %v149_v15 }
  0xa3   :  { %v159_v18 = vmax.f32 %v155_v16, 0.0  ;;  %v161_v19 = vmax.f32 %v157_v17, 0.0 }
  0xa5   :  { %163 = vst [vmem:[%s308_s4] sm:$0xff] %v159_v18 }
  0xa6   :  { %165 = vst [vmem:[%s308_s4 + $0x10] sm:$0xff] %v161_v19  ;;  %v120_v20 = vpop.f32.mrf.mxu0  ;;  %v125_v21 = vpop.f32.mrf.mxu1 }
  0xa7   :  { %v148_v22 = vmul.f32 %v229_v10, %v120_v20  ;;  %v150_v23 = vmul.f32 %v229_v10, %v125_v21 }
  0xa9   :  { %v156_v24 = vadd.f32 %v230_v11, %v148_v22  ;;  %v158_v25 = vadd.f32 %v230_v11, %v150_v23 }
  0xab   :  { %v160_v26 = vmax.f32 %v156_v24, 0.0  ;;  %v162_v27 = vmax.f32 %v158_v25, 0.0 }
  0xad   :  { %164 = vst [vmem:[%s308_s4 + $0x8] sm:$0xff] %v160_v26 }
  0xae   :  { %166 = vst [vmem:[%s308_s4 + $0x18] sm:$0xff] %v162_v27 }

// kernel: modified_resnet_forward.43
= control target key start
LH: loop header
LB: loop body
LE: loop exit
PB: predicated region body
PF: predicated region fallthrough
CT: control target
= control target key end

     0   :  { %s1399_s1 = inlined_call_operand.vmem [shape: bf16[512,256], index: 1, kind: input, shape index: {}]   ;;  %s1400_s0 = inlined_call_operand.vmem [shape: bf16[16,512], index: 0, kind: input, shape index: {}]   ;;  %s1401_s2 = inlined_call_operand.vmem [shape: f32[1,256], index: 2, kind: input, shape index: {}]   ;;  %s1402_s3 = inlined_call_operand.vmem [shape: f32[1,256], index: 3, kind: input, shape index: {}]   ;;  %s1403_s4 = inlined_call_operand.vmem [shape: f32[16,256], index: 4, kind: output, shape index: {}]  }
   0x1   :  { %v666_v0 = vld [vmem:[%s1399_s1 + $0x70] sm:$0xf]  ;;  %v883_v1 = vld [vmem:[%s1399_s1 + $0x74] sm:$0xf0]  ;;  %v658_v11 = vld [vmem:[%s1399_s1 + $0x60] sm:$0xf] }
   0x2   :  { %v730_v2 = vld [vmem:[%s1399_s1 + $0xf0] sm:$0xf]  ;;  %v667_v3 = vor.u32 %v883_v1, %v666_v0  ;;  %v899_v4 = vld [vmem:[%s1399_s1 + $0xf4] sm:$0xf0]  ;;  %v881_v13 = vld [vmem:[%s1399_s1 + $0x64] sm:$0xf0] }
   0x3   :  { %v794_v5 = vld [vmem:[%s1399_s1 + $0x170] sm:$0xf]  ;;  %v915_v6 = vld [vmem:[%s1399_s1 + $0x174] sm:$0xf0]  ;;  %v731_v7 = vor.u32 %v899_v4, %v730_v2  ;;  %v722_v14 = vld [vmem:[%s1399_s1 + $0xe0] sm:$0xf]  ;;  %v659_v16 = vor.u32 %v881_v13, %v658_v11 }
   0x4   :  { %v795_v8 = vor.u32 %v915_v6, %v794_v5  ;;  %v858_v9 = vld [vmem:[%s1399_s1 + $0x1f0] sm:$0xf]  ;;  %v931_v10 = vld [vmem:[%s1399_s1 + $0x1f4] sm:$0xf0]  ;;  %437 = vmatpush.bf16.msra.mxu0 %v667_v3  ;;  %v897_v15 = vld [vmem:[%s1399_s1 + $0xe4] sm:$0xf0] }
   0x5   :  { %v859_v12 = vor.u32 %v931_v10, %v858_v9  ;;  %451 = vmatpush.bf16.msra.mxu1 %v731_v7  ;;  %v723_v17 = vor.u32 %v897_v15, %v722_v14  ;;  %v786_v18 = vld [vmem:[%s1399_s1 + $0x160] sm:$0xf]  ;;  %v913_v19 = vld [vmem:[%s1399_s1 + $0x164] sm:$0xf0]  ;;  %v650_v23 = vld [vmem:[%s1399_s1 + $0x50] sm:$0xf] }
   0x6   :  { %465 = vmatpush.bf16.msra.mxu2 %v795_v8  ;;  %v850_v20 = vld [vmem:[%s1399_s1 + $0x1e0] sm:$0xf]  ;;  %v787_v21 = vor.u32 %v913_v19, %v786_v18  ;;  %v929_v22 = vld [vmem:[%s1399_s1 + $0x1e4] sm:$0xf0]  ;;  %v879_v24 = vld [vmem:[%s1399_s1 + $0x54] sm:$0xf0] }
   0x7   :  { %479 = vmatpush.bf16.msra.mxu3 %v859_v12  ;;  %v851_v25 = vor.u32 %v929_v22, %v850_v20  ;;  %v714_v26 = vld [vmem:[%s1399_s1 + $0xd0] sm:$0xf]  ;;  %v895_v27 = vld [vmem:[%s1399_s1 + $0xd4] sm:$0xf0]  ;;  %v651_v29 = vor.u32 %v879_v24, %v650_v23  ;;  %v642_v35 = vld [vmem:[%s1399_s1 + $0x40] sm:$0xf] }
   0x8   :  { %v778_v28 = vld [vmem:[%s1399_s1 + $0x150] sm:$0xf]  ;;  %438 = vmatpush.bf16.msra.mxu0 %v659_v16  ;;  %v911_v30 = vld [vmem:[%s1399_s1 + $0x154] sm:$0xf0]  ;;  %v715_v33 = vor.u32 %v895_v27, %v714_v26  ;;  %v877_v36 = vld [vmem:[%s1399_s1 + $0x44] sm:$0xf0] }
   0x9   :  { %v842_v31 = vld [vmem:[%s1399_s1 + $0x1d0] sm:$0xf]  ;;  %v927_v32 = vld [vmem:[%s1399_s1 + $0x1d4] sm:$0xf0]  ;;  %452 = vmatpush.bf16.msra.mxu1 %v723_v17  ;;  %v779_v34 = vor.u32 %v911_v30, %v778_v28  ;;  %v706_v37 = vld [vmem:[%s1399_s1 + $0xc0] sm:$0xf]  ;;  %v643_v44 = vor.u32 %v877_v36, %v642_v35 }
   0xa   :  { %466 = vmatpush.bf16.msra.mxu2 %v787_v21  ;;  %v843_v38 = vor.u32 %v927_v32, %v842_v31  ;;  %v893_v39 = vld [vmem:[%s1399_s1 + $0xc4] sm:$0xf0]  ;;  %v770_v40 = vld [vmem:[%s1399_s1 + $0x140] sm:$0xf]  ;;  %v634_v47 = vld [vmem:[%s1399_s1 + $0x30] sm:$0xf] }
   0xb   :  { %480 = vmatpush.bf16.msra.mxu3 %v851_v25  ;;  %v909_v41 = vld [vmem:[%s1399_s1 + $0x144] sm:$0xf0]  ;;  %v834_v42 = vld [vmem:[%s1399_s1 + $0x1c0] sm:$0xf]  ;;  %v707_v45 = vor.u32 %v893_v39, %v706_v37  ;;  %v875_v48 = vld [vmem:[%s1399_s1 + $0x34] sm:$0xf0] }
   0xc   :  { %v925_v43 = vld [vmem:[%s1399_s1 + $0x1c4] sm:$0xf0]  ;;  %439 = vmatpush.bf16.msra.mxu0 %v651_v29  ;;  %v771_v46 = vor.u32 %v909_v41, %v770_v40  ;;  %v698_v49 = vld [vmem:[%s1399_s1 + $0xb0] sm:$0xf]  ;;  %v891_v51 = vld [vmem:[%s1399_s1 + $0xb4] sm:$0xf0]  ;;  %v635_v56 = vor.u32 %v875_v48, %v634_v47 }
   0xd   :  { %453 = vmatpush.bf16.msra.mxu1 %v715_v33  ;;  %v835_v50 = vor.u32 %v925_v43, %v834_v42  ;;  %v762_v52 = vld [vmem:[%s1399_s1 + $0x130] sm:$0xf]  ;;  %v907_v53 = vld [vmem:[%s1399_s1 + $0x134] sm:$0xf0]  ;;  %v699_v57 = vor.u32 %v891_v51, %v698_v49  ;;  %v626_v59 = vld [vmem:[%s1399_s1 + $0x20] sm:$0xf] }
   0xe   :  { %467 = vmatpush.bf16.msra.mxu2 %v779_v34  ;;  %v826_v54 = vld [vmem:[%s1399_s1 + $0x1b0] sm:$0xf]  ;;  %v923_v55 = vld [vmem:[%s1399_s1 + $0x1b4] sm:$0xf0]  ;;  %v763_v58 = vor.u32 %v907_v53, %v762_v52  ;;  %v873_v60 = vld [vmem:[%s1399_s1 + $0x24] sm:$0xf0] }
   0xf   :  { %481 = vmatpush.bf16.msra.mxu3 %v843_v38  ;;  %v690_v61 = vld [vmem:[%s1399_s1 + $0xa0] sm:$0xf]  ;;  %v827_v62 = vor.u32 %v923_v55, %v826_v54  ;;  %v889_v63 = vld [vmem:[%s1399_s1 + $0xa4] sm:$0xf0]  ;;  %v627_v4 = vor.u32 %v873_v60, %v626_v59  ;;  %v618_v7 = vld [vmem:[%s1399_s1 + $0x10] sm:$0xf] }
  0x10   :  { %440 = vmatpush.bf16.msra.mxu0 %v643_v44  ;;  %v754_v0 = vld [vmem:[%s1399_s1 + $0x120] sm:$0xf]  ;;  %v905_v1 = vld [vmem:[%s1399_s1 + $0x124] sm:$0xf0]  ;;  %v691_v5 = vor.u32 %v889_v63, %v690_v61  ;;  %v871_v8 = vld [vmem:[%s1399_s1 + $0x14] sm:$0xf0] }
  0x11   :  { %454 = vmatpush.bf16.msra.mxu1 %v707_v45  ;;  %v818_v2 = vld [vmem:[%s1399_s1 + $0x1a0] sm:$0xf]  ;;  %v921_v3 = vld [vmem:[%s1399_s1 + $0x1a4] sm:$0xf0]  ;;  %v755_v6 = vor.u32 %v905_v1, %v754_v0  ;;  %v682_v9 = vld [vmem:[%s1399_s1 + $0x90] sm:$0xf]  ;;  %v619_v17 = vor.u32 %v871_v8, %v618_v7 }
  0x12   :  { %468 = vmatpush.bf16.msra.mxu2 %v771_v46  ;;  %v819_v10 = vor.u32 %v921_v3, %v818_v2  ;;  %v887_v11 = vld [vmem:[%s1399_s1 + $0x94] sm:$0xf0]  ;;  %v746_v12 = vld [vmem:[%s1399_s1 + $0x110] sm:$0xf]  ;;  %v610_v16 = vld [vmem:[%s1399_s1] sm:$0xf] }
  0x13   :  { %482 = vmatpush.bf16.msra.mxu3 %v835_v50  ;;  %v903_v13 = vld [vmem:[%s1399_s1 + $0x114] sm:$0xf0]  ;;  %v810_v14 = vld [vmem:[%s1399_s1 + $0x190] sm:$0xf]  ;;  %v869_v18 = vld [vmem:[%s1399_s1 + $0x4] sm:$0xf0]  ;;  %v683_v21 = vor.u32 %v887_v11, %v682_v9 }
  0x14   :  { %441 = vmatpush.bf16.msra.mxu0 %v635_v56  ;;  %v919_v15 = vld [vmem:[%s1399_s1 + $0x194] sm:$0xf0]  ;;  %v674_v19 = vld [vmem:[%s1399_s1 + $0x80] sm:$0xf]  ;;  %v885_v20 = vld [vmem:[%s1399_s1 + $0x84] sm:$0xf0]  ;;  %v747_v22 = vor.u32 %v903_v13, %v746_v12  ;;  %v611_v33 = vor.u32 %v869_v18, %v610_v16 }
  0x15   :  { %455 = vmatpush.bf16.msra.mxu1 %v699_v57  ;;  %v738_v23 = vld [vmem:[%s1399_s1 + $0x100] sm:$0xf]  ;;  %v901_v24 = vld [vmem:[%s1399_s1 + $0x104] sm:$0xf0]  ;;  %v811_v26 = vor.u32 %v919_v15, %v810_v14  ;;  %v882_v28 = vld [vmem:[%s1399_s1 + $0x74] sm:$0xf]  ;;  %v675_v37 = vor.u32 %v885_v20, %v674_v19 }
  0x16   :  { %469 = vmatpush.bf16.msra.mxu2 %v763_v58  ;;  %v802_v25 = vld [vmem:[%s1399_s1 + $0x180] sm:$0xf]  ;;  %v917_v27 = vld [vmem:[%s1399_s1 + $0x184] sm:$0xf0]  ;;  %v668_v29 = vld [vmem:[%s1399_s1 + $0x78] sm:$0xf0]  ;;  %v739_v38 = vor.u32 %v901_v24, %v738_v23 }
  0x17   :  { %483 = vmatpush.bf16.msra.mxu3 %v827_v62  ;;  %v898_v30 = vld [vmem:[%s1399_s1 + $0xf4] sm:$0xf]  ;;  %v732_v31 = vld [vmem:[%s1399_s1 + $0xf8] sm:$0xf0]  ;;  %v880_v39 = vld [vmem:[%s1399_s1 + $0x64] sm:$0xf]  ;;  %v803_v43 = vor.u32 %v917_v27, %v802_v25  ;;  %v671_v44 = vor.u32 %v882_v28, %v668_v29 }
  0x18   :  { %442 = vmatpush.bf16.msra.mxu0 %v627_v4  ;;  %v914_v32 = vld [vmem:[%s1399_s1 + $0x174] sm:$0xf]  ;;  %v796_v34 = vld [vmem:[%s1399_s1 + $0x178] sm:$0xf0]  ;;  %v660_v40 = vld [vmem:[%s1399_s1 + $0x68] sm:$0xf0]  ;;  %v735_v49 = vor.u32 %v898_v30, %v732_v31 }
  0x19   :  { %456 = vmatpush.bf16.msra.mxu1 %v691_v5  ;;  %v930_v35 = vld [vmem:[%s1399_s1 + $0x1f4] sm:$0xf]  ;;  %v860_v36 = vld [vmem:[%s1399_s1 + $0x1f8] sm:$0xf0]  ;;  %v602_v41 = vld [vmem:[%s1400_s0 + $0x8] sm:$0xf]  ;;  %v799_v50 = vor.u32 %v914_v32, %v796_v34  ;;  %v663_v63 = vor.u32 %v880_v39, %v660_v40 }
  0x1a   :  { %470 = vmatpush.bf16.msra.mxu2 %v755_v6  ;;  %v867_v42 = vld [vmem:[%s1400_s0 + $0x14] sm:$0xf0]  ;;  %v896_v45 = vld [vmem:[%s1399_s1 + $0xe4] sm:$0xf]  ;;  %v724_v46 = vld [vmem:[%s1399_s1 + $0xe8] sm:$0xf0]  ;;  %v863_v54 = vor.u32 %v930_v35, %v860_v36 }
  0x1b   :  { %484 = vmatpush.bf16.msra.mxu3 %v819_v10  ;;  %v912_v47 = vld [vmem:[%s1399_s1 + $0x164] sm:$0xf]  ;;  %v788_v48 = vld [vmem:[%s1399_s1 + $0x168] sm:$0xf0]  ;;  %v604_v52 = vld [vmem:[%s1400_s0 + $0x18] sm:$0xf0]  ;;  %v1206_v55 = vor.u32 %v867_v42, %v602_v41  ;;  %v727_v1 = vor.u32 %v896_v45, %v724_v46 }
  0x1c   :  { %443 = vmatpush.bf16.msra.mxu0 %v619_v17  ;;  %v865_v51 = vld [vmem:[%s1400_s0 + $0xc] sm:$0xf]  ;;  %v594_v53 = vld [vmem:[%s1400_s0] sm:$0xf]  ;;  %v866_v56 = vld [vmem:[%s1400_s0 + $0xc] sm:$0xf0]  ;;  %v791_v2 = vor.u32 %v912_v47, %v788_v48 }
  0x1d   :  { %457 = vmatpush.bf16.msra.mxu1 %v683_v21  ;;  %v864_v57 = vld [vmem:[%s1400_s0 + $0x4] sm:$0xf]  ;;  %v596_v58 = vld [vmem:[%s1400_s0 + $0x10] sm:$0xf0]  ;;  %v852_v60 = vld [vmem:[%s1399_s1 + $0x1e8] sm:$0xf0]  ;;  %v1223_v61 = vor.u32 %v865_v51, %v604_v52  ;;  %v1225_v62 = vor.u32 %v866_v56, %v594_v53 }
  0x1e   :  { %471 = vmatpush.bf16.msra.mxu2 %v747_v22  ;;  %v928_v59 = vld [vmem:[%s1399_s1 + $0x1e4] sm:$0xf]  ;;  %v1227_v0 = vor.u32 %v864_v57, %v596_v58  ;;  %v878_v3 = vld [vmem:[%s1399_s1 + $0x54] sm:$0xf]  ;;  %v652_v4 = vld [vmem:[%s1399_s1 + $0x58] sm:$0xf0] }
  0x1f   :  { %485 = vmatpush.bf16.msra.mxu3 %v811_v26  ;;  %v894_v5 = vld [vmem:[%s1399_s1 + $0xd4] sm:$0xf]  ;;  %v855_v6 = vor.u32 %v928_v59, %v852_v60  ;;  %v716_v7 = vld [vmem:[%s1399_s1 + $0xd8] sm:$0xf0]  ;;  %v655_v12 = vor.u32 %v878_v3, %v652_v4  ;;  %v876_v15 = vld [vmem:[%s1399_s1 + $0x44] sm:$0xf] }
  0x20   :  { %444 = vmatpush.bf16.msra.mxu0 %v611_v33  ;;  %v910_v8 = vld [vmem:[%s1399_s1 + $0x154] sm:$0xf]  ;;  %v780_v9 = vld [vmem:[%s1399_s1 + $0x158] sm:$0xf0]  ;;  %v719_v13 = vor.u32 %v894_v5, %v716_v7  ;;  %v644_v16 = vld [vmem:[%s1399_s1 + $0x48] sm:$0xf0] }
  0x21   :  { %458 = vmatpush.bf16.msra.mxu1 %v675_v37  ;;  %v926_v10 = vld [vmem:[%s1399_s1 + $0x1d4] sm:$0xf]  ;;  %v844_v11 = vld [vmem:[%s1399_s1 + $0x1d8] sm:$0xf0]  ;;  %v783_v14 = vor.u32 %v910_v8, %v780_v9  ;;  %v892_v17 = vld [vmem:[%s1399_s1 + $0xc4] sm:$0xf]  ;;  %v647_v24 = vor.u32 %v876_v15, %v644_v16 }
  0x22   :  { %472 = vmatpush.bf16.msra.mxu2 %v739_v38  ;;  %v847_v18 = vor.u32 %v926_v10, %v844_v11  ;;  %v708_v19 = vld [vmem:[%s1399_s1 + $0xc8] sm:$0xf0]  ;;  %v908_v20 = vld [vmem:[%s1399_s1 + $0x144] sm:$0xf]  ;;  %v874_v27 = vld [vmem:[%s1399_s1 + $0x34] sm:$0xf] }
  0x23   :  { %486 = vmatpush.bf16.msra.mxu3 %v803_v43  ;;  %445 = vmatmul.bf16.vlgmr.msra.gmra.mxu0 %v1225_v62  ;;  %v772_v21 = vld [vmem:[%s1399_s1 + $0x148] sm:$0xf0]  ;;  %v924_v22 = vld [vmem:[%s1399_s1 + $0x1c4] sm:$0xf]  ;;  %v711_v25 = vor.u32 %v892_v17, %v708_v19  ;;  %v636_v28 = vld [vmem:[%s1399_s1 + $0x38] sm:$0xf0] }
  0x24   :  { %493 = vmatpush.bf16.msrb.mxu0 %v671_v44  ;;  %459 = vmatmul.bf16.vlgmr.msra.gmra.mxu1 %v1227_v0  ;;  %v836_v23 = vld [vmem:[%s1399_s1 + $0x1c8] sm:$0xf0]  ;;  %v775_v26 = vor.u32 %v908_v20, %v772_v21  ;;  %v890_v29 = vld [vmem:[%s1399_s1 + $0xb4] sm:$0xf]  ;;  %v700_v31 = vld [vmem:[%s1399_s1 + $0xb8] sm:$0xf0]  ;;  %v639_v36 = vor.u32 %v874_v27, %v636_v28 }
  0x25   :  { %507 = vmatpush.bf16.msrb.mxu1 %v735_v49  ;;  %473 = vmatmul.bf16.vlgmr.msra.gmra.mxu2 %v1206_v55  ;;  %v839_v30 = vor.u32 %v924_v22, %v836_v23  ;;  %v906_v32 = vld [vmem:[%s1399_s1 + $0x134] sm:$0xf]  ;;  %v764_v33 = vld [vmem:[%s1399_s1 + $0x138] sm:$0xf0]  ;;  %v703_v37 = vor.u32 %v890_v29, %v700_v31  ;;  %v872_v39 = vld [vmem:[%s1399_s1 + $0x24] sm:$0xf] }
  0x26   :  { %521 = vmatpush.bf16.msrb.mxu2 %v799_v50  ;;  %487 = vmatmul.bf16.vlgmr.msra.gmra.mxu3 %v1223_v61  ;;  %v922_v34 = vld [vmem:[%s1399_s1 + $0x1b4] sm:$0xf]  ;;  %v828_v35 = vld [vmem:[%s1399_s1 + $0x1b8] sm:$0xf0]  ;;  %v767_v38 = vor.u32 %v906_v32, %v764_v33  ;;  %v628_v40 = vld [vmem:[%s1399_s1 + $0x28] sm:$0xf0] }
  0x27   :  { %535 = vmatpush.bf16.msrb.mxu3 %v863_v54  ;;  %v888_v41 = vld [vmem:[%s1399_s1 + $0xa4] sm:$0xf]  ;;  %v831_v42 = vor.u32 %v922_v34, %v828_v35  ;;  %v692_v43 = vld [vmem:[%s1399_s1 + $0xa8] sm:$0xf0]  ;;  %v631_v48 = vor.u32 %v872_v39, %v628_v40  ;;  %v870_v51 = vld [vmem:[%s1399_s1 + $0x14] sm:$0xf] }
  0x28   :  { %494 = vmatpush.bf16.msrb.mxu0 %v663_v63  ;;  %v904_v44 = vld [vmem:[%s1399_s1 + $0x124] sm:$0xf]  ;;  %v756_v45 = vld [vmem:[%s1399_s1 + $0x128] sm:$0xf0]  ;;  %v695_v49 = vor.u32 %v888_v41, %v692_v43  ;;  %v620_v52 = vld [vmem:[%s1399_s1 + $0x18] sm:$0xf0] }
  0x29   :  { %508 = vmatpush.bf16.msrb.mxu1 %v727_v1  ;;  %v920_v46 = vld [vmem:[%s1399_s1 + $0x1a4] sm:$0xf]  ;;  %v820_v47 = vld [vmem:[%s1399_s1 + $0x1a8] sm:$0xf0]  ;;  %v759_v50 = vor.u32 %v904_v44, %v756_v45  ;;  %v886_v53 = vld [vmem:[%s1399_s1 + $0x94] sm:$0xf]  ;;  %v623_v63 = vor.u32 %v870_v51, %v620_v52 }
  0x2a   :  { %522 = vmatpush.bf16.msrb.mxu2 %v791_v2  ;;  %v823_v54 = vor.u32 %v920_v46, %v820_v47  ;;  %v684_v56 = vld [vmem:[%s1399_s1 + $0x98] sm:$0xf0]  ;;  %v902_v57 = vld [vmem:[%s1399_s1 + $0x114] sm:$0xf]  ;;  %v868_v3 = vld [vmem:[%s1399_s1 + $0x4] sm:$0xf] }
  0x2b   :  { %536 = vmatpush.bf16.msrb.mxu3 %v855_v6  ;;  %v748_v58 = vld [vmem:[%s1399_s1 + $0x118] sm:$0xf0]  ;;  %v918_v59 = vld [vmem:[%s1399_s1 + $0x194] sm:$0xf]  ;;  %v687_v1 = vor.u32 %v886_v53, %v684_v56  ;;  %v612_v4 = vld [vmem:[%s1399_s1 + $0x8] sm:$0xf0] }
  0x2c   :  { %495 = vmatpush.bf16.msrb.mxu0 %v655_v12  ;;  %v812_v60 = vld [vmem:[%s1399_s1 + $0x198] sm:$0xf0]  ;;  %v751_v2 = vor.u32 %v902_v57, %v748_v58  ;;  %v884_v5 = vld [vmem:[%s1399_s1 + $0x84] sm:$0xf]  ;;  %v676_v7 = vld [vmem:[%s1399_s1 + $0x88] sm:$0xf0]  ;;  %v615_v12 = vor.u32 %v868_v3, %v612_v4 }
  0x2d   :  { %509 = vmatpush.bf16.msrb.mxu1 %v719_v13  ;;  %v815_v6 = vor.u32 %v918_v59, %v812_v60  ;;  %v900_v8 = vld [vmem:[%s1399_s1 + $0x104] sm:$0xf]  ;;  %v740_v9 = vld [vmem:[%s1399_s1 + $0x108] sm:$0xf0]  ;;  %v679_v13 = vor.u32 %v884_v5, %v676_v7  ;;  %v564_v19 = vld [vmem:[%s1401_s2] sm:$0x3] }
  0x2e   :  { %523 = vmatpush.bf16.msrb.mxu2 %v783_v14  ;;  %v916_v10 = vld [vmem:[%s1399_s1 + $0x184] sm:$0xf]  ;;  %v804_v11 = vld [vmem:[%s1399_s1 + $0x188] sm:$0xf0]  ;;  %v743_v14 = vor.u32 %v900_v8, %v740_v9  ;;  %v574_v21 = vld [vmem:[%s1402_s3] sm:$0x3] }
  0x2f   :  { %537 = vmatpush.bf16.msrb.mxu3 %v847_v18  ;;  %v807_v15 = vor.u32 %v916_v10, %v804_v11  ;;  %v566_v23 = vperm.slane %v564_v19, 0  ;;  %v567_v40 = vperm.slane %v564_v19, 1 }
  0x30   :  { %496 = vmatpush.bf16.msrb.mxu0 %v647_v24  ;;  %v576_v24 = vperm.slane %v574_v21, 0 }
  0x31   :  { %510 = vmatpush.bf16.msrb.mxu1 %v711_v25 }
  0x32   :  { %524 = vmatpush.bf16.msrb.mxu2 %v775_v26 }
  0x33   :  { %538 = vmatpush.bf16.msrb.mxu3 %v839_v30 }
  0x34   :  { %497 = vmatpush.bf16.msrb.mxu0 %v639_v36 }
  0x35   :  { %511 = vmatpush.bf16.msrb.mxu1 %v703_v37 }
  0x36   :  { %525 = vmatpush.bf16.msrb.mxu2 %v767_v38 }
  0x37   :  { %539 = vmatpush.bf16.msrb.mxu3 %v831_v42  ;;  %v577_v42 = vperm.slane %v574_v21, 1 }
  0x38   :  { %498 = vmatpush.bf16.msrb.mxu0 %v631_v48 }
  0x39   :  { %512 = vmatpush.bf16.msrb.mxu1 %v695_v49 }
  0x3a   :  { %526 = vmatpush.bf16.msrb.mxu2 %v759_v50 }
  0x3b   :  { %540 = vmatpush.bf16.msrb.mxu3 %v823_v54 }
  0x3c   :  { %499 = vmatpush.bf16.msrb.mxu0 %v623_v63 }
  0x3d   :  { %513 = vmatpush.bf16.msrb.mxu1 %v687_v1 }
  0x3e   :  { %527 = vmatpush.bf16.msrb.mxu2 %v751_v2 }
  0x3f   :  { %541 = vmatpush.bf16.msrb.mxu3 %v815_v6 }
  0x40   :  { %500 = vmatpush.bf16.msrb.mxu0 %v615_v12 }
  0x41   :  { %514 = vmatpush.bf16.msrb.mxu1 %v679_v13 }
  0x42   :  { %528 = vmatpush.bf16.msrb.mxu2 %v743_v14 }
  0x43   :  { %542 = vmatpush.bf16.msrb.mxu3 %v807_v15  ;;  %501 = vmatmul.bf16.vlgmr.msrb.gmra.mxu0 %v1225_v62 }
  0x44   :  { %515 = vmatmul.bf16.vlgmr.msrb.gmra.mxu1 %v1227_v0 }
  0x45   :  { %529 = vmatmul.bf16.vlgmr.msrb.gmra.mxu2 %v1206_v55 }
  0x46   :  { %543 = vmatmul.bf16.vlgmr.msrb.gmra.mxu3 %v1223_v61 }
  0xa0   :  { %v446_v16 = vpop.f32.mrf.mxu0 }
  0xa1   :  { %v460_v17 = vpop.f32.mrf.mxu1 }
  0xa2   :  { %v461_v18 = vadd.f32 %v460_v17, %v446_v16 }
  0xa8   :  { %v474_v20 = vpop.f32.mrf.mxu2  ;;  %v448_v55 = vpop.f32.mrf.mxu0 }
  0xa9   :  { %v475_v22 = vadd.f32 %v474_v20, %v461_v18  ;;  %v488_v62 = vpop.f32.mrf.mxu3  ;;  %v462_v25 = vpop.f32.mrf.mxu1 }
  0xaa   :  { %v463_v26 = vadd.f32 %v462_v25, %v448_v55 }
  0xab   :  { %v489_v0 = vadd.f32 %v488_v62, %v475_v22 }
  0xad   :  { %v570_v61 = vmul.f32 %v566_v23, %v489_v0 }
  0xaf   :  { %v580_v27 = vadd.f32 %v576_v24, %v570_v61 }
  0xb0   :  { %v476_v28 = vpop.f32.mrf.mxu2 }
  0xb1   :  { %584 = vst [vmem:[%s1403_s4] sm:$0xff] %v580_v27  ;;  %v477_v29 = vadd.f32 %v476_v28, %v463_v26  ;;  %v490_v30 = vpop.f32.mrf.mxu3 }
  0xb3   :  { %v491_v31 = vadd.f32 %v490_v30, %v477_v29 }
  0xb5   :  { %v572_v32 = vmul.f32 %v566_v23, %v491_v31 }
  0xb7   :  { %v582_v33 = vadd.f32 %v576_v24, %v572_v32 }
  0xb9   :  { %586 = vst [vmem:[%s1403_s4 + $0x10] sm:$0xff] %v582_v33 }
  0xc0   :  { %v502_v34 = vpop.f32.mrf.mxu0 }
  0xc1   :  { %v516_v35 = vpop.f32.mrf.mxu1 }
  0xc2   :  { %v517_v36 = vadd.f32 %v516_v35, %v502_v34 }
  0xc8   :  { %v530_v37 = vpop.f32.mrf.mxu2  ;;  %v504_v43 = vpop.f32.mrf.mxu0 }
  0xc9   :  { %v531_v38 = vadd.f32 %v530_v37, %v517_v36  ;;  %v544_v39 = vpop.f32.mrf.mxu3  ;;  %v518_v44 = vpop.f32.mrf.mxu1 }
  0xca   :  { %v519_v47 = vadd.f32 %v518_v44, %v504_v43 }
  0xcb   :  { %v545_v41 = vadd.f32 %v544_v39, %v531_v38 }
  0xcd   :  { %v571_v45 = vmul.f32 %v567_v40, %v545_v41 }
  0xcf   :  { %v581_v46 = vadd.f32 %v577_v42, %v571_v45 }
  0xd0   :  { %v532_v48 = vpop.f32.mrf.mxu2 }
  0xd1   :  { %585 = vst [vmem:[%s1403_s4 + $0x8] sm:$0xff] %v581_v46  ;;  %v533_v49 = vadd.f32 %v532_v48, %v519_v47  ;;  %v546_v50 = vpop.f32.mrf.mxu3 }
  0xd3   :  { %v547_v51 = vadd.f32 %v546_v50, %v533_v49 }
  0xd5   :  { %v573_v52 = vmul.f32 %v567_v40, %v547_v51 }
  0xd7   :  { %v583_v53 = vadd.f32 %v577_v42, %v573_v52 }
  0xd9   :  { %587 = vst [vmem:[%s1403_s4 + $0x18] sm:$0xff] %v583_v53 }

// kernel: modified_resnet_forward.42
= control target key start
LH: loop header
LB: loop body
LE: loop exit
PB: predicated region body
PF: predicated region fallthrough
CT: control target
= control target key end

     0   :  { %s805_s15 = smov 0   ;;  %s807_s16 = smov 0   ;;  %s907_s0 = inlined_call_operand.vmem [shape: bf16[32,640], index: 0, kind: input, shape index: {}]   ;;  %s908_s1 = inlined_call_operand.vmem [shape: bf16[640,128], index: 1, kind: input, shape index: {}]   ;;  %s909_s2 = inlined_call_operand.vmem [shape: f32[1,128], index: 2, kind: input, shape index: {}]   ;;  %s910_s3 = inlined_call_operand.vmem [shape: f32[1,128], index: 3, kind: input, shape index: {}]   ;;  %s911_s4 = inlined_call_operand.vmem [shape: f32[32,128], index: 4, kind: output, shape index: {}]  }
   0x1   :  { %s809_s17 = smov 0   ;;  %s811_s18 = smov 0  }
   0x2   :  { %s813_s19 = smov 0  }
   0x3 LB: > { %s26_s20 = sadd.s32 1, %s773_s18  ;;  %p49_p1 = scmp.ne.s32.totalorder %s765_s16, %s761_s15  ;;  %s777_s19 = sphi %s813_s19, %s14_s19   ;;  %s773_s18 = sphi %s811_s18, %s915_s18   ;;  %s769_s17 = sphi %s809_s17, %s914_s17   ;;  %s765_s16 = sphi %s807_s16, %s913_s16   ;;  %s761_s15 = sphi %s805_s15, %s912_s15  }
   0x4   : > { %p27_p0 = scmp.ge.s32.totalorder %s26_s20, 5  ;;  %p50_p2 = scmp.eq.s32.totalorder %s777_s19, 0 }
   0x5   : > { %s42_s22 = sadd.s32 1, %s765_s16  ;;  %p625_p5 = scmp.ge.s32.totalorder %s777_s19, 5 }
   0x6   : > { %s917_s20 = smov (%p27_p0, %s26_s20), 0  ;;  %p51_p3 = por %p50_p2, %p49_p1 }
   0x7   : > { %s38_s21 = ssub.s32 %s773_s18, %s917_s20  ;;  %195 = sbr.rel (%p625_p5) target bundleno = 20 (0x14), region = 24 }
   0x8   : > { %p40_p4 = scmp.eq.s32.totalorder %s38_s21, 0 }
   0xa   : > { %s840_s23 = scalar_select %p40_p4, %s765_s16, %s42_s22  }
   0xc   : > { %198 = sbr.rel (!%p51_p3) target bundleno = 20 (0x14), region = 28  ;;  %s200_s24 = sand.u32 (%p51_p3), 1, %s765_s16  }
   0xd   : > { %s627_s25 = sshll.u32 (%p51_p3), %s773_s18, 2  ;;  %s626_s26 = sshll.u32 (%p51_p3), %s200_s24, 4 }
   0xe   : > { %s207_s29 = scalar_lea.vmem (%p51_p3), %s907_s0, %s627_s25  ;;  %s202_s30 = scalar_lea.vmem (%p51_p3), [#allocation3], %s626_s26 }
   0xf   : > { %v224_v0 = vld [vmem:[%s207_s29] sm:$0xf] (%p51_p3)  ;;  %v226_v1 = vld [vmem:[%s207_s29 + $0x14] sm:$0xf] (%p51_p3)  ;;  %v228_v2 = vld [vmem:[%s207_s29 + $0x28] sm:$0xf] (%p51_p3) }
  0x10   : > { %225 = vst [vmem:[%s202_s30] sm:$0xf] (%p51_p3), %v224_v0  ;;  %v230_v3 = vld [vmem:[%s207_s29 + $0x3c] sm:$0xf] (%p51_p3) }
  0x11   : > { %227 = vst [vmem:[%s202_s30 + $0x4] sm:$0xf] %v226_v1 }
  0x12   : > { %229 = vst [vmem:[%s202_s30 + $0x8] sm:$0xf] %v228_v2 }
  0x13   : > { %231 = vst [vmem:[%s202_s30 + $0xc] sm:$0xf] %v230_v3 }
  0x14 PF: > { %p628_p6 = scmp.ge.s32.totalorder %s777_s19, 1  ;;  %p274_p7 = scmp.lt.s32.totalorder %s777_s19, 6 }
  0x16   : > { %p275_p8 = pnand %p628_p6, %p274_p7 }
  0x17   : > { %s281_s5 = sand.u32 (!%p275_p8), 1, %s761_s15   ;;  %s630_s6 = sshll.u32 (!%p275_p8), %s769_s17, 4 }
  0x18   : > { %278 = sbr.rel (%p275_p8) target bundleno = 223 (0xdf), region = 73  ;;  %s852_s7 = sshll.u32 (!%p275_p8), %s281_s5, 4 }
  0x19   : > { %p325_p9 = scmp.lt.s32.totalorder (!%p275_p8), %s630_s6, 79  ;;  %s283_s12 = scalar_lea.vmem (!%p275_p8), [#allocation3], %s852_s7 }
  0x1a   : > { %p632_p10 = scmp.ne.s32.totalorder (!%p275_p8), %s769_s17, 0 }
  0x1d   : > { %s919_s6 = smov (!%p325_p9, %s630_s6), 79  ;;  %351 = sbr.rel (%p632_p10) target bundleno = 39 (0x27), region = 81 }
  0x1e   : > { %s631_s8 = sshll.u32 %s919_s6, 2 }
  0x1f   : > { %s857_s11 = scalar_lea.vmem %s908_s1, %s631_s8 }
  0x22   : > { %v779_v4 = vmov 0.0  }
  0x23   : > { %352 = vst [vmem:[#allocation2 + $0x10] sm:$0xff] %v779_v4 }
  0x24   : > { %353 = vst [vmem:[#allocation2] sm:$0xff] %v779_v4 }
  0x25   : > { %354 = vst [vmem:[#allocation2 + $0x18] sm:$0xff] %v779_v4 }
  0x26   : > { %355 = vst [vmem:[#allocation2 + $0x8] sm:$0xff] %v779_v4 }
  0x27 PF: > { %v687_v5 = vld [vmem:[%s857_s11 + $0x38] sm:$0xff]  ;;  %v686_v6 = vld [vmem:[%s857_s11 + $0x30] sm:$0xff]  ;;  %v685_v7 = vld [vmem:[%s857_s11 + $0x28] sm:$0xff]  ;;  %p673_p11 = scmp.ne.s32.totalorder %s769_s17, 4 }
  0x28   : > { %440 = vmatpush.bf16.msra.mxu0 %v687_v5  ;;  %688 = vmatpush.bf16.msra.mxu1 %v687_v5  ;;  %v684_v8 = vld [vmem:[%s857_s11 + $0x20] sm:$0xff]  ;;  %v683_v9 = vld [vmem:[%s857_s11 + $0x18] sm:$0xff]  ;;  %v682_v10 = vld [vmem:[%s857_s11 + $0x10] sm:$0xff] }
  0x29   : > { %v681_v11 = vld [vmem:[%s857_s11 + $0x8] sm:$0xff]  ;;  %v680_v12 = vld [vmem:[%s857_s11] sm:$0xff] }
  0x2a   : > { %v678_v13 = vld [vmem:[%s283_s12] sm:$0xff]  ;;  %v679_v14 = vld [vmem:[%s283_s12 + $0x8] sm:$0xff] }
  0x2b   : > { %v356_v15 = vld [vmem:[#allocation2 + $0x10] sm:$0xff]  ;;  %v357_v21 = vld [vmem:[#allocation2] sm:$0xff] }
  0x2c   : > { %441 = vmatpush.bf16.msra.mxu0 %v686_v6  ;;  %689 = vmatpush.bf16.msra.mxu1 %v686_v6  ;;  %v358_v16 = vld [vmem:[#allocation2 + $0x18] sm:$0xff] }
  0x2d   : > { %v359_v22 = vld [vmem:[#allocation2 + $0x8] sm:$0xff] }
  0x30   : > { %442 = vmatpush.bf16.msra.mxu0 %v685_v7  ;;  %690 = vmatpush.bf16.msra.mxu1 %v685_v7 }
  0x34   : > { %443 = vmatpush.bf16.msra.mxu0 %v684_v8  ;;  %691 = vmatpush.bf16.msra.mxu1 %v684_v8 }
  0x38   : > { %444 = vmatpush.bf16.msra.mxu0 %v683_v9  ;;  %692 = vmatpush.bf16.msra.mxu1 %v683_v9 }
  0x3c   : > { %445 = vmatpush.bf16.msra.mxu0 %v682_v10  ;;  %693 = vmatpush.bf16.msra.mxu1 %v682_v10 }
  0x40   : > { %446 = vmatpush.bf16.msra.mxu0 %v681_v11  ;;  %694 = vmatpush.bf16.msra.mxu1 %v681_v11 }
  0x44   : > { %447 = vmatpush.bf16.msra.mxu0 %v680_v12  ;;  %695 = vmatpush.bf16.msra.mxu1 %v680_v12 }
  0x47   : > { %448 = vmatmul.bf16.vlgmr.msra.gmra.mxu0 %v678_v13  ;;  %453 = vmatmul.bf16.vlgmr.msra.gmra.mxu1 %v679_v14 }
  0xc4   : > { %v449_v17 = vpop.f32.mrf.mxu0  ;;  %v454_v18 = vpop.f32.mrf.mxu1 }
  0xc5   : > { %v459_v19 = vadd.f32 %v449_v17, %v356_v15  ;;  %v461_v20 = vadd.f32 %v454_v18, %v358_v16 }
  0xc7   : > { %463 = vst [vmem:[#allocation2 + $0x10] sm:$0xff] %v459_v19 }
  0xc8   : > { %465 = vst [vmem:[#allocation2 + $0x18] sm:$0xff] %v461_v20 }
  0xcc   : > { %v451_v23 = vpop.f32.mrf.mxu0  ;;  %v456_v24 = vpop.f32.mrf.mxu1  ;;  %470 = sbr.rel (%p673_p11) target bundleno = 223 (0xdf), region = 85 }
  0xcd   : > { %v460_v25 = vadd.f32 %v451_v23, %v357_v21  ;;  %v462_v26 = vadd.f32 %v456_v24, %v359_v22 }
  0xcf   : > { %464 = vst [vmem:[#allocation2] sm:$0xff] %v460_v25 }
  0xd0   : > { %466 = vst [vmem:[#allocation2 + $0x8] sm:$0xff] %v462_v26 }
  0xd1   : > { %v471_v27 = vld [vmem:[#allocation2 + $0x10] sm:$0xff]  ;;  %v737_v28 = vld [vmem:[%s909_s2] ss:$0 sm:$0xff]  ;;  %v473_v33 = vld [vmem:[#allocation2 + $0x18] sm:$0xff] }
  0xd2   : > { %v738_v29 = vld [vmem:[%s910_s3] ss:$0 sm:$0xff]  ;;  %v479_v31 = vmul.f32 %v737_v28, %v471_v27  ;;  %v481_v35 = vmul.f32 %v737_v28, %v473_v33 }
  0xd4   : > { %v487_v37 = vadd.f32 %v738_v29, %v479_v31  ;;  %v489_v39 = vadd.f32 %v738_v29, %v481_v35 }
  0xd6   : > { %v472_v30 = vld [vmem:[#allocation2] sm:$0xff]  ;;  %v491_v41 = vmax.f32 %v487_v37, 0.0  ;;  %v493_v43 = vmax.f32 %v489_v39, 0.0 }
  0xd7   : > { %v480_v32 = vmul.f32 %v737_v28, %v472_v30  ;;  %v474_v34 = vld [vmem:[#allocation2 + $0x8] sm:$0xff] }
  0xd8   : > { %v482_v36 = vmul.f32 %v737_v28, %v474_v34  ;;  %495 = vst [vmem:[%s911_s4] sm:$0xff] %v491_v41 }
  0xd9   : > { %v488_v38 = vadd.f32 %v738_v29, %v480_v32  ;;  %497 = vst [vmem:[%s911_s4 + $0x10] sm:$0xff] %v493_v43 }
  0xda   : > { %v490_v40 = vadd.f32 %v738_v29, %v482_v36 }
  0xdb   : > { %v492_v42 = vmax.f32 %v488_v38, 0.0 }
  0xdc   : > { %v494_v44 = vmax.f32 %v490_v40, 0.0 }
  0xdd   : > { %496 = vst [vmem:[%s911_s4 + $0x8] sm:$0xff] %v492_v42 }
  0xde   : > { %498 = vst [vmem:[%s911_s4 + $0x18] sm:$0xff] %v494_v44 }
  0xdf PF: > { %s14_s19 = sadd.s32 1, %s777_s19   ;;  %s912_s15 = smov %s765_s16 }
  0xe0   : > { %p11_p12 = scmp.ge.s32.totalorder %s14_s19, 7   ;;  %s913_s16 = smov %s840_s23 }
  0xe1   : > { %s914_s17 = smov %s773_s18  ;;  %s915_s18 = smov %s917_s20 }
  0xe2   :  { %13 = sbr.rel (!%p11_p12) target bundleno = 3 (0x3), region = 129 }

// kernel: modified_resnet_forward.44
= control target key start
LH: loop header
LB: loop body
LE: loop exit
PB: predicated region body
PF: predicated region fallthrough
CT: control target
= control target key end

     0   :  { %s781_s1 = inlined_call_operand.vmem [shape: bf16[256,256], index: 1, kind: input, shape index: {}]   ;;  %s782_s0 = inlined_call_operand.vmem [shape: bf16[16,256], index: 0, kind: input, shape index: {}]   ;;  %s783_s2 = inlined_call_operand.vmem [shape: f32[1,256], index: 2, kind: input, shape index: {}]   ;;  %s784_s3 = inlined_call_operand.vmem [shape: f32[1,256], index: 3, kind: input, shape index: {}]   ;;  %s785_s4 = inlined_call_operand.vmem [shape: f32[16,256], index: 4, kind: input, shape index: {}]   ;;  %s786_s5 = inlined_call_operand.vmem [shape: f32[16,256], index: 5, kind: output, shape index: {}]  }
   0x1   :  { %v413_v0 = vld [vmem:[%s781_s1 + $0x70] sm:$0xf]  ;;  %v500_v1 = vld [vmem:[%s781_s1 + $0x74] sm:$0xf0]  ;;  %v499_v5 = vld [vmem:[%s781_s1 + $0x74] sm:$0xf] }
   0x2   :  { %v477_v2 = vld [vmem:[%s781_s1 + $0xf0] sm:$0xf]  ;;  %v414_v3 = vor.u32 %v500_v1, %v413_v0  ;;  %v516_v4 = vld [vmem:[%s781_s1 + $0xf4] sm:$0xf0]  ;;  %v415_v6 = vld [vmem:[%s781_s1 + $0x78] sm:$0xf0] }
   0x3   :  { %v478_v7 = vor.u32 %v516_v4, %v477_v2  ;;  %v418_v8 = vor.u32 %v499_v5, %v415_v6  ;;  %v515_v9 = vld [vmem:[%s781_s1 + $0xf4] sm:$0xf]  ;;  %v479_v10 = vld [vmem:[%s781_s1 + $0xf8] sm:$0xf0]  ;;  %v405_v11 = vld [vmem:[%s781_s1 + $0x60] sm:$0xf] }
   0x4   :  { %236 = vmatpush.bf16.msra.mxu0 %v414_v3  ;;  %v482_v12 = vor.u32 %v515_v9, %v479_v10  ;;  %v498_v13 = vld [vmem:[%s781_s1 + $0x64] sm:$0xf0]  ;;  %v469_v14 = vld [vmem:[%s781_s1 + $0xe0] sm:$0xf]  ;;  %v497_v18 = vld [vmem:[%s781_s1 + $0x64] sm:$0xf] }
   0x5   :  { %v514_v15 = vld [vmem:[%s781_s1 + $0xe4] sm:$0xf0]  ;;  %250 = vmatpush.bf16.msra.mxu1 %v478_v7  ;;  %264 = vmatpush.bf16.msra.mxu2 %v418_v8  ;;  %v406_v16 = vor.u32 %v498_v13, %v405_v11  ;;  %v407_v19 = vld [vmem:[%s781_s1 + $0x68] sm:$0xf0]  ;;  %v513_v20 = vld [vmem:[%s781_s1 + $0xe4] sm:$0xf] }
   0x6   :  { %v470_v17 = vor.u32 %v514_v15, %v469_v14  ;;  %278 = vmatpush.bf16.msra.mxu3 %v482_v12  ;;  %v410_v21 = vor.u32 %v497_v18, %v407_v19  ;;  %v471_v22 = vld [vmem:[%s781_s1 + $0xe8] sm:$0xf0]  ;;  %v397_v23 = vld [vmem:[%s781_s1 + $0x50] sm:$0xf]  ;;  %v496_v24 = vld [vmem:[%s781_s1 + $0x54] sm:$0xf0] }
   0x7   :  { %v474_v25 = vor.u32 %v513_v20, %v471_v22  ;;  %v461_v26 = vld [vmem:[%s781_s1 + $0xd0] sm:$0xf]  ;;  %v512_v27 = vld [vmem:[%s781_s1 + $0xd4] sm:$0xf0]  ;;  %v495_v28 = vld [vmem:[%s781_s1 + $0x54] sm:$0xf]  ;;  %v398_v29 = vor.u32 %v496_v24, %v397_v23 }
   0x8   :  { %237 = vmatpush.bf16.msra.mxu0 %v406_v16  ;;  %v399_v30 = vld [vmem:[%s781_s1 + $0x58] sm:$0xf0]  ;;  %v511_v31 = vld [vmem:[%s781_s1 + $0xd4] sm:$0xf]  ;;  %v462_v33 = vor.u32 %v512_v27, %v461_v26  ;;  %v389_v35 = vld [vmem:[%s781_s1 + $0x40] sm:$0xf] }
   0x9   :  { %v463_v32 = vld [vmem:[%s781_s1 + $0xd8] sm:$0xf0]  ;;  %251 = vmatpush.bf16.msra.mxu1 %v470_v17  ;;  %265 = vmatpush.bf16.msra.mxu2 %v410_v21  ;;  %v402_v34 = vor.u32 %v495_v28, %v399_v30  ;;  %v494_v36 = vld [vmem:[%s781_s1 + $0x44] sm:$0xf0]  ;;  %v453_v37 = vld [vmem:[%s781_s1 + $0xc0] sm:$0xf] }
   0xa   :  { %279 = vmatpush.bf16.msra.mxu3 %v474_v25  ;;  %v466_v38 = vor.u32 %v511_v31, %v463_v32  ;;  %v510_v39 = vld [vmem:[%s781_s1 + $0xc4] sm:$0xf0]  ;;  %v493_v40 = vld [vmem:[%s781_s1 + $0x44] sm:$0xf]  ;;  %v391_v41 = vld [vmem:[%s781_s1 + $0x48] sm:$0xf0]  ;;  %v390_v44 = vor.u32 %v494_v36, %v389_v35 }
   0xb   :  { %v509_v42 = vld [vmem:[%s781_s1 + $0xc4] sm:$0xf]  ;;  %v455_v43 = vld [vmem:[%s781_s1 + $0xc8] sm:$0xf0]  ;;  %v454_v45 = vor.u32 %v510_v39, %v453_v37  ;;  %v394_v46 = vor.u32 %v493_v40, %v391_v41  ;;  %v381_v47 = vld [vmem:[%s781_s1 + $0x30] sm:$0xf] }
   0xc   :  { %238 = vmatpush.bf16.msra.mxu0 %v398_v29  ;;  %v492_v48 = vld [vmem:[%s781_s1 + $0x34] sm:$0xf0]  ;;  %v445_v49 = vld [vmem:[%s781_s1 + $0xb0] sm:$0xf]  ;;  %v458_v50 = vor.u32 %v509_v42, %v455_v43  ;;  %v491_v52 = vld [vmem:[%s781_s1 + $0x34] sm:$0xf] }
   0xd   :  { %252 = vmatpush.bf16.msra.mxu1 %v462_v33  ;;  %266 = vmatpush.bf16.msra.mxu2 %v402_v34  ;;  %v508_v51 = vld [vmem:[%s781_s1 + $0xb4] sm:$0xf0]  ;;  %v383_v53 = vld [vmem:[%s781_s1 + $0x38] sm:$0xf0]  ;;  %v507_v54 = vld [vmem:[%s781_s1 + $0xb4] sm:$0xf]  ;;  %v382_v56 = vor.u32 %v492_v48, %v381_v47 }
   0xe   :  { %280 = vmatpush.bf16.msra.mxu3 %v466_v38  ;;  %v447_v55 = vld [vmem:[%s781_s1 + $0xb8] sm:$0xf0]  ;;  %v446_v57 = vor.u32 %v508_v51, %v445_v49  ;;  %v386_v58 = vor.u32 %v491_v52, %v383_v53  ;;  %v373_v59 = vld [vmem:[%s781_s1 + $0x20] sm:$0xf]  ;;  %v490_v60 = vld [vmem:[%s781_s1 + $0x24] sm:$0xf0] }
   0xf   :  { %v437_v61 = vld [vmem:[%s781_s1 + $0xa0] sm:$0xf]  ;;  %v450_v62 = vor.u32 %v507_v54, %v447_v55  ;;  %v506_v63 = vld [vmem:[%s781_s1 + $0xa4] sm:$0xf0]  ;;  %v489_v0 = vld [vmem:[%s781_s1 + $0x24] sm:$0xf]  ;;  %v374_v4 = vor.u32 %v490_v60, %v373_v59 }
  0x10   :  { %239 = vmatpush.bf16.msra.mxu0 %v390_v44  ;;  %v375_v1 = vld [vmem:[%s781_s1 + $0x28] sm:$0xf0]  ;;  %v505_v2 = vld [vmem:[%s781_s1 + $0xa4] sm:$0xf]  ;;  %v438_v5 = vor.u32 %v506_v63, %v437_v61  ;;  %v365_v7 = vld [vmem:[%s781_s1 + $0x10] sm:$0xf] }
  0x11   :  { %253 = vmatpush.bf16.msra.mxu1 %v454_v45  ;;  %267 = vmatpush.bf16.msra.mxu2 %v394_v46  ;;  %v439_v3 = vld [vmem:[%s781_s1 + $0xa8] sm:$0xf0]  ;;  %v378_v6 = vor.u32 %v489_v0, %v375_v1  ;;  %v488_v8 = vld [vmem:[%s781_s1 + $0x14] sm:$0xf0]  ;;  %v429_v9 = vld [vmem:[%s781_s1 + $0x90] sm:$0xf] }
  0x12   :  { %281 = vmatpush.bf16.msra.mxu3 %v458_v50  ;;  %v442_v10 = vor.u32 %v505_v2, %v439_v3  ;;  %v504_v11 = vld [vmem:[%s781_s1 + $0x94] sm:$0xf0]  ;;  %v487_v12 = vld [vmem:[%s781_s1 + $0x14] sm:$0xf]  ;;  %v367_v13 = vld [vmem:[%s781_s1 + $0x18] sm:$0xf0]  ;;  %v366_v16 = vor.u32 %v488_v8, %v365_v7 }
  0x13   :  { %v503_v14 = vld [vmem:[%s781_s1 + $0x94] sm:$0xf]  ;;  %v431_v15 = vld [vmem:[%s781_s1 + $0x98] sm:$0xf0]  ;;  %v430_v17 = vor.u32 %v504_v11, %v429_v9  ;;  %v370_v18 = vor.u32 %v487_v12, %v367_v13  ;;  %v357_v19 = vld [vmem:[%s781_s1] sm:$0xf] }
  0x14   :  { %240 = vmatpush.bf16.msra.mxu0 %v382_v56  ;;  %v486_v20 = vld [vmem:[%s781_s1 + $0x4] sm:$0xf0]  ;;  %v421_v21 = vld [vmem:[%s781_s1 + $0x80] sm:$0xf]  ;;  %v434_v22 = vor.u32 %v503_v14, %v431_v15  ;;  %v485_v24 = vld [vmem:[%s781_s1 + $0x4] sm:$0xf] }
  0x15   :  { %254 = vmatpush.bf16.msra.mxu1 %v446_v57  ;;  %268 = vmatpush.bf16.msra.mxu2 %v386_v58  ;;  %v502_v23 = vld [vmem:[%s781_s1 + $0x84] sm:$0xf0]  ;;  %v359_v25 = vld [vmem:[%s781_s1 + $0x8] sm:$0xf0]  ;;  %v501_v26 = vld [vmem:[%s781_s1 + $0x84] sm:$0xf]  ;;  %v358_v28 = vor.u32 %v486_v20, %v357_v19 }
  0x16   :  { %282 = vmatpush.bf16.msra.mxu3 %v450_v62  ;;  %v423_v27 = vld [vmem:[%s781_s1 + $0x88] sm:$0xf0]  ;;  %v349_v29 = vld [vmem:[%s782_s0] sm:$0xf]  ;;  %v484_v30 = vld [vmem:[%s782_s0 + $0x4] sm:$0xf0]  ;;  %v422_v31 = vor.u32 %v502_v23, %v421_v21  ;;  %v362_v32 = vor.u32 %v485_v24, %v359_v25 }
  0x17   :  { %v483_v33 = vld [vmem:[%s782_s0 + $0x4] sm:$0xf]  ;;  %v351_v34 = vld [vmem:[%s782_s0 + $0x8] sm:$0xf0]  ;;  %v426_v35 = vor.u32 %v501_v26, %v423_v27  ;;  %v350_v36 = vor.u32 %v484_v30, %v349_v29  ;;  %v307_v38 = vld [vmem:[%s783_s2] sm:$0x3] }
  0x18   :  { %241 = vmatpush.bf16.msra.mxu0 %v374_v4  ;;  %v354_v37 = vor.u32 %v483_v33, %v351_v34  ;;  %v317_v39 = vld [vmem:[%s784_s3] sm:$0x3]  ;;  %v309_v41 = vperm.slane %v307_v38, 0  ;;  %v310_v49 = vperm.slane %v307_v38, 1  ;;  %v328_v59 = vld [vmem:[%s785_s4 + $0x8] sm:$0xff]  ;;  %v329_v62 = vld [vmem:[%s785_s4 + $0x10] sm:$0xff] }
  0x19   :  { %255 = vmatpush.bf16.msra.mxu1 %v438_v5  ;;  %269 = vmatpush.bf16.msra.mxu2 %v378_v6  ;;  %v319_v44 = vperm.slane %v317_v39, 0  ;;  %v327_v46 = vld [vmem:[%s785_s4] sm:$0xff]  ;;  %v320_v54 = vperm.slane %v317_v39, 1  ;;  %v330_v8 = vld [vmem:[%s785_s4 + $0x18] sm:$0xff] }
  0x1a   :  { %283 = vmatpush.bf16.msra.mxu3 %v442_v10 }
  0x1c   :  { %242 = vmatpush.bf16.msra.mxu0 %v366_v16 }
  0x1d   :  { %256 = vmatpush.bf16.msra.mxu1 %v430_v17  ;;  %270 = vmatpush.bf16.msra.mxu2 %v370_v18 }
  0x1e   :  { %284 = vmatpush.bf16.msra.mxu3 %v434_v22 }
  0x20   :  { %243 = vmatpush.bf16.msra.mxu0 %v358_v28 }
  0x21   :  { %257 = vmatpush.bf16.msra.mxu1 %v422_v31  ;;  %271 = vmatpush.bf16.msra.mxu2 %v362_v32 }
  0x22   :  { %285 = vmatpush.bf16.msra.mxu3 %v426_v35 }
  0x23   :  { %244 = vmatmul.bf16.vlgmr.msra.gmra.mxu0 %v350_v36 }
  0x24   :  { %258 = vmatmul.bf16.vlgmr.msra.gmra.mxu1 %v354_v37  ;;  %272 = vmatmul.bf16.vlgmr.msra.gmra.mxu2 %v350_v36 }
  0x25   :  { %286 = vmatmul.bf16.vlgmr.msra.gmra.mxu3 %v354_v37 }
  0xa0   :  { %v245_v40 = vpop.f32.mrf.mxu0 }
  0xa1   :  { %v259_v42 = vpop.f32.mrf.mxu1 }
  0xa2   :  { %v260_v43 = vadd.f32 %v259_v42, %v245_v40 }
  0xa4   :  { %v313_v45 = vmul.f32 %v309_v41, %v260_v43 }
  0xa6   :  { %v323_v47 = vadd.f32 %v319_v44, %v313_v45 }
  0xa7   :  { %v273_v48 = vpop.f32.mrf.mxu2 }
  0xa8   :  { %v331_v50 = vadd.f32 %v327_v46, %v323_v47  ;;  %v287_v51 = vpop.f32.mrf.mxu3  ;;  %v247_v52 = vpop.f32.mrf.mxu0 }
  0xa9   :  { %v288_v53 = vadd.f32 %v287_v51, %v273_v48  ;;  %v261_v55 = vpop.f32.mrf.mxu1 }
  0xaa   :  { %v335_v56 = vmax.f32 %v331_v50, 0.0  ;;  %v262_v57 = vadd.f32 %v261_v55, %v247_v52 }
  0xab   :  { %v314_v58 = vmul.f32 %v310_v49, %v288_v53 }
  0xac   :  { %339 = vst [vmem:[%s786_s5] sm:$0xff] %v335_v56  ;;  %v315_v60 = vmul.f32 %v309_v41, %v262_v57 }
  0xad   :  { %v324_v61 = vadd.f32 %v320_v54, %v314_v58 }
  0xae   :  { %v325_v63 = vadd.f32 %v319_v44, %v315_v60 }
  0xaf   :  { %v332_v0 = vadd.f32 %v328_v59, %v324_v61  ;;  %v275_v1 = vpop.f32.mrf.mxu2 }
  0xb0   :  { %v333_v2 = vadd.f32 %v329_v62, %v325_v63  ;;  %v289_v3 = vpop.f32.mrf.mxu3 }
  0xb1   :  { %v336_v4 = vmax.f32 %v332_v0, 0.0  ;;  %v290_v5 = vadd.f32 %v289_v3, %v275_v1 }
  0xb2   :  { %v337_v6 = vmax.f32 %v333_v2, 0.0 }
  0xb3   :  { %340 = vst [vmem:[%s786_s5 + $0x8] sm:$0xff] %v336_v4  ;;  %v316_v7 = vmul.f32 %v310_v49, %v290_v5 }
  0xb4   :  { %341 = vst [vmem:[%s786_s5 + $0x10] sm:$0xff] %v337_v6 }
  0xb5   :  { %v326_v9 = vadd.f32 %v320_v54, %v316_v7 }
  0xb7   :  { %v334_v10 = vadd.f32 %v330_v8, %v326_v9 }
  0xb9   :  { %v338_v11 = vmax.f32 %v334_v10, 0.0 }
  0xbb   :  { %342 = vst [vmem:[%s786_s5 + $0x18] sm:$0xff] %v338_v11 }

// kernel: modified_resnet_forward.45
= control target key start
LH: loop header
LB: loop body
LE: loop exit
PB: predicated region body
PF: predicated region fallthrough
CT: control target
= control target key end

     0   :  { %s411_s1 = inlined_call_operand.vmem [shape: bf16[256,128], index: 1, kind: input, shape index: {}]   ;;  %s412_s0 = inlined_call_operand.vmem [shape: bf16[16,256], index: 0, kind: input, shape index: {}]   ;;  %s413_s2 = inlined_call_operand.vmem [shape: f32[1,128], index: 2, kind: input, shape index: {}]   ;;  %s414_s3 = inlined_call_operand.vmem [shape: f32[1,128], index: 3, kind: input, shape index: {}]   ;;  %s415_s4 = inlined_call_operand.vmem [shape: f32[16,128], index: 4, kind: output, shape index: {}]  }
   0x1   :  { %v303_v0 = vld [vmem:[%s411_s1 + $0x38] sm:$0xff]  ;;  %v302_v2 = vld [vmem:[%s411_s1 + $0x30] sm:$0xff]  ;;  %v301_v4 = vld [vmem:[%s411_s1 + $0x28] sm:$0xff] }
   0x2   :  { %v311_v1 = vld [vmem:[%s411_s1 + $0x78] sm:$0xff]  ;;  %165 = vmatpush.bf16.msra.mxu0 %v303_v0  ;;  %v310_v3 = vld [vmem:[%s411_s1 + $0x70] sm:$0xff]  ;;  %v309_v5 = vld [vmem:[%s411_s1 + $0x68] sm:$0xff] }
   0x3   :  { %179 = vmatpush.bf16.msra.mxu1 %v311_v1  ;;  %v300_v6 = vld [vmem:[%s411_s1 + $0x20] sm:$0xff]  ;;  %v299_v8 = vld [vmem:[%s411_s1 + $0x18] sm:$0xff]  ;;  %v298_v10 = vld [vmem:[%s411_s1 + $0x10] sm:$0xff] }
   0x4   :  { %v308_v7 = vld [vmem:[%s411_s1 + $0x60] sm:$0xff]  ;;  %v307_v9 = vld [vmem:[%s411_s1 + $0x58] sm:$0xff]  ;;  %v306_v11 = vld [vmem:[%s411_s1 + $0x50] sm:$0xff] }
   0x5   :  { %v297_v12 = vld [vmem:[%s411_s1 + $0x8] sm:$0xff]  ;;  %v296_v14 = vld [vmem:[%s411_s1] sm:$0xff] }
   0x6   :  { %166 = vmatpush.bf16.msra.mxu0 %v302_v2  ;;  %v305_v13 = vld [vmem:[%s411_s1 + $0x48] sm:$0xff]  ;;  %v304_v15 = vld [vmem:[%s411_s1 + $0x40] sm:$0xff] }
   0x7   :  { %180 = vmatpush.bf16.msra.mxu1 %v310_v3  ;;  %v224_v16 = vld [vmem:[%s412_s0] sm:$0xf]  ;;  %v295_v17 = vld [vmem:[%s412_s0 + $0x4] sm:$0xf0]  ;;  %v294_v18 = vld [vmem:[%s412_s0 + $0x4] sm:$0xf] }
   0x8   :  { %v226_v19 = vld [vmem:[%s412_s0 + $0x8] sm:$0xf0]  ;;  %v225_v20 = vor.u32 %v295_v17, %v224_v16  ;;  %v312_v22 = vld [vmem:[%s413_s2] ss:$0 sm:$0xff] }
   0x9   :  { %v229_v21 = vor.u32 %v294_v18, %v226_v19  ;;  %v313_v26 = vld [vmem:[%s414_s3] ss:$0 sm:$0xff] }
   0xa   :  { %167 = vmatpush.bf16.msra.mxu0 %v301_v4 }
   0xb   :  { %181 = vmatpush.bf16.msra.mxu1 %v309_v5 }
   0xe   :  { %168 = vmatpush.bf16.msra.mxu0 %v300_v6 }
   0xf   :  { %182 = vmatpush.bf16.msra.mxu1 %v308_v7 }
  0x12   :  { %169 = vmatpush.bf16.msra.mxu0 %v299_v8 }
  0x13   :  { %183 = vmatpush.bf16.msra.mxu1 %v307_v9 }
  0x16   :  { %170 = vmatpush.bf16.msra.mxu0 %v298_v10 }
  0x17   :  { %184 = vmatpush.bf16.msra.mxu1 %v306_v11 }
  0x1a   :  { %171 = vmatpush.bf16.msra.mxu0 %v297_v12 }
  0x1b   :  { %185 = vmatpush.bf16.msra.mxu1 %v305_v13 }
  0x1e   :  { %172 = vmatpush.bf16.msra.mxu0 %v296_v14 }
  0x1f   :  { %186 = vmatpush.bf16.msra.mxu1 %v304_v15 }
  0x21   :  { %173 = vmatmul.bf16.vlgmr.msra.gmra.mxu0 %v225_v20 }
  0x22   :  { %187 = vmatmul.bf16.vlgmr.msra.gmra.mxu1 %v229_v21 }
  0x9e   :  { %v174_v23 = vpop.f32.mrf.mxu0 }
  0x9f   :  { %v188_v24 = vpop.f32.mrf.mxu1 }
  0xa0   :  { %v189_v25 = vadd.f32 %v188_v24, %v174_v23 }
  0xa2   :  { %v206_v27 = vmul.f32 %v312_v22, %v189_v25 }
  0xa4   :  { %v212_v28 = vadd.f32 %v313_v26, %v206_v27 }
  0xa6   :  { %v214_v29 = vmax.f32 %v212_v28, 0.0  ;;  %v176_v30 = vpop.f32.mrf.mxu0 }
  0xa7   :  { %v190_v31 = vpop.f32.mrf.mxu1 }
  0xa8   :  { %216 = vst [vmem:[%s415_s4] sm:$0xff] %v214_v29  ;;  %v191_v32 = vadd.f32 %v190_v31, %v176_v30 }
  0xaa   :  { %v207_v33 = vmul.f32 %v312_v22, %v191_v32 }
  0xac   :  { %v213_v34 = vadd.f32 %v313_v26, %v207_v33 }
  0xae   :  { %v215_v35 = vmax.f32 %v213_v34, 0.0 }
  0xb0   :  { %217 = vst [vmem:[%s415_s4 + $0x8] sm:$0xff] %v215_v35 }

// kernel: modified_resnet_forward.46
= control target key start
LH: loop header
LB: loop body
LE: loop exit
PB: predicated region body
PF: predicated region fallthrough
CT: control target
= control target key end

     0   :  { %s1010_s15 = smov 0   ;;  %s1012_s16 = smov 0   ;;  %s1123_s0 = inlined_call_operand.vmem [shape: bf16[16,1152], index: 0, kind: input, shape index: {}]   ;;  %s1124_s1 = inlined_call_operand.vmem [shape: bf16[1152,128], index: 1, kind: input, shape index: {}]   ;;  %s1125_s2 = inlined_call_operand.vmem [shape: f32[1,128], index: 2, kind: input, shape index: {}]   ;;  %s1126_s3 = inlined_call_operand.vmem [shape: f32[1,128], index: 3, kind: input, shape index: {}]   ;;  %s1127_s4 = inlined_call_operand.vmem [shape: f32[16,128], index: 4, kind: output, shape index: {}]  }
   0x1   :  { %s1014_s17 = smov 0   ;;  %s1016_s18 = smov 0  }
   0x2   :  { %s1018_s19 = smov 0  }
   0x3 LB: > { %s26_s20 = sadd.s32 1, %s978_s18  ;;  %p49_p1 = scmp.ne.s32.totalorder %s970_s16, %s966_s15  ;;  %s982_s19 = sphi %s1018_s19, %s14_s19   ;;  %s978_s18 = sphi %s1016_s18, %s1131_s18   ;;  %s974_s17 = sphi %s1014_s17, %s1130_s17   ;;  %s970_s16 = sphi %s1012_s16, %s1129_s16   ;;  %s966_s15 = sphi %s1010_s15, %s1128_s15  }
   0x4   : > { %p27_p0 = scmp.ge.s32.totalorder %s26_s20, 3  ;;  %p50_p2 = scmp.eq.s32.totalorder %s982_s19, 0 }
   0x5   : > { %s42_s22 = sadd.s32 1, %s970_s16  ;;  %p749_p5 = scmp.ge.s32.totalorder %s982_s19, 3 }
   0x6   : > { %s1133_s20 = smov (%p27_p0, %s26_s20), 0  ;;  %p51_p3 = por %p50_p2, %p49_p1 }
   0x7   : > { %s38_s21 = ssub.s32 %s978_s18, %s1133_s20  ;;  %195 = sbr.rel (%p749_p5) target bundleno = 21 (0x15), region = 24 }
   0x8   : > { %p40_p4 = scmp.eq.s32.totalorder %s38_s21, 0 }
   0xa   : > { %s1045_s23 = scalar_select %p40_p4, %s970_s16, %s42_s22  }
   0xc   : > { %198 = sbr.rel (!%p51_p3) target bundleno = 21 (0x15), region = 28  ;;  %s200_s24 = sand.u32 (%p51_p3), 1, %s970_s16  }
   0xd   : > { %s871_s25 = smul.u32 (%p51_p3), 12, %s978_s18 }
   0xe   : > { %s899_s26 = smul.u32 (%p51_p3), 24, %s200_s24 }
   0xf   : > { %s208_s29 = scalar_lea.vmem (%p51_p3), %s1123_s0, %s871_s25 }
  0x10   : > { %v223_v0 = vld [vmem:[%s208_s29] sm:$0xff] (%p51_p3)  ;;  %v751_v2 = vld [vmem:[%s208_s29 + $0x8] sm:$0xf] (%p51_p3)  ;;  %s202_s30 = scalar_lea.vmem (%p51_p3), [#allocation3], %s899_s26  ;;  %v753_v3 = vld [vmem:[%s208_s29 + $0x2c] sm:$0xf] (%p51_p3) }
  0x11   : > { %v225_v1 = vld [vmem:[%s208_s29 + $0x24] sm:$0xff]  ;;  %224 = vst [vmem:[%s202_s30] sm:$0xff] %v223_v0 }
  0x12   : > { %226 = vst [vmem:[%s202_s30 + $0xc] sm:$0xff] %v225_v1 }
  0x13   : > { %752 = vst [vmem:[%s202_s30 + $0x8] sm:$0xf] %v751_v2 }
  0x14   : > { %754 = vst [vmem:[%s202_s30 + $0x14] sm:$0xf] %v753_v3 }
  0x15 PF: > { %p755_p6 = scmp.ge.s32.totalorder %s982_s19, 1  ;;  %p255_p7 = scmp.lt.s32.totalorder %s982_s19, 4 }
  0x17   : > { %p256_p8 = pnand %p755_p6, %p255_p7 }
  0x18   : > { %s262_s5 = sand.u32 (!%p256_p8), 1, %s966_s15   ;;  %s306_s6 = smul.u32 (!%p256_p8), 48, %s974_s17 }
  0x19   : > { %259 = sbr.rel (%p256_p8) target bundleno = 231 (0xe7), region = 58  ;;  %p757_p10 = scmp.ne.s32.totalorder (!%p256_p8), %s974_s17, 0 }
  0x1a   : > { %s900_s7 = smul.u32 (!%p256_p8), 24, %s262_s5  ;;  %p307_p9 = scmp.lt.s32.totalorder (!%p256_p8), %s306_s6, 143 }
  0x1c   : > { %s1062_s12 = scalar_lea.vmem (!%p256_p8), [#allocation3], %s900_s7 }
  0x1e   : > { %s1135_s6 = smov (!%p307_p9, %s306_s6), 143  ;;  %333 = sbr.rel (%p757_p10) target bundleno = 38 (0x26), region = 66 }
  0x1f   : > { %s756_s8 = sshll.u32 %s1135_s6, 2 }
  0x20   : > { %s1060_s11 = scalar_lea.vmem %s1124_s1, %s756_s8 }
  0x23   : > { %v984_v4 = vmov 0.0  }
  0x24   : > { %334 = vst [vmem:[#allocation2] sm:$0xff] %v984_v4 }
  0x25   : > { %335 = vst [vmem:[#allocation2 + $0x8] sm:$0xff] %v984_v4 }
  0x26 PF: > { %v882_v5 = vld [vmem:[%s1060_s11 + $0x38] sm:$0xff]  ;;  %v881_v8 = vld [vmem:[%s1060_s11 + $0x30] sm:$0xff]  ;;  %v880_v11 = vld [vmem:[%s1060_s11 + $0x28] sm:$0xff]  ;;  %p866_p11 = scmp.ne.s32.totalorder %s974_s17, 2 }
  0x27   : > { %v890_v6 = vld [vmem:[%s1060_s11 + $0x78] sm:$0xff]  ;;  %550 = vmatpush.bf16.msra.mxu0 %v882_v5  ;;  %v889_v9 = vld [vmem:[%s1060_s11 + $0x70] sm:$0xff]  ;;  %v888_v12 = vld [vmem:[%s1060_s11 + $0x68] sm:$0xff] }
  0x28   : > { %v898_v7 = vld [vmem:[%s1060_s11 + $0xb8] sm:$0xff]  ;;  %564 = vmatpush.bf16.msra.mxu1 %v890_v6  ;;  %v897_v10 = vld [vmem:[%s1060_s11 + $0xb0] sm:$0xff]  ;;  %v896_v13 = vld [vmem:[%s1060_s11 + $0xa8] sm:$0xff] }
  0x29   : > { %578 = vmatpush.bf16.msra.mxu2 %v898_v7  ;;  %v879_v14 = vld [vmem:[%s1060_s11 + $0x20] sm:$0xff]  ;;  %v878_v17 = vld [vmem:[%s1060_s11 + $0x18] sm:$0xff]  ;;  %v877_v20 = vld [vmem:[%s1060_s11 + $0x10] sm:$0xff] }
  0x2a   : > { %v887_v15 = vld [vmem:[%s1060_s11 + $0x60] sm:$0xff]  ;;  %v886_v18 = vld [vmem:[%s1060_s11 + $0x58] sm:$0xff]  ;;  %v885_v21 = vld [vmem:[%s1060_s11 + $0x50] sm:$0xff] }
  0x2b   : > { %551 = vmatpush.bf16.msra.mxu0 %v881_v8  ;;  %v895_v16 = vld [vmem:[%s1060_s11 + $0xa0] sm:$0xff]  ;;  %v894_v19 = vld [vmem:[%s1060_s11 + $0x98] sm:$0xff]  ;;  %v893_v22 = vld [vmem:[%s1060_s11 + $0x90] sm:$0xff] }
  0x2c   : > { %565 = vmatpush.bf16.msra.mxu1 %v889_v9  ;;  %v876_v23 = vld [vmem:[%s1060_s11 + $0x8] sm:$0xff]  ;;  %v875_v26 = vld [vmem:[%s1060_s11] sm:$0xff]  ;;  %v873_v29 = vld [vmem:[%s1062_s12 + $0x8] sm:$0xf0] }
  0x2d   : > { %579 = vmatpush.bf16.msra.mxu2 %v897_v10  ;;  %v884_v24 = vld [vmem:[%s1060_s11 + $0x48] sm:$0xff]  ;;  %v883_v27 = vld [vmem:[%s1060_s11 + $0x40] sm:$0xff]  ;;  %v768_v33 = vld [vmem:[%s1062_s12 + $0x8] sm:$0xf] }
  0x2e   : > { %v892_v25 = vld [vmem:[%s1060_s11 + $0x88] sm:$0xff]  ;;  %v762_v31 = vld [vmem:[%s1062_s12 + $0xc] sm:$0xf0]  ;;  %v874_v34 = vld [vmem:[%s1062_s12 + $0x10] sm:$0xf0] }
  0x2f   : > { %552 = vmatpush.bf16.msra.mxu0 %v880_v11  ;;  %v760_v28 = vld [vmem:[%s1062_s12] sm:$0xf]  ;;  %v872_v30 = vld [vmem:[%s1062_s12 + $0x4] sm:$0xf]  ;;  %v891_v32 = vld [vmem:[%s1060_s11 + $0x80] sm:$0xff]  ;;  %v769_v37 = vor.u32 %v874_v34, %v768_v33 }
  0x30   : > { %566 = vmatpush.bf16.msra.mxu1 %v888_v12  ;;  %v761_v35 = vor.u32 %v873_v29, %v760_v28  ;;  %v765_v36 = vor.u32 %v872_v30, %v762_v31  ;;  %v336_v41 = vld [vmem:[#allocation2] sm:$0xff]  ;;  %v337_v48 = vld [vmem:[#allocation2 + $0x8] sm:$0xff] }
  0x31   : > { %580 = vmatpush.bf16.msra.mxu2 %v896_v13 }
  0x33   : > { %553 = vmatpush.bf16.msra.mxu0 %v879_v14 }
  0x34   : > { %567 = vmatpush.bf16.msra.mxu1 %v887_v15 }
  0x35   : > { %581 = vmatpush.bf16.msra.mxu2 %v895_v16 }
  0x37   : > { %554 = vmatpush.bf16.msra.mxu0 %v878_v17 }
  0x38   : > { %568 = vmatpush.bf16.msra.mxu1 %v886_v18 }
  0x39   : > { %582 = vmatpush.bf16.msra.mxu2 %v894_v19 }
  0x3b   : > { %555 = vmatpush.bf16.msra.mxu0 %v877_v20 }
  0x3c   : > { %569 = vmatpush.bf16.msra.mxu1 %v885_v21 }
  0x3d   : > { %583 = vmatpush.bf16.msra.mxu2 %v893_v22 }
  0x3f   : > { %556 = vmatpush.bf16.msra.mxu0 %v876_v23 }
  0x40   : > { %570 = vmatpush.bf16.msra.mxu1 %v884_v24 }
  0x41   : > { %584 = vmatpush.bf16.msra.mxu2 %v892_v25 }
  0x43   : > { %557 = vmatpush.bf16.msra.mxu0 %v875_v26 }
  0x44   : > { %571 = vmatpush.bf16.msra.mxu1 %v883_v27 }
  0x45   : > { %585 = vmatpush.bf16.msra.mxu2 %v891_v32 }
  0x46   : > { %558 = vmatmul.bf16.vlgmr.msra.gmra.mxu0 %v761_v35 }
  0x47   : > { %572 = vmatmul.bf16.vlgmr.msra.gmra.mxu1 %v765_v36 }
  0x48   : > { %586 = vmatmul.bf16.vlgmr.msra.gmra.mxu2 %v769_v37 }
  0xc3   : > { %v559_v38 = vpop.f32.mrf.mxu0 }
  0xc4   : > { %v573_v39 = vpop.f32.mrf.mxu1 }
  0xc5   : > { %v574_v40 = vadd.f32 %v573_v39, %v559_v38 }
  0xcb   : > { %v587_v42 = vpop.f32.mrf.mxu2  ;;  %v561_v45 = vpop.f32.mrf.mxu0 }
  0xcc   : > { %v588_v43 = vadd.f32 %v587_v42, %v574_v40  ;;  %v575_v46 = vpop.f32.mrf.mxu1 }
  0xcd   : > { %v576_v47 = vadd.f32 %v575_v46, %v561_v45 }
  0xce   : > { %v592_v44 = vadd.f32 %v588_v43, %v336_v41 }
  0xd0   : > { %594 = vst [vmem:[#allocation2] sm:$0xff] %v592_v44 }
  0xd3   : > { %v589_v49 = vpop.f32.mrf.mxu2 }
  0xd4   : > { %v590_v50 = vadd.f32 %v589_v49, %v576_v47  ;;  %599 = sbr.rel (%p866_p11) target bundleno = 231 (0xe7), region = 70 }
  0xd6   : > { %v593_v51 = vadd.f32 %v590_v50, %v337_v48 }
  0xd8   : > { %595 = vst [vmem:[#allocation2 + $0x8] sm:$0xff] %v593_v51 }
  0xd9   : > { %v600_v52 = vld [vmem:[#allocation2] sm:$0xff] }
  0xda   : > { %v942_v53 = vld [vmem:[%s1125_s2] ss:$0 sm:$0xff] }
  0xdb   : > { %v943_v54 = vld [vmem:[%s1126_s3] ss:$0 sm:$0xff]  ;;  %v606_v56 = vmul.f32 %v942_v53, %v600_v52 }
  0xdd   : > { %v612_v58 = vadd.f32 %v943_v54, %v606_v56 }
  0xdf   : > { %v601_v55 = vld [vmem:[#allocation2 + $0x8] sm:$0xff]  ;;  %v614_v60 = vmax.f32 %v612_v58, 0.0 }
  0xe0   : > { %v607_v57 = vmul.f32 %v942_v53, %v601_v55 }
  0xe1   : > { %616 = vst [vmem:[%s1127_s4] sm:$0xff] %v614_v60 }
  0xe2   : > { %v613_v59 = vadd.f32 %v943_v54, %v607_v57 }
  0xe4   : > { %v615_v61 = vmax.f32 %v613_v59, 0.0 }
  0xe6   : > { %617 = vst [vmem:[%s1127_s4 + $0x8] sm:$0xff] %v615_v61 }
  0xe7 PF: > { %s14_s19 = sadd.s32 1, %s982_s19   ;;  %s1128_s15 = smov %s970_s16 }
  0xe8   : > { %p11_p12 = scmp.ge.s32.totalorder %s14_s19, 5   ;;  %s1129_s16 = smov %s1045_s23 }
  0xe9   : > { %s1130_s17 = smov %s978_s18  ;;  %s1131_s18 = smov %s1133_s20 }
  0xea   :  { %13 = sbr.rel (!%p11_p12) target bundleno = 3 (0x3), region = 120 }

// kernel: modified_resnet_forward.48
= control target key start
LH: loop header
LB: loop body
LE: loop exit
PB: predicated region body
PF: predicated region fallthrough
CT: control target
= control target key end

     0   :  { %s1051_s18 = smov 0   ;;  %s1053_s19 = smov 0   ;;  %s1202_s0 = inlined_call_operand.vmem [shape: bf16[16,128], index: 0, kind: input, shape index: {}]   ;;  %s1203_s1 = inlined_call_operand.vmem [shape: bf16[128,512], index: 1, kind: input, shape index: {}]   ;;  %s1204_s2 = inlined_call_operand.vmem [shape: f32[1,512], index: 2, kind: input, shape index: {}]   ;;  %s1205_s3 = inlined_call_operand.vmem [shape: f32[1,512], index: 3, kind: input, shape index: {}]   ;;  %s1206_s4 = inlined_call_operand.vmem [shape: f32[16,512], index: 4, kind: input, shape index: {}]   ;;  %s1207_s5 = inlined_call_operand.vmem [shape: f32[16,512], index: 5, kind: output, shape index: {}]  }
   0x1   :  { %s1055_s20 = smov 0   ;;  %s1057_s21 = smov 0  }
   0x2   :  { %s1059_s22 = smov 0  }
   0x3 LB: > { %s30_s23 = sadd.s32 1, %s1015_s21  ;;  %s831_s24 = sadd.s32 4294967295, %s1019_s22   ;;  %s1019_s22 = sphi %s1059_s22, %s15_s22   ;;  %s1015_s21 = sphi %s1057_s21, %s1213_s21   ;;  %s1011_s20 = sphi %s1055_s20, %s1212_s20   ;;  %s1007_s19 = sphi %s1053_s19, %s1211_s19   ;;  %s1003_s18 = sphi %s1051_s18, %s1210_s18  }
   0x4   : > { %p32_p0 = scmp.ge.s32.totalorder %s30_s23, 2  ;;  %p78_p1 = scmp.ne.s32.totalorder %s1007_s19, %s1003_s18 }
   0x5   : > { %p79_p2 = scmp.eq.s32.totalorder %s1019_s22, 0  ;;  %p190_p4 = scmp.eq.s32.totalorder %s831_s24, 1 }
   0x6   : > { %s1215_s23 = smov (%p32_p0, %s30_s23), 0  ;;  %s71_s27 = sadd.s32 1, %s1007_s19 }
   0x7   : > { %p1083_p3 = por %p79_p2, %p78_p1  ;;  %s67_s26 = ssub.s32 %s1015_s21, %s1215_s23 }
   0x8   : > { %p69_p5 = scmp.eq.s32.totalorder %s67_s26, 0  ;;  %p1090_p6 = por %p190_p4, %p78_p1 }
   0x9   : > { %p835_p7 = scmp.ge.s32.totalorder %s1019_s22, 2 }
   0xa   : > { %s1095_s29 = scalar_select %p69_p5, %s1007_s19, %s71_s27  }
   0xb   : > { %224 = sbr.rel (%p835_p7) target bundleno = 44 (0x2c), region = 20 }
  0x10   : > { %227 = sbr.rel (!%p1083_p3) target bundleno = 36 (0x24), region = 24  ;;  %s229_s30 = sand.u32 (%p1083_p3), 1, %s1007_s19  }
  0x11   : > { %s921_s6 = sshll.u32 (%p1083_p3), %s1015_s21, 3  ;;  %s836_s7 = sshll.u32 (%p1083_p3), %s229_s30, 7 }
  0x12   : > { %s1105_s10 = scalar_lea.vmem (%p1083_p3), %s1203_s1, %s921_s6  ;;  %s231_s11 = scalar_lea.vmem (%p1083_p3), [#allocation3], %s836_s7 }
  0x13   : > { %v296_v0 = vld [vmem:[%s1105_s10] sm:$0xff] (%p1083_p3)  ;;  %v298_v1 = vld [vmem:[%s1105_s10 + $0x10] sm:$0xff] (%p1083_p3) }
  0x14   : > { %v300_v2 = vld [vmem:[%s1105_s10 + $0x20] sm:$0xff] (%p1083_p3)  ;;  %297 = vst [vmem:[%s231_s11] sm:$0xff] (%p1083_p3), %v296_v0  ;;  %v302_v3 = vld [vmem:[%s1105_s10 + $0x30] sm:$0xff] (%p1083_p3) }
  0x15   : > { %299 = vst [vmem:[%s231_s11 + $0x8] sm:$0xff] %v298_v1  ;;  %v304_v4 = vld [vmem:[%s1105_s10 + $0x40] sm:$0xff]  ;;  %v306_v5 = vld [vmem:[%s1105_s10 + $0x50] sm:$0xff] }
  0x16   : > { %301 = vst [vmem:[%s231_s11 + $0x10] sm:$0xff] %v300_v2  ;;  %v308_v6 = vld [vmem:[%s1105_s10 + $0x60] sm:$0xff]  ;;  %v310_v7 = vld [vmem:[%s1105_s10 + $0x70] sm:$0xff] }
  0x17   : > { %303 = vst [vmem:[%s231_s11 + $0x18] sm:$0xff] %v302_v3  ;;  %v312_v8 = vld [vmem:[%s1105_s10 + $0x80] sm:$0xff]  ;;  %v314_v9 = vld [vmem:[%s1105_s10 + $0x90] sm:$0xff] }
  0x18   : > { %305 = vst [vmem:[%s231_s11 + $0x20] sm:$0xff] %v304_v4  ;;  %v316_v10 = vld [vmem:[%s1105_s10 + $0xa0] sm:$0xff]  ;;  %v318_v11 = vld [vmem:[%s1105_s10 + $0xb0] sm:$0xff] }
  0x19   : > { %307 = vst [vmem:[%s231_s11 + $0x28] sm:$0xff] %v306_v5  ;;  %v320_v12 = vld [vmem:[%s1105_s10 + $0xc0] sm:$0xff]  ;;  %v322_v13 = vld [vmem:[%s1105_s10 + $0xd0] sm:$0xff] }
  0x1a   : > { %309 = vst [vmem:[%s231_s11 + $0x30] sm:$0xff] %v308_v6  ;;  %v324_v14 = vld [vmem:[%s1105_s10 + $0xe0] sm:$0xff]  ;;  %v326_v15 = vld [vmem:[%s1105_s10 + $0xf0] sm:$0xff] }
  0x1b   : > { %311 = vst [vmem:[%s231_s11 + $0x38] sm:$0xff] %v310_v7 }
  0x1c   : > { %313 = vst [vmem:[%s231_s11 + $0x40] sm:$0xff] %v312_v8 }
  0x1d   : > { %315 = vst [vmem:[%s231_s11 + $0x48] sm:$0xff] %v314_v9 }
  0x1e   : > { %317 = vst [vmem:[%s231_s11 + $0x50] sm:$0xff] %v316_v10 }
  0x1f   : > { %319 = vst [vmem:[%s231_s11 + $0x58] sm:$0xff] %v318_v11 }
  0x20   : > { %321 = vst [vmem:[%s231_s11 + $0x60] sm:$0xff] %v320_v12 }
  0x21   : > { %323 = vst [vmem:[%s231_s11 + $0x68] sm:$0xff] %v322_v13 }
  0x22   : > { %325 = vst [vmem:[%s231_s11 + $0x70] sm:$0xff] %v324_v14 }
  0x23   : > { %327 = vst [vmem:[%s231_s11 + $0x78] sm:$0xff] %v326_v15 }
  0x24 PF: > { %349 = sbr.rel (!%p1083_p3) target bundleno = 44 (0x2c), region = 70  ;;  %s351_s12 = sand.u32 (%p1083_p3), 1, %s1007_s19  }
  0x25   : > { %s922_s13 = sshll.u32 (%p1083_p3), %s1015_s21, 4  ;;  %s839_s14 = sshll.u32 (%p1083_p3), %s351_s12, 5 }
  0x26   : > { %s359_s17 = scalar_lea.vmem (%p1083_p3), %s1206_s4, %s922_s13  ;;  %s353_s24 = scalar_lea.vmem (%p1083_p3), [#allocation4], %s839_s14 }
  0x27   : > { %v372_v16 = vld [vmem:[%s359_s17] sm:$0xff] (%p1083_p3)  ;;  %v374_v17 = vld [vmem:[%s359_s17 + $0x8] sm:$0xff] (%p1083_p3) }
  0x28   : > { %v376_v18 = vld [vmem:[%s359_s17 + $0x20] sm:$0xff] (%p1083_p3)  ;;  %373 = vst [vmem:[%s353_s24] sm:$0xff] (%p1083_p3), %v372_v16  ;;  %v378_v19 = vld [vmem:[%s359_s17 + $0x28] sm:$0xff] (%p1083_p3) }
  0x29   : > { %375 = vst [vmem:[%s353_s24 + $0x8] sm:$0xff] %v374_v17 }
  0x2a   : > { %377 = vst [vmem:[%s353_s24 + $0x10] sm:$0xff] %v376_v18 }
  0x2b   : > { %379 = vst [vmem:[%s353_s24 + $0x18] sm:$0xff] %v378_v19 }
  0x2c PF: > { %p842_p8 = scmp.ge.s32.totalorder %s1019_s22, 1  ;;  %p384_p9 = scmp.lt.s32.totalorder %s1019_s22, 3 }
  0x2e   : > { %p385_p10 = pnand %p842_p8, %p384_p9 }
  0x2f   : > { %s391_s25 = sand.u32 (!%p385_p10), 1, %s1003_s18   ;;  %s846_s7 = sshll.u32 (!%p385_p10), %s1011_s20, 1 }
  0x30   : > { %388 = sbr.rel (%p385_p10) target bundleno = 239 (0xef), region = 93  ;;  %s843_s26 = sshll.u32 (!%p385_p10), %s391_s25, 7 }
  0x31   : > { %s1135_s27 = scalar_lea.vmem (!%p385_p10), [#allocation3], %s843_s26  ;;  %p456_p11 = scmp.lt.s32.totalorder (!%p385_p10), %s846_s7, 3 }
  0x32   : > { %s844_s14 = sshll.u32 (!%p385_p10), %s391_s25, 5 }
  0x33   : > { %s400_s15 = scalar_lea.vmem (!%p385_p10), [#allocation4], %s844_s14  ;;  %s443_s18 = scalar_lea.vmem (!%p385_p10), [#allocation5], %s844_s14 }
  0x35   : > { %v910_v20 = vld [vmem:[%s1135_s27 + $0x70] sm:$0xf]  ;;  %v939_v21 = vld [vmem:[%s1135_s27 + $0x74] sm:$0xf0]  ;;  %v938_v22 = vld [vmem:[%s1135_s27 + $0x74] sm:$0xf] }
  0x36   : > { %v911_v23 = vor.u32 %v939_v21, %v910_v20  ;;  %v912_v24 = vld [vmem:[%s1135_s27 + $0x78] sm:$0xf0]  ;;  %v902_v25 = vld [vmem:[%s1135_s27 + $0x60] sm:$0xf]  ;;  %v937_v26 = vld [vmem:[%s1135_s27 + $0x64] sm:$0xf0] }
  0x37   : > { %v915_v27 = vor.u32 %v938_v22, %v912_v24  ;;  %v936_v28 = vld [vmem:[%s1135_s27 + $0x64] sm:$0xf]  ;;  %v904_v29 = vld [vmem:[%s1135_s27 + $0x68] sm:$0xf0]  ;;  %v903_v30 = vor.u32 %v937_v26, %v902_v25  ;;  %v894_v32 = vld [vmem:[%s1135_s27 + $0x50] sm:$0xf] }
  0x38   : > { %585 = vmatpush.bf16.msra.mxu0 %v911_v23  ;;  %v907_v31 = vor.u32 %v936_v28, %v904_v29  ;;  %v935_v33 = vld [vmem:[%s1135_s27 + $0x54] sm:$0xf0]  ;;  %v934_v34 = vld [vmem:[%s1135_s27 + $0x54] sm:$0xf]  ;;  %v896_v35 = vld [vmem:[%s1135_s27 + $0x58] sm:$0xf0] }
  0x39   : > { %599 = vmatpush.bf16.msra.mxu1 %v915_v27  ;;  %v895_v36 = vor.u32 %v935_v33, %v894_v32  ;;  %v899_v37 = vor.u32 %v934_v34, %v896_v35  ;;  %v886_v38 = vld [vmem:[%s1135_s27 + $0x40] sm:$0xf]  ;;  %v933_v39 = vld [vmem:[%s1135_s27 + $0x44] sm:$0xf0]  ;;  %v932_v40 = vld [vmem:[%s1135_s27 + $0x44] sm:$0xf] }
  0x3a   : > { %v888_v41 = vld [vmem:[%s1135_s27 + $0x48] sm:$0xf0]  ;;  %v887_v42 = vor.u32 %v933_v39, %v886_v38  ;;  %v878_v44 = vld [vmem:[%s1135_s27 + $0x30] sm:$0xf]  ;;  %v931_v45 = vld [vmem:[%s1135_s27 + $0x34] sm:$0xf0] }
  0x3b   : > { %v891_v43 = vor.u32 %v932_v40, %v888_v41  ;;  %v930_v46 = vld [vmem:[%s1135_s27 + $0x34] sm:$0xf]  ;;  %v880_v47 = vld [vmem:[%s1135_s27 + $0x38] sm:$0xf0]  ;;  %v879_v48 = vor.u32 %v931_v45, %v878_v44  ;;  %v870_v50 = vld [vmem:[%s1135_s27 + $0x20] sm:$0xf] }
  0x3c   : > { %586 = vmatpush.bf16.msra.mxu0 %v903_v30  ;;  %v883_v49 = vor.u32 %v930_v46, %v880_v47  ;;  %v929_v51 = vld [vmem:[%s1135_s27 + $0x24] sm:$0xf0]  ;;  %v928_v52 = vld [vmem:[%s1135_s27 + $0x24] sm:$0xf]  ;;  %v872_v53 = vld [vmem:[%s1135_s27 + $0x28] sm:$0xf0] }
  0x3d   : > { %600 = vmatpush.bf16.msra.mxu1 %v907_v31  ;;  %v871_v54 = vor.u32 %v929_v51, %v870_v50  ;;  %v875_v55 = vor.u32 %v928_v52, %v872_v53  ;;  %v862_v56 = vld [vmem:[%s1135_s27 + $0x10] sm:$0xf]  ;;  %v927_v57 = vld [vmem:[%s1135_s27 + $0x14] sm:$0xf0]  ;;  %v926_v58 = vld [vmem:[%s1135_s27 + $0x14] sm:$0xf] }
  0x3e   : > { %v864_v59 = vld [vmem:[%s1135_s27 + $0x18] sm:$0xf0]  ;;  %v863_v60 = vor.u32 %v927_v57, %v862_v56  ;;  %v854_v62 = vld [vmem:[%s1135_s27] sm:$0xf]  ;;  %v925_v63 = vld [vmem:[%s1135_s27 + $0x4] sm:$0xf0] }
  0x3f   : > { %v867_v61 = vor.u32 %v926_v58, %v864_v59  ;;  %v924_v0 = vld [vmem:[%s1135_s27 + $0x4] sm:$0xf]  ;;  %v856_v1 = vld [vmem:[%s1135_s27 + $0x8] sm:$0xf0]  ;;  %v855_v2 = vor.u32 %v925_v63, %v854_v62  ;;  %s1217_s7 = smov (!%p456_p11, %s846_s7), 3  ;;  %v650_v26 = vld [vmem:[%s400_s15 + $0x10] sm:$0xff] }
  0x40   : > { %587 = vmatpush.bf16.msra.mxu0 %v895_v36  ;;  %v859_v3 = vor.u32 %v924_v0, %v856_v1  ;;  %v923_v4 = vld [vmem:[%s1202_s0] sm:$0xff]  ;;  %s458_s10 = scalar_lea.vmem %s1204_s2, %s1217_s7  ;;  %s463_s13 = scalar_lea.vmem %s1205_s3, %s1217_s7  ;;  %v649_v17 = vld [vmem:[%s400_s15 + $0x8] sm:$0xff]  ;;  %v651_v29 = vld [vmem:[%s400_s15 + $0x18] sm:$0xff] }
  0x41   : > { %601 = vmatpush.bf16.msra.mxu1 %v899_v37  ;;  %v628_v5 = vld [vmem:[%s458_s10] sm:$0x3]  ;;  %s940_s16 = sshll.u32 (%p1090_p6), %s1011_s20, 4 }
  0x42   : > { %v638_v6 = vld [vmem:[%s463_s13] sm:$0x3]  ;;  %v630_v7 = vperm.slane %v628_v5, 0  ;;  %v631_v8 = vperm.slane %v628_v5, 1  ;;  %s676_s25 = scalar_lea.vmem (%p1090_p6), %s1207_s5, %s940_s16 }
  0x43   : > { %v640_v9 = vperm.slane %v638_v6, 0  ;;  %v641_v11 = vperm.slane %v638_v6, 1  ;;  %v648_v14 = vld [vmem:[%s400_s15] sm:$0xff] }
  0x44   : > { %588 = vmatpush.bf16.msra.mxu0 %v887_v42 }
  0x45   : > { %602 = vmatpush.bf16.msra.mxu1 %v891_v43 }
  0x48   : > { %589 = vmatpush.bf16.msra.mxu0 %v879_v48 }
  0x49   : > { %603 = vmatpush.bf16.msra.mxu1 %v883_v49 }
  0x4c   : > { %590 = vmatpush.bf16.msra.mxu0 %v871_v54 }
  0x4d   : > { %604 = vmatpush.bf16.msra.mxu1 %v875_v55 }
  0x50   : > { %591 = vmatpush.bf16.msra.mxu0 %v863_v60 }
  0x51   : > { %605 = vmatpush.bf16.msra.mxu1 %v867_v61 }
  0x54   : > { %592 = vmatpush.bf16.msra.mxu0 %v855_v2 }
  0x55   : > { %606 = vmatpush.bf16.msra.mxu1 %v859_v3 }
  0x57   : > { %593 = vmatmul.bf16.vlgmr.msra.gmra.mxu0 %v923_v4 }
  0x58   : > { %607 = vmatmul.bf16.vlgmr.msra.gmra.mxu1 %v923_v4 }
  0xd4   : > { %v594_v10 = vpop.f32.mrf.mxu0 }
  0xd5   : > { %v634_v12 = vmul.f32 %v630_v7, %v594_v10  ;;  %v608_v13 = vpop.f32.mrf.mxu1 }
  0xd6   : > { %v635_v15 = vmul.f32 %v631_v8, %v608_v13 }
  0xd7   : > { %v644_v16 = vadd.f32 %v640_v9, %v634_v12 }
  0xd8   : > { %v645_v18 = vadd.f32 %v641_v11, %v635_v15 }
  0xd9   : > { %v652_v19 = vadd.f32 %v648_v14, %v644_v16 }
  0xda   : > { %v653_v20 = vadd.f32 %v649_v17, %v645_v18 }
  0xdb   : > { %v656_v21 = vmax.f32 %v652_v19, 0.0 }
  0xdc   : > { %v657_v22 = vmax.f32 %v653_v20, 0.0  ;;  %v596_v23 = vpop.f32.mrf.mxu0 }
  0xdd   : > { %660 = vst [vmem:[%s443_s18] sm:$0xff] %v656_v21  ;;  %v636_v24 = vmul.f32 %v630_v7, %v596_v23  ;;  %v610_v25 = vpop.f32.mrf.mxu1 }
  0xde   : > { %661 = vst [vmem:[%s443_s18 + $0x8] sm:$0xff] %v657_v22  ;;  %v637_v27 = vmul.f32 %v631_v8, %v610_v25 }
  0xdf   : > { %v646_v28 = vadd.f32 %v640_v9, %v636_v24 }
  0xe0   : > { %v647_v30 = vadd.f32 %v641_v11, %v637_v27 }
  0xe1   : > { %v654_v31 = vadd.f32 %v650_v26, %v646_v28 }
  0xe2   : > { %v655_v32 = vadd.f32 %v651_v29, %v647_v30  ;;  %670 = sbr.rel (!%p1090_p6) target bundleno = 239 (0xef), region = 113 }
  0xe3   : > { %v658_v33 = vmax.f32 %v654_v31, 0.0 }
  0xe4   : > { %v659_v34 = vmax.f32 %v655_v32, 0.0  ;;  %v689_v35 = vld [vmem:[%s443_s18] sm:$0xff] (%p1090_p6) }
  0xe5   : > { %662 = vst [vmem:[%s443_s18 + $0x10] sm:$0xff] %v658_v33  ;;  %v691_v36 = vld [vmem:[%s443_s18 + $0x8] sm:$0xff] (%p1090_p6) }
  0xe6   : > { %663 = vst [vmem:[%s443_s18 + $0x18] sm:$0xff] %v659_v34 }
  0xe7   : > { %690 = vst [vmem:[%s676_s25] sm:$0xff] %v689_v35 }
  0xe8   : > { %692 = vst [vmem:[%s676_s25 + $0x8] sm:$0xff] %v691_v36 }
  0xec   : > { %v693_v37 = vld [vmem:[%s443_s18 + $0x10] sm:$0xff] }
  0xed   : > { %v695_v38 = vld [vmem:[%s443_s18 + $0x18] sm:$0xff]  ;;  %694 = vst [vmem:[%s676_s25 + $0x20] sm:$0xff] %v693_v37 }
  0xee   : > { %696 = vst [vmem:[%s676_s25 + $0x28] sm:$0xff] %v695_v38 }
  0xef PF: > { %s15_s22 = sadd.s32 1, %s1019_s22   ;;  %s1210_s18 = smov %s1007_s19 }
  0xf0   : > { %p12_p12 = scmp.ge.s32.totalorder %s15_s22, 4   ;;  %s1211_s19 = smov %s1095_s29 }
  0xf1   : > { %s1212_s20 = smov %s1015_s21  ;;  %s1213_s21 = smov %s1215_s23 }
  0xf2   :  { %14 = sbr.rel (!%p12_p12) target bundleno = 3 (0x3), region = 184 }

// kernel: modified_resnet_forward.47
= control target key start
LH: loop header
LB: loop body
LE: loop exit
PB: predicated region body
PF: predicated region fallthrough
CT: control target
= control target key end

     0   :  { %s1216_s15 = smov 0   ;;  %s1218_s16 = smov 0   ;;  %s1445_s0 = inlined_call_operand.vmem [shape: bf16[16,256], index: 0, kind: input, shape index: {}]   ;;  %s1446_s1 = inlined_call_operand.vmem [shape: bf16[256,512], index: 1, kind: input, shape index: {}]   ;;  %s1447_s2 = inlined_call_operand.vmem [shape: f32[1,512], index: 2, kind: input, shape index: {}]   ;;  %s1448_s3 = inlined_call_operand.vmem [shape: f32[1,512], index: 3, kind: input, shape index: {}]   ;;  %s1449_s4 = inlined_call_operand.vmem [shape: f32[16,512], index: 4, kind: output, shape index: {}]  }
   0x1   :  { %s1220_s17 = smov 0   ;;  %s1222_s18 = smov 0  }
   0x2   :  { %s1224_s19 = smov 0  }
   0x3 LB: > { %s29_s20 = sadd.s32 1, %s1185_s18  ;;  %s921_s21 = sadd.s32 4294967295, %s1189_s19   ;;  %s1189_s19 = sphi %s1224_s19, %s14_s19   ;;  %s1185_s18 = sphi %s1222_s18, %s1454_s18   ;;  %s1181_s17 = sphi %s1220_s17, %s1453_s17   ;;  %s1177_s16 = sphi %s1218_s16, %s1452_s16   ;;  %s1173_s15 = sphi %s1216_s15, %s1451_s15  }
   0x4   : > { %p31_p0 = scmp.ge.s32.totalorder %s29_s20, 2  ;;  %p77_p1 = scmp.ne.s32.totalorder %s1177_s16, %s1173_s15 }
   0x5   : > { %p78_p2 = scmp.eq.s32.totalorder %s1189_s19, 0  ;;  %p161_p4 = scmp.eq.s32.totalorder %s921_s21, 1 }
   0x6   : > { %s1456_s20 = smov (%p31_p0, %s29_s20), 0  ;;  %s70_s23 = sadd.s32 1, %s1177_s16 }
   0x7   : > { %p79_p3 = por %p78_p2, %p77_p1  ;;  %s66_s22 = ssub.s32 %s1185_s18, %s1456_s20 }
   0x8   : > { %p68_p5 = scmp.eq.s32.totalorder %s66_s22, 0  ;;  %p1251_p6 = por %p161_p4, %p77_p1 }
   0x9   : > { %p925_p7 = scmp.ge.s32.totalorder %s1189_s19, 2 }
   0xa   : > { %s1256_s25 = scalar_select %p68_p5, %s1177_s16, %s70_s23  }
   0xb   : > { %198 = sbr.rel (%p925_p7) target bundleno = 52 (0x34), region = 20 }
  0x10   : > { %201 = sbr.rel (!%p79_p3) target bundleno = 52 (0x34), region = 24  ;;  %s203_s26 = sand.u32 (%p79_p3), 1, %s1177_s16  }
  0x11   : > { %s1075_s27 = sshll.u32 (%p79_p3), %s1185_s18, 3  ;;  %s926_s28 = sshll.u32 (%p79_p3), %s203_s26, 8 }
  0x12   : > { %s1264_s5 = scalar_lea.vmem (%p79_p3), %s1446_s1, %s1075_s27  ;;  %s1269_s6 = scalar_lea.vmem (%p79_p3), [#allocation3], %s926_s28 }
  0x13   : > { %v302_v0 = vld [vmem:[%s1264_s5] sm:$0xff] (%p79_p3)  ;;  %v304_v1 = vld [vmem:[%s1264_s5 + $0x10] sm:$0xff] (%p79_p3) }
  0x14   : > { %v306_v2 = vld [vmem:[%s1264_s5 + $0x20] sm:$0xff] (%p79_p3)  ;;  %303 = vst [vmem:[%s1269_s6] sm:$0xff] (%p79_p3), %v302_v0  ;;  %v308_v3 = vld [vmem:[%s1264_s5 + $0x30] sm:$0xff] (%p79_p3) }
  0x15   : > { %305 = vst [vmem:[%s1269_s6 + $0x8] sm:$0xff] %v304_v1  ;;  %v310_v4 = vld [vmem:[%s1264_s5 + $0x40] sm:$0xff]  ;;  %v312_v5 = vld [vmem:[%s1264_s5 + $0x50] sm:$0xff] }
  0x16   : > { %307 = vst [vmem:[%s1269_s6 + $0x10] sm:$0xff] %v306_v2  ;;  %v314_v6 = vld [vmem:[%s1264_s5 + $0x60] sm:$0xff]  ;;  %v316_v7 = vld [vmem:[%s1264_s5 + $0x70] sm:$0xff] }
  0x17   : > { %309 = vst [vmem:[%s1269_s6 + $0x18] sm:$0xff] %v308_v3  ;;  %v318_v8 = vld [vmem:[%s1264_s5 + $0x80] sm:$0xff]  ;;  %v320_v9 = vld [vmem:[%s1264_s5 + $0x90] sm:$0xff] }
  0x18   : > { %311 = vst [vmem:[%s1269_s6 + $0x20] sm:$0xff] %v310_v4  ;;  %v322_v10 = vld [vmem:[%s1264_s5 + $0xa0] sm:$0xff]  ;;  %v324_v11 = vld [vmem:[%s1264_s5 + $0xb0] sm:$0xff] }
  0x19   : > { %313 = vst [vmem:[%s1269_s6 + $0x28] sm:$0xff] %v312_v5  ;;  %v326_v12 = vld [vmem:[%s1264_s5 + $0xc0] sm:$0xff]  ;;  %v328_v13 = vld [vmem:[%s1264_s5 + $0xd0] sm:$0xff] }
  0x1a   : > { %315 = vst [vmem:[%s1269_s6 + $0x30] sm:$0xff] %v314_v6  ;;  %v330_v14 = vld [vmem:[%s1264_s5 + $0xe0] sm:$0xff]  ;;  %v332_v15 = vld [vmem:[%s1264_s5 + $0xf0] sm:$0xff] }
  0x1b   : > { %317 = vst [vmem:[%s1269_s6 + $0x38] sm:$0xff] %v316_v7  ;;  %v334_v16 = vld [vmem:[%s1264_s5 + $0x100] sm:$0xff]  ;;  %v336_v17 = vld [vmem:[%s1264_s5 + $0x110] sm:$0xff] }
  0x1c   : > { %319 = vst [vmem:[%s1269_s6 + $0x40] sm:$0xff] %v318_v8  ;;  %v338_v18 = vld [vmem:[%s1264_s5 + $0x120] sm:$0xff]  ;;  %v340_v19 = vld [vmem:[%s1264_s5 + $0x130] sm:$0xff] }
  0x1d   : > { %321 = vst [vmem:[%s1269_s6 + $0x48] sm:$0xff] %v320_v9  ;;  %v342_v20 = vld [vmem:[%s1264_s5 + $0x140] sm:$0xff]  ;;  %v344_v21 = vld [vmem:[%s1264_s5 + $0x150] sm:$0xff] }
  0x1e   : > { %323 = vst [vmem:[%s1269_s6 + $0x50] sm:$0xff] %v322_v10  ;;  %v346_v22 = vld [vmem:[%s1264_s5 + $0x160] sm:$0xff]  ;;  %v348_v23 = vld [vmem:[%s1264_s5 + $0x170] sm:$0xff] }
  0x1f   : > { %325 = vst [vmem:[%s1269_s6 + $0x58] sm:$0xff] %v324_v11  ;;  %v350_v24 = vld [vmem:[%s1264_s5 + $0x180] sm:$0xff]  ;;  %v352_v25 = vld [vmem:[%s1264_s5 + $0x190] sm:$0xff] }
  0x20   : > { %327 = vst [vmem:[%s1269_s6 + $0x60] sm:$0xff] %v326_v12  ;;  %v354_v26 = vld [vmem:[%s1264_s5 + $0x1a0] sm:$0xff]  ;;  %v356_v27 = vld [vmem:[%s1264_s5 + $0x1b0] sm:$0xff] }
  0x21   : > { %329 = vst [vmem:[%s1269_s6 + $0x68] sm:$0xff] %v328_v13  ;;  %v358_v28 = vld [vmem:[%s1264_s5 + $0x1c0] sm:$0xff]  ;;  %v360_v29 = vld [vmem:[%s1264_s5 + $0x1d0] sm:$0xff] }
  0x22   : > { %331 = vst [vmem:[%s1269_s6 + $0x70] sm:$0xff] %v330_v14  ;;  %v362_v30 = vld [vmem:[%s1264_s5 + $0x1e0] sm:$0xff]  ;;  %v364_v31 = vld [vmem:[%s1264_s5 + $0x1f0] sm:$0xff] }
  0x23   : > { %333 = vst [vmem:[%s1269_s6 + $0x78] sm:$0xff] %v332_v15 }
  0x24   : > { %335 = vst [vmem:[%s1269_s6 + $0x80] sm:$0xff] %v334_v16 }
  0x25   : > { %337 = vst [vmem:[%s1269_s6 + $0x88] sm:$0xff] %v336_v17 }
  0x26   : > { %339 = vst [vmem:[%s1269_s6 + $0x90] sm:$0xff] %v338_v18 }
  0x27   : > { %341 = vst [vmem:[%s1269_s6 + $0x98] sm:$0xff] %v340_v19 }
  0x28   : > { %343 = vst [vmem:[%s1269_s6 + $0xa0] sm:$0xff] %v342_v20 }
  0x29   : > { %345 = vst [vmem:[%s1269_s6 + $0xa8] sm:$0xff] %v344_v21 }
  0x2a   : > { %347 = vst [vmem:[%s1269_s6 + $0xb0] sm:$0xff] %v346_v22 }
  0x2b   : > { %349 = vst [vmem:[%s1269_s6 + $0xb8] sm:$0xff] %v348_v23 }
  0x2c   : > { %351 = vst [vmem:[%s1269_s6 + $0xc0] sm:$0xff] %v350_v24 }
  0x2d   : > { %353 = vst [vmem:[%s1269_s6 + $0xc8] sm:$0xff] %v352_v25 }
  0x2e   : > { %355 = vst [vmem:[%s1269_s6 + $0xd0] sm:$0xff] %v354_v26 }
  0x2f   : > { %357 = vst [vmem:[%s1269_s6 + $0xd8] sm:$0xff] %v356_v27 }
  0x30   : > { %359 = vst [vmem:[%s1269_s6 + $0xe0] sm:$0xff] %v358_v28 }
  0x31   : > { %361 = vst [vmem:[%s1269_s6 + $0xe8] sm:$0xff] %v360_v29 }
  0x32   : > { %363 = vst [vmem:[%s1269_s6 + $0xf0] sm:$0xff] %v362_v30 }
  0x33   : > { %365 = vst [vmem:[%s1269_s6 + $0xf8] sm:$0xff] %v364_v31 }
  0x34 PF: > { %p929_p8 = scmp.ge.s32.totalorder %s1189_s19, 1  ;;  %p386_p9 = scmp.lt.s32.totalorder %s1189_s19, 3 }
  0x36   : > { %p387_p10 = pnand %p929_p8, %p386_p9 }
  0x37   : > { %s393_s7 = sand.u32 (!%p387_p10), 1, %s1173_s15   ;;  %s932_s26 = sshll.u32 (!%p387_p10), %s1181_s17, 1 }
  0x38   : > { %390 = sbr.rel (%p387_p10) target bundleno = 252 (0xfc), region = 70  ;;  %s930_s8 = sshll.u32 (!%p387_p10), %s393_s7, 8 }
  0x39   : > { %s1337_s9 = scalar_lea.vmem (!%p387_p10), [#allocation3], %s930_s8  ;;  %p450_p11 = scmp.lt.s32.totalorder (!%p387_p10), %s932_s26, 3 }
  0x3a   : > { %s931_s8 = sshll.u32 (!%p387_p10), %s393_s7, 5 }
  0x3d   : > { %v1000_v32 = vld [vmem:[%s1337_s9 + $0x70] sm:$0xf]  ;;  %v1093_v33 = vld [vmem:[%s1337_s9 + $0x74] sm:$0xf0]  ;;  %v1092_v37 = vld [vmem:[%s1337_s9 + $0x74] sm:$0xf] }
  0x3e   : > { %v1064_v34 = vld [vmem:[%s1337_s9 + $0xf0] sm:$0xf]  ;;  %v1001_v35 = vor.u32 %v1093_v33, %v1000_v32  ;;  %v1109_v36 = vld [vmem:[%s1337_s9 + $0xf4] sm:$0xf0]  ;;  %v1002_v38 = vld [vmem:[%s1337_s9 + $0x78] sm:$0xf0] }
  0x3f   : > { %v1065_v39 = vor.u32 %v1109_v36, %v1064_v34  ;;  %v1005_v40 = vor.u32 %v1092_v37, %v1002_v38  ;;  %v1108_v41 = vld [vmem:[%s1337_s9 + $0xf4] sm:$0xf]  ;;  %v1066_v42 = vld [vmem:[%s1337_s9 + $0xf8] sm:$0xf0]  ;;  %v992_v43 = vld [vmem:[%s1337_s9 + $0x60] sm:$0xf] }
  0x40   : > { %677 = vmatpush.bf16.msra.mxu0 %v1001_v35  ;;  %v1069_v44 = vor.u32 %v1108_v41, %v1066_v42  ;;  %v1091_v45 = vld [vmem:[%s1337_s9 + $0x64] sm:$0xf0]  ;;  %v1056_v46 = vld [vmem:[%s1337_s9 + $0xe0] sm:$0xf]  ;;  %v1090_v50 = vld [vmem:[%s1337_s9 + $0x64] sm:$0xf] }
  0x41   : > { %v1107_v47 = vld [vmem:[%s1337_s9 + $0xe4] sm:$0xf0]  ;;  %691 = vmatpush.bf16.msra.mxu1 %v1065_v39  ;;  %705 = vmatpush.bf16.msra.mxu2 %v1005_v40  ;;  %v993_v48 = vor.u32 %v1091_v45, %v992_v43  ;;  %v994_v51 = vld [vmem:[%s1337_s9 + $0x68] sm:$0xf0]  ;;  %v1106_v52 = vld [vmem:[%s1337_s9 + $0xe4] sm:$0xf] }
  0x42   : > { %v1057_v49 = vor.u32 %v1107_v47, %v1056_v46  ;;  %719 = vmatpush.bf16.msra.mxu3 %v1069_v44  ;;  %v997_v53 = vor.u32 %v1090_v50, %v994_v51  ;;  %v1058_v54 = vld [vmem:[%s1337_s9 + $0xe8] sm:$0xf0]  ;;  %v984_v55 = vld [vmem:[%s1337_s9 + $0x50] sm:$0xf]  ;;  %v1089_v56 = vld [vmem:[%s1337_s9 + $0x54] sm:$0xf0] }
  0x43   : > { %v1061_v57 = vor.u32 %v1106_v52, %v1058_v54  ;;  %v1048_v58 = vld [vmem:[%s1337_s9 + $0xd0] sm:$0xf]  ;;  %v1105_v59 = vld [vmem:[%s1337_s9 + $0xd4] sm:$0xf0]  ;;  %v1088_v60 = vld [vmem:[%s1337_s9 + $0x54] sm:$0xf]  ;;  %v985_v61 = vor.u32 %v1089_v56, %v984_v55 }
  0x44   : > { %678 = vmatpush.bf16.msra.mxu0 %v993_v48  ;;  %v986_v62 = vld [vmem:[%s1337_s9 + $0x58] sm:$0xf0]  ;;  %v1104_v63 = vld [vmem:[%s1337_s9 + $0xd4] sm:$0xf]  ;;  %v1049_v1 = vor.u32 %v1105_v59, %v1048_v58  ;;  %v976_v3 = vld [vmem:[%s1337_s9 + $0x40] sm:$0xf] }
  0x45   : > { %v1050_v0 = vld [vmem:[%s1337_s9 + $0xd8] sm:$0xf0]  ;;  %692 = vmatpush.bf16.msra.mxu1 %v1057_v49  ;;  %706 = vmatpush.bf16.msra.mxu2 %v997_v53  ;;  %v989_v2 = vor.u32 %v1088_v60, %v986_v62  ;;  %v1087_v4 = vld [vmem:[%s1337_s9 + $0x44] sm:$0xf0]  ;;  %v1040_v5 = vld [vmem:[%s1337_s9 + $0xc0] sm:$0xf] }
  0x46   : > { %720 = vmatpush.bf16.msra.mxu3 %v1061_v57  ;;  %v1053_v6 = vor.u32 %v1104_v63, %v1050_v0  ;;  %v1103_v7 = vld [vmem:[%s1337_s9 + $0xc4] sm:$0xf0]  ;;  %v1086_v8 = vld [vmem:[%s1337_s9 + $0x44] sm:$0xf]  ;;  %v978_v9 = vld [vmem:[%s1337_s9 + $0x48] sm:$0xf0]  ;;  %v977_v12 = vor.u32 %v1087_v4, %v976_v3 }
  0x47   : > { %v1102_v10 = vld [vmem:[%s1337_s9 + $0xc4] sm:$0xf]  ;;  %v1042_v11 = vld [vmem:[%s1337_s9 + $0xc8] sm:$0xf0]  ;;  %v1041_v13 = vor.u32 %v1103_v7, %v1040_v5  ;;  %v981_v14 = vor.u32 %v1086_v8, %v978_v9  ;;  %v968_v15 = vld [vmem:[%s1337_s9 + $0x30] sm:$0xf] }
  0x48   : > { %679 = vmatpush.bf16.msra.mxu0 %v985_v61  ;;  %v1085_v16 = vld [vmem:[%s1337_s9 + $0x34] sm:$0xf0]  ;;  %v1032_v17 = vld [vmem:[%s1337_s9 + $0xb0] sm:$0xf]  ;;  %v1045_v18 = vor.u32 %v1102_v10, %v1042_v11  ;;  %v1084_v20 = vld [vmem:[%s1337_s9 + $0x34] sm:$0xf] }
  0x49   : > { %693 = vmatpush.bf16.msra.mxu1 %v1049_v1  ;;  %707 = vmatpush.bf16.msra.mxu2 %v989_v2  ;;  %v1101_v19 = vld [vmem:[%s1337_s9 + $0xb4] sm:$0xf0]  ;;  %v970_v21 = vld [vmem:[%s1337_s9 + $0x38] sm:$0xf0]  ;;  %v1100_v22 = vld [vmem:[%s1337_s9 + $0xb4] sm:$0xf]  ;;  %v969_v24 = vor.u32 %v1085_v16, %v968_v15 }
  0x4a   : > { %721 = vmatpush.bf16.msra.mxu3 %v1053_v6  ;;  %v1034_v23 = vld [vmem:[%s1337_s9 + $0xb8] sm:$0xf0]  ;;  %v1033_v25 = vor.u32 %v1101_v19, %v1032_v17  ;;  %v973_v26 = vor.u32 %v1084_v20, %v970_v21  ;;  %v960_v27 = vld [vmem:[%s1337_s9 + $0x20] sm:$0xf]  ;;  %v1083_v28 = vld [vmem:[%s1337_s9 + $0x24] sm:$0xf0] }
  0x4b   : > { %v1024_v29 = vld [vmem:[%s1337_s9 + $0xa0] sm:$0xf]  ;;  %v1037_v30 = vor.u32 %v1100_v22, %v1034_v23  ;;  %v1099_v31 = vld [vmem:[%s1337_s9 + $0xa4] sm:$0xf0]  ;;  %v1082_v32 = vld [vmem:[%s1337_s9 + $0x24] sm:$0xf]  ;;  %v961_v36 = vor.u32 %v1083_v28, %v960_v27 }
  0x4c   : > { %680 = vmatpush.bf16.msra.mxu0 %v977_v12  ;;  %v962_v33 = vld [vmem:[%s1337_s9 + $0x28] sm:$0xf0]  ;;  %v1098_v34 = vld [vmem:[%s1337_s9 + $0xa4] sm:$0xf]  ;;  %v1025_v37 = vor.u32 %v1099_v31, %v1024_v29  ;;  %v952_v39 = vld [vmem:[%s1337_s9 + $0x10] sm:$0xf] }
  0x4d   : > { %694 = vmatpush.bf16.msra.mxu1 %v1041_v13  ;;  %708 = vmatpush.bf16.msra.mxu2 %v981_v14  ;;  %v1026_v35 = vld [vmem:[%s1337_s9 + $0xa8] sm:$0xf0]  ;;  %v965_v38 = vor.u32 %v1082_v32, %v962_v33  ;;  %v1081_v40 = vld [vmem:[%s1337_s9 + $0x14] sm:$0xf0]  ;;  %v1016_v41 = vld [vmem:[%s1337_s9 + $0x90] sm:$0xf] }
  0x4e   : > { %722 = vmatpush.bf16.msra.mxu3 %v1045_v18  ;;  %v1029_v42 = vor.u32 %v1098_v34, %v1026_v35  ;;  %v1097_v43 = vld [vmem:[%s1337_s9 + $0x94] sm:$0xf0]  ;;  %v1080_v44 = vld [vmem:[%s1337_s9 + $0x14] sm:$0xf]  ;;  %v954_v45 = vld [vmem:[%s1337_s9 + $0x18] sm:$0xf0]  ;;  %v953_v48 = vor.u32 %v1081_v40, %v952_v39 }
  0x4f   : > { %v1096_v46 = vld [vmem:[%s1337_s9 + $0x94] sm:$0xf]  ;;  %v1018_v47 = vld [vmem:[%s1337_s9 + $0x98] sm:$0xf0]  ;;  %v1017_v49 = vor.u32 %v1097_v43, %v1016_v41  ;;  %v957_v50 = vor.u32 %v1080_v44, %v954_v45  ;;  %v944_v51 = vld [vmem:[%s1337_s9] sm:$0xf] }
  0x50   : > { %681 = vmatpush.bf16.msra.mxu0 %v969_v24  ;;  %v1079_v52 = vld [vmem:[%s1337_s9 + $0x4] sm:$0xf0]  ;;  %v1008_v53 = vld [vmem:[%s1337_s9 + $0x80] sm:$0xf]  ;;  %v1021_v54 = vor.u32 %v1096_v46, %v1018_v47  ;;  %v1078_v56 = vld [vmem:[%s1337_s9 + $0x4] sm:$0xf] }
  0x51   : > { %695 = vmatpush.bf16.msra.mxu1 %v1033_v25  ;;  %709 = vmatpush.bf16.msra.mxu2 %v973_v26  ;;  %v1095_v55 = vld [vmem:[%s1337_s9 + $0x84] sm:$0xf0]  ;;  %v946_v57 = vld [vmem:[%s1337_s9 + $0x8] sm:$0xf0]  ;;  %v1094_v58 = vld [vmem:[%s1337_s9 + $0x84] sm:$0xf]  ;;  %v945_v60 = vor.u32 %v1079_v52, %v944_v51 }
  0x52   : > { %723 = vmatpush.bf16.msra.mxu3 %v1037_v30  ;;  %v1010_v59 = vld [vmem:[%s1337_s9 + $0x88] sm:$0xf0]  ;;  %v936_v61 = vld [vmem:[%s1445_s0] sm:$0xf]  ;;  %v1077_v62 = vld [vmem:[%s1445_s0 + $0x4] sm:$0xf0]  ;;  %v1009_v63 = vor.u32 %v1095_v55, %v1008_v53  ;;  %v949_v0 = vor.u32 %v1078_v56, %v946_v57 }
  0x53   : > { %v1076_v1 = vld [vmem:[%s1445_s0 + $0x4] sm:$0xf]  ;;  %v938_v2 = vld [vmem:[%s1445_s0 + $0x8] sm:$0xf0]  ;;  %v1013_v3 = vor.u32 %v1094_v58, %v1010_v59  ;;  %v937_v4 = vor.u32 %v1077_v62, %v936_v61  ;;  %s1458_s26 = smov (!%p450_p11, %s932_s26), 3  ;;  %s434_s9 = scalar_lea.vmem [#allocation4], %s931_s8 }
  0x54   : > { %682 = vmatpush.bf16.msra.mxu0 %v961_v36  ;;  %v941_v5 = vor.u32 %v1076_v1, %v938_v2  ;;  %s452_s29 = scalar_lea.vmem %s1447_s2, %s1458_s26  ;;  %s457_s6 = scalar_lea.vmem %s1448_s3, %s1458_s26 }
  0x55   : > { %696 = vmatpush.bf16.msra.mxu1 %v1025_v37  ;;  %710 = vmatpush.bf16.msra.mxu2 %v965_v38  ;;  %v748_v6 = vld [vmem:[%s452_s29] sm:$0x3]  ;;  %s1110_s15 = sshll.u32 (%p1251_p6), %s1181_s17, 4 }
  0x56   : > { %724 = vmatpush.bf16.msra.mxu3 %v1029_v42  ;;  %v758_v7 = vld [vmem:[%s457_s6] sm:$0x3]  ;;  %v750_v9 = vperm.slane %v748_v6, 0  ;;  %v751_v16 = vperm.slane %v748_v6, 1  ;;  %s784_s11 = scalar_lea.vmem (%p1251_p6), %s1449_s4, %s1110_s15 }
  0x57   : > { %v760_v12 = vperm.slane %v758_v7, 0  ;;  %v761_v20 = vperm.slane %v758_v7, 1 }
  0x58   : > { %683 = vmatpush.bf16.msra.mxu0 %v953_v48 }
  0x59   : > { %697 = vmatpush.bf16.msra.mxu1 %v1017_v49  ;;  %711 = vmatpush.bf16.msra.mxu2 %v957_v50 }
  0x5a   : > { %725 = vmatpush.bf16.msra.mxu3 %v1021_v54 }
  0x5c   : > { %684 = vmatpush.bf16.msra.mxu0 %v945_v60 }
  0x5d   : > { %698 = vmatpush.bf16.msra.mxu1 %v1009_v63  ;;  %712 = vmatpush.bf16.msra.mxu2 %v949_v0 }
  0x5e   : > { %726 = vmatpush.bf16.msra.mxu3 %v1013_v3 }
  0x5f   : > { %685 = vmatmul.bf16.vlgmr.msra.gmra.mxu0 %v937_v4 }
  0x60   : > { %699 = vmatmul.bf16.vlgmr.msra.gmra.mxu1 %v941_v5  ;;  %713 = vmatmul.bf16.vlgmr.msra.gmra.mxu2 %v937_v4 }
  0x61   : > { %727 = vmatmul.bf16.vlgmr.msra.gmra.mxu3 %v941_v5 }
  0xdc   : > { %v686_v8 = vpop.f32.mrf.mxu0 }
  0xdd   : > { %v700_v10 = vpop.f32.mrf.mxu1 }
  0xde   : > { %v701_v11 = vadd.f32 %v700_v10, %v686_v8 }
  0xe0   : > { %v754_v13 = vmul.f32 %v750_v9, %v701_v11 }
  0xe2   : > { %v764_v14 = vadd.f32 %v760_v12, %v754_v13 }
  0xe3   : > { %v714_v15 = vpop.f32.mrf.mxu2 }
  0xe4   : > { %768 = vst [vmem:[%s434_s9] sm:$0xff] %v764_v14  ;;  %v728_v17 = vpop.f32.mrf.mxu3  ;;  %v688_v18 = vpop.f32.mrf.mxu0 }
  0xe5   : > { %v729_v19 = vadd.f32 %v728_v17, %v714_v15  ;;  %v702_v21 = vpop.f32.mrf.mxu1 }
  0xe6   : > { %v703_v22 = vadd.f32 %v702_v21, %v688_v18 }
  0xe7   : > { %v755_v23 = vmul.f32 %v751_v16, %v729_v19 }
  0xe8   : > { %v756_v24 = vmul.f32 %v750_v9, %v703_v22 }
  0xe9   : > { %v765_v25 = vadd.f32 %v761_v20, %v755_v23 }
  0xea   : > { %v766_v26 = vadd.f32 %v760_v12, %v756_v24 }
  0xeb   : > { %769 = vst [vmem:[%s434_s9 + $0x8] sm:$0xff] %v765_v25  ;;  %v716_v27 = vpop.f32.mrf.mxu2  ;;  %v797_v32 = vld [vmem:[%s434_s9] sm:$0xff] (%p1251_p6) }
  0xec   : > { %770 = vst [vmem:[%s434_s9 + $0x10] sm:$0xff] %v766_v26  ;;  %v730_v28 = vpop.f32.mrf.mxu3 }
  0xed   : > { %v731_v29 = vadd.f32 %v730_v28, %v716_v27  ;;  %798 = vst [vmem:[%s784_s11] sm:$0xff] (%p1251_p6), %v797_v32 }
  0xef   : > { %v757_v30 = vmul.f32 %v751_v16, %v731_v29  ;;  %778 = sbr.rel (!%p1251_p6) target bundleno = 252 (0xfc), region = 86 }
  0xf1   : > { %v767_v31 = vadd.f32 %v761_v20, %v757_v30 }
  0xf2   : > { %v799_v33 = vld [vmem:[%s434_s9 + $0x8] sm:$0xff] (%p1251_p6) }
  0xf3   : > { %771 = vst [vmem:[%s434_s9 + $0x18] sm:$0xff] %v767_v31  ;;  %v801_v34 = vld [vmem:[%s434_s9 + $0x10] sm:$0xff] (%p1251_p6) }
  0xf4   : > { %800 = vst [vmem:[%s784_s11 + $0x8] sm:$0xff] %v799_v33 }
  0xf5   : > { %802 = vst [vmem:[%s784_s11 + $0x20] sm:$0xff] %v801_v34 }
  0xfa   : > { %v803_v35 = vld [vmem:[%s434_s9 + $0x18] sm:$0xff] }
  0xfb   : > { %804 = vst [vmem:[%s784_s11 + $0x28] sm:$0xff] %v803_v35 }
  0xfc PF: > { %s14_s19 = sadd.s32 1, %s1189_s19   ;;  %s1451_s15 = smov %s1177_s16 }
  0xfd   : > { %p11_p12 = scmp.ge.s32.totalorder %s14_s19, 4   ;;  %s1452_s16 = smov %s1256_s25 }
  0xfe   : > { %s1453_s17 = smov %s1185_s18  ;;  %s1454_s18 = smov %s1456_s20 }
  0xff   :  { %13 = sbr.rel (!%p11_p12) target bundleno = 3 (0x3), region = 149 }

// kernel: modified_resnet_forward.49
= control target key start
LH: loop header
LB: loop body
LE: loop exit
PB: predicated region body
PF: predicated region fallthrough
CT: control target
= control target key end

     0   :  { %s1774_s15 = smov 0   ;;  %s1776_s16 = smov 0   ;;  %s2169_s0 = inlined_call_operand.vmem [shape: bf16[16,512], index: 0, kind: input, shape index: {}]   ;;  %s2170_s1 = inlined_call_operand.vmem [shape: bf16[512,512], index: 1, kind: input, shape index: {}]   ;;  %s2171_s2 = inlined_call_operand.vmem [shape: f32[1,512], index: 2, kind: input, shape index: {}]   ;;  %s2172_s3 = inlined_call_operand.vmem [shape: f32[1,512], index: 3, kind: input, shape index: {}]   ;;  %s2173_s4 = inlined_call_operand.vmem [shape: f32[16,512], index: 4, kind: output, shape index: {}]  }
   0x1   :  { %s1778_s17 = smov 0   ;;  %s1780_s18 = smov 0  }
   0x2   :  { %s1782_s19 = smov 0  }
   0x3 LB: > { %s29_s20 = sadd.s32 1, %s1743_s18  ;;  %s1309_s21 = sadd.s32 4294967295, %s1747_s19   ;;  %s1747_s19 = sphi %s1782_s19, %s14_s19   ;;  %s1743_s18 = sphi %s1780_s18, %s2178_s18   ;;  %s1739_s17 = sphi %s1778_s17, %s2177_s17   ;;  %s1735_s16 = sphi %s1776_s16, %s2176_s16   ;;  %s1731_s15 = sphi %s1774_s15, %s2175_s15  }
   0x4   : > { %p31_p0 = scmp.ge.s32.totalorder %s29_s20, 2  ;;  %p77_p1 = scmp.ne.s32.totalorder %s1735_s16, %s1731_s15 }
   0x5   : > { %p78_p2 = scmp.eq.s32.totalorder %s1747_s19, 0  ;;  %p161_p4 = scmp.eq.s32.totalorder %s1309_s21, 1 }
   0x6   : > { %s2180_s20 = smov (%p31_p0, %s29_s20), 0  ;;  %s70_s23 = sadd.s32 1, %s1735_s16 }
   0x7   : > { %p79_p3 = por %p78_p2, %p77_p1  ;;  %s66_s22 = ssub.s32 %s1743_s18, %s2180_s20 }
   0x8   : > { %p68_p5 = scmp.eq.s32.totalorder %s66_s22, 0  ;;  %p1809_p6 = por %p161_p4, %p77_p1 }
   0x9   : > { %p1313_p7 = scmp.ge.s32.totalorder %s1747_s19, 2 }
   0xa   : > { %s1814_s25 = scalar_select %p68_p5, %s1735_s16, %s70_s23  }
   0xb   : > { %198 = sbr.rel (%p1313_p7) target bundleno = 84 (0x54), region = 20 }
  0x10   : > { %201 = sbr.rel (!%p79_p3) target bundleno = 84 (0x54), region = 24  ;;  %s203_s26 = sand.u32 (%p79_p3), 1, %s1735_s16  }
  0x11   : > { %s1599_s27 = sshll.u32 (%p79_p3), %s1743_s18, 3  ;;  %s1314_s28 = sshll.u32 (%p79_p3), %s203_s26, 9 }
  0x12   : > { %s1822_s5 = scalar_lea.vmem (%p79_p3), %s2170_s1, %s1599_s27  ;;  %s1827_s6 = scalar_lea.vmem (%p79_p3), [#allocation3], %s1314_s28 }
  0x13   : > { %v366_v0 = vld [vmem:[%s1822_s5] sm:$0xff] (%p79_p3)  ;;  %v368_v1 = vld [vmem:[%s1822_s5 + $0x10] sm:$0xff] (%p79_p3) }
  0x14   : > { %v370_v2 = vld [vmem:[%s1822_s5 + $0x20] sm:$0xff] (%p79_p3)  ;;  %367 = vst [vmem:[%s1827_s6] sm:$0xff] (%p79_p3), %v366_v0  ;;  %v372_v3 = vld [vmem:[%s1822_s5 + $0x30] sm:$0xff] (%p79_p3) }
  0x15   : > { %369 = vst [vmem:[%s1827_s6 + $0x8] sm:$0xff] %v368_v1  ;;  %v374_v4 = vld [vmem:[%s1822_s5 + $0x40] sm:$0xff]  ;;  %v376_v5 = vld [vmem:[%s1822_s5 + $0x50] sm:$0xff] }
  0x16   : > { %371 = vst [vmem:[%s1827_s6 + $0x10] sm:$0xff] %v370_v2  ;;  %v378_v6 = vld [vmem:[%s1822_s5 + $0x60] sm:$0xff]  ;;  %v380_v7 = vld [vmem:[%s1822_s5 + $0x70] sm:$0xff] }
  0x17   : > { %373 = vst [vmem:[%s1827_s6 + $0x18] sm:$0xff] %v372_v3  ;;  %v382_v8 = vld [vmem:[%s1822_s5 + $0x80] sm:$0xff]  ;;  %v384_v9 = vld [vmem:[%s1822_s5 + $0x90] sm:$0xff] }
  0x18   : > { %375 = vst [vmem:[%s1827_s6 + $0x20] sm:$0xff] %v374_v4  ;;  %v386_v10 = vld [vmem:[%s1822_s5 + $0xa0] sm:$0xff]  ;;  %v388_v11 = vld [vmem:[%s1822_s5 + $0xb0] sm:$0xff] }
  0x19   : > { %377 = vst [vmem:[%s1827_s6 + $0x28] sm:$0xff] %v376_v5  ;;  %v390_v12 = vld [vmem:[%s1822_s5 + $0xc0] sm:$0xff]  ;;  %v392_v13 = vld [vmem:[%s1822_s5 + $0xd0] sm:$0xff] }
  0x1a   : > { %379 = vst [vmem:[%s1827_s6 + $0x30] sm:$0xff] %v378_v6  ;;  %v394_v14 = vld [vmem:[%s1822_s5 + $0xe0] sm:$0xff]  ;;  %v396_v15 = vld [vmem:[%s1822_s5 + $0xf0] sm:$0xff] }
  0x1b   : > { %381 = vst [vmem:[%s1827_s6 + $0x38] sm:$0xff] %v380_v7  ;;  %v398_v16 = vld [vmem:[%s1822_s5 + $0x100] sm:$0xff]  ;;  %v400_v17 = vld [vmem:[%s1822_s5 + $0x110] sm:$0xff] }
  0x1c   : > { %383 = vst [vmem:[%s1827_s6 + $0x40] sm:$0xff] %v382_v8  ;;  %v402_v18 = vld [vmem:[%s1822_s5 + $0x120] sm:$0xff]  ;;  %v404_v19 = vld [vmem:[%s1822_s5 + $0x130] sm:$0xff] }
  0x1d   : > { %385 = vst [vmem:[%s1827_s6 + $0x48] sm:$0xff] %v384_v9  ;;  %v406_v20 = vld [vmem:[%s1822_s5 + $0x140] sm:$0xff]  ;;  %v408_v21 = vld [vmem:[%s1822_s5 + $0x150] sm:$0xff] }
  0x1e   : > { %387 = vst [vmem:[%s1827_s6 + $0x50] sm:$0xff] %v386_v10  ;;  %v410_v22 = vld [vmem:[%s1822_s5 + $0x160] sm:$0xff]  ;;  %v412_v23 = vld [vmem:[%s1822_s5 + $0x170] sm:$0xff] }
  0x1f   : > { %389 = vst [vmem:[%s1827_s6 + $0x58] sm:$0xff] %v388_v11  ;;  %v414_v24 = vld [vmem:[%s1822_s5 + $0x180] sm:$0xff]  ;;  %v416_v25 = vld [vmem:[%s1822_s5 + $0x190] sm:$0xff] }
  0x20   : > { %391 = vst [vmem:[%s1827_s6 + $0x60] sm:$0xff] %v390_v12  ;;  %v418_v26 = vld [vmem:[%s1822_s5 + $0x1a0] sm:$0xff]  ;;  %v420_v27 = vld [vmem:[%s1822_s5 + $0x1b0] sm:$0xff] }
  0x21   : > { %393 = vst [vmem:[%s1827_s6 + $0x68] sm:$0xff] %v392_v13  ;;  %v422_v28 = vld [vmem:[%s1822_s5 + $0x1c0] sm:$0xff]  ;;  %v424_v29 = vld [vmem:[%s1822_s5 + $0x1d0] sm:$0xff] }
  0x22   : > { %395 = vst [vmem:[%s1827_s6 + $0x70] sm:$0xff] %v394_v14  ;;  %v426_v30 = vld [vmem:[%s1822_s5 + $0x1e0] sm:$0xff]  ;;  %v428_v31 = vld [vmem:[%s1822_s5 + $0x1f0] sm:$0xff] }
  0x23   : > { %397 = vst [vmem:[%s1827_s6 + $0x78] sm:$0xff] %v396_v15  ;;  %v430_v32 = vld [vmem:[%s1822_s5 + $0x200] sm:$0xff]  ;;  %v432_v33 = vld [vmem:[%s1822_s5 + $0x210] sm:$0xff] }
  0x24   : > { %399 = vst [vmem:[%s1827_s6 + $0x80] sm:$0xff] %v398_v16  ;;  %v434_v34 = vld [vmem:[%s1822_s5 + $0x220] sm:$0xff]  ;;  %v436_v35 = vld [vmem:[%s1822_s5 + $0x230] sm:$0xff] }
  0x25   : > { %401 = vst [vmem:[%s1827_s6 + $0x88] sm:$0xff] %v400_v17  ;;  %v438_v36 = vld [vmem:[%s1822_s5 + $0x240] sm:$0xff]  ;;  %v440_v37 = vld [vmem:[%s1822_s5 + $0x250] sm:$0xff] }
  0x26   : > { %403 = vst [vmem:[%s1827_s6 + $0x90] sm:$0xff] %v402_v18  ;;  %v442_v38 = vld [vmem:[%s1822_s5 + $0x260] sm:$0xff]  ;;  %v444_v39 = vld [vmem:[%s1822_s5 + $0x270] sm:$0xff] }
  0x27   : > { %405 = vst [vmem:[%s1827_s6 + $0x98] sm:$0xff] %v404_v19  ;;  %v446_v40 = vld [vmem:[%s1822_s5 + $0x280] sm:$0xff]  ;;  %v448_v41 = vld [vmem:[%s1822_s5 + $0x290] sm:$0xff] }
  0x28   : > { %407 = vst [vmem:[%s1827_s6 + $0xa0] sm:$0xff] %v406_v20  ;;  %v450_v42 = vld [vmem:[%s1822_s5 + $0x2a0] sm:$0xff]  ;;  %v452_v43 = vld [vmem:[%s1822_s5 + $0x2b0] sm:$0xff] }
  0x29   : > { %409 = vst [vmem:[%s1827_s6 + $0xa8] sm:$0xff] %v408_v21  ;;  %v454_v44 = vld [vmem:[%s1822_s5 + $0x2c0] sm:$0xff]  ;;  %v456_v45 = vld [vmem:[%s1822_s5 + $0x2d0] sm:$0xff] }
  0x2a   : > { %411 = vst [vmem:[%s1827_s6 + $0xb0] sm:$0xff] %v410_v22  ;;  %v458_v46 = vld [vmem:[%s1822_s5 + $0x2e0] sm:$0xff]  ;;  %v460_v47 = vld [vmem:[%s1822_s5 + $0x2f0] sm:$0xff] }
  0x2b   : > { %413 = vst [vmem:[%s1827_s6 + $0xb8] sm:$0xff] %v412_v23  ;;  %v462_v48 = vld [vmem:[%s1822_s5 + $0x300] sm:$0xff]  ;;  %v464_v49 = vld [vmem:[%s1822_s5 + $0x310] sm:$0xff] }
  0x2c   : > { %415 = vst [vmem:[%s1827_s6 + $0xc0] sm:$0xff] %v414_v24  ;;  %v466_v50 = vld [vmem:[%s1822_s5 + $0x320] sm:$0xff]  ;;  %v468_v51 = vld [vmem:[%s1822_s5 + $0x330] sm:$0xff] }
  0x2d   : > { %417 = vst [vmem:[%s1827_s6 + $0xc8] sm:$0xff] %v416_v25  ;;  %v470_v52 = vld [vmem:[%s1822_s5 + $0x340] sm:$0xff]  ;;  %v472_v53 = vld [vmem:[%s1822_s5 + $0x350] sm:$0xff] }
  0x2e   : > { %419 = vst [vmem:[%s1827_s6 + $0xd0] sm:$0xff] %v418_v26  ;;  %v474_v54 = vld [vmem:[%s1822_s5 + $0x360] sm:$0xff]  ;;  %v476_v55 = vld [vmem:[%s1822_s5 + $0x370] sm:$0xff] }
  0x2f   : > { %421 = vst [vmem:[%s1827_s6 + $0xd8] sm:$0xff] %v420_v27  ;;  %v478_v56 = vld [vmem:[%s1822_s5 + $0x380] sm:$0xff]  ;;  %v480_v57 = vld [vmem:[%s1822_s5 + $0x390] sm:$0xff] }
  0x30   : > { %423 = vst [vmem:[%s1827_s6 + $0xe0] sm:$0xff] %v422_v28  ;;  %v482_v58 = vld [vmem:[%s1822_s5 + $0x3a0] sm:$0xff]  ;;  %v484_v59 = vld [vmem:[%s1822_s5 + $0x3b0] sm:$0xff] }
  0x31   : > { %425 = vst [vmem:[%s1827_s6 + $0xe8] sm:$0xff] %v424_v29  ;;  %v486_v60 = vld [vmem:[%s1822_s5 + $0x3c0] sm:$0xff]  ;;  %v488_v61 = vld [vmem:[%s1822_s5 + $0x3d0] sm:$0xff] }
  0x32   : > { %427 = vst [vmem:[%s1827_s6 + $0xf0] sm:$0xff] %v426_v30  ;;  %v490_v62 = vld [vmem:[%s1822_s5 + $0x3e0] sm:$0xff]  ;;  %v492_v63 = vld [vmem:[%s1822_s5 + $0x3f0] sm:$0xff] }
  0x33   : > { %429 = vst [vmem:[%s1827_s6 + $0xf8] sm:$0xff] %v428_v31 }
  0x34   : > { %431 = vst [vmem:[%s1827_s6 + $0x100] sm:$0xff] %v430_v32 }
  0x35   : > { %433 = vst [vmem:[%s1827_s6 + $0x108] sm:$0xff] %v432_v33 }
  0x36   : > { %435 = vst [vmem:[%s1827_s6 + $0x110] sm:$0xff] %v434_v34 }
  0x37   : > { %437 = vst [vmem:[%s1827_s6 + $0x118] sm:$0xff] %v436_v35 }
  0x38   : > { %439 = vst [vmem:[%s1827_s6 + $0x120] sm:$0xff] %v438_v36 }
  0x39   : > { %441 = vst [vmem:[%s1827_s6 + $0x128] sm:$0xff] %v440_v37 }
  0x3a   : > { %443 = vst [vmem:[%s1827_s6 + $0x130] sm:$0xff] %v442_v38 }
  0x3b   : > { %445 = vst [vmem:[%s1827_s6 + $0x138] sm:$0xff] %v444_v39 }
  0x3c   : > { %447 = vst [vmem:[%s1827_s6 + $0x140] sm:$0xff] %v446_v40 }
  0x3d   : > { %449 = vst [vmem:[%s1827_s6 + $0x148] sm:$0xff] %v448_v41 }
  0x3e   : > { %451 = vst [vmem:[%s1827_s6 + $0x150] sm:$0xff] %v450_v42 }
  0x3f   : > { %453 = vst [vmem:[%s1827_s6 + $0x158] sm:$0xff] %v452_v43 }
  0x40   : > { %455 = vst [vmem:[%s1827_s6 + $0x160] sm:$0xff] %v454_v44 }
  0x41   : > { %457 = vst [vmem:[%s1827_s6 + $0x168] sm:$0xff] %v456_v45 }
  0x42   : > { %459 = vst [vmem:[%s1827_s6 + $0x170] sm:$0xff] %v458_v46 }
  0x43   : > { %461 = vst [vmem:[%s1827_s6 + $0x178] sm:$0xff] %v460_v47 }
  0x44   : > { %463 = vst [vmem:[%s1827_s6 + $0x180] sm:$0xff] %v462_v48 }
  0x45   : > { %465 = vst [vmem:[%s1827_s6 + $0x188] sm:$0xff] %v464_v49 }
  0x46   : > { %467 = vst [vmem:[%s1827_s6 + $0x190] sm:$0xff] %v466_v50 }
  0x47   : > { %469 = vst [vmem:[%s1827_s6 + $0x198] sm:$0xff] %v468_v51 }
  0x48   : > { %471 = vst [vmem:[%s1827_s6 + $0x1a0] sm:$0xff] %v470_v52 }
  0x49   : > { %473 = vst [vmem:[%s1827_s6 + $0x1a8] sm:$0xff] %v472_v53 }
  0x4a   : > { %475 = vst [vmem:[%s1827_s6 + $0x1b0] sm:$0xff] %v474_v54 }
  0x4b   : > { %477 = vst [vmem:[%s1827_s6 + $0x1b8] sm:$0xff] %v476_v55 }
  0x4c   : > { %479 = vst [vmem:[%s1827_s6 + $0x1c0] sm:$0xff] %v478_v56 }
  0x4d   : > { %481 = vst [vmem:[%s1827_s6 + $0x1c8] sm:$0xff] %v480_v57 }
  0x4e   : > { %483 = vst [vmem:[%s1827_s6 + $0x1d0] sm:$0xff] %v482_v58 }
  0x4f   : > { %485 = vst [vmem:[%s1827_s6 + $0x1d8] sm:$0xff] %v484_v59 }
  0x50   : > { %487 = vst [vmem:[%s1827_s6 + $0x1e0] sm:$0xff] %v486_v60 }
  0x51   : > { %489 = vst [vmem:[%s1827_s6 + $0x1e8] sm:$0xff] %v488_v61 }
  0x52   : > { %491 = vst [vmem:[%s1827_s6 + $0x1f0] sm:$0xff] %v490_v62 }
  0x53   : > { %493 = vst [vmem:[%s1827_s6 + $0x1f8] sm:$0xff] %v492_v63 }
  0x54 PF: > { %p1317_p8 = scmp.ge.s32.totalorder %s1747_s19, 1  ;;  %p514_p9 = scmp.lt.s32.totalorder %s1747_s19, 3 }
  0x56   : > { %p515_p10 = pnand %p1317_p8, %p514_p9 }
  0x57   : > { %s521_s7 = sand.u32 (!%p515_p10), 1, %s1731_s15  }
  0x58   : > { %518 = sbr.rel (%p515_p10) target bundleno = 318 (0x13e), region = 70  ;;  %s1318_s8 = sshll.u32 (!%p515_p10), %s521_s7, 9 }
  0x59   : > { %s1959_s9 = scalar_lea.vmem (!%p515_p10), [#allocation3], %s1318_s8  ;;  %s1319_s22 = sshll.u32 (!%p515_p10), %s521_s7, 5 }
  0x5a   : > { %s2138_s23 = scalar_lea.vmem (!%p515_p10), [#allocation4], %s1319_s22 }
  0x5d   : > { %v1396_v0 = vld [vmem:[%s1959_s9 + $0x70] sm:$0xf]  ;;  %v1619_v1 = vld [vmem:[%s1959_s9 + $0x74] sm:$0xf0]  ;;  %v1388_v11 = vld [vmem:[%s1959_s9 + $0x60] sm:$0xf] }
  0x5e   : > { %v1460_v2 = vld [vmem:[%s1959_s9 + $0xf0] sm:$0xf]  ;;  %v1397_v3 = vor.u32 %v1619_v1, %v1396_v0  ;;  %v1635_v4 = vld [vmem:[%s1959_s9 + $0xf4] sm:$0xf0]  ;;  %v1617_v13 = vld [vmem:[%s1959_s9 + $0x64] sm:$0xf0] }
  0x5f   : > { %v1524_v5 = vld [vmem:[%s1959_s9 + $0x170] sm:$0xf]  ;;  %v1651_v6 = vld [vmem:[%s1959_s9 + $0x174] sm:$0xf0]  ;;  %v1461_v7 = vor.u32 %v1635_v4, %v1460_v2  ;;  %v1452_v14 = vld [vmem:[%s1959_s9 + $0xe0] sm:$0xf]  ;;  %v1389_v16 = vor.u32 %v1617_v13, %v1388_v11 }
  0x60   : > { %v1525_v8 = vor.u32 %v1651_v6, %v1524_v5  ;;  %v1588_v9 = vld [vmem:[%s1959_s9 + $0x1f0] sm:$0xf]  ;;  %v1667_v10 = vld [vmem:[%s1959_s9 + $0x1f4] sm:$0xf0]  ;;  %1009 = vmatpush.bf16.msra.mxu0 %v1397_v3  ;;  %v1633_v15 = vld [vmem:[%s1959_s9 + $0xe4] sm:$0xf0] }
  0x61   : > { %v1589_v12 = vor.u32 %v1667_v10, %v1588_v9  ;;  %1023 = vmatpush.bf16.msra.mxu1 %v1461_v7  ;;  %v1453_v17 = vor.u32 %v1633_v15, %v1452_v14  ;;  %v1516_v18 = vld [vmem:[%s1959_s9 + $0x160] sm:$0xf]  ;;  %v1649_v19 = vld [vmem:[%s1959_s9 + $0x164] sm:$0xf0]  ;;  %v1380_v23 = vld [vmem:[%s1959_s9 + $0x50] sm:$0xf] }
  0x62   : > { %1037 = vmatpush.bf16.msra.mxu2 %v1525_v8  ;;  %v1580_v20 = vld [vmem:[%s1959_s9 + $0x1e0] sm:$0xf]  ;;  %v1517_v21 = vor.u32 %v1649_v19, %v1516_v18  ;;  %v1665_v22 = vld [vmem:[%s1959_s9 + $0x1e4] sm:$0xf0]  ;;  %v1615_v24 = vld [vmem:[%s1959_s9 + $0x54] sm:$0xf0] }
  0x63   : > { %1051 = vmatpush.bf16.msra.mxu3 %v1589_v12  ;;  %v1581_v25 = vor.u32 %v1665_v22, %v1580_v20  ;;  %v1444_v26 = vld [vmem:[%s1959_s9 + $0xd0] sm:$0xf]  ;;  %v1631_v27 = vld [vmem:[%s1959_s9 + $0xd4] sm:$0xf0]  ;;  %v1381_v29 = vor.u32 %v1615_v24, %v1380_v23  ;;  %v1372_v35 = vld [vmem:[%s1959_s9 + $0x40] sm:$0xf] }
  0x64   : > { %v1508_v28 = vld [vmem:[%s1959_s9 + $0x150] sm:$0xf]  ;;  %1010 = vmatpush.bf16.msra.mxu0 %v1389_v16  ;;  %v1647_v30 = vld [vmem:[%s1959_s9 + $0x154] sm:$0xf0]  ;;  %v1445_v33 = vor.u32 %v1631_v27, %v1444_v26  ;;  %v1613_v36 = vld [vmem:[%s1959_s9 + $0x44] sm:$0xf0] }
  0x65   : > { %v1572_v31 = vld [vmem:[%s1959_s9 + $0x1d0] sm:$0xf]  ;;  %v1663_v32 = vld [vmem:[%s1959_s9 + $0x1d4] sm:$0xf0]  ;;  %1024 = vmatpush.bf16.msra.mxu1 %v1453_v17  ;;  %v1509_v34 = vor.u32 %v1647_v30, %v1508_v28  ;;  %v1436_v37 = vld [vmem:[%s1959_s9 + $0xc0] sm:$0xf]  ;;  %v1373_v44 = vor.u32 %v1613_v36, %v1372_v35 }
  0x66   : > { %1038 = vmatpush.bf16.msra.mxu2 %v1517_v21  ;;  %v1573_v38 = vor.u32 %v1663_v32, %v1572_v31  ;;  %v1629_v39 = vld [vmem:[%s1959_s9 + $0xc4] sm:$0xf0]  ;;  %v1500_v40 = vld [vmem:[%s1959_s9 + $0x140] sm:$0xf]  ;;  %v1364_v47 = vld [vmem:[%s1959_s9 + $0x30] sm:$0xf] }
  0x67   : > { %1052 = vmatpush.bf16.msra.mxu3 %v1581_v25  ;;  %v1645_v41 = vld [vmem:[%s1959_s9 + $0x144] sm:$0xf0]  ;;  %v1564_v42 = vld [vmem:[%s1959_s9 + $0x1c0] sm:$0xf]  ;;  %v1437_v45 = vor.u32 %v1629_v39, %v1436_v37  ;;  %v1611_v48 = vld [vmem:[%s1959_s9 + $0x34] sm:$0xf0] }
  0x68   : > { %v1661_v43 = vld [vmem:[%s1959_s9 + $0x1c4] sm:$0xf0]  ;;  %1011 = vmatpush.bf16.msra.mxu0 %v1381_v29  ;;  %v1501_v46 = vor.u32 %v1645_v41, %v1500_v40  ;;  %v1428_v49 = vld [vmem:[%s1959_s9 + $0xb0] sm:$0xf]  ;;  %v1627_v51 = vld [vmem:[%s1959_s9 + $0xb4] sm:$0xf0]  ;;  %v1365_v56 = vor.u32 %v1611_v48, %v1364_v47 }
  0x69   : > { %1025 = vmatpush.bf16.msra.mxu1 %v1445_v33  ;;  %v1565_v50 = vor.u32 %v1661_v43, %v1564_v42  ;;  %v1492_v52 = vld [vmem:[%s1959_s9 + $0x130] sm:$0xf]  ;;  %v1643_v53 = vld [vmem:[%s1959_s9 + $0x134] sm:$0xf0]  ;;  %v1429_v57 = vor.u32 %v1627_v51, %v1428_v49  ;;  %v1356_v59 = vld [vmem:[%s1959_s9 + $0x20] sm:$0xf] }
  0x6a   : > { %1039 = vmatpush.bf16.msra.mxu2 %v1509_v34  ;;  %v1556_v54 = vld [vmem:[%s1959_s9 + $0x1b0] sm:$0xf]  ;;  %v1659_v55 = vld [vmem:[%s1959_s9 + $0x1b4] sm:$0xf0]  ;;  %v1493_v58 = vor.u32 %v1643_v53, %v1492_v52  ;;  %v1609_v60 = vld [vmem:[%s1959_s9 + $0x24] sm:$0xf0] }
  0x6b   : > { %1053 = vmatpush.bf16.msra.mxu3 %v1573_v38  ;;  %v1420_v61 = vld [vmem:[%s1959_s9 + $0xa0] sm:$0xf]  ;;  %v1557_v62 = vor.u32 %v1659_v55, %v1556_v54  ;;  %v1625_v63 = vld [vmem:[%s1959_s9 + $0xa4] sm:$0xf0]  ;;  %v1357_v4 = vor.u32 %v1609_v60, %v1356_v59  ;;  %v1348_v7 = vld [vmem:[%s1959_s9 + $0x10] sm:$0xf] }
  0x6c   : > { %1012 = vmatpush.bf16.msra.mxu0 %v1373_v44  ;;  %v1484_v0 = vld [vmem:[%s1959_s9 + $0x120] sm:$0xf]  ;;  %v1641_v1 = vld [vmem:[%s1959_s9 + $0x124] sm:$0xf0]  ;;  %v1421_v5 = vor.u32 %v1625_v63, %v1420_v61  ;;  %v1607_v8 = vld [vmem:[%s1959_s9 + $0x14] sm:$0xf0] }
  0x6d   : > { %1026 = vmatpush.bf16.msra.mxu1 %v1437_v45  ;;  %v1548_v2 = vld [vmem:[%s1959_s9 + $0x1a0] sm:$0xf]  ;;  %v1657_v3 = vld [vmem:[%s1959_s9 + $0x1a4] sm:$0xf0]  ;;  %v1485_v6 = vor.u32 %v1641_v1, %v1484_v0  ;;  %v1412_v9 = vld [vmem:[%s1959_s9 + $0x90] sm:$0xf]  ;;  %v1349_v17 = vor.u32 %v1607_v8, %v1348_v7 }
  0x6e   : > { %1040 = vmatpush.bf16.msra.mxu2 %v1501_v46  ;;  %v1549_v10 = vor.u32 %v1657_v3, %v1548_v2  ;;  %v1623_v11 = vld [vmem:[%s1959_s9 + $0x94] sm:$0xf0]  ;;  %v1476_v12 = vld [vmem:[%s1959_s9 + $0x110] sm:$0xf]  ;;  %v1340_v16 = vld [vmem:[%s1959_s9] sm:$0xf] }
  0x6f   : > { %1054 = vmatpush.bf16.msra.mxu3 %v1565_v50  ;;  %v1639_v13 = vld [vmem:[%s1959_s9 + $0x114] sm:$0xf0]  ;;  %v1540_v14 = vld [vmem:[%s1959_s9 + $0x190] sm:$0xf]  ;;  %v1605_v18 = vld [vmem:[%s1959_s9 + $0x4] sm:$0xf0]  ;;  %v1413_v21 = vor.u32 %v1623_v11, %v1412_v9 }
  0x70   : > { %1013 = vmatpush.bf16.msra.mxu0 %v1365_v56  ;;  %v1655_v15 = vld [vmem:[%s1959_s9 + $0x194] sm:$0xf0]  ;;  %v1404_v19 = vld [vmem:[%s1959_s9 + $0x80] sm:$0xf]  ;;  %v1621_v20 = vld [vmem:[%s1959_s9 + $0x84] sm:$0xf0]  ;;  %v1477_v22 = vor.u32 %v1639_v13, %v1476_v12  ;;  %v1341_v33 = vor.u32 %v1605_v18, %v1340_v16 }
  0x71   : > { %1027 = vmatpush.bf16.msra.mxu1 %v1429_v57  ;;  %v1468_v23 = vld [vmem:[%s1959_s9 + $0x100] sm:$0xf]  ;;  %v1637_v24 = vld [vmem:[%s1959_s9 + $0x104] sm:$0xf0]  ;;  %v1541_v26 = vor.u32 %v1655_v15, %v1540_v14  ;;  %v1618_v28 = vld [vmem:[%s1959_s9 + $0x74] sm:$0xf]  ;;  %v1405_v37 = vor.u32 %v1621_v20, %v1404_v19 }
  0x72   : > { %1041 = vmatpush.bf16.msra.mxu2 %v1493_v58  ;;  %v1532_v25 = vld [vmem:[%s1959_s9 + $0x180] sm:$0xf]  ;;  %v1653_v27 = vld [vmem:[%s1959_s9 + $0x184] sm:$0xf0]  ;;  %v1398_v29 = vld [vmem:[%s1959_s9 + $0x78] sm:$0xf0]  ;;  %v1469_v38 = vor.u32 %v1637_v24, %v1468_v23 }
  0x73   : > { %1055 = vmatpush.bf16.msra.mxu3 %v1557_v62  ;;  %v1634_v30 = vld [vmem:[%s1959_s9 + $0xf4] sm:$0xf]  ;;  %v1462_v31 = vld [vmem:[%s1959_s9 + $0xf8] sm:$0xf0]  ;;  %v1616_v39 = vld [vmem:[%s1959_s9 + $0x64] sm:$0xf]  ;;  %v1533_v43 = vor.u32 %v1653_v27, %v1532_v25  ;;  %v1401_v44 = vor.u32 %v1618_v28, %v1398_v29 }
  0x74   : > { %1014 = vmatpush.bf16.msra.mxu0 %v1357_v4  ;;  %v1650_v32 = vld [vmem:[%s1959_s9 + $0x174] sm:$0xf]  ;;  %v1526_v34 = vld [vmem:[%s1959_s9 + $0x178] sm:$0xf0]  ;;  %v1390_v40 = vld [vmem:[%s1959_s9 + $0x68] sm:$0xf0]  ;;  %v1465_v49 = vor.u32 %v1634_v30, %v1462_v31 }
  0x75   : > { %1028 = vmatpush.bf16.msra.mxu1 %v1421_v5  ;;  %v1666_v35 = vld [vmem:[%s1959_s9 + $0x1f4] sm:$0xf]  ;;  %v1590_v36 = vld [vmem:[%s1959_s9 + $0x1f8] sm:$0xf0]  ;;  %v1332_v41 = vld [vmem:[%s2169_s0 + $0x8] sm:$0xf]  ;;  %v1529_v50 = vor.u32 %v1650_v32, %v1526_v34  ;;  %v1393_v63 = vor.u32 %v1616_v39, %v1390_v40 }
  0x76   : > { %1042 = vmatpush.bf16.msra.mxu2 %v1485_v6  ;;  %v1603_v42 = vld [vmem:[%s2169_s0 + $0x14] sm:$0xf0]  ;;  %v1632_v45 = vld [vmem:[%s1959_s9 + $0xe4] sm:$0xf]  ;;  %v1454_v46 = vld [vmem:[%s1959_s9 + $0xe8] sm:$0xf0]  ;;  %v1593_v54 = vor.u32 %v1666_v35, %v1590_v36 }
  0x77   : > { %1056 = vmatpush.bf16.msra.mxu3 %v1549_v10  ;;  %v1648_v47 = vld [vmem:[%s1959_s9 + $0x164] sm:$0xf]  ;;  %v1518_v48 = vld [vmem:[%s1959_s9 + $0x168] sm:$0xf0]  ;;  %v1334_v52 = vld [vmem:[%s2169_s0 + $0x18] sm:$0xf0]  ;;  %v2054_v55 = vor.u32 %v1603_v42, %v1332_v41  ;;  %v1457_v1 = vor.u32 %v1632_v45, %v1454_v46 }
  0x78   : > { %1015 = vmatpush.bf16.msra.mxu0 %v1349_v17  ;;  %v1601_v51 = vld [vmem:[%s2169_s0 + $0xc] sm:$0xf]  ;;  %v1324_v53 = vld [vmem:[%s2169_s0] sm:$0xf]  ;;  %v1602_v56 = vld [vmem:[%s2169_s0 + $0xc] sm:$0xf0]  ;;  %v1521_v2 = vor.u32 %v1648_v47, %v1518_v48 }
  0x79   : > { %1029 = vmatpush.bf16.msra.mxu1 %v1413_v21  ;;  %v1600_v57 = vld [vmem:[%s2169_s0 + $0x4] sm:$0xf]  ;;  %v1326_v58 = vld [vmem:[%s2169_s0 + $0x10] sm:$0xf0]  ;;  %v1582_v60 = vld [vmem:[%s1959_s9 + $0x1e8] sm:$0xf0]  ;;  %v2067_v61 = vor.u32 %v1601_v51, %v1334_v52  ;;  %v2069_v62 = vor.u32 %v1602_v56, %v1324_v53 }
  0x7a   : > { %1043 = vmatpush.bf16.msra.mxu2 %v1477_v22  ;;  %v1664_v59 = vld [vmem:[%s1959_s9 + $0x1e4] sm:$0xf]  ;;  %v2071_v0 = vor.u32 %v1600_v57, %v1326_v58  ;;  %v1614_v3 = vld [vmem:[%s1959_s9 + $0x54] sm:$0xf]  ;;  %v1382_v4 = vld [vmem:[%s1959_s9 + $0x58] sm:$0xf0] }
  0x7b   : > { %1057 = vmatpush.bf16.msra.mxu3 %v1541_v26  ;;  %v1630_v5 = vld [vmem:[%s1959_s9 + $0xd4] sm:$0xf]  ;;  %v1585_v6 = vor.u32 %v1664_v59, %v1582_v60  ;;  %v1446_v7 = vld [vmem:[%s1959_s9 + $0xd8] sm:$0xf0]  ;;  %v1385_v12 = vor.u32 %v1614_v3, %v1382_v4  ;;  %v1612_v15 = vld [vmem:[%s1959_s9 + $0x44] sm:$0xf] }
  0x7c   : > { %1016 = vmatpush.bf16.msra.mxu0 %v1341_v33  ;;  %v1646_v8 = vld [vmem:[%s1959_s9 + $0x154] sm:$0xf]  ;;  %v1510_v9 = vld [vmem:[%s1959_s9 + $0x158] sm:$0xf0]  ;;  %v1449_v13 = vor.u32 %v1630_v5, %v1446_v7  ;;  %v1374_v16 = vld [vmem:[%s1959_s9 + $0x48] sm:$0xf0] }
  0x7d   : > { %1030 = vmatpush.bf16.msra.mxu1 %v1405_v37  ;;  %v1662_v10 = vld [vmem:[%s1959_s9 + $0x1d4] sm:$0xf]  ;;  %v1574_v11 = vld [vmem:[%s1959_s9 + $0x1d8] sm:$0xf0]  ;;  %v1513_v14 = vor.u32 %v1646_v8, %v1510_v9  ;;  %v1628_v17 = vld [vmem:[%s1959_s9 + $0xc4] sm:$0xf]  ;;  %v1377_v24 = vor.u32 %v1612_v15, %v1374_v16 }
  0x7e   : > { %1044 = vmatpush.bf16.msra.mxu2 %v1469_v38  ;;  %v1577_v18 = vor.u32 %v1662_v10, %v1574_v11  ;;  %v1438_v19 = vld [vmem:[%s1959_s9 + $0xc8] sm:$0xf0]  ;;  %v1644_v20 = vld [vmem:[%s1959_s9 + $0x144] sm:$0xf]  ;;  %v1610_v27 = vld [vmem:[%s1959_s9 + $0x34] sm:$0xf] }
  0x7f   : > { %1058 = vmatpush.bf16.msra.mxu3 %v1533_v43  ;;  %1017 = vmatmul.bf16.vlgmr.msra.gmra.mxu0 %v2069_v62  ;;  %v1502_v21 = vld [vmem:[%s1959_s9 + $0x148] sm:$0xf0]  ;;  %v1660_v22 = vld [vmem:[%s1959_s9 + $0x1c4] sm:$0xf]  ;;  %v1441_v25 = vor.u32 %v1628_v17, %v1438_v19  ;;  %v1366_v28 = vld [vmem:[%s1959_s9 + $0x38] sm:$0xf0] }
  0x80   : > { %1065 = vmatpush.bf16.msrb.mxu0 %v1401_v44  ;;  %1031 = vmatmul.bf16.vlgmr.msra.gmra.mxu1 %v2071_v0  ;;  %v1566_v23 = vld [vmem:[%s1959_s9 + $0x1c8] sm:$0xf0]  ;;  %v1505_v26 = vor.u32 %v1644_v20, %v1502_v21  ;;  %v1626_v29 = vld [vmem:[%s1959_s9 + $0xb4] sm:$0xf]  ;;  %v1430_v31 = vld [vmem:[%s1959_s9 + $0xb8] sm:$0xf0]  ;;  %v1369_v36 = vor.u32 %v1610_v27, %v1366_v28 }
  0x81   : > { %1079 = vmatpush.bf16.msrb.mxu1 %v1465_v49  ;;  %1045 = vmatmul.bf16.vlgmr.msra.gmra.mxu2 %v2054_v55  ;;  %v1569_v30 = vor.u32 %v1660_v22, %v1566_v23  ;;  %v1642_v32 = vld [vmem:[%s1959_s9 + $0x134] sm:$0xf]  ;;  %v1494_v33 = vld [vmem:[%s1959_s9 + $0x138] sm:$0xf0]  ;;  %v1433_v37 = vor.u32 %v1626_v29, %v1430_v31  ;;  %v1608_v39 = vld [vmem:[%s1959_s9 + $0x24] sm:$0xf] }
  0x82   : > { %1093 = vmatpush.bf16.msrb.mxu2 %v1529_v50  ;;  %1059 = vmatmul.bf16.vlgmr.msra.gmra.mxu3 %v2067_v61  ;;  %v1658_v34 = vld [vmem:[%s1959_s9 + $0x1b4] sm:$0xf]  ;;  %v1558_v35 = vld [vmem:[%s1959_s9 + $0x1b8] sm:$0xf0]  ;;  %v1497_v38 = vor.u32 %v1642_v32, %v1494_v33  ;;  %v1358_v40 = vld [vmem:[%s1959_s9 + $0x28] sm:$0xf0] }
  0x83   : > { %1107 = vmatpush.bf16.msrb.mxu3 %v1593_v54  ;;  %v1624_v41 = vld [vmem:[%s1959_s9 + $0xa4] sm:$0xf]  ;;  %v1561_v42 = vor.u32 %v1658_v34, %v1558_v35  ;;  %v1422_v43 = vld [vmem:[%s1959_s9 + $0xa8] sm:$0xf0]  ;;  %v1361_v48 = vor.u32 %v1608_v39, %v1358_v40  ;;  %v1606_v51 = vld [vmem:[%s1959_s9 + $0x14] sm:$0xf] }
  0x84   : > { %1066 = vmatpush.bf16.msrb.mxu0 %v1393_v63  ;;  %v1640_v44 = vld [vmem:[%s1959_s9 + $0x124] sm:$0xf]  ;;  %v1486_v45 = vld [vmem:[%s1959_s9 + $0x128] sm:$0xf0]  ;;  %v1425_v49 = vor.u32 %v1624_v41, %v1422_v43  ;;  %v1350_v52 = vld [vmem:[%s1959_s9 + $0x18] sm:$0xf0] }
  0x85   : > { %1080 = vmatpush.bf16.msrb.mxu1 %v1457_v1  ;;  %v1656_v46 = vld [vmem:[%s1959_s9 + $0x1a4] sm:$0xf]  ;;  %v1550_v47 = vld [vmem:[%s1959_s9 + $0x1a8] sm:$0xf0]  ;;  %v1489_v50 = vor.u32 %v1640_v44, %v1486_v45  ;;  %v1622_v53 = vld [vmem:[%s1959_s9 + $0x94] sm:$0xf]  ;;  %v1353_v63 = vor.u32 %v1606_v51, %v1350_v52 }
  0x86   : > { %1094 = vmatpush.bf16.msrb.mxu2 %v1521_v2  ;;  %v1553_v54 = vor.u32 %v1656_v46, %v1550_v47  ;;  %v1414_v56 = vld [vmem:[%s1959_s9 + $0x98] sm:$0xf0]  ;;  %v1638_v57 = vld [vmem:[%s1959_s9 + $0x114] sm:$0xf]  ;;  %v1604_v3 = vld [vmem:[%s1959_s9 + $0x4] sm:$0xf] }
  0x87   : > { %1108 = vmatpush.bf16.msrb.mxu3 %v1585_v6  ;;  %v1478_v58 = vld [vmem:[%s1959_s9 + $0x118] sm:$0xf0]  ;;  %v1654_v59 = vld [vmem:[%s1959_s9 + $0x194] sm:$0xf]  ;;  %v1417_v1 = vor.u32 %v1622_v53, %v1414_v56  ;;  %v1342_v4 = vld [vmem:[%s1959_s9 + $0x8] sm:$0xf0] }
  0x88   : > { %1067 = vmatpush.bf16.msrb.mxu0 %v1385_v12  ;;  %v1542_v60 = vld [vmem:[%s1959_s9 + $0x198] sm:$0xf0]  ;;  %v1481_v2 = vor.u32 %v1638_v57, %v1478_v58  ;;  %v1620_v5 = vld [vmem:[%s1959_s9 + $0x84] sm:$0xf]  ;;  %v1406_v7 = vld [vmem:[%s1959_s9 + $0x88] sm:$0xf0]  ;;  %v1345_v12 = vor.u32 %v1604_v3, %v1342_v4 }
  0x89   : > { %1081 = vmatpush.bf16.msrb.mxu1 %v1449_v13  ;;  %v1545_v6 = vor.u32 %v1654_v59, %v1542_v60  ;;  %v1636_v8 = vld [vmem:[%s1959_s9 + $0x104] sm:$0xf]  ;;  %v1470_v9 = vld [vmem:[%s1959_s9 + $0x108] sm:$0xf0]  ;;  %v1409_v13 = vor.u32 %v1620_v5, %v1406_v7  ;;  %s1668_s15 = sshll.u32 (%p1809_p6), %s1739_s17, 4 }
  0x8a   : > { %1095 = vmatpush.bf16.msrb.mxu2 %v1513_v14  ;;  %v1652_v10 = vld [vmem:[%s1959_s9 + $0x184] sm:$0xf]  ;;  %v1534_v11 = vld [vmem:[%s1959_s9 + $0x188] sm:$0xf0]  ;;  %v1473_v14 = vor.u32 %v1636_v8, %v1470_v9  ;;  %s1320_s9 = sshll.u32 %s1739_s17, 1  ;;  %s1172_s27 = scalar_lea.vmem (%p1809_p6), %s2173_s4, %s1668_s15 }
  0x8b   : > { %1109 = vmatpush.bf16.msrb.mxu3 %v1577_v18  ;;  %v1537_v15 = vor.u32 %v1652_v10, %v1534_v11  ;;  %p578_p11 = scmp.lt.s32.totalorder %s1320_s9, 3 }
  0x8c   : > { %1068 = vmatpush.bf16.msrb.mxu0 %v1377_v24 }
  0x8d   : > { %1082 = vmatpush.bf16.msrb.mxu1 %v1441_v25  ;;  %s2182_s9 = smov (!%p578_p11, %s1320_s9), 3 }
  0x8e   : > { %1096 = vmatpush.bf16.msrb.mxu2 %v1505_v26  ;;  %s580_s12 = scalar_lea.vmem %s2171_s2, %s2182_s9  ;;  %s585_s21 = scalar_lea.vmem %s2172_s3, %s2182_s9 }
  0x8f   : > { %1110 = vmatpush.bf16.msrb.mxu3 %v1569_v30 }
  0x90   : > { %1069 = vmatpush.bf16.msrb.mxu0 %v1369_v36 }
  0x91   : > { %1083 = vmatpush.bf16.msrb.mxu1 %v1433_v37 }
  0x92   : > { %1097 = vmatpush.bf16.msrb.mxu2 %v1497_v38 }
  0x93   : > { %1111 = vmatpush.bf16.msrb.mxu3 %v1561_v42 }
  0x94   : > { %1070 = vmatpush.bf16.msrb.mxu0 %v1361_v48 }
  0x95   : > { %1084 = vmatpush.bf16.msrb.mxu1 %v1425_v49 }
  0x96   : > { %1098 = vmatpush.bf16.msrb.mxu2 %v1489_v50 }
  0x97   : > { %1112 = vmatpush.bf16.msrb.mxu3 %v1553_v54 }
  0x98   : > { %1071 = vmatpush.bf16.msrb.mxu0 %v1353_v63 }
  0x99   : > { %1085 = vmatpush.bf16.msrb.mxu1 %v1417_v1 }
  0x9a   : > { %1099 = vmatpush.bf16.msrb.mxu2 %v1481_v2 }
  0x9b   : > { %1113 = vmatpush.bf16.msrb.mxu3 %v1545_v6 }
  0x9c   : > { %1072 = vmatpush.bf16.msrb.mxu0 %v1345_v12 }
  0x9d   : > { %1086 = vmatpush.bf16.msrb.mxu1 %v1409_v13 }
  0x9e   : > { %1100 = vmatpush.bf16.msrb.mxu2 %v1473_v14 }
  0x9f   : > { %1114 = vmatpush.bf16.msrb.mxu3 %v1537_v15  ;;  %1073 = vmatmul.bf16.vlgmr.msrb.gmra.mxu0 %v2069_v62  ;;  %v1136_v62 = vld [vmem:[%s580_s12] sm:$0x3] }
  0xa0   : > { %1087 = vmatmul.bf16.vlgmr.msrb.gmra.mxu1 %v2071_v0  ;;  %v1139_v40 = vperm.slane %v1136_v62, 1 }
  0xa1   : > { %1101 = vmatmul.bf16.vlgmr.msrb.gmra.mxu2 %v2054_v55  ;;  %v1146_v55 = vld [vmem:[%s585_s21] sm:$0x3] }
  0xa2   : > { %1115 = vmatmul.bf16.vlgmr.msrb.gmra.mxu3 %v2067_v61  ;;  %v1138_v61 = vperm.slane %v1136_v62, 0  ;;  %v1148_v22 = vperm.slane %v1146_v55, 0  ;;  %v1149_v42 = vperm.slane %v1146_v55, 1 }
  0xfc   : > { %v1018_v16 = vpop.f32.mrf.mxu0 }
  0xfd   : > { %v1032_v17 = vpop.f32.mrf.mxu1 }
  0xfe   : > { %v1033_v18 = vadd.f32 %v1032_v17, %v1018_v16 }
 0x104   : > { %v1046_v0 = vpop.f32.mrf.mxu2  ;;  %v1020_v23 = vpop.f32.mrf.mxu0 }
 0x105   : > { %v1047_v19 = vadd.f32 %v1046_v0, %v1033_v18  ;;  %v1060_v20 = vpop.f32.mrf.mxu3  ;;  %v1034_v24 = vpop.f32.mrf.mxu1 }
 0x106   : > { %v1035_v26 = vadd.f32 %v1034_v24, %v1020_v23 }
 0x107   : > { %v1061_v21 = vadd.f32 %v1060_v20, %v1047_v19 }
 0x109   : > { %v1142_v25 = vmul.f32 %v1138_v61, %v1061_v21 }
 0x10b   : > { %v1152_v27 = vadd.f32 %v1148_v22, %v1142_v25 }
 0x10c   : > { %v1048_v28 = vpop.f32.mrf.mxu2 }
 0x10d   : > { %1156 = vst [vmem:[%s2138_s23] sm:$0xff] %v1152_v27  ;;  %v1049_v29 = vadd.f32 %v1048_v28, %v1035_v26  ;;  %v1062_v30 = vpop.f32.mrf.mxu3 }
 0x10f   : > { %v1063_v31 = vadd.f32 %v1062_v30, %v1049_v29 }
 0x111   : > { %v1144_v32 = vmul.f32 %v1138_v61, %v1063_v31 }
 0x113   : > { %v1154_v33 = vadd.f32 %v1148_v22, %v1144_v32 }
 0x114   : > { %v1185_v54 = vld [vmem:[%s2138_s23] sm:$0xff] (%p1809_p6) }
 0x115   : > { %1158 = vst [vmem:[%s2138_s23 + $0x10] sm:$0xff] %v1154_v33 }
 0x116   : > { %1186 = vst [vmem:[%s1172_s27] sm:$0xff] (%p1809_p6), %v1185_v54 }
 0x11c   : > { %v1074_v34 = vpop.f32.mrf.mxu0  ;;  %v1189_v57 = vld [vmem:[%s2138_s23 + $0x10] sm:$0xff] (%p1809_p6) }
 0x11d   : > { %v1088_v35 = vpop.f32.mrf.mxu1  ;;  %1190 = vst [vmem:[%s1172_s27 + $0x20] sm:$0xff] (%p1809_p6), %v1189_v57 }
 0x11e   : > { %v1089_v36 = vadd.f32 %v1088_v35, %v1074_v34 }
 0x124   : > { %v1102_v37 = vpop.f32.mrf.mxu2  ;;  %v1076_v43 = vpop.f32.mrf.mxu0 }
 0x125   : > { %v1103_v38 = vadd.f32 %v1102_v37, %v1089_v36  ;;  %v1116_v39 = vpop.f32.mrf.mxu3  ;;  %v1090_v44 = vpop.f32.mrf.mxu1 }
 0x126   : > { %v1091_v47 = vadd.f32 %v1090_v44, %v1076_v43 }
 0x127   : > { %v1117_v41 = vadd.f32 %v1116_v39, %v1103_v38 }
 0x129   : > { %v1143_v45 = vmul.f32 %v1139_v40, %v1117_v41 }
 0x12b   : > { %v1153_v46 = vadd.f32 %v1149_v42, %v1143_v45 }
 0x12c   : > { %v1104_v48 = vpop.f32.mrf.mxu2 }
 0x12d   : > { %1157 = vst [vmem:[%s2138_s23 + $0x8] sm:$0xff] %v1153_v46  ;;  %v1105_v49 = vadd.f32 %v1104_v48, %v1091_v47  ;;  %v1118_v50 = vpop.f32.mrf.mxu3 }
 0x12f   : > { %v1119_v51 = vadd.f32 %v1118_v50, %v1105_v49 }
 0x131   : > { %v1145_v52 = vmul.f32 %v1139_v40, %v1119_v51  ;;  %1166 = sbr.rel (!%p1809_p6) target bundleno = 318 (0x13e), region = 86 }
 0x133   : > { %v1155_v53 = vadd.f32 %v1149_v42, %v1145_v52 }
 0x134   : > { %v1187_v56 = vld [vmem:[%s2138_s23 + $0x8] sm:$0xff] (%p1809_p6) }
 0x135   : > { %1159 = vst [vmem:[%s2138_s23 + $0x18] sm:$0xff] %v1155_v53 }
 0x136   : > { %1188 = vst [vmem:[%s1172_s27 + $0x8] sm:$0xff] %v1187_v56 }
 0x13c   : > { %v1191_v58 = vld [vmem:[%s2138_s23 + $0x18] sm:$0xff] }
 0x13d   : > { %1192 = vst [vmem:[%s1172_s27 + $0x28] sm:$0xff] %v1191_v58 }
 0x13e PF: > { %s14_s19 = sadd.s32 1, %s1747_s19   ;;  %s2175_s15 = smov %s1735_s16 }
 0x13f   : > { %p11_p12 = scmp.ge.s32.totalorder %s14_s19, 4   ;;  %s2176_s16 = smov %s1814_s25 }
 0x140   : > { %s2177_s17 = smov %s1743_s18  ;;  %s2178_s18 = smov %s2180_s20 }
 0x141   :  { %13 = sbr.rel (!%p11_p12) target bundleno = 3 (0x3), region = 149 }

// kernel: modified_resnet_forward.52
= control target key start
LH: loop header
LB: loop body
LE: loop exit
PB: predicated region body
PF: predicated region fallthrough
CT: control target
= control target key end

     0   :  { %s389_s12 = smov 0   ;;  %s417_s0 = inlined_call_operand.vmem [shape: f32[16,1,64], index: 0, kind: input, shape index: {}]   ;;  %s418_s1 = inlined_call_operand.vmem [shape: f32[16,5,64], index: 1, kind: input, shape index: {}]   ;;  %s419_s2 = inlined_call_operand.vmem [shape: f32[16,5,64], index: 2, kind: input, shape index: {}]   ;;  %s420_s3 = inlined_call_operand.vmem [shape: f32[16,1,64], index: 3, kind: output, shape index: {}]  }
   0x1 LB: > { %s336_s13 = sadd.s32 4294967295, %s367_s12   ;;  %p340_p0 = scmp.ge.s32.totalorder %s367_s12, 1  ;;  %s367_s12 = sphi %s389_s12, %s13_s12  }
   0x2   : > { %p153_p1 = scmp.lt.s32.totalorder %s367_s12, 17 }
   0x4   : > { %p154_p2 = pnand %p340_p0, %p153_p1 }
   0x5   : > { %p181_p3 = scmp.lt.s32.totalorder (!%p154_p2), %s336_s13, 15 }
   0x6   : > { %157 = sbr.rel (%p154_p2) target bundleno = 525 (0x20d), region = 32 }
   0xb   : > { %s422_s13 = smov (!%p181_p3, %s336_s13), 15  ;;  %vm199_vm0 = vcmask 523264   ;;  %vm226_vm1 = vcmask 32768   ;;  %vm242_vm2 = vcmask 1044480   ;;  %vm238_vm3 = vcmask 39936  }
   0xc   : > { %s341_s14 = sshll.u32 %s422_s13, 3  ;;  %s183_s17 = scalar_lea.vmem %s417_s0, %s422_s13  ;;  %vm266_vm4 = vcmask 516096  }
   0xd   : > { %s187_s20 = scalar_lea.vmem %s418_s1, %s341_s14  ;;  %v195_v0 = vld [vmem:[%s183_s17] sm:$0x1]  ;;  %s191_s23 = scalar_lea.vmem %s419_s2, %s341_s14 }
   0xe   : > { %v197_v1 = vld [vmem:[%s187_s20] sm:$0x1f]  ;;  %v196_v2 = vmul.f32 0.125, %v195_v0  ;;  %s194_s26 = scalar_lea.vmem %s420_s3, %s422_s13 }
   0xf   : > { %343 = vmatpush.xpose.msk.msra.mxu0 %vm199_vm0, %v197_v1  ;;  %v198_v10 = vld [vmem:[%s191_s23] sm:$0x1f] }
  0x10   : > { %345 = vmatpush.msk.msra.mxu1 %vm242_vm2, %v198_v10 }
  0x12   : > { %344 = vmatmul.msk.f32.vlgmr.msra.gmra.mxu0 %vm199_vm0, %v196_v2 }
  0x8f   : > { %v223_v3 = vpop.f32.mrf.mxu0 }
  0x90   : > { %v227_v4 = vsel %vm226_vm1, %v223_v3, -inf }
  0x91   : > { %228 = vmax.xlane.f32.xlu0 %v227_v4 }
 0x104   : > { %v229_v5 = vpop.xlane.xlu0 %228 }
 0x105   : > { %v230_v6 = vsub.f32 %v223_v3, %v229_v5 }
 0x107   : > { %v231_v7 = vmul.f32 1.442695, %v230_v6 }
 0x109   : > { %357 = vpow2.f32 %v231_v7 }
 0x10f   : > { %v358_v8 = vpop.eup %357 }
 0x110   : > { %v233_v9 = vsel %vm226_vm1, %v358_v8, 0.0 }
 0x111   : > { %234 = vadd.xlane.f32.xlu0 %v233_v9 }
 0x184   : > { %v235_v11 = vpop.xlane.xlu0 %234 }
 0x185   : > { %359 = vrcp.f32 %v235_v11 }
 0x18b   : > { %v360_v12 = vpop.eup %359 }
 0x18c   : > { %v237_v13 = vmul.f32 %v360_v12, %v358_v8 }
 0x18e   : > { %346 = vmatmul.msk.f32.vlgmr.msra.gmra.mxu1 %vm238_vm3, %v237_v13 }
 0x20b   : > { %v263_v14 = vpop.f32.mrf.mxu1 }
 0x20c   : > { %267 = vst.msk [vmem:[%s194_s26] sm:$0x1] %vm266_vm4, %v263_v14 }
 0x20d PF: > { %s13_s12 = sadd.s32 1, %s367_s12  }
 0x20e   : > { %p10_p4 = scmp.ge.s32.totalorder %s13_s12, 18  }
 0x210   :  { %12 = sbr.rel (!%p10_p4) target bundleno = 1 (0x1), region = 68 }

// kernel: modified_resnet_forward.53
= control target key start
LH: loop header
LB: loop body
LE: loop exit
PB: predicated region body
PF: predicated region fallthrough
CT: control target
= control target key end

     0   :  { %s727_s1 = inlined_call_operand.vmem [shape: bf16[512,128], index: 1, kind: input, shape index: {}]   ;;  %s728_s0 = inlined_call_operand.vmem [shape: bf16[16,512], index: 0, kind: input, shape index: {}]   ;;  %s729_s2 = inlined_call_operand.vmem [shape: f32[1,128], index: 2, kind: input, shape index: {}]   ;;  %s730_s3 = inlined_call_operand.vmem [shape: f32[1,128], index: 3, kind: input, shape index: {}]   ;;  %s731_s4 = inlined_call_operand.vmem [shape: f32[16,128], index: 4, kind: output, shape index: {}]  }
   0x1   :  { %v543_v0 = vld [vmem:[%s727_s1 + $0x38] sm:$0xff]  ;;  %v542_v4 = vld [vmem:[%s727_s1 + $0x30] sm:$0xff]  ;;  %v541_v8 = vld [vmem:[%s727_s1 + $0x28] sm:$0xff] }
   0x2   :  { %v551_v1 = vld [vmem:[%s727_s1 + $0x78] sm:$0xff]  ;;  %305 = vmatpush.bf16.msra.mxu0 %v543_v0  ;;  %v550_v5 = vld [vmem:[%s727_s1 + $0x70] sm:$0xff]  ;;  %v549_v9 = vld [vmem:[%s727_s1 + $0x68] sm:$0xff] }
   0x3   :  { %v559_v2 = vld [vmem:[%s727_s1 + $0xb8] sm:$0xff]  ;;  %319 = vmatpush.bf16.msra.mxu1 %v551_v1  ;;  %v558_v6 = vld [vmem:[%s727_s1 + $0xb0] sm:$0xff]  ;;  %v557_v10 = vld [vmem:[%s727_s1 + $0xa8] sm:$0xff] }
   0x4   :  { %v567_v3 = vld [vmem:[%s727_s1 + $0xf8] sm:$0xff]  ;;  %333 = vmatpush.bf16.msra.mxu2 %v559_v2  ;;  %v566_v7 = vld [vmem:[%s727_s1 + $0xf0] sm:$0xff]  ;;  %v565_v11 = vld [vmem:[%s727_s1 + $0xe8] sm:$0xff] }
   0x5   :  { %347 = vmatpush.bf16.msra.mxu3 %v567_v3  ;;  %v540_v12 = vld [vmem:[%s727_s1 + $0x20] sm:$0xff]  ;;  %v539_v16 = vld [vmem:[%s727_s1 + $0x18] sm:$0xff]  ;;  %v538_v20 = vld [vmem:[%s727_s1 + $0x10] sm:$0xff] }
   0x6   :  { %306 = vmatpush.bf16.msra.mxu0 %v542_v4  ;;  %v548_v13 = vld [vmem:[%s727_s1 + $0x60] sm:$0xff]  ;;  %v547_v17 = vld [vmem:[%s727_s1 + $0x58] sm:$0xff]  ;;  %v546_v21 = vld [vmem:[%s727_s1 + $0x50] sm:$0xff] }
   0x7   :  { %320 = vmatpush.bf16.msra.mxu1 %v550_v5  ;;  %v556_v14 = vld [vmem:[%s727_s1 + $0xa0] sm:$0xff]  ;;  %v555_v18 = vld [vmem:[%s727_s1 + $0x98] sm:$0xff]  ;;  %v554_v22 = vld [vmem:[%s727_s1 + $0x90] sm:$0xff] }
   0x8   :  { %334 = vmatpush.bf16.msra.mxu2 %v558_v6  ;;  %v564_v15 = vld [vmem:[%s727_s1 + $0xe0] sm:$0xff]  ;;  %v563_v19 = vld [vmem:[%s727_s1 + $0xd8] sm:$0xff]  ;;  %v562_v23 = vld [vmem:[%s727_s1 + $0xd0] sm:$0xff] }
   0x9   :  { %348 = vmatpush.bf16.msra.mxu3 %v566_v7  ;;  %v537_v24 = vld [vmem:[%s727_s1 + $0x8] sm:$0xff]  ;;  %v536_v28 = vld [vmem:[%s727_s1] sm:$0xff]  ;;  %v534_v33 = vld [vmem:[%s728_s0 + $0xc] sm:$0xf0] }
   0xa   :  { %307 = vmatpush.bf16.msra.mxu0 %v541_v8  ;;  %v545_v25 = vld [vmem:[%s727_s1 + $0x48] sm:$0xff]  ;;  %v544_v29 = vld [vmem:[%s727_s1 + $0x40] sm:$0xff]  ;;  %v392_v35 = vld [vmem:[%s728_s0 + $0x10] sm:$0xf0] }
   0xb   :  { %321 = vmatpush.bf16.msra.mxu1 %v549_v9  ;;  %v553_v26 = vld [vmem:[%s727_s1 + $0x88] sm:$0xff]  ;;  %v552_v30 = vld [vmem:[%s727_s1 + $0x80] sm:$0xff]  ;;  %v535_v37 = vld [vmem:[%s728_s0 + $0x14] sm:$0xf0] }
   0xc   :  { %335 = vmatpush.bf16.msra.mxu2 %v557_v10  ;;  %v561_v27 = vld [vmem:[%s727_s1 + $0xc8] sm:$0xff]  ;;  %v560_v31 = vld [vmem:[%s727_s1 + $0xc0] sm:$0xff]  ;;  %v400_v39 = vld [vmem:[%s728_s0 + $0x18] sm:$0xf0] }
   0xd   :  { %349 = vmatpush.bf16.msra.mxu3 %v565_v11  ;;  %v390_v32 = vld [vmem:[%s728_s0] sm:$0xf]  ;;  %v532_v34 = vld [vmem:[%s728_s0 + $0x4] sm:$0xf]  ;;  %v398_v36 = vld [vmem:[%s728_s0 + $0x8] sm:$0xf] }
   0xe   :  { %308 = vmatpush.bf16.msra.mxu0 %v540_v12  ;;  %v533_v38 = vld [vmem:[%s728_s0 + $0xc] sm:$0xf]  ;;  %v391_v40 = vor.u32 %v534_v33, %v390_v32  ;;  %v395_v41 = vor.u32 %v532_v34, %v392_v35  ;;  %v399_v42 = vor.u32 %v535_v37, %v398_v36  ;;  %v568_v50 = vld [vmem:[%s729_s2] ss:$0 sm:$0xff] }
   0xf   :  { %322 = vmatpush.bf16.msra.mxu1 %v548_v13  ;;  %v403_v43 = vor.u32 %v533_v38, %v400_v39  ;;  %v569_v52 = vld [vmem:[%s730_s3] ss:$0 sm:$0xff] }
  0x10   :  { %336 = vmatpush.bf16.msra.mxu2 %v556_v14 }
  0x11   :  { %350 = vmatpush.bf16.msra.mxu3 %v564_v15 }
  0x12   :  { %309 = vmatpush.bf16.msra.mxu0 %v539_v16 }
  0x13   :  { %323 = vmatpush.bf16.msra.mxu1 %v547_v17 }
  0x14   :  { %337 = vmatpush.bf16.msra.mxu2 %v555_v18 }
  0x15   :  { %351 = vmatpush.bf16.msra.mxu3 %v563_v19 }
  0x16   :  { %310 = vmatpush.bf16.msra.mxu0 %v538_v20 }
  0x17   :  { %324 = vmatpush.bf16.msra.mxu1 %v546_v21 }
  0x18   :  { %338 = vmatpush.bf16.msra.mxu2 %v554_v22 }
  0x19   :  { %352 = vmatpush.bf16.msra.mxu3 %v562_v23 }
  0x1a   :  { %311 = vmatpush.bf16.msra.mxu0 %v537_v24 }
  0x1b   :  { %325 = vmatpush.bf16.msra.mxu1 %v545_v25 }
  0x1c   :  { %339 = vmatpush.bf16.msra.mxu2 %v553_v26 }
  0x1d   :  { %353 = vmatpush.bf16.msra.mxu3 %v561_v27 }
  0x1e   :  { %312 = vmatpush.bf16.msra.mxu0 %v536_v28 }
  0x1f   :  { %326 = vmatpush.bf16.msra.mxu1 %v544_v29 }
  0x20   :  { %340 = vmatpush.bf16.msra.mxu2 %v552_v30 }
  0x21   :  { %354 = vmatpush.bf16.msra.mxu3 %v560_v31  ;;  %313 = vmatmul.bf16.vlgmr.msra.gmra.mxu0 %v391_v40 }
  0x22   :  { %327 = vmatmul.bf16.vlgmr.msra.gmra.mxu1 %v395_v41 }
  0x23   :  { %341 = vmatmul.bf16.vlgmr.msra.gmra.mxu2 %v399_v42 }
  0x24   :  { %355 = vmatmul.bf16.vlgmr.msra.gmra.mxu3 %v403_v43 }
  0x9e   :  { %v314_v44 = vpop.f32.mrf.mxu0 }
  0x9f   :  { %v328_v45 = vpop.f32.mrf.mxu1 }
  0xa0   :  { %v329_v46 = vadd.f32 %v328_v45, %v314_v44 }
  0xa6   :  { %v342_v47 = vpop.f32.mrf.mxu2  ;;  %v316_v53 = vpop.f32.mrf.mxu0 }
  0xa7   :  { %v356_v48 = vpop.f32.mrf.mxu3  ;;  %v343_v49 = vadd.f32 %v342_v47, %v329_v46  ;;  %v330_v54 = vpop.f32.mrf.mxu1 }
  0xa8   :  { %v331_v57 = vadd.f32 %v330_v54, %v316_v53 }
  0xa9   :  { %v357_v51 = vadd.f32 %v356_v48, %v343_v49 }
  0xab   :  { %v374_v55 = vmul.f32 %v568_v50, %v357_v51 }
  0xad   :  { %v380_v56 = vadd.f32 %v569_v52, %v374_v55 }
  0xae   :  { %v344_v58 = vpop.f32.mrf.mxu2 }
  0xaf   :  { %382 = vst [vmem:[%s731_s4] sm:$0xff] %v380_v56  ;;  %v345_v59 = vadd.f32 %v344_v58, %v331_v57  ;;  %v358_v60 = vpop.f32.mrf.mxu3 }
  0xb1   :  { %v359_v61 = vadd.f32 %v358_v60, %v345_v59 }
  0xb3   :  { %v375_v62 = vmul.f32 %v568_v50, %v359_v61 }
  0xb5   :  { %v381_v63 = vadd.f32 %v569_v52, %v375_v62 }
  0xb7   :  { %383 = vst [vmem:[%s731_s4 + $0x8] sm:$0xff] %v381_v63 }

</bundles_post_ra>
